<compile_context>
chip_gen: v7x
topology: tpu7x:2x2x1
jax: 0.10.0
libtpu: 0.0.40
codegen_flags: <defaults>
</compile_context>

<pallas_src>
import jax
import jax.numpy as jnp
from jax import lax
from jax.experimental import pallas as pl
from jax.experimental.pallas import tpu as pltpu


_KB = 512  # Din streaming block (multiple of 256 -> aligned MXU passes on v6e/v7x)


# --------------------------- fused DQN forward kernel ---------------------------
def _dqn_fused_kernel(
    x_ref,                                   # (Tc*Bp, KB)  bf16, streamed over Din
    wih1,                                    # (KB, 3*H1)   bf16, streamed over Din
    whh1, bf1, bn1,                          # (H1,3H1) bf16, (1,3H1) f32, (1,H1) f32
    wih2, whh2, bf2, bn2,                    # gru2 (resident)
    wih3, whh3, bf3, bn3,                    # gru3 (resident)
    wih4, whh4, bf4, bn4,                    # gru4 (resident)
    wfc_a, wfc_b, bfc,                       # fc: (H4,Np) f32, (H4,Np) f32, (1,Np) f32
    out_ref,                                 # (Bp, Np) f32
    gx1_acc,                                 # VMEM scratch (Tc*Bp, 3*H1) f32
):
    k = pl.program_id(0)
    Bp = out_ref.shape[0]
    T = x_ref.shape[0] // Bp                 # static (== 2 after truncation)

    @pl.when(k == 0)
    def _():
        gx1_acc[...] = jnp.zeros_like(gx1_acc)

    # Streamed layer-1 input projection: one block of W_ih1 per grid step -> the dominant
    # weight DMA is overlapped with this matmul by the BlockSpec pipeline.
    gx1_acc[...] += jnp.dot(x_ref[...], wih1[...], preferred_element_type=jnp.float32)

    def gru_recur(gx, whh_ref, bf_ref, bn_ref):
        """gx: (T*Bp, 3H) f32 input projection WITHOUT biases. Returns per-t hidden states."""
        H = whh_ref.shape[0]
        whh = whh_ref[...]                   # bf16
        bf = bf_ref[...]                     # (1, 3H) f32 (b_ih + [b_hr, b_hz, 0] folded)
        bn = bn_ref[...]                     # (1, H)  f32 (b_hn, stays inside the r-gate)
        # t = 0: h_{-1} == 0 -> skip the recurrent matmul entirely (exact).
        g0 = gx[0:Bp] + bf
        r = jax.nn.sigmoid(g0[:, :H])
        z = jax.nn.sigmoid(g0[:, H:2 * H])
        n = jnp.tanh(g0[:, 2 * H:] + r * bn)
        h = (1.0 - z) * n
        hs = [h]
        for t in range(1, T):                # static -> fully unrolled (T == 2)
            gt = gx[t * Bp:(t + 1) * Bp] + bf
            gh = jnp.dot(h.astype(jnp.bfloat16), whh, preferred_element_type=jnp.float32)
            r = jax.nn.sigmoid(gt[:, :H] + gh[:, :H])
            z = jax.nn.sigmoid(gt[:, H:2 * H] + gh[:, H:2 * H])
            n = jnp.tanh(gt[:, 2 * H:] + r * (gh[:, 2 * H:] + bn))
            h = (1.0 - z) * n + z * h
            hs.append(h)
        return hs

    @pl.when(k == pl.num_programs(0) - 1)
    def _():
        # Layer-1 recurrence on the fully accumulated projection.
        hs = gru_recur(gx1_acc[...], whh1, bf1, bn1)
        # Layers 2-4: hoisted input projection (single weight pass) + recurrence,
        # activations flow in registers (no VMEM scratch round-trips).
        for wih, whh, bf, bn in ((wih2, whh2, bf2, bn2),
                                 (wih3, whh3, bf3, bn3),
                                 (wih4, whh4, bf4, bn4)):
            h_cat = jnp.concatenate(hs, axis=0).astype(jnp.bfloat16)   # (T*Bp, H_prev)
            gx = jnp.dot(h_cat, wih[...], preferred_element_type=jnp.float32)
            hs = gru_recur(gx, whh, bf, bn)
        # fc head: feat = concat(h_t0, h_t1) @ W_fc == h_t0 @ W_top + h_t1 @ W_bot.
        out_ref[...] = (
            jnp.dot(hs[0], wfc_a[...], preferred_element_type=jnp.float32)
            + jnp.dot(hs[1], wfc_b[...], preferred_element_type=jnp.float32)
            + bfc[...]
        )


# ------------------------- one-time weight preparation ---------------------------
def _prep_gru(p, pad_din_to=None):
    """PyTorch layouts (3H,Din)/(3H,H)/(3H,) -> (Din,3H)/(H,3H) bf16, folded f32 biases."""
    H = p["whh"].shape[1]
    wih_t = jnp.transpose(p["wih"]).astype(jnp.bfloat16)
    whh_t = jnp.transpose(p["whh"]).astype(jnp.bfloat16)
    if pad_din_to is not None:
        wih_t = jnp.pad(wih_t, ((0, pad_din_to - wih_t.shape[0]), (0, 0)))
    bih = p["bih"].astype(jnp.float32)
    bhh = p["bhh"].astype(jnp.float32)
    # r/z hidden biases fold into the input-projection bias; only b_hn stays in the r-gate.
    bf = bih + jnp.concatenate([bhh[:2 * H], jnp.zeros((H,), jnp.float32)])
    bn = bhh[2 * H:]
    return wih_t, whh_t, bf[None, :], bn[None, :]


def prepare_params(params):
    """One-time prep (transposes / folds / padding / bf16 casts). Call ONCE outside the
    jitted forward so no per-call HBM relayout of the weights happens."""
    din = params["gru1"]["wih"].shape[1]
    din_p = ((din + _KB - 1) // _KB) * _KB
    prepped = {"gru1": _prep_gru(params["gru1"], pad_din_to=din_p)}
    for name in ("gru2", "gru3", "gru4"):
        prepped[name] = _prep_gru(params[name])
    h4 = params["gru4"]["whh"].shape[1]
    n_angles = params["fc"]["w"].shape[0]
    n_p = ((n_angles + 127) // 128) * 128
    wfc_t = jnp.transpose(params["fc"]["w"].astype(jnp.float32))        # (2*H4, n_angles)
    wfc_t = jnp.pad(wfc_t, ((0, 0), (0, n_p - n_angles)))
    bfc = jnp.pad(params["fc"]["b"].astype(jnp.float32), (0, n_p - n_angles))[None, :]
    prepped["fc"] = (wfc_t[:h4], wfc_t[h4:], bfc)
    return jax.tree_util.tree_map(jnp.asarray, prepped)


# --------------------------------- forward wrapper --------------------------------
def dqn_forward(prepped, x, n_angles):
    """x: (B, T, n_observations), batch-first like nn.GRU(batch_first=True)."""
    B, T, Din = x.shape
    Tc = 2                                   # head reads only t=0,1 of a causal stack: exact
    Bp = ((B + 7) // 8) * 8                  # sublane-dense batch

    wih1, whh1, bf1, bn1 = prepped["gru1"]
    Din_p, G1 = wih1.shape                   # (padded Din, 3*H1)
    Np = prepped["fc"][0].shape[1]

    x_tb = jnp.transpose(x[:, :Tc, :].astype(jnp.bfloat16), (1, 0, 2))   # (Tc, B, Din)
    x_tb = jnp.pad(x_tb, ((0, 0), (0, Bp - B), (0, Din_p - Din)))        # zero-pad: exact
    x_flat = x_tb.reshape(Tc * Bp, Din_p)

    args = [x_flat, wih1, whh1, bf1, bn1]
    for name in ("gru2", "gru3", "gru4"):
        args += list(prepped[name])
    args += list(prepped["fc"])

    def full_spec(a):
        return pl.BlockSpec(a.shape, lambda k: (0,) * a.ndim)   # resident, fetched once

    in_specs = [
        pl.BlockSpec((Tc * Bp, _KB), lambda k: (0, k)),          # x: stream Din columns
        pl.BlockSpec((_KB, G1), lambda k: (k, 0)),               # W_ih1: stream Din rows
    ] + [full_spec(a) for a in args[2:]]

    out = pl.pallas_call(
        _dqn_fused_kernel,
        out_shape=jax.ShapeDtypeStruct((Bp, Np), jnp.float32),
        grid=(Din_p // _KB,),
        in_specs=in_specs,
        out_specs=pl.BlockSpec((Bp, Np), lambda k: (0, 0)),
        scratch_shapes=[pltpu.VMEM((Tc * Bp, G1), jnp.float32)],
        compiler_params=pltpu.CompilerParams(
            dimension_semantics=("arbitrary",),                  # K reduction with accumulator
            vmem_limit_bytes=32 * 1024 * 1024,                   # footprint is O(block), not O(Din)
        ),
    )(*args)
    # TODO(synk): training-mode dropout masking (pltpu PRNG) not implemented (eval-mode identity).
    return out[:B, :n_angles]


# ------------------------------ pure-JAX reference -------------------------------
def _gru_ref(x, wih, whh, bih, bhh):
    B = x.shape[0]
    H = whh.shape[1]

    def step(h, x_t):
        gx = x_t @ wih.T + bih
        gh = h @ whh.T + bhh
        r = jax.nn.sigmoid(gx[:, :H] + gh[:, :H])
        z = jax.nn.sigmoid(gx[:, H:2 * H] + gh[:, H:2 * H])
        n = jnp.tanh(gx[:, 2 * H:] + r * gh[:, 2 * H:])
        h = (1.0 - z) * n + z * h
        return h, h

    _, ys = lax.scan(step, jnp.zeros((B, H), jnp.float32), jnp.transpose(x, (1, 0, 2)))
    return jnp.transpose(ys, (1, 0, 2))


def dqn_forward_ref(params, x):
    h = x
    for name in ("gru1", "gru2", "gru3", "gru4"):
        p = params[name]
        h = _gru_ref(h, p["wih"], p["whh"], p["bih"], p["bhh"])
    feat = jnp.concatenate([h[:, 0, :], h[:, 1, :]], axis=1)
    return feat @ params["fc"]["w"].T + params["fc"]["b"]


# --------------------------------- param init ------------------------------------
def init_params(key, n_observations, n_angles):
    layer_dims = [(n_observations, 512), (512, 256), (256, 128), (128, 64)]
    keys = jax.random.split(key, 4 * len(layer_dims) + 2)
    params = {}
    ki = 0
    for li, (din, h) in enumerate(layer_dims, start=1):
        k = h ** -0.5
        params[f"gru{li}"] = {
            "wih": jax.random.uniform(keys[ki + 0], (3 * h, din), jnp.float32, -k, k),
            "whh": jax.random.uniform(keys[ki + 1], (3 * h, h), jnp.float32, -k, k),
            "bih": jax.random.uniform(keys[ki + 2], (3 * h,), jnp.float32, -k, k),
            "bhh": jax.random.uniform(keys[ki + 3], (3 * h,), jnp.float32, -k, k),
        }
        ki += 4
    kf = 128 ** -0.5  # fc fan_in = 64 * 2
    params["fc"] = {
        "w": jax.random.uniform(keys[ki + 0], (n_angles, 128), jnp.float32, -kf, kf),
        "b": jax.random.uniform(keys[ki + 1], (n_angles,), jnp.float32, -kf, kf),
    }
    return params


if __name__ == "__main__":
    # Small shapes consistent with the module: n_observations is a constructor arg
    # (4000 in the original script; scaled down here), hidden sizes 512/256/128/64 fixed.
    B, T = 2, 8
    n_observations, n_angles = 256, 16

    root = jax.random.PRNGKey(0)
    pkey, xkey = jax.random.split(root)
    params = init_params(pkey, n_observations, n_angles)
    x = jax.random.normal(xkey, (B, T, n_observations), jnp.float32)

    prepped = prepare_params(params)                     # one-time weight prep (not per call)
    fwd = jax.jit(dqn_forward, static_argnames=("n_angles",))
    out = jax.block_until_ready(fwd(prepped, x, n_angles=n_angles))

    ref = dqn_forward_ref(params, x)
    assert out.shape == (B, n_angles), out.shape
    # bf16 weights/activations in the kernel vs f32 reference -> loosened tolerance.
    assert jnp.allclose(out, ref, atol=5e-2, rtol=5e-2), float(jnp.max(jnp.abs(out - ref)))
    print("KERNEL_OK")
</pallas_src>

<mosaic_0001>
module attributes {stable_mosaic.version = 11 : i64} {
  func.func @_dqn_fused_kernel(%arg0: i32, %arg1: memref<16x512xbf16, #tpu.memory_space<vmem>>, %arg2: memref<512x1536xbf16, #tpu.memory_space<vmem>>, %arg3: memref<512x1536xbf16, #tpu.memory_space<vmem>>, %arg4: memref<1x1536xf32, #tpu.memory_space<vmem>>, %arg5: memref<1x512xf32, #tpu.memory_space<vmem>>, %arg6: memref<512x768xbf16, #tpu.memory_space<vmem>>, %arg7: memref<256x768xbf16, #tpu.memory_space<vmem>>, %arg8: memref<1x768xf32, #tpu.memory_space<vmem>>, %arg9: memref<1x256xf32, #tpu.memory_space<vmem>>, %arg10: memref<256x384xbf16, #tpu.memory_space<vmem>>, %arg11: memref<128x384xbf16, #tpu.memory_space<vmem>>, %arg12: memref<1x384xf32, #tpu.memory_space<vmem>>, %arg13: memref<1x128xf32, #tpu.memory_space<vmem>>, %arg14: memref<128x192xbf16, #tpu.memory_space<vmem>>, %arg15: memref<64x192xbf16, #tpu.memory_space<vmem>>, %arg16: memref<1x192xf32, #tpu.memory_space<vmem>>, %arg17: memref<1x64xf32, #tpu.memory_space<vmem>>, %arg18: memref<64x128xf32, #tpu.memory_space<vmem>>, %arg19: memref<64x128xf32, #tpu.memory_space<vmem>>, %arg20: memref<1x128xf32, #tpu.memory_space<vmem>>, %arg21: memref<8x128xf32, #tpu.memory_space<vmem>>, %arg22: memref<16x1536xf32, #tpu.memory_space<vmem>>) attributes {dimension_semantics = [#tpu.dimension_semantics<arbitrary>], iteration_bounds = array<i64: 1>, scalar_prefetch = 0 : i64, scratch_operands = 1 : i64, tpu.core_type = #tpu.core_type<tc>, window_params = [{transform_indices = @transform_0, window_bounds = array<i64: 16, 512>}, {transform_indices = @transform_1, window_bounds = array<i64: 512, 1536>}, {pipeline_mode = #tpu.pipeline_mode<synchronous>, transform_indices = @transform_2, window_bounds = array<i64: 512, 1536>}, {pipeline_mode = #tpu.pipeline_mode<synchronous>, transform_indices = @transform_3, window_bounds = array<i64: 1, 1536>}, {pipeline_mode = #tpu.pipeline_mode<synchronous>, transform_indices = @transform_4, window_bounds = array<i64: 1, 512>}, {pipeline_mode = #tpu.pipeline_mode<synchronous>, transform_indices = @transform_5, window_bounds = array<i64: 512, 768>}, {pipeline_mode = #tpu.pipeline_mode<synchronous>, transform_indices = @transform_6, window_bounds = array<i64: 256, 768>}, {pipeline_mode = #tpu.pipeline_mode<synchronous>, transform_indices = @transform_7, window_bounds = array<i64: 1, 768>}, {pipeline_mode = #tpu.pipeline_mode<synchronous>, transform_indices = @transform_8, window_bounds = array<i64: 1, 256>}, {pipeline_mode = #tpu.pipeline_mode<synchronous>, transform_indices = @transform_9, window_bounds = array<i64: 256, 384>}, {pipeline_mode = #tpu.pipeline_mode<synchronous>, transform_indices = @transform_10, window_bounds = array<i64: 128, 384>}, {pipeline_mode = #tpu.pipeline_mode<synchronous>, transform_indices = @transform_11, window_bounds = array<i64: 1, 384>}, {pipeline_mode = #tpu.pipeline_mode<synchronous>, transform_indices = @transform_12, window_bounds = array<i64: 1, 128>}, {pipeline_mode = #tpu.pipeline_mode<synchronous>, transform_indices = @transform_13, window_bounds = array<i64: 128, 192>}, {pipeline_mode = #tpu.pipeline_mode<synchronous>, transform_indices = @transform_14, window_bounds = array<i64: 64, 192>}, {pipeline_mode = #tpu.pipeline_mode<synchronous>, transform_indices = @transform_15, window_bounds = array<i64: 1, 192>}, {pipeline_mode = #tpu.pipeline_mode<synchronous>, transform_indices = @transform_16, window_bounds = array<i64: 1, 64>}, {pipeline_mode = #tpu.pipeline_mode<synchronous>, transform_indices = @transform_17, window_bounds = array<i64: 64, 128>}, {pipeline_mode = #tpu.pipeline_mode<synchronous>, transform_indices = @transform_18, window_bounds = array<i64: 64, 128>}, {pipeline_mode = #tpu.pipeline_mode<synchronous>, transform_indices = @transform_19, window_bounds = array<i64: 1, 128>}, {pipeline_mode = #tpu.pipeline_mode<synchronous>, transform_indices = @transform_20, window_bounds = array<i64: 8, 128>}]} {
    %c0_i32 = arith.constant 0 : i32
    %0 = arith.cmpi eq, %arg0, %c0_i32 : i32
    %1 = arith.extui %0 : i1 to i32
    %c0_i32_0 = arith.constant 0 : i32
    %2 = arith.cmpi ne, %1, %c0_i32_0 : i32
    scf.if %2 {
      %cst_10 = arith.constant 0.000000e+00 : f32
      %12 = vector.broadcast %cst_10 : f32 to vector<16x1536xf32>
      %c0_11 = arith.constant 0 : index
      %c0_12 = arith.constant 0 : index
      %13 = vector.load %arg22[%c0_11, %c0_12] : memref<16x1536xf32, #tpu.memory_space<vmem>>, vector<16x1536xf32>
      tpu.vector_store %arg22[%c0_11, %c0_12], %12 {strides = array<i32>} : memref<16x1536xf32, #tpu.memory_space<vmem>>, vector<16x1536xf32>,
    } else {
    }
    %c0 = arith.constant 0 : index
    %c0_1 = arith.constant 0 : index
    %3 = vector.load %arg22[%c0, %c0_1] : memref<16x1536xf32, #tpu.memory_space<vmem>>, vector<16x1536xf32>
    %c0_2 = arith.constant 0 : index
    %c0_3 = arith.constant 0 : index
    %4 = vector.load %arg1[%c0_2, %c0_3] : memref<16x512xbf16, #tpu.memory_space<vmem>>, vector<16x512xbf16>
    %c0_4 = arith.constant 0 : index
    %c0_5 = arith.constant 0 : index
    %5 = vector.load %arg2[%c0_4, %c0_5] : memref<512x1536xbf16, #tpu.memory_space<vmem>>, vector<512x1536xbf16>
    %cst = arith.constant dense<0.000000e+00> : vector<16x1536xf32>
    %6 = tpu.matmul %4, %5, %cst {dimension_numbers = #tpu.dot_dimension_numbers<[1], [0], [0], [1], [0, 0, 1, 1], [], []>} : vector<16x512xbf16>, vector<512x1536xbf16>, vector<16x1536xf32> -> vector<16x1536xf32>
    %7 = arith.addf %3, %6 : vector<16x1536xf32>
    %c0_6 = arith.constant 0 : index
    %c0_7 = arith.constant 0 : index
    %8 = vector.load %arg22[%c0_6, %c0_7] : memref<16x1536xf32, #tpu.memory_space<vmem>>, vector<16x1536xf32>
    tpu.vector_store %arg22[%c0_6, %c0_7], %7 {strides = array<i32>} : memref<16x1536xf32, #tpu.memory_space<vmem>>, vector<16x1536xf32>,
    %c0_i32_8 = arith.constant 0 : i32
    %9 = arith.cmpi eq, %arg0, %c0_i32_8 : i32
    %10 = arith.extui %9 : i1 to i32
    %c0_i32_9 = arith.constant 0 : i32
    %11 = arith.cmpi ne, %10, %c0_i32_9 : i32
    scf.if %11 {
      %c0_10 = arith.constant 0 : index
      %c0_11 = arith.constant 0 : index
      %12 = vector.load %arg22[%c0_10, %c0_11] : memref<16x1536xf32, #tpu.memory_space<vmem>>, vector<16x1536xf32>
      %c0_12 = arith.constant 0 : index
      %c0_13 = arith.constant 0 : index
      %13 = vector.load %arg3[%c0_12, %c0_13] : memref<512x1536xbf16, #tpu.memory_space<vmem>>, vector<512x1536xbf16>
      %c0_14 = arith.constant 0 : index
      %c0_15 = arith.constant 0 : index
      %14 = vector.load %arg4[%c0_14, %c0_15] : memref<1x1536xf32, #tpu.memory_space<vmem>>, vector<1x1536xf32>
      %c0_16 = arith.constant 0 : index
      %c0_17 = arith.constant 0 : index
      %15 = vector.load %arg5[%c0_16, %c0_17] : memref<1x512xf32, #tpu.memory_space<vmem>>, vector<1x512xf32>
      %16 = vector.extract_strided_slice %12 {offsets = [0, 0], sizes = [8, 1536], strides = [1, 1]} : vector<16x1536xf32> to vector<8x1536xf32>
      %17 = vector.broadcast %14 : vector<1x1536xf32> to vector<8x1536xf32>
      %18 = arith.addf %16, %17 : vector<8x1536xf32>
      %19 = vector.extract_strided_slice %18 {offsets = [0, 0], sizes = [8, 512], strides = [1, 1]} : vector<8x1536xf32> to vector<8x512xf32>
      %20 = arith.negf %19 : vector<8x512xf32>
      %21 = math.exp %20 : vector<8x512xf32>
      %cst_18 = arith.constant 1.000000e+00 : f32
      %22 = vector.broadcast %cst_18 : f32 to vector<8x512xf32>
      %23 = arith.addf %22, %21 : vector<8x512xf32>
      %24 = arith.divf %22, %23 : vector<8x512xf32>
      %25 = vector.extract_strided_slice %18 {offsets = [0, 512], sizes = [8, 512], strides = [1, 1]} : vector<8x1536xf32> to vector<8x512xf32>
      %26 = arith.negf %25 : vector<8x512xf32>
      %27 = math.exp %26 : vector<8x512xf32>
      %cst_19 = arith.constant 1.000000e+00 : f32
      %28 = vector.broadcast %cst_19 : f32 to vector<8x512xf32>
      %29 = arith.addf %28, %27 : vector<8x512xf32>
      %30 = arith.divf %28, %29 : vector<8x512xf32>
      %31 = vector.extract_strided_slice %18 {offsets = [0, 1024], sizes = [8, 512], strides = [1, 1]} : vector<8x1536xf32> to vector<8x512xf32>
      %32 = vector.broadcast %15 : vector<1x512xf32> to vector<8x512xf32>
      %33 = arith.mulf %24, %32 : vector<8x512xf32>
      %34 = arith.addf %31, %33 : vector<8x512xf32>
      %35 = math.tanh %34 : vector<8x512xf32>
      %cst_20 = arith.constant 1.000000e+00 : f32
      %36 = vector.broadcast %cst_20 : f32 to vector<8x512xf32>
      %37 = arith.subf %36, %30 : vector<8x512xf32>
      %38 = arith.mulf %37, %35 : vector<8x512xf32>
      %39 = vector.extract_strided_slice %12 {offsets = [8, 0], sizes = [8, 1536], strides = [1, 1]} : vector<16x1536xf32> to vector<8x1536xf32>
      %40 = vector.broadcast %14 : vector<1x1536xf32> to vector<8x1536xf32>
      %41 = arith.addf %39, %40 : vector<8x1536xf32>
      %42 = arith.truncf %38 : vector<8x512xf32> to vector<8x512xbf16>
      %cst_21 = arith.constant dense<0.000000e+00> : vector<8x1536xf32>
      %43 = tpu.matmul %42, %13, %cst_21 {dimension_numbers = #tpu.dot_dimension_numbers<[1], [0], [0], [1], [0, 0, 1, 1], [], []>} : vector<8x512xbf16>, vector<512x1536xbf16>, vector<8x1536xf32> -> vector<8x1536xf32>
      %44 = vector.extract_strided_slice %41 {offsets = [0, 0], sizes = [8, 512], strides = [1, 1]} : vector<8x1536xf32> to vector<8x512xf32>
      %45 = vector.extract_strided_slice %43 {offsets = [0, 0], sizes = [8, 512], strides = [1, 1]} : vector<8x1536xf32> to vector<8x512xf32>
      %46 = arith.addf %44, %45 : vector<8x512xf32>
      %47 = arith.negf %46 : vector<8x512xf32>
      %48 = math.exp %47 : vector<8x512xf32>
      %cst_22 = arith.constant 1.000000e+00 : f32
      %49 = vector.broadcast %cst_22 : f32 to vector<8x512xf32>
      %50 = arith.addf %49, %48 : vector<8x512xf32>
      %51 = arith.divf %49, %50 : vector<8x512xf32>
      %52 = vector.extract_strided_slice %41 {offsets = [0, 512], sizes = [8, 512], strides = [1, 1]} : vector<8x1536xf32> to vector<8x512xf32>
      %53 = vector.extract_strided_slice %43 {offsets = [0, 512], sizes = [8, 512], strides = [1, 1]} : vector<8x1536xf32> to vector<8x512xf32>
      %54 = arith.addf %52, %53 : vector<8x512xf32>
      %55 = arith.negf %54 : vector<8x512xf32>
      %56 = math.exp %55 : vector<8x512xf32>
      %cst_23 = arith.constant 1.000000e+00 : f32
      %57 = vector.broadcast %cst_23 : f32 to vector<8x512xf32>
      %58 = arith.addf %57, %56 : vector<8x512xf32>
      %59 = arith.divf %57, %58 : vector<8x512xf32>
      %60 = vector.extract_strided_slice %41 {offsets = [0, 1024], sizes = [8, 512], strides = [1, 1]} : vector<8x1536xf32> to vector<8x512xf32>
      %61 = vector.extract_strided_slice %43 {offsets = [0, 1024], sizes = [8, 512], strides = [1, 1]} : vector<8x1536xf32> to vector<8x512xf32>
      %62 = vector.broadcast %15 : vector<1x512xf32> to vector<8x512xf32>
      %63 = arith.addf %61, %62 : vector<8x512xf32>
      %64 = arith.mulf %51, %63 : vector<8x512xf32>
      %65 = arith.addf %60, %64 : vector<8x512xf32>
      %66 = math.tanh %65 : vector<8x512xf32>
      %cst_24 = arith.constant 1.000000e+00 : f32
      %67 = vector.broadcast %cst_24 : f32 to vector<8x512xf32>
      %68 = arith.subf %67, %59 : vector<8x512xf32>
      %69 = arith.mulf %68, %66 : vector<8x512xf32>
      %70 = arith.mulf %59, %38 : vector<8x512xf32>
      %71 = arith.addf %69, %70 : vector<8x512xf32>
      %72 = tpu.concatenate %38, %71 in 0 : vector<8x512xf32>, vector<8x512xf32> -> vector<16x512xf32>
      %73 = arith.truncf %72 : vector<16x512xf32> to vector<16x512xbf16>
      %c0_25 = arith.constant 0 : index
      %c0_26 = arith.constant 0 : index
      %74 = vector.load %arg6[%c0_25, %c0_26] : memref<512x768xbf16, #tpu.memory_space<vmem>>, vector<512x768xbf16>
      %cst_27 = arith.constant dense<0.000000e+00> : vector<16x768xf32>
      %75 = tpu.matmul %73, %74, %cst_27 {dimension_numbers = #tpu.dot_dimension_numbers<[1], [0], [0], [1], [0, 0, 1, 1], [], []>} : vector<16x512xbf16>, vector<512x768xbf16>, vector<16x768xf32> -> vector<16x768xf32>
      %c0_28 = arith.constant 0 : index
      %c0_29 = arith.constant 0 : index
      %76 = vector.load %arg7[%c0_28, %c0_29] : memref<256x768xbf16, #tpu.memory_space<vmem>>, vector<256x768xbf16>
      %c0_30 = arith.constant 0 : index
      %c0_31 = arith.constant 0 : index
      %77 = vector.load %arg8[%c0_30, %c0_31] : memref<1x768xf32, #tpu.memory_space<vmem>>, vector<1x768xf32>
      %c0_32 = arith.constant 0 : index
      %c0_33 = arith.constant 0 : index
      %78 = vector.load %arg9[%c0_32, %c0_33] : memref<1x256xf32, #tpu.memory_space<vmem>>, vector<1x256xf32>
      %79 = vector.extract_strided_slice %75 {offsets = [0, 0], sizes = [8, 768], strides = [1, 1]} : vector<16x768xf32> to vector<8x768xf32>
      %80 = vector.broadcast %77 : vector<1x768xf32> to vector<8x768xf32>
      %81 = arith.addf %79, %80 : vector<8x768xf32>
      %82 = vector.extract_strided_slice %81 {offsets = [0, 0], sizes = [8, 256], strides = [1, 1]} : vector<8x768xf32> to vector<8x256xf32>
      %83 = arith.negf %82 : vector<8x256xf32>
      %84 = math.exp %83 : vector<8x256xf32>
      %cst_34 = arith.constant 1.000000e+00 : f32
      %85 = vector.broadcast %cst_34 : f32 to vector<8x256xf32>
      %86 = arith.addf %85, %84 : vector<8x256xf32>
      %87 = arith.divf %85, %86 : vector<8x256xf32>
      %88 = vector.extract_strided_slice %81 {offsets = [0, 256], sizes = [8, 256], strides = [1, 1]} : vector<8x768xf32> to vector<8x256xf32>
      %89 = arith.negf %88 : vector<8x256xf32>
      %90 = math.exp %89 : vector<8x256xf32>
      %cst_35 = arith.constant 1.000000e+00 : f32
      %91 = vector.broadcast %cst_35 : f32 to vector<8x256xf32>
      %92 = arith.addf %91, %90 : vector<8x256xf32>
      %93 = arith.divf %91, %92 : vector<8x256xf32>
      %94 = vector.extract_strided_slice %81 {offsets = [0, 512], sizes = [8, 256], strides = [1, 1]} : vector<8x768xf32> to vector<8x256xf32>
      %95 = vector.broadcast %78 : vector<1x256xf32> to vector<8x256xf32>
      %96 = arith.mulf %87, %95 : vector<8x256xf32>
      %97 = arith.addf %94, %96 : vector<8x256xf32>
      %98 = math.tanh %97 : vector<8x256xf32>
      %cst_36 = arith.constant 1.000000e+00 : f32
      %99 = vector.broadcast %cst_36 : f32 to vector<8x256xf32>
      %100 = arith.subf %99, %93 : vector<8x256xf32>
      %101 = arith.mulf %100, %98 : vector<8x256xf32>
      %102 = vector.extract_strided_slice %75 {offsets = [8, 0], sizes = [8, 768], strides = [1, 1]} : vector<16x768xf32> to vector<8x768xf32>
      %103 = vector.broadcast %77 : vector<1x768xf32> to vector<8x768xf32>
      %104 = arith.addf %102, %103 : vector<8x768xf32>
      %105 = arith.truncf %101 : vector<8x256xf32> to vector<8x256xbf16>
      %cst_37 = arith.constant dense<0.000000e+00> : vector<8x768xf32>
      %106 = tpu.matmul %105, %76, %cst_37 {dimension_numbers = #tpu.dot_dimension_numbers<[1], [0], [0], [1], [0, 0, 1, 1], [], []>} : vector<8x256xbf16>, vector<256x768xbf16>, vector<8x768xf32> -> vector<8x768xf32>
      %107 = vector.extract_strided_slice %104 {offsets = [0, 0], sizes = [8, 256], strides = [1, 1]} : vector<8x768xf32> to vector<8x256xf32>
      %108 = vector.extract_strided_slice %106 {offsets = [0, 0], sizes = [8, 256], strides = [1, 1]} : vector<8x768xf32> to vector<8x256xf32>
      %109 = arith.addf %107, %108 : vector<8x256xf32>
      %110 = arith.negf %109 : vector<8x256xf32>
      %111 = math.exp %110 : vector<8x256xf32>
      %cst_38 = arith.constant 1.000000e+00 : f32
      %112 = vector.broadcast %cst_38 : f32 to vector<8x256xf32>
      %113 = arith.addf %112, %111 : vector<8x256xf32>
      %114 = arith.divf %112, %113 : vector<8x256xf32>
      %115 = vector.extract_strided_slice %104 {offsets = [0, 256], sizes = [8, 256], strides = [1, 1]} : vector<8x768xf32> to vector<8x256xf32>
      %116 = vector.extract_strided_slice %106 {offsets = [0, 256], sizes = [8, 256], strides = [1, 1]} : vector<8x768xf32> to vector<8x256xf32>
      %117 = arith.addf %115, %116 : vector<8x256xf32>
      %118 = arith.negf %117 : vector<8x256xf32>
      %119 = math.exp %118 : vector<8x256xf32>
      %cst_39 = arith.constant 1.000000e+00 : f32
      %120 = vector.broadcast %cst_39 : f32 to vector<8x256xf32>
      %121 = arith.addf %120, %119 : vector<8x256xf32>
      %122 = arith.divf %120, %121 : vector<8x256xf32>
      %123 = vector.extract_strided_slice %104 {offsets = [0, 512], sizes = [8, 256], strides = [1, 1]} : vector<8x768xf32> to vector<8x256xf32>
      %124 = vector.extract_strided_slice %106 {offsets = [0, 512], sizes = [8, 256], strides = [1, 1]} : vector<8x768xf32> to vector<8x256xf32>
      %125 = vector.broadcast %78 : vector<1x256xf32> to vector<8x256xf32>
      %126 = arith.addf %124, %125 : vector<8x256xf32>
      %127 = arith.mulf %114, %126 : vector<8x256xf32>
      %128 = arith.addf %123, %127 : vector<8x256xf32>
      %129 = math.tanh %128 : vector<8x256xf32>
      %cst_40 = arith.constant 1.000000e+00 : f32
      %130 = vector.broadcast %cst_40 : f32 to vector<8x256xf32>
      %131 = arith.subf %130, %122 : vector<8x256xf32>
      %132 = arith.mulf %131, %129 : vector<8x256xf32>
      %133 = arith.mulf %122, %101 : vector<8x256xf32>
      %134 = arith.addf %132, %133 : vector<8x256xf32>
      %135 = tpu.concatenate %101, %134 in 0 : vector<8x256xf32>, vector<8x256xf32> -> vector<16x256xf32>
      %136 = arith.truncf %135 : vector<16x256xf32> to vector<16x256xbf16>
      %c0_41 = arith.constant 0 : index
      %c0_42 = arith.constant 0 : index
      %137 = vector.load %arg10[%c0_41, %c0_42] : memref<256x384xbf16, #tpu.memory_space<vmem>>, vector<256x384xbf16>
      %cst_43 = arith.constant dense<0.000000e+00> : vector<16x384xf32>
      %138 = tpu.matmul %136, %137, %cst_43 {dimension_numbers = #tpu.dot_dimension_numbers<[1], [0], [0], [1], [0, 0, 1, 1], [], []>} : vector<16x256xbf16>, vector<256x384xbf16>, vector<16x384xf32> -> vector<16x384xf32>
      %c0_44 = arith.constant 0 : index
      %c0_45 = arith.constant 0 : index
      %139 = vector.load %arg11[%c0_44, %c0_45] : memref<128x384xbf16, #tpu.memory_space<vmem>>, vector<128x384xbf16>
      %c0_46 = arith.constant 0 : index
      %c0_47 = arith.constant 0 : index
      %140 = vector.load %arg12[%c0_46, %c0_47] : memref<1x384xf32, #tpu.memory_space<vmem>>, vector<1x384xf32>
      %c0_48 = arith.constant 0 : index
      %c0_49 = arith.constant 0 : index
      %141 = vector.load %arg13[%c0_48, %c0_49] : memref<1x128xf32, #tpu.memory_space<vmem>>, vector<1x128xf32>
      %142 = vector.extract_strided_slice %138 {offsets = [0, 0], sizes = [8, 384], strides = [1, 1]} : vector<16x384xf32> to vector<8x384xf32>
      %143 = vector.broadcast %140 : vector<1x384xf32> to vector<8x384xf32>
      %144 = arith.addf %142, %143 : vector<8x384xf32>
      %145 = vector.extract_strided_slice %144 {offsets = [0, 0], sizes = [8, 128], strides = [1, 1]} : vector<8x384xf32> to vector<8x128xf32>
      %146 = arith.negf %145 : vector<8x128xf32>
      %147 = math.exp %146 : vector<8x128xf32>
      %cst_50 = arith.constant 1.000000e+00 : f32
      %148 = vector.broadcast %cst_50 : f32 to vector<8x128xf32>
      %149 = arith.addf %148, %147 : vector<8x128xf32>
      %150 = arith.divf %148, %149 : vector<8x128xf32>
      %151 = vector.extract_strided_slice %144 {offsets = [0, 128], sizes = [8, 128], strides = [1, 1]} : vector<8x384xf32> to vector<8x128xf32>
      %152 = arith.negf %151 : vector<8x128xf32>
      %153 = math.exp %152 : vector<8x128xf32>
      %cst_51 = arith.constant 1.000000e+00 : f32
      %154 = vector.broadcast %cst_51 : f32 to vector<8x128xf32>
      %155 = arith.addf %154, %153 : vector<8x128xf32>
      %156 = arith.divf %154, %155 : vector<8x128xf32>
      %157 = vector.extract_strided_slice %144 {offsets = [0, 256], sizes = [8, 128], strides = [1, 1]} : vector<8x384xf32> to vector<8x128xf32>
      %158 = vector.broadcast %141 : vector<1x128xf32> to vector<8x128xf32>
      %159 = arith.mulf %150, %158 : vector<8x128xf32>
      %160 = arith.addf %157, %159 : vector<8x128xf32>
      %161 = math.tanh %160 : vector<8x128xf32>
      %cst_52 = arith.constant 1.000000e+00 : f32
      %162 = vector.broadcast %cst_52 : f32 to vector<8x128xf32>
      %163 = arith.subf %162, %156 : vector<8x128xf32>
      %164 = arith.mulf %163, %161 : vector<8x128xf32>
      %165 = vector.extract_strided_slice %138 {offsets = [8, 0], sizes = [8, 384], strides = [1, 1]} : vector<16x384xf32> to vector<8x384xf32>
      %166 = vector.broadcast %140 : vector<1x384xf32> to vector<8x384xf32>
      %167 = arith.addf %165, %166 : vector<8x384xf32>
      %168 = arith.truncf %164 : vector<8x128xf32> to vector<8x128xbf16>
      %cst_53 = arith.constant dense<0.000000e+00> : vector<8x384xf32>
      %169 = tpu.matmul %168, %139, %cst_53 {dimension_numbers = #tpu.dot_dimension_numbers<[1], [0], [0], [1], [0, 0, 1, 1], [], []>} : vector<8x128xbf16>, vector<128x384xbf16>, vector<8x384xf32> -> vector<8x384xf32>
      %170 = vector.extract_strided_slice %167 {offsets = [0, 0], sizes = [8, 128], strides = [1, 1]} : vector<8x384xf32> to vector<8x128xf32>
      %171 = vector.extract_strided_slice %169 {offsets = [0, 0], sizes = [8, 128], strides = [1, 1]} : vector<8x384xf32> to vector<8x128xf32>
      %172 = arith.addf %170, %171 : vector<8x128xf32>
      %173 = arith.negf %172 : vector<8x128xf32>
      %174 = math.exp %173 : vector<8x128xf32>
      %cst_54 = arith.constant 1.000000e+00 : f32
      %175 = vector.broadcast %cst_54 : f32 to vector<8x128xf32>
      %176 = arith.addf %175, %174 : vector<8x128xf32>
      %177 = arith.divf %175, %176 : vector<8x128xf32>
      %178 = vector.extract_strided_slice %167 {offsets = [0, 128], sizes = [8, 128], strides = [1, 1]} : vector<8x384xf32> to vector<8x128xf32>
      %179 = vector.extract_strided_slice %169 {offsets = [0, 128], sizes = [8, 128], strides = [1, 1]} : vector<8x384xf32> to vector<8x128xf32>
      %180 = arith.addf %178, %179 : vector<8x128xf32>
      %181 = arith.negf %180 : vector<8x128xf32>
      %182 = math.exp %181 : vector<8x128xf32>
      %cst_55 = arith.constant 1.000000e+00 : f32
      %183 = vector.broadcast %cst_55 : f32 to vector<8x128xf32>
      %184 = arith.addf %183, %182 : vector<8x128xf32>
      %185 = arith.divf %183, %184 : vector<8x128xf32>
      %186 = vector.extract_strided_slice %167 {offsets = [0, 256], sizes = [8, 128], strides = [1, 1]} : vector<8x384xf32> to vector<8x128xf32>
      %187 = vector.extract_strided_slice %169 {offsets = [0, 256], sizes = [8, 128], strides = [1, 1]} : vector<8x384xf32> to vector<8x128xf32>
      %188 = vector.broadcast %141 : vector<1x128xf32> to vector<8x128xf32>
      %189 = arith.addf %187, %188 : vector<8x128xf32>
      %190 = arith.mulf %177, %189 : vector<8x128xf32>
      %191 = arith.addf %186, %190 : vector<8x128xf32>
      %192 = math.tanh %191 : vector<8x128xf32>
      %cst_56 = arith.constant 1.000000e+00 : f32
      %193 = vector.broadcast %cst_56 : f32 to vector<8x128xf32>
      %194 = arith.subf %193, %185 : vector<8x128xf32>
      %195 = arith.mulf %194, %192 : vector<8x128xf32>
      %196 = arith.mulf %185, %164 : vector<8x128xf32>
      %197 = arith.addf %195, %196 : vector<8x128xf32>
      %198 = tpu.concatenate %164, %197 in 0 : vector<8x128xf32>, vector<8x128xf32> -> vector<16x128xf32>
      %199 = arith.truncf %198 : vector<16x128xf32> to vector<16x128xbf16>
      %c0_57 = arith.constant 0 : index
      %c0_58 = arith.constant 0 : index
      %200 = vector.load %arg14[%c0_57, %c0_58] : memref<128x192xbf16, #tpu.memory_space<vmem>>, vector<128x192xbf16>
      %cst_59 = arith.constant dense<0.000000e+00> : vector<16x192xf32>
      %201 = tpu.matmul %199, %200, %cst_59 {dimension_numbers = #tpu.dot_dimension_numbers<[1], [0], [0], [1], [0, 0, 1, 1], [], []>} : vector<16x128xbf16>, vector<128x192xbf16>, vector<16x192xf32> -> vector<16x192xf32>
      %c0_60 = arith.constant 0 : index
      %c0_61 = arith.constant 0 : index
      %202 = vector.load %arg15[%c0_60, %c0_61] : memref<64x192xbf16, #tpu.memory_space<vmem>>, vector<64x192xbf16>
      %c0_62 = arith.constant 0 : index
      %c0_63 = arith.constant 0 : index
      %203 = vector.load %arg16[%c0_62, %c0_63] : memref<1x192xf32, #tpu.memory_space<vmem>>, vector<1x192xf32>
      %c0_64 = arith.constant 0 : index
      %c0_65 = arith.constant 0 : index
      %204 = vector.load %arg17[%c0_64, %c0_65] : memref<1x64xf32, #tpu.memory_space<vmem>>, vector<1x64xf32>
      %205 = vector.extract_strided_slice %201 {offsets = [0, 0], sizes = [8, 192], strides = [1, 1]} : vector<16x192xf32> to vector<8x192xf32>
      %206 = vector.broadcast %203 : vector<1x192xf32> to vector<8x192xf32>
      %207 = arith.addf %205, %206 : vector<8x192xf32>
      %208 = vector.extract_strided_slice %207 {offsets = [0, 0], sizes = [8, 64], strides = [1, 1]} : vector<8x192xf32> to vector<8x64xf32>
      %209 = arith.negf %208 : vector<8x64xf32>
      %210 = math.exp %209 : vector<8x64xf32>
      %cst_66 = arith.constant 1.000000e+00 : f32
      %211 = vector.broadcast %cst_66 : f32 to vector<8x64xf32>
      %212 = arith.addf %211, %210 : vector<8x64xf32>
      %213 = arith.divf %211, %212 : vector<8x64xf32>
      %214 = vector.extract_strided_slice %207 {offsets = [0, 64], sizes = [8, 64], strides = [1, 1]} : vector<8x192xf32> to vector<8x64xf32>
      %215 = arith.negf %214 : vector<8x64xf32>
      %216 = math.exp %215 : vector<8x64xf32>
      %cst_67 = arith.constant 1.000000e+00 : f32
      %217 = vector.broadcast %cst_67 : f32 to vector<8x64xf32>
      %218 = arith.addf %217, %216 : vector<8x64xf32>
      %219 = arith.divf %217, %218 : vector<8x64xf32>
      %220 = vector.extract_strided_slice %207 {offsets = [0, 128], sizes = [8, 64], strides = [1, 1]} : vector<8x192xf32> to vector<8x64xf32>
      %221 = vector.broadcast %204 : vector<1x64xf32> to vector<8x64xf32>
      %222 = arith.mulf %213, %221 : vector<8x64xf32>
      %223 = arith.addf %220, %222 : vector<8x64xf32>
      %224 = math.tanh %223 : vector<8x64xf32>
      %cst_68 = arith.constant 1.000000e+00 : f32
      %225 = vector.broadcast %cst_68 : f32 to vector<8x64xf32>
      %226 = arith.subf %225, %219 : vector<8x64xf32>
      %227 = arith.mulf %226, %224 : vector<8x64xf32>
      %228 = vector.extract_strided_slice %201 {offsets = [8, 0], sizes = [8, 192], strides = [1, 1]} : vector<16x192xf32> to vector<8x192xf32>
      %229 = vector.broadcast %203 : vector<1x192xf32> to vector<8x192xf32>
      %230 = arith.addf %228, %229 : vector<8x192xf32>
      %231 = arith.truncf %227 : vector<8x64xf32> to vector<8x64xbf16>
      %cst_69 = arith.constant dense<0.000000e+00> : vector<8x192xf32>
      %232 = tpu.matmul %231, %202, %cst_69 {dimension_numbers = #tpu.dot_dimension_numbers<[1], [0], [0], [1], [0, 0, 1, 1], [], []>} : vector<8x64xbf16>, vector<64x192xbf16>, vector<8x192xf32> -> vector<8x192xf32>
      %233 = vector.extract_strided_slice %230 {offsets = [0, 0], sizes = [8, 64], strides = [1, 1]} : vector<8x192xf32> to vector<8x64xf32>
      %234 = vector.extract_strided_slice %232 {offsets = [0, 0], sizes = [8, 64], strides = [1, 1]} : vector<8x192xf32> to vector<8x64xf32>
      %235 = arith.addf %233, %234 : vector<8x64xf32>
      %236 = arith.negf %235 : vector<8x64xf32>
      %237 = math.exp %236 : vector<8x64xf32>
      %cst_70 = arith.constant 1.000000e+00 : f32
      %238 = vector.broadcast %cst_70 : f32 to vector<8x64xf32>
      %239 = arith.addf %238, %237 : vector<8x64xf32>
      %240 = arith.divf %238, %239 : vector<8x64xf32>
      %241 = vector.extract_strided_slice %230 {offsets = [0, 64], sizes = [8, 64], strides = [1, 1]} : vector<8x192xf32> to vector<8x64xf32>
      %242 = vector.extract_strided_slice %232 {offsets = [0, 64], sizes = [8, 64], strides = [1, 1]} : vector<8x192xf32> to vector<8x64xf32>
      %243 = arith.addf %241, %242 : vector<8x64xf32>
      %244 = arith.negf %243 : vector<8x64xf32>
      %245 = math.exp %244 : vector<8x64xf32>
      %cst_71 = arith.constant 1.000000e+00 : f32
      %246 = vector.broadcast %cst_71 : f32 to vector<8x64xf32>
      %247 = arith.addf %246, %245 : vector<8x64xf32>
      %248 = arith.divf %246, %247 : vector<8x64xf32>
      %249 = vector.extract_strided_slice %230 {offsets = [0, 128], sizes = [8, 64], strides = [1, 1]} : vector<8x192xf32> to vector<8x64xf32>
      %250 = vector.extract_strided_slice %232 {offsets = [0, 128], sizes = [8, 64], strides = [1, 1]} : vector<8x192xf32> to vector<8x64xf32>
      %251 = vector.broadcast %204 : vector<1x64xf32> to vector<8x64xf32>
      %252 = arith.addf %250, %251 : vector<8x64xf32>
      %253 = arith.mulf %240, %252 : vector<8x64xf32>
      %254 = arith.addf %249, %253 : vector<8x64xf32>
      %255 = math.tanh %254 : vector<8x64xf32>
      %cst_72 = arith.constant 1.000000e+00 : f32
      %256 = vector.broadcast %cst_72 : f32 to vector<8x64xf32>
      %257 = arith.subf %256, %248 : vector<8x64xf32>
      %258 = arith.mulf %257, %255 : vector<8x64xf32>
      %259 = arith.mulf %248, %227 : vector<8x64xf32>
      %260 = arith.addf %258, %259 : vector<8x64xf32>
      %c0_73 = arith.constant 0 : index
      %c0_74 = arith.constant 0 : index
      %261 = vector.load %arg18[%c0_73, %c0_74] : memref<64x128xf32, #tpu.memory_space<vmem>>, vector<64x128xf32>
      %cst_75 = arith.constant dense<0.000000e+00> : vector<8x128xf32>
      %262 = tpu.matmul %227, %261, %cst_75 {dimension_numbers = #tpu.dot_dimension_numbers<[1], [0], [0], [1], [0, 0, 1, 1], [], []>} : vector<8x64xf32>, vector<64x128xf32>, vector<8x128xf32> -> vector<8x128xf32>
      %c0_76 = arith.constant 0 : index
      %c0_77 = arith.constant 0 : index
      %263 = vector.load %arg19[%c0_76, %c0_77] : memref<64x128xf32, #tpu.memory_space<vmem>>, vector<64x128xf32>
      %cst_78 = arith.constant dense<0.000000e+00> : vector<8x128xf32>
      %264 = tpu.matmul %260, %263, %cst_78 {dimension_numbers = #tpu.dot_dimension_numbers<[1], [0], [0], [1], [0, 0, 1, 1], [], []>} : vector<8x64xf32>, vector<64x128xf32>, vector<8x128xf32> -> vector<8x128xf32>
      %265 = arith.addf %262, %264 : vector<8x128xf32>
      %c0_79 = arith.constant 0 : index
      %c0_80 = arith.constant 0 : index
      %266 = vector.load %arg20[%c0_79, %c0_80] : memref<1x128xf32, #tpu.memory_space<vmem>>, vector<1x128xf32>
      %267 = vector.broadcast %266 : vector<1x128xf32> to vector<8x128xf32>
      %268 = arith.addf %265, %267 : vector<8x128xf32>
      %c0_81 = arith.constant 0 : index
      %c0_82 = arith.constant 0 : index
      %269 = vector.load %arg21[%c0_81, %c0_82] : memref<8x128xf32, #tpu.memory_space<vmem>>, vector<8x128xf32>
      tpu.vector_store %arg21[%c0_81, %c0_82], %268 {strides = array<i32>} : memref<8x128xf32, #tpu.memory_space<vmem>>, vector<8x128xf32>,
    } else {
    }
    return
  }
  func.func @transform_0(%arg0: i32) -> (i32, i32) {
    %c0_i32 = arith.constant 0 : i32
    %c0_i32_0 = arith.constant 0 : i32
    return %c0_i32, %arg0 : i32, i32
  }
  func.func @transform_1(%arg0: i32) -> (i32, i32) {
    %c0_i32 = arith.constant 0 : i32
    %c0_i32_0 = arith.constant 0 : i32
    return %arg0, %c0_i32 : i32, i32
  }
  func.func @transform_2(%arg0: i32) -> (i32, i32) {
    %c0_i32 = arith.constant 0 : i32
    %c0_i32_0 = arith.constant 0 : i32
    %c0_i32_1 = arith.constant 0 : i32
    return %c0_i32, %c0_i32_0 : i32, i32
  }
  func.func @transform_3(%arg0: i32) -> (i32, i32) {
    %c0_i32 = arith.constant 0 : i32
    %c0_i32_0 = arith.constant 0 : i32
    %c0_i32_1 = arith.constant 0 : i32
    return %c0_i32, %c0_i32_0 : i32, i32
  }
  func.func @transform_4(%arg0: i32) -> (i32, i32) {
    %c0_i32 = arith.constant 0 : i32
    %c0_i32_0 = arith.constant 0 : i32
    %c0_i32_1 = arith.constant 0 : i32
    return %c0_i32, %c0_i32_0 : i32, i32
  }
  func.func @transform_5(%arg0: i32) -> (i32, i32) {
    %c0_i32 = arith.constant 0 : i32
    %c0_i32_0 = arith.constant 0 : i32
    %c0_i32_1 = arith.constant 0 : i32
    return %c0_i32, %c0_i32_0 : i32, i32
  }
  func.func @transform_6(%arg0: i32) -> (i32, i32) {
    %c0_i32 = arith.constant 0 : i32
    %c0_i32_0 = arith.constant 0 : i32
    %c0_i32_1 = arith.constant 0 : i32
    return %c0_i32, %c0_i32_0 : i32, i32
  }
  func.func @transform_7(%arg0: i32) -> (i32, i32) {
    %c0_i32 = arith.constant 0 : i32
    %c0_i32_0 = arith.constant 0 : i32
    %c0_i32_1 = arith.constant 0 : i32
    return %c0_i32, %c0_i32_0 : i32, i32
  }
  func.func @transform_8(%arg0: i32) -> (i32, i32) {
    %c0_i32 = arith.constant 0 : i32
    %c0_i32_0 = arith.constant 0 : i32
    %c0_i32_1 = arith.constant 0 : i32
    return %c0_i32, %c0_i32_0 : i32, i32
  }
  func.func @transform_9(%arg0: i32) -> (i32, i32) {
    %c0_i32 = arith.constant 0 : i32
    %c0_i32_0 = arith.constant 0 : i32
    %c0_i32_1 = arith.constant 0 : i32
    return %c0_i32, %c0_i32_0 : i32, i32
  }
  func.func @transform_10(%arg0: i32) -> (i32, i32) {
    %c0_i32 = arith.constant 0 : i32
    %c0_i32_0 = arith.constant 0 : i32
    %c0_i32_1 = arith.constant 0 : i32
    return %c0_i32, %c0_i32_0 : i32, i32
  }
  func.func @transform_11(%arg0: i32) -> (i32, i32) {
    %c0_i32 = arith.constant 0 : i32
    %c0_i32_0 = arith.constant 0 : i32
    %c0_i32_1 = arith.constant 0 : i32
    return %c0_i32, %c0_i32_0 : i32, i32
  }
  func.func @transform_12(%arg0: i32) -> (i32, i32) {
    %c0_i32 = arith.constant 0 : i32
    %c0_i32_0 = arith.constant 0 : i32
    %c0_i32_1 = arith.constant 0 : i32
    return %c0_i32, %c0_i32_0 : i32, i32
  }
  func.func @transform_13(%arg0: i32) -> (i32, i32) {
    %c0_i32 = arith.constant 0 : i32
    %c0_i32_0 = arith.constant 0 : i32
    %c0_i32_1 = arith.constant 0 : i32
    return %c0_i32, %c0_i32_0 : i32, i32
  }
  func.func @transform_14(%arg0: i32) -> (i32, i32) {
    %c0_i32 = arith.constant 0 : i32
    %c0_i32_0 = arith.constant 0 : i32
    %c0_i32_1 = arith.constant 0 : i32
    return %c0_i32, %c0_i32_0 : i32, i32
  }
  func.func @transform_15(%arg0: i32) -> (i32, i32) {
    %c0_i32 = arith.constant 0 : i32
    %c0_i32_0 = arith.constant 0 : i32
    %c0_i32_1 = arith.constant 0 : i32
    return %c0_i32, %c0_i32_0 : i32, i32
  }
  func.func @transform_16(%arg0: i32) -> (i32, i32) {
    %c0_i32 = arith.constant 0 : i32
    %c0_i32_0 = arith.constant 0 : i32
    %c0_i32_1 = arith.constant 0 : i32
    return %c0_i32, %c0_i32_0 : i32, i32
  }
  func.func @transform_17(%arg0: i32) -> (i32, i32) {
    %c0_i32 = arith.constant 0 : i32
    %c0_i32_0 = arith.constant 0 : i32
    %c0_i32_1 = arith.constant 0 : i32
    return %c0_i32, %c0_i32_0 : i32, i32
  }
  func.func @transform_18(%arg0: i32) -> (i32, i32) {
    %c0_i32 = arith.constant 0 : i32
    %c0_i32_0 = arith.constant 0 : i32
    %c0_i32_1 = arith.constant 0 : i32
    return %c0_i32, %c0_i32_0 : i32, i32
  }
  func.func @transform_19(%arg0: i32) -> (i32, i32) {
    %c0_i32 = arith.constant 0 : i32
    %c0_i32_0 = arith.constant 0 : i32
    %c0_i32_1 = arith.constant 0 : i32
    return %c0_i32, %c0_i32_0 : i32, i32
  }
  func.func @transform_20(%arg0: i32) -> (i32, i32) {
    %c0_i32 = arith.constant 0 : i32
    %c0_i32_0 = arith.constant 0 : i32
    %c0_i32_1 = arith.constant 0 : i32
    return %c0_i32, %c0_i32_0 : i32, i32
  }
}

</mosaic_0001>

<bundles_post_ra>
// kernel: dqn_forward.1
= control target key start
LH: loop header
LB: loop body
LE: loop exit
PB: predicated region body
PF: predicated region fallthrough
CT: control target
= control target key end

     0   :  { %s14335_s0 = inlined_call_operand.vmem [shape: bf16[16,512], index: 0, kind: input, shape index: {}]   ;;  %s14336_s1 = inlined_call_operand.hbm [shape: bf16[512,1536], index: 1, kind: input, shape index: {}]   ;;  %s14337_s2 = inlined_call_operand.hbm [shape: bf16[512,1536], index: 2, kind: input, shape index: {}]   ;;  %s14338_s3 = inlined_call_operand.hbm [shape: f32[1,1536], index: 3, kind: input, shape index: {}]   ;;  %s14339_s4 = inlined_call_operand.hbm [shape: f32[1,512], index: 4, kind: input, shape index: {}]   ;;  %s14340_s5 = inlined_call_operand.hbm [shape: bf16[512,768], index: 5, kind: input, shape index: {}]   ;;  %s14341_s6 = inlined_call_operand.hbm [shape: bf16[256,768], index: 6, kind: input, shape index: {}]   ;;  %s14342_s7 = inlined_call_operand.hbm [shape: f32[1,768], index: 7, kind: input, shape index: {}]   ;;  %s14343_s8 = inlined_call_operand.hbm [shape: f32[1,256], index: 8, kind: input, shape index: {}]   ;;  %s14344_s9 = inlined_call_operand.hbm [shape: bf16[256,384], index: 9, kind: input, shape index: {}]   ;;  %s14345_s10 = inlined_call_operand.hbm [shape: bf16[128,384], index: 10, kind: input, shape index: {}]   ;;  %s14346_s11 = inlined_call_operand.hbm [shape: f32[1,384], index: 11, kind: input, shape index: {}]   ;;  %s14347_s12 = inlined_call_operand.hbm [shape: f32[1,128], index: 12, kind: input, shape index: {}]   ;;  %s14348_s13 = inlined_call_operand.vmem [shape: bf16[128,192], index: 13, kind: input, shape index: {}]   ;;  %s14349_s14 = inlined_call_operand.hbm [shape: bf16[64,192], index: 14, kind: input, shape index: {}]   ;;  %s14350_s15 = inlined_call_operand.hbm [shape: f32[1,192], index: 15, kind: input, shape index: {}]   ;;  %s14351_s16 = inlined_call_operand.hbm [shape: f32[1,64], index: 16, kind: input, shape index: {}]   ;;  %s14352_s17 = inlined_call_operand.hbm [shape: f32[64,128], index: 17, kind: input, shape index: {}]   ;;  %s14353_s18 = inlined_call_operand.hbm [shape: f32[64,128], index: 18, kind: input, shape index: {}]   ;;  %s14354_s19 = inlined_call_operand.hbm [shape: f32[1,128], index: 19, kind: input, shape index: {}]   ;;  %s14355_s20 = inlined_call_operand.vmem [shape: f32[8,128], index: 20, kind: output, shape index: {}]  }
   0x1   :  { %14366 = sst [smem:[#allocation41_spill]] %s14335_s0 }
   0x2   :  { %14367 = sst [smem:[#allocation42_spill]] %s14336_s1 }
   0x3   :  { %14368 = sst [smem:[#allocation43_spill]] %s14337_s2 }
   0x4   :  { %14369 = sst [smem:[#allocation44_spill]] %s14338_s3 }
   0x5   :  { %14370 = sst [smem:[#allocation45_spill]] %s14339_s4 }
   0x6   :  { %14371 = sst [smem:[#allocation46_spill]] %s14355_s20 }
   0x7   :  { %25 = vsyncpa [#allocation4], 0 }
   0x8   :  { %26 = vsyncpa [#allocation6], 0 }
   0x9   :  { %27 = vsyncpa [#allocation9], 0 }
   0xa   :  { %28 = vsyncpa [#allocation12], 0 }
   0xb   :  { %29 = vsyncpa [#allocation15], 0 }
   0xc   :  { %30 = vsyncpa [#allocation18], 0 }
   0xd   :  { %31 = vsyncpa [#allocation21], 0 }
   0xe   :  { %32 = vsyncpa [#allocation24], 0 }
   0xf   :  { %33 = vsyncpa [#allocation27], 0 }
  0x10   :  { %34 = vsyncpa [#allocation30], 0  ;;  %s13479_s1 = smov [#allocation5]   ;;  %s13480_s23 = smov [#allocation8]  }
  0x11   :  { %s54_s22 = sshll.u32 %s13479_s1, 4  ;;  %s77_s24 = sshll.u32 %s13480_s23, 4  ;;  %s55_s22 = int_to_ptr.vmem [resolvable:$true] %s54_s22  ;;  %s78_s24 = int_to_ptr.vmem [resolvable:$true] %s77_s24 }
  0x12   :  { %s14372_s3 = sld [smem:[#allocation43_spill]] }
  0x18   :  { %s13063_s26 = scalar_lea.hbm %s14372_s3, 49152 }
  0x19   :  { %p13064_p0 = scmp.ne.s32.totalorder %s14372_s3, %s13063_s26  ;;  %p13067_p1 = scmp.lt.u32.totalorder %s13063_s26, %s14372_s3 }
  0x1b   :  { %p13069_p2 = pnand %p13067_p1, %p13064_p0 }
  0x1d   :  { %13072 = shalt.err (!%p13069_p2)
}
  0x1e   :  { %s13073_s30 = scalar_lea.vmem %s55_s22, 49152  ;;  %p13078_p4 = scmp.lt.s32.totalorder %s55_s22, %s55_s22 }
  0x1f   :  { %p13074_p3 = scmp.ne.s32.totalorder %s55_s22, %s13073_s30  ;;  %p13079_p5 = scmp.lt.s32.totalorder %s13073_s30, %s13073_s30 }
  0x21   :  { %p13080_p6 = por %p13079_p5, %p13078_p4 }
  0x23   :  { %p13081_p7 = pnand %p13080_p6, %p13074_p3 }
  0x25   :  { %13084 = shalt.err (!%p13081_p7)
}
  0x26   :  { %s14361_s0 = smov 768   ;;  %s13482_s21 = smov 48  }
  0x27   :  { %60 = dma.hbm_to_vmem [thread:$0]  %s14372_s3, 49152, %s55_s22, [#allocation6], %s14361_s0, %s14361_s0, %s13482_s21  }
  0x28   :  { %s14373_s26 = sld [smem:[#allocation45_spill]] }
  0x2e   :  { %s13085_s27 = scalar_lea.hbm %s14373_s26, 64 }
  0x2f   :  { %p13086_p8 = scmp.ne.s32.totalorder %s14373_s26, %s13085_s27  ;;  %p13089_p9 = scmp.lt.u32.totalorder %s13085_s27, %s14373_s26 }
  0x31   :  { %p13091_p10 = pnand %p13089_p9, %p13086_p8 }
  0x33   :  { %13094 = shalt.err (!%p13091_p10)
}
  0x34   :  { %s13095_s20 = scalar_lea.vmem %s78_s24, 64  ;;  %p13100_p12 = scmp.lt.s32.totalorder %s78_s24, %s78_s24 }
  0x35   :  { %p13096_p11 = scmp.ne.s32.totalorder %s78_s24, %s13095_s20  ;;  %p13101_p13 = scmp.lt.s32.totalorder %s13095_s20, %s13095_s20 }
  0x37   :  { %p13102_p0 = por %p13101_p13, %p13100_p12 }
  0x39   :  { %p13103_p1 = pnand %p13102_p0, %p13096_p11 }
  0x3b   :  { %13106 = shalt.err (!%p13103_p1)
}
  0x3c   :  { %80 = dma.hbm_to_vmem [thread:$0]  %s14373_s26, 64, %s78_s24, [#allocation9]  }
  0x3d   :  { %s13483_s1 = smov [#allocation11]   ;;  %s13484_s2 = smov [#allocation14]  }
  0x3e   :  { %s98_s23 = sshll.u32 %s13483_s1, 4  ;;  %s121_s25 = sshll.u32 %s13484_s2, 4  ;;  %s99_s23 = int_to_ptr.vmem [resolvable:$true] %s98_s23  ;;  %s122_s25 = int_to_ptr.vmem [resolvable:$true] %s121_s25 }
  0x3f   :  { %s13107_s4 = scalar_lea.hbm %s14341_s6, 12288 }
  0x40   :  { %p13108_p2 = scmp.ne.s32.totalorder %s14341_s6, %s13107_s4  ;;  %p13111_p3 = scmp.lt.u32.totalorder %s13107_s4, %s14341_s6 }
  0x42   :  { %p13113_p4 = pnand %p13111_p3, %p13108_p2 }
  0x44   :  { %13116 = shalt.err (!%p13113_p4)
}
  0x45   :  { %s13117_s24 = scalar_lea.vmem %s99_s23, 12288  ;;  %p13122_p6 = scmp.lt.s32.totalorder %s99_s23, %s99_s23 }
  0x46   :  { %p13118_p5 = scmp.ne.s32.totalorder %s99_s23, %s13117_s24  ;;  %p13123_p7 = scmp.lt.s32.totalorder %s13117_s24, %s13117_s24 }
  0x48   :  { %p13124_p8 = por %p13123_p7, %p13122_p6 }
  0x4a   :  { %p13125_p9 = pnand %p13124_p8, %p13118_p5 }
  0x4c   :  { %13128 = shalt.err (!%p13125_p9)
}
  0x4d   :  { %s13485_s26 = smov 384   ;;  %s13486_s22 = smov 24  }
  0x4e   :  { %104 = dma.hbm_to_vmem [thread:$0]  %s14341_s6, 12288, %s99_s23, [#allocation12], %s13485_s26, %s13485_s26, %s13486_s22  }
  0x4f   :  { %s13129_s27 = scalar_lea.hbm %s14343_s8, 32 }
  0x50   :  { %p13130_p10 = scmp.ne.s32.totalorder %s14343_s8, %s13129_s27  ;;  %p13133_p11 = scmp.lt.u32.totalorder %s13129_s27, %s14343_s8 }
  0x52   :  { %p13135_p12 = pnand %p13133_p11, %p13130_p10 }
  0x54   :  { %13138 = shalt.err (!%p13135_p12)
}
  0x55   :  { %s13139_s20 = scalar_lea.vmem %s122_s25, 32  ;;  %p13144_p0 = scmp.lt.s32.totalorder %s122_s25, %s122_s25 }
  0x56   :  { %p13140_p13 = scmp.ne.s32.totalorder %s122_s25, %s13139_s20  ;;  %p13145_p1 = scmp.lt.s32.totalorder %s13139_s20, %s13139_s20 }
  0x58   :  { %p13146_p2 = por %p13145_p1, %p13144_p0 }
  0x5a   :  { %p13147_p3 = pnand %p13146_p2, %p13140_p13 }
  0x5c   :  { %13150 = shalt.err (!%p13147_p3)
}
  0x5d   :  { %124 = dma.hbm_to_vmem [thread:$0]  %s14343_s8, 32, %s122_s25, [#allocation15]  }
  0x5e   :  { %s13487_s24 = smov [#allocation17]   ;;  %s13488_s1 = smov [#allocation20]  }
  0x5f   :  { %s142_s3 = sshll.u32 %s13487_s24, 4  ;;  %s165_s0 = sshll.u32 %s13488_s1, 4  ;;  %s143_s3 = int_to_ptr.vmem [resolvable:$true] %s142_s3  ;;  %s13669_s0 = int_to_ptr.vmem [resolvable:$true] %s165_s0 }
  0x60   :  { %s13151_s28 = scalar_lea.hbm %s14345_s10, 3072 }
  0x61   :  { %p13152_p4 = scmp.ne.s32.totalorder %s14345_s10, %s13151_s28  ;;  %p13155_p5 = scmp.lt.u32.totalorder %s13151_s28, %s14345_s10 }
  0x63   :  { %p13157_p6 = pnand %p13155_p5, %p13152_p4 }
  0x65   :  { %13160 = shalt.err (!%p13157_p6)
}
  0x66   :  { %s13161_s8 = scalar_lea.vmem %s143_s3, 3072  ;;  %p13166_p8 = scmp.lt.s32.totalorder %s143_s3, %s143_s3 }
  0x67   :  { %p13162_p7 = scmp.ne.s32.totalorder %s143_s3, %s13161_s8  ;;  %p13167_p9 = scmp.lt.s32.totalorder %s13161_s8, %s13161_s8 }
  0x69   :  { %p13168_p10 = por %p13167_p9, %p13166_p8 }
  0x6b   :  { %p13169_p11 = pnand %p13168_p10, %p13162_p7 }
  0x6d   :  { %13172 = shalt.err (!%p13169_p11)
}
  0x6e   :  { %s13489_s25 = smov 192   ;;  %s13490_s6 = smov 12  }
  0x6f   :  { %148 = dma.hbm_to_vmem [thread:$0]  %s14345_s10, 3072, %s143_s3, [#allocation18], %s13489_s25, %s13489_s25, %s13490_s6  }
  0x70   :  { %s13173_s27 = scalar_lea.hbm %s14347_s12, 16 }
  0x71   :  { %p13174_p12 = scmp.ne.s32.totalorder %s14347_s12, %s13173_s27  ;;  %p13177_p13 = scmp.lt.u32.totalorder %s13173_s27, %s14347_s12 }
  0x73   :  { %p13179_p0 = pnand %p13177_p13, %p13174_p12 }
  0x75   :  { %13182 = shalt.err (!%p13179_p0)
}
  0x76   :  { %s13183_s20 = scalar_lea.vmem %s13669_s0, 16  ;;  %s13187_s10 = scalar_lea.vmem %s13669_s0, 32 }
  0x77   :  { %p13184_p1 = scmp.ne.s32.totalorder %s13669_s0, %s13183_s20  ;;  %p13188_p2 = scmp.lt.s32.totalorder %s13669_s0, %s13669_s0 }
  0x78   :  { %p13189_p3 = scmp.lt.s32.totalorder %s13187_s10, %s13183_s20 }
  0x7a   :  { %p13190_p4 = por %p13189_p3, %p13188_p2 }
  0x7c   :  { %p13191_p5 = pnand %p13190_p4, %p13184_p1 }
  0x7e   :  { %13194 = shalt.err (!%p13191_p5)
}
  0x7f   :  { %168 = dma.hbm_to_vmem [thread:$0]  %s14347_s12, 16, %s13669_s0, [#allocation21]  }
  0x80   :  { %s13491_s23 = smov [#allocation23]   ;;  %s13195_s27 = scalar_lea.hbm %s14350_s15, 32 }
  0x81   :  { %s189_s24 = sshll.u32 %s13491_s23, 4  ;;  %p13196_p6 = scmp.ne.s32.totalorder %s14350_s15, %s13195_s27  ;;  %s190_s24 = int_to_ptr.vmem [resolvable:$true] %s189_s24 }
  0x82   :  { %p13199_p7 = scmp.lt.u32.totalorder %s13195_s27, %s14350_s15 }
  0x84   :  { %p13201_p8 = pnand %p13199_p7, %p13196_p6 }
  0x86   :  { %13204 = shalt.err (!%p13201_p8)
}
  0x87   :  { %s13205_s20 = scalar_lea.vmem %s190_s24, 32  ;;  %p13210_p10 = scmp.lt.s32.totalorder %s190_s24, %s190_s24 }
  0x88   :  { %p13206_p9 = scmp.ne.s32.totalorder %s190_s24, %s13205_s20  ;;  %p13211_p11 = scmp.lt.s32.totalorder %s13205_s20, %s13205_s20 }
  0x8a   :  { %p13212_p12 = por %p13211_p11, %p13210_p10 }
  0x8c   :  { %p13213_p13 = pnand %p13212_p12, %p13206_p9 }
  0x8e   :  { %13216 = shalt.err (!%p13213_p13)
}
  0x8f   :  { %192 = dma.hbm_to_vmem [thread:$0]  %s14350_s15, 32, %s190_s24, [#allocation24]  }
  0x90   :  { %s13492_s10 = smov [#allocation26]   ;;  %s13493_s8 = smov [#allocation3]  }
  0x91   :  { %s208_s3 = sshll.u32 %s13492_s10, 4  ;;  %s42_s23 = sshll.u32 %s13493_s8, 4  ;;  %s209_s3 = int_to_ptr.vmem [resolvable:$true] %s208_s3  ;;  %s43_s23 = int_to_ptr.vmem [resolvable:$true] %s42_s23 }
  0x92   :  { %s13217_s27 = scalar_lea.hbm %s14352_s17, 1024 }
  0x93   :  { %p13218_p0 = scmp.ne.s32.totalorder %s14352_s17, %s13217_s27  ;;  %p13221_p1 = scmp.lt.u32.totalorder %s13217_s27, %s14352_s17 }
  0x95   :  { %p13223_p2 = pnand %p13221_p1, %p13218_p0 }
  0x97   :  { %13226 = shalt.err (!%p13223_p2)
}
  0x98   :  { %s13227_s15 = scalar_lea.vmem %s209_s3, 1024  ;;  %p13232_p4 = scmp.lt.s32.totalorder %s209_s3, %s209_s3 }
  0x99   :  { %p13228_p3 = scmp.ne.s32.totalorder %s209_s3, %s13227_s15  ;;  %p13233_p5 = scmp.lt.s32.totalorder %s13227_s15, %s13227_s15 }
  0x9b   :  { %p13234_p6 = por %p13233_p5, %p13232_p4 }
  0x9d   :  { %p13235_p7 = pnand %p13234_p6, %p13228_p3 }
  0x9f   :  { %13238 = shalt.err (!%p13235_p7)
}
  0xa0   :  { %s14362_s24 = smov 128   ;;  %s14364_s20 = smov 8  }
  0xa1   :  { %214 = dma.hbm_to_vmem [thread:$0]  %s14352_s17, 1024, %s209_s3, [#allocation27], %s14362_s24, %s14362_s24, %s14364_s20  }
  0xa2   :  { %s14374_s1 = sld [smem:[#allocation42_spill]] }
  0xa8   :  { %s13239_s2 = scalar_lea.hbm %s14374_s1, 49152 }
  0xa9   :  { %p13240_p8 = scmp.ne.s32.totalorder %s14374_s1, %s13239_s2  ;;  %p13243_p9 = scmp.lt.u32.totalorder %s13239_s2, %s14374_s1 }
  0xab   :  { %p13245_p10 = pnand %p13243_p9, %p13240_p8 }
  0xad   :  { %13248 = shalt.err (!%p13245_p10)
}
  0xae   :  { %s13249_s30 = scalar_lea.vmem %s43_s23, 49152  ;;  %p13254_p12 = scmp.lt.s32.totalorder %s43_s23, %s43_s23 }
  0xaf   :  { %p13250_p11 = scmp.ne.s32.totalorder %s43_s23, %s13249_s30  ;;  %p13255_p13 = scmp.lt.s32.totalorder %s13249_s30, %s13249_s30 }
  0xb1   :  { %p13256_p0 = por %p13255_p13, %p13254_p12 }
  0xb3   :  { %p13257_p1 = pnand %p13256_p0, %p13250_p11 }
  0xb5   :  { %13260 = shalt.err (!%p13257_p1)
}
  0xb6   :  { %s14375_s17 = smov 768   ;;  %s13496_s12 = smov [#allocation7]  }
  0xb7   :  { %48 = dma.hbm_to_vmem [thread:$0]  %s14374_s1, 49152, %s43_s23, [#allocation4], %s14375_s17, %s14375_s17, %s13482_s21  }
  0xb8   :  { %s67_s0 = sshll.u32 %s13496_s12, 4  ;;  %s13497_s10 = smov [#allocation10]   ;;  %s68_s0 = int_to_ptr.vmem [resolvable:$true] %s67_s0 }
  0xb9   :  { %s86_s8 = sshll.u32 %s13497_s10, 4  ;;  %s14376_s28 = sld [smem:[#allocation44_spill]]  ;;  %s87_s8 = int_to_ptr.vmem [resolvable:$true] %s86_s8 }
  0xbf   :  { %s13261_s4 = scalar_lea.hbm %s14376_s28, 192 }
  0xc0   :  { %p13262_p2 = scmp.ne.s32.totalorder %s14376_s28, %s13261_s4  ;;  %p13265_p3 = scmp.lt.u32.totalorder %s13261_s4, %s14376_s28 }
  0xc2   :  { %p13267_p4 = pnand %p13265_p3, %p13262_p2 }
  0xc4   :  { %13270 = shalt.err (!%p13267_p4)
}
  0xc5   :  { %s13271_s21 = scalar_lea.vmem %s68_s0, 192  ;;  %p13276_p6 = scmp.lt.s32.totalorder %s68_s0, %s68_s0 }
  0xc6   :  { %p13272_p5 = scmp.ne.s32.totalorder %s68_s0, %s13271_s21  ;;  %p13277_p7 = scmp.lt.s32.totalorder %s13271_s21, %s13271_s21 }
  0xc8   :  { %p13278_p8 = por %p13277_p7, %p13276_p6 }
  0xca   :  { %p13279_p9 = pnand %p13278_p8, %p13272_p5 }
  0xcc   :  { %13282 = shalt.err (!%p13279_p9)
}
  0xcd   :  { %70 = dma.hbm_to_vmem [thread:$0]  %s14376_s28, 192, %s68_s0, [#allocation6]  }
  0xce   :  { %s13283_s15 = scalar_lea.hbm %s14340_s5, 24576 }
  0xcf   :  { %p13284_p10 = scmp.ne.s32.totalorder %s14340_s5, %s13283_s15  ;;  %p13287_p11 = scmp.lt.u32.totalorder %s13283_s15, %s14340_s5 }
  0xd1   :  { %p13289_p12 = pnand %p13287_p11, %p13284_p10 }
  0xd3   :  { %13292 = shalt.err (!%p13289_p12)
}
  0xd4   :  { %s13293_s2 = scalar_lea.vmem %s87_s8, 24576  ;;  %p13298_p0 = scmp.lt.s32.totalorder %s87_s8, %s87_s8 }
  0xd5   :  { %p13294_p13 = scmp.ne.s32.totalorder %s87_s8, %s13293_s2  ;;  %p13299_p1 = scmp.lt.s32.totalorder %s13293_s2, %s13293_s2 }
  0xd7   :  { %p13300_p2 = por %p13299_p1, %p13298_p0 }
  0xd9   :  { %p13301_p3 = pnand %p13300_p2, %p13294_p13 }
  0xdb   :  { %13304 = shalt.err (!%p13301_p3)
}
  0xdc   :  { %92 = dma.hbm_to_vmem [thread:$0]  %s14340_s5, 24576, %s87_s8, [#allocation9], %s13485_s26, %s13485_s26, %s13486_s22  }
  0xdd   :  { %s13498_s28 = smov [#allocation13]   ;;  %s13499_s29 = smov [#allocation16]  }
  0xde   :  { %s111_s4 = sshll.u32 %s13498_s28, 4  ;;  %s130_s30 = sshll.u32 %s13499_s29, 4  ;;  %s112_s4 = int_to_ptr.vmem [resolvable:$true] %s111_s4  ;;  %s131_s30 = int_to_ptr.vmem [resolvable:$true] %s130_s30 }
  0xdf   :  { %s13305_s1 = scalar_lea.hbm %s14342_s7, 96 }
  0xe0   :  { %p13306_p4 = scmp.ne.s32.totalorder %s14342_s7, %s13305_s1  ;;  %p13309_p5 = scmp.lt.u32.totalorder %s13305_s1, %s14342_s7 }
  0xe2   :  { %p13311_p6 = pnand %p13309_p5, %p13306_p4 }
  0xe4   :  { %13314 = shalt.err (!%p13311_p6)
}
  0xe5   :  { %s13315_s5 = scalar_lea.vmem %s112_s4, 96  ;;  %p13320_p8 = scmp.lt.s32.totalorder %s112_s4, %s112_s4 }
  0xe6   :  { %p13316_p7 = scmp.ne.s32.totalorder %s112_s4, %s13315_s5  ;;  %p13321_p9 = scmp.lt.s32.totalorder %s13315_s5, %s13315_s5 }
  0xe8   :  { %p13322_p10 = por %p13321_p9, %p13320_p8 }
  0xea   :  { %p13323_p11 = pnand %p13322_p10, %p13316_p7 }
  0xec   :  { %13326 = shalt.err (!%p13323_p11)
}
  0xed   :  { %114 = dma.hbm_to_vmem [thread:$0]  %s14342_s7, 96, %s112_s4, [#allocation12]  }
  0xee   :  { %s13327_s12 = scalar_lea.hbm %s14344_s9, 6144 }
  0xef   :  { %p13328_p12 = scmp.ne.s32.totalorder %s14344_s9, %s13327_s12  ;;  %p13331_p13 = scmp.lt.u32.totalorder %s13327_s12, %s14344_s9 }
  0xf1   :  { %p13333_p0 = pnand %p13331_p13, %p13328_p12 }
  0xf3   :  { %13336 = shalt.err (!%p13333_p0)
}
  0xf4   :  { %s13337_s28 = scalar_lea.vmem %s131_s30, 6144  ;;  %p13342_p2 = scmp.lt.s32.totalorder %s131_s30, %s131_s30 }
  0xf5   :  { %p13338_p1 = scmp.ne.s32.totalorder %s131_s30, %s13337_s28  ;;  %p13343_p3 = scmp.lt.s32.totalorder %s13337_s28, %s13337_s28 }
  0xf7   :  { %p13344_p4 = por %p13343_p3, %p13342_p2 }
  0xf9   :  { %p13345_p5 = pnand %p13344_p4, %p13338_p1 }
  0xfb   :  { %13348 = shalt.err (!%p13345_p5)
}
  0xfc   :  { %136 = dma.hbm_to_vmem [thread:$0]  %s14344_s9, 6144, %s131_s30, [#allocation15], %s13489_s25, %s13489_s25, %s13490_s6  }
  0xfd   :  { %s13500_s29 = smov [#allocation19]   ;;  %s13501_s23 = smov [#allocation22]  }
  0xfe   :  { %s155_s21 = sshll.u32 %s13500_s29, 4  ;;  %s176_s1 = sshll.u32 %s13501_s23, 4  ;;  %s156_s21 = int_to_ptr.vmem [resolvable:$true] %s155_s21  ;;  %s177_s1 = int_to_ptr.vmem [resolvable:$true] %s176_s1 }
  0xff   :  { %s13349_s15 = scalar_lea.hbm %s14346_s11, 48 }
 0x100   :  { %p13350_p6 = scmp.ne.s32.totalorder %s14346_s11, %s13349_s15  ;;  %p13353_p7 = scmp.lt.u32.totalorder %s13349_s15, %s14346_s11 }
 0x102   :  { %p13355_p8 = pnand %p13353_p7, %p13350_p6 }
 0x104   :  { %13358 = shalt.err (!%p13355_p8)
}
 0x105   :  { %s13359_s9 = scalar_lea.vmem %s156_s21, 48  ;;  %s13363_s25 = scalar_lea.vmem %s156_s21, 64 }
 0x106   :  { %p13360_p9 = scmp.ne.s32.totalorder %s156_s21, %s13359_s9  ;;  %p13364_p10 = scmp.lt.s32.totalorder %s156_s21, %s156_s21 }
 0x107   :  { %p13365_p11 = scmp.lt.s32.totalorder %s13363_s25, %s13359_s9 }
 0x109   :  { %p13366_p12 = por %p13365_p11, %p13364_p10 }
 0x10b   :  { %p13367_p13 = pnand %p13366_p12, %p13360_p9 }
 0x10d   :  { %13370 = shalt.err (!%p13367_p13)
}
 0x10e   :  { %158 = dma.hbm_to_vmem [thread:$0]  %s14346_s11, 48, %s156_s21, [#allocation18]  }
 0x10f   :  { %s13371_s12 = scalar_lea.hbm %s14349_s14, 1024 }
 0x110   :  { %p13372_p0 = scmp.ne.s32.totalorder %s14349_s14, %s13371_s12  ;;  %p13375_p1 = scmp.lt.u32.totalorder %s13371_s12, %s14349_s14 }
 0x112   :  { %p13377_p2 = pnand %p13375_p1, %p13372_p0 }
 0x114   :  { %13380 = shalt.err (!%p13377_p2)
}
 0x115   :  { %s13381_s28 = scalar_lea.vmem %s177_s1, 1024  ;;  %p13386_p4 = scmp.lt.s32.totalorder %s177_s1, %s177_s1 }
 0x116   :  { %p13382_p3 = scmp.ne.s32.totalorder %s177_s1, %s13381_s28  ;;  %p13387_p5 = scmp.lt.s32.totalorder %s13381_s28, %s13381_s28 }
 0x118   :  { %p13388_p6 = por %p13387_p5, %p13386_p4 }
 0x11a   :  { %p13389_p7 = pnand %p13388_p6, %p13382_p3 }
 0x11c   :  { %13392 = shalt.err (!%p13389_p7)
}
 0x11d   :  { %s14377_s11 = smov 8   ;;  %s14378_s7 = smov 128  }
 0x11e   :  { %182 = dma.hbm_to_vmem [thread:$0]  %s14349_s14, 1024, %s177_s1, [#allocation21], %s14378_s7, %s14378_s7, %s14377_s11  }
 0x11f   :  { %s13502_s21 = smov [#allocation25]   ;;  %s13503_s17 = smov [#allocation28]  }
 0x120   :  { %s199_s23 = sshll.u32 %s13502_s21, 4  ;;  %s220_s3 = sshll.u32 %s13503_s17, 4  ;;  %s200_s23 = int_to_ptr.vmem [resolvable:$true] %s199_s23  ;;  %s221_s3 = int_to_ptr.vmem [resolvable:$true] %s220_s3 }
 0x121   :  { %s13393_s5 = scalar_lea.hbm %s14351_s16, 16 }
 0x122   :  { %p13394_p8 = scmp.ne.s32.totalorder %s14351_s16, %s13393_s5  ;;  %p13397_p9 = scmp.lt.u32.totalorder %s13393_s5, %s14351_s16 }
 0x124   :  { %p13399_p10 = pnand %p13397_p9, %p13394_p8 }
 0x126   :  { %13402 = shalt.err (!%p13399_p10)
}
 0x127   :  { %s13403_s14 = scalar_lea.vmem %s200_s23, 16  ;;  %s13407_s1 = scalar_lea.vmem %s200_s23, 32 }
 0x128   :  { %p13404_p11 = scmp.ne.s32.totalorder %s200_s23, %s13403_s14  ;;  %p13408_p12 = scmp.lt.s32.totalorder %s200_s23, %s200_s23 }
 0x129   :  { %p13409_p13 = scmp.lt.s32.totalorder %s13407_s1, %s13403_s14 }
 0x12b   :  { %p13410_p0 = por %p13409_p13, %p13408_p12 }
 0x12d   :  { %p13411_p1 = pnand %p13410_p0, %p13404_p11 }
 0x12f   :  { %13414 = shalt.err (!%p13411_p1)
}
 0x130   :  { %202 = dma.hbm_to_vmem [thread:$0]  %s14351_s16, 16, %s200_s23, [#allocation24]  }
 0x131   :  { %s13415_s12 = scalar_lea.hbm %s14353_s18, 1024 }
 0x132   :  { %p13416_p2 = scmp.ne.s32.totalorder %s14353_s18, %s13415_s12  ;;  %p13419_p3 = scmp.lt.u32.totalorder %s13415_s12, %s14353_s18 }
 0x134   :  { %p13421_p4 = pnand %p13419_p3, %p13416_p2 }
 0x136   :  { %13424 = shalt.err (!%p13421_p4)
}
 0x137   :  { %s13425_s28 = scalar_lea.vmem %s221_s3, 1024  ;;  %p13430_p6 = scmp.lt.s32.totalorder %s221_s3, %s221_s3 }
 0x138   :  { %p13426_p5 = scmp.ne.s32.totalorder %s221_s3, %s13425_s28  ;;  %p13431_p7 = scmp.lt.s32.totalorder %s13425_s28, %s13425_s28 }
 0x13a   :  { %p13432_p8 = por %p13431_p7, %p13430_p6 }
 0x13c   :  { %p13433_p9 = pnand %p13432_p8, %p13426_p5 }
 0x13e   :  { %13436 = shalt.err (!%p13433_p9)
}
 0x13f   :  { %226 = dma.hbm_to_vmem [thread:$0]  %s14353_s18, 1024, %s221_s3, [#allocation27], %s14378_s7, %s14378_s7, %s14377_s11  }
 0x140   :  { %s13504_s29 = smov [#allocation29]   ;;  %s13437_s15 = scalar_lea.hbm %s14354_s19, 16 }
 0x141   :  { %s233_s21 = sshll.u32 %s13504_s29, 4  ;;  %p13438_p10 = scmp.ne.s32.totalorder %s14354_s19, %s13437_s15  ;;  %s234_s21 = int_to_ptr.vmem [resolvable:$true] %s233_s21 }
 0x142   :  { %p13441_p11 = scmp.lt.u32.totalorder %s13437_s15, %s14354_s19 }
 0x144   :  { %p13443_p12 = pnand %p13441_p11, %p13438_p10 }
 0x146   :  { %13446 = shalt.err (!%p13443_p12)
}
 0x147   :  { %s13447_s9 = scalar_lea.vmem %s234_s21, 16  ;;  %s13451_s18 = scalar_lea.vmem %s234_s21, 32 }
 0x148   :  { %p13448_p13 = scmp.ne.s32.totalorder %s234_s21, %s13447_s9  ;;  %p13452_p0 = scmp.lt.s32.totalorder %s234_s21, %s234_s21 }
 0x149   :  { %p13453_p1 = scmp.lt.s32.totalorder %s13451_s18, %s13447_s9 }
 0x14b   :  { %p13454_p2 = por %p13453_p1, %p13452_p0 }
 0x14d   :  { %p13455_p3 = pnand %p13454_p2, %p13448_p13 }
 0x14f   :  { %13458 = shalt.err (!%p13455_p3)
}
 0x150   :  { %236 = dma.hbm_to_vmem [thread:$0]  %s14354_s19, 16, %s234_s21, [#allocation30]  }
 0x151   :  { %13459 = dma.done.wait [#allocation4], 49152  }
 0x152   :  { %13460 = vsyncadd [#allocation4], 4294918144 }
 0x153   :  { %13461 = dma.done.wait [#allocation6], 49344  }
 0x154   :  { %13462 = vsyncadd [#allocation6], 4294917952 }
 0x155   :  { %13463 = dma.done.wait [#allocation9], 24640  }
 0x156   :  { %13464 = vsyncadd [#allocation9], 4294942656 }
 0x157   :  { %13465 = dma.done.wait [#allocation12], 12384  }
 0x158   :  { %13466 = vsyncadd [#allocation12], 4294954912 }
 0x159   :  { %13467 = dma.done.wait [#allocation15], 6176  }
 0x15a   :  { %13468 = vsyncadd [#allocation15], 4294961120 }
 0x15b   :  { %13469 = dma.done.wait [#allocation18], 3120  }
 0x15c   :  { %13470 = vsyncadd [#allocation18], 4294964176 }
 0x15d   :  { %13471 = dma.done.wait [#allocation21], 1040  }
 0x15e   :  { %13472 = vsyncadd [#allocation21], 4294966256 }
 0x15f   :  { %13473 = dma.done.wait [#allocation24], 48  }
 0x160   :  { %13474 = vsyncadd [#allocation24], 4294967248 }
 0x161   :  { %13475 = dma.done.wait [#allocation27], 2048  }
 0x162   :  { %13476 = vsyncadd [#allocation27], 4294965248 }
 0x163   :  { %13477 = dma.done.wait [#allocation30], 16  }
 0x164   :  { %13478 = vsyncadd [#allocation30], 4294967280  ;;  %v11184_v0 = vld [vmem:[#allocation3 + $0x4] ss:$48 sps:$4 sm:$0xff]   ;;  %v11186_v1 = vld [vmem:[#allocation3 + $0xc] ss:$48 sps:$4 sm:$0xff]  }
 0x165   :  { %2672 = vmatprep.subr.bf16.mxu0 %v11184_v0  ;;  %v11188_v2 = vld [vmem:[#allocation3] ss:$48 sps:$4 sm:$0xff]   ;;  %v11189_v3 = vld [vmem:[#allocation3 + $0x8] ss:$48 sps:$4 sm:$0xff]   ;;  %2758 = vmatprep.subr.bf16.mxu1 %v11186_v1  ;;  %v11190_v4 = vld [vmem:[#allocation3 + $0x64] ss:$48 sps:$4 sm:$0xff]  }
 0x166   :  { %2673 = vmatpush1.bf16.msra.mxu0 %v11188_v2  ;;  %2759 = vmatpush1.bf16.msra.mxu1 %v11189_v3  ;;  %v11192_v5 = vld [vmem:[#allocation3 + $0x6c] ss:$48 sps:$4 sm:$0xff]   ;;  %v11194_v6 = vld [vmem:[#allocation3 + $0x60] ss:$48 sps:$4 sm:$0xff]   ;;  %v11195_v7 = vld [vmem:[#allocation3 + $0x68] ss:$48 sps:$4 sm:$0xff]  }
 0x167   :  { %2674 = vmatprep.subr.bf16.mxu0 %v11190_v4  ;;  %2760 = vmatprep.subr.bf16.mxu1 %v11192_v5  ;;  %v11196_v8 = vld [vmem:[#allocation3 + $0xc4] ss:$48 sps:$4 sm:$0xff]   ;;  %v11198_v9 = vld [vmem:[#allocation3 + $0xcc] ss:$48 sps:$4 sm:$0xff]   ;;  %v11200_v10 = vld [vmem:[#allocation3 + $0xc0] ss:$48 sps:$4 sm:$0xff]  }
 0x168   :  { %v11201_v11 = vld [vmem:[#allocation3 + $0xc8] ss:$48 sps:$4 sm:$0xff]   ;;  %v11202_v12 = vld [vmem:[#allocation3 + $0x124] ss:$48 sps:$4 sm:$0xff]   ;;  %v11204_v13 = vld [vmem:[#allocation3 + $0x12c] ss:$48 sps:$4 sm:$0xff]  }
 0x169   :  { %v11206_v14 = vld [vmem:[#allocation3 + $0x120] ss:$48 sps:$4 sm:$0xff]   ;;  %v11207_v15 = vld [vmem:[#allocation3 + $0x128] ss:$48 sps:$4 sm:$0xff]   ;;  %v11208_v16 = vld [vmem:[#allocation3 + $0x184] ss:$48 sps:$4 sm:$0xff]  }
 0x16a   :  { %2675 = vmatpush1.bf16.msra.mxu0 %v11194_v6  ;;  %2761 = vmatpush1.bf16.msra.mxu1 %v11195_v7  ;;  %v11210_v17 = vld [vmem:[#allocation3 + $0x18c] ss:$48 sps:$4 sm:$0xff]   ;;  %v11212_v18 = vld [vmem:[#allocation3 + $0x180] ss:$48 sps:$4 sm:$0xff]   ;;  %v11213_v19 = vld [vmem:[#allocation3 + $0x188] ss:$48 sps:$4 sm:$0xff]  }
 0x16b   :  { %2676 = vmatprep.subr.bf16.mxu0 %v11196_v8  ;;  %2762 = vmatprep.subr.bf16.mxu1 %v11198_v9  ;;  %v11214_v20 = vld [vmem:[#allocation3 + $0x1e4] ss:$48 sps:$4 sm:$0xff]   ;;  %v11216_v21 = vld [vmem:[#allocation3 + $0x1ec] ss:$48 sps:$4 sm:$0xff]   ;;  %v11218_v22 = vld [vmem:[#allocation3 + $0x1e0] ss:$48 sps:$4 sm:$0xff]  }
 0x16c   :  { %v11219_v23 = vld [vmem:[#allocation3 + $0x1e8] ss:$48 sps:$4 sm:$0xff]   ;;  %v11220_v24 = vld [vmem:[#allocation3 + $0x244] ss:$48 sps:$4 sm:$0xff]   ;;  %v11222_v25 = vld [vmem:[#allocation3 + $0x24c] ss:$48 sps:$4 sm:$0xff]  }
 0x16d   :  { %v11224_v26 = vld [vmem:[#allocation3 + $0x240] ss:$48 sps:$4 sm:$0xff]   ;;  %v11225_v27 = vld [vmem:[#allocation3 + $0x248] ss:$48 sps:$4 sm:$0xff]   ;;  %v11226_v28 = vld [vmem:[#allocation3 + $0x2a4] ss:$48 sps:$4 sm:$0xff]  }
 0x16e   :  { %2677 = vmatpush1.bf16.msra.mxu0 %v11200_v10  ;;  %2763 = vmatpush1.bf16.msra.mxu1 %v11201_v11  ;;  %v11228_v29 = vld [vmem:[#allocation3 + $0x2ac] ss:$48 sps:$4 sm:$0xff]   ;;  %v11230_v30 = vld [vmem:[#allocation3 + $0x2a0] ss:$48 sps:$4 sm:$0xff]   ;;  %v11231_v31 = vld [vmem:[#allocation3 + $0x2a8] ss:$48 sps:$4 sm:$0xff]  }
 0x16f   :  { %2678 = vmatprep.subr.bf16.mxu0 %v11202_v12  ;;  %2764 = vmatprep.subr.bf16.mxu1 %v11204_v13  ;;  %v11232_v32 = vld [vmem:[#allocation3 + $0x304] ss:$48 sps:$4 sm:$0xff]   ;;  %v11234_v33 = vld [vmem:[#allocation3 + $0x30c] ss:$48 sps:$4 sm:$0xff]   ;;  %v11236_v34 = vld [vmem:[#allocation3 + $0x300] ss:$48 sps:$4 sm:$0xff]  }
 0x170   :  { %v11237_v35 = vld [vmem:[#allocation3 + $0x308] ss:$48 sps:$4 sm:$0xff]   ;;  %v11238_v36 = vld [vmem:[#allocation3 + $0x364] ss:$48 sps:$4 sm:$0xff]   ;;  %v11240_v37 = vld [vmem:[#allocation3 + $0x36c] ss:$48 sps:$4 sm:$0xff]  }
 0x171   :  { %v11242_v38 = vld [vmem:[#allocation3 + $0x360] ss:$48 sps:$4 sm:$0xff]   ;;  %v11243_v39 = vld [vmem:[#allocation3 + $0x368] ss:$48 sps:$4 sm:$0xff]   ;;  %v11244_v40 = vld [vmem:[#allocation3 + $0x3c4] ss:$48 sps:$4 sm:$0xff]  }
 0x172   :  { %2679 = vmatpush1.bf16.msra.mxu0 %v11206_v14  ;;  %2765 = vmatpush1.bf16.msra.mxu1 %v11207_v15  ;;  %v11246_v41 = vld [vmem:[#allocation3 + $0x3cc] ss:$48 sps:$4 sm:$0xff]   ;;  %v11248_v42 = vld [vmem:[#allocation3 + $0x3c0] ss:$48 sps:$4 sm:$0xff]   ;;  %v11249_v43 = vld [vmem:[#allocation3 + $0x3c8] ss:$48 sps:$4 sm:$0xff]  }
 0x173   :  { %2680 = vmatprep.subr.bf16.mxu0 %v11208_v16  ;;  %2766 = vmatprep.subr.bf16.mxu1 %v11210_v17  ;;  %v11250_v44 = vld [vmem:[#allocation3 + $0x424] ss:$48 sps:$4 sm:$0xff]   ;;  %v11252_v45 = vld [vmem:[#allocation3 + $0x42c] ss:$48 sps:$4 sm:$0xff]   ;;  %v11254_v46 = vld [vmem:[#allocation3 + $0x420] ss:$48 sps:$4 sm:$0xff]  }
 0x174   :  { %s14379_s25 = sld [smem:[#allocation41_spill]]  ;;  %v11255_v48 = vld [vmem:[#allocation3 + $0x428] ss:$48 sps:$4 sm:$0xff]   ;;  %v11256_v49 = vld [vmem:[#allocation3 + $0x484] ss:$48 sps:$4 sm:$0xff]   ;;  %vm13507_vm0 = vmmov 0  }
 0x175   :  { %v11258_v50 = vld [vmem:[#allocation3 + $0x48c] ss:$48 sps:$4 sm:$0xff]   ;;  %v11260_v51 = vld [vmem:[#allocation3 + $0x480] ss:$48 sps:$4 sm:$0xff]   ;;  %v11261_v52 = vld [vmem:[#allocation3 + $0x488] ss:$48 sps:$4 sm:$0xff]  }
 0x176   :  { %2681 = vmatpush1.bf16.msra.mxu0 %v11212_v18  ;;  %2767 = vmatpush1.bf16.msra.mxu1 %v11213_v19  ;;  %v11262_v53 = vld [vmem:[#allocation3 + $0x4e4] ss:$48 sps:$4 sm:$0xff]   ;;  %v11264_v54 = vld [vmem:[#allocation3 + $0x4ec] ss:$48 sps:$4 sm:$0xff]   ;;  %v11266_v55 = vld [vmem:[#allocation3 + $0x4e0] ss:$48 sps:$4 sm:$0xff]  }
 0x177   :  { %2682 = vmatprep.subr.bf16.mxu0 %v11214_v20  ;;  %2768 = vmatprep.subr.bf16.mxu1 %v11216_v21  ;;  %v11267_v56 = vld [vmem:[#allocation3 + $0x4e8] ss:$48 sps:$4 sm:$0xff]   ;;  %v11268_v57 = vld [vmem:[#allocation3 + $0x544] ss:$48 sps:$4 sm:$0xff]   ;;  %v11270_v58 = vld [vmem:[#allocation3 + $0x54c] ss:$48 sps:$4 sm:$0xff]  }
 0x178   :  { %v11272_v59 = vld [vmem:[#allocation3 + $0x540] ss:$48 sps:$4 sm:$0xff]   ;;  %v11273_v60 = vld [vmem:[#allocation3 + $0x548] ss:$48 sps:$4 sm:$0xff]   ;;  %v11274_v61 = vld [vmem:[#allocation3 + $0x5a4] ss:$48 sps:$4 sm:$0xff]  }
 0x179   :  { %v11276_v62 = vld [vmem:[#allocation3 + $0x5ac] ss:$48 sps:$4 sm:$0xff]   ;;  %v11278_v63 = vld [vmem:[#allocation3 + $0x5a0] ss:$48 sps:$4 sm:$0xff]   ;;  %v11279_v0 = vld [vmem:[#allocation3 + $0x5a8] ss:$48 sps:$4 sm:$0xff]  }
 0x17a   :  { %2683 = vmatpush1.bf16.msra.mxu0 %v11218_v22  ;;  %2769 = vmatpush1.bf16.msra.mxu1 %v11219_v23  ;;  %v13869_v47 = vld [vmem:[%s14379_s25 + $0x4] ss:$16 sps:$4 sm:$0xff]   ;;  %v11287_v2 = vld [vmem:[#allocation3 + $0x60c] ss:$48 sps:$4 sm:$0xff]   ;;  %v11282_v3 = vld [vmem:[#allocation3 + $0x600] ss:$48 sps:$4 sm:$0xff]  }
 0x17b   :  { %2684 = vmatprep.subr.bf16.mxu0 %v11220_v24  ;;  %2770 = vmatprep.subr.bf16.mxu1 %v11222_v25  ;;  %v11284_v1 = vld [vmem:[#allocation3 + $0x604] ss:$48 sps:$4 sm:$0xff]   ;;  %v11285_v4 = vld [vmem:[#allocation3 + $0x608] ss:$48 sps:$4 sm:$0xff]   ;;  %v13876_v5 = vld [vmem:[%s14379_s25] ss:$16 sps:$4 sm:$0xff]  }
 0x17c   :  { %2704 = vmatprep.mubr.bf16.mxu0 %v13869_v47  ;;  %2790 = vmatprep.mubr.bf16.mxu1 %v13869_v47  ;;  %v11291_v6 = vld [vmem:[#allocation3 + $0x664] ss:$48 sps:$4 sm:$0xff]   ;;  %v11294_v7 = vld [vmem:[#allocation3 + $0x66c] ss:$48 sps:$4 sm:$0xff]   ;;  %v11289_v8 = vld [vmem:[#allocation3 + $0x660] ss:$48 sps:$4 sm:$0xff]  }
 0x17d   :  { %v11292_v9 = vld [vmem:[#allocation3 + $0x668] ss:$48 sps:$4 sm:$0xff]   ;;  %v11297_v10 = vld [vmem:[#allocation3 + $0x6c4] ss:$48 sps:$4 sm:$0xff]   ;;  %v11300_v11 = vld [vmem:[#allocation3 + $0x6cc] ss:$48 sps:$4 sm:$0xff]  }
 0x17e   :  { %2685 = vmatpush1.bf16.msra.mxu0 %v11224_v26  ;;  %2771 = vmatpush1.bf16.msra.mxu1 %v11225_v27  ;;  %v11295_v12 = vld [vmem:[#allocation3 + $0x6c0] ss:$48 sps:$4 sm:$0xff]   ;;  %v11298_v13 = vld [vmem:[#allocation3 + $0x6c8] ss:$48 sps:$4 sm:$0xff]   ;;  %v11303_v14 = vld [vmem:[#allocation3 + $0x724] ss:$48 sps:$4 sm:$0xff]  }
 0x17f   :  { %2686 = vmatprep.subr.bf16.mxu0 %v11226_v28  ;;  %2772 = vmatprep.subr.bf16.mxu1 %v11228_v29  ;;  %v11306_v15 = vld [vmem:[#allocation3 + $0x72c] ss:$48 sps:$4 sm:$0xff]   ;;  %v11301_v16 = vld [vmem:[#allocation3 + $0x720] ss:$48 sps:$4 sm:$0xff]   ;;  %v11304_v17 = vld [vmem:[#allocation3 + $0x728] ss:$48 sps:$4 sm:$0xff]  }
 0x180   :  { %v11309_v18 = vld [vmem:[#allocation3 + $0x784] ss:$48 sps:$4 sm:$0xff]   ;;  %v11312_v19 = vld [vmem:[#allocation3 + $0x78c] ss:$48 sps:$4 sm:$0xff]   ;;  %v11307_v20 = vld [vmem:[#allocation3 + $0x780] ss:$48 sps:$4 sm:$0xff]  }
 0x181   :  { %v11310_v21 = vld [vmem:[#allocation3 + $0x788] ss:$48 sps:$4 sm:$0xff]   ;;  %v11315_v22 = vld [vmem:[#allocation3 + $0x7e4] ss:$48 sps:$4 sm:$0xff]   ;;  %v11318_v23 = vld [vmem:[#allocation3 + $0x7ec] ss:$48 sps:$4 sm:$0xff]  }
 0x182   :  { %2687 = vmatpush1.bf16.msra.mxu0 %v11230_v30  ;;  %2773 = vmatpush1.bf16.msra.mxu1 %v11231_v31  ;;  %v11313_v24 = vld [vmem:[#allocation3 + $0x7e0] ss:$48 sps:$4 sm:$0xff]   ;;  %v11316_v25 = vld [vmem:[#allocation3 + $0x7e8] ss:$48 sps:$4 sm:$0xff]   ;;  %v11321_v26 = vld [vmem:[#allocation3 + $0x844] ss:$48 sps:$4 sm:$0xff]  }
 0x183   :  { %2688 = vmatprep.subr.bf16.mxu0 %v11232_v32  ;;  %2774 = vmatprep.subr.bf16.mxu1 %v11234_v33  ;;  %v11324_v27 = vld [vmem:[#allocation3 + $0x84c] ss:$48 sps:$4 sm:$0xff]   ;;  %v11319_v28 = vld [vmem:[#allocation3 + $0x840] ss:$48 sps:$4 sm:$0xff]   ;;  %v11322_v29 = vld [vmem:[#allocation3 + $0x848] ss:$48 sps:$4 sm:$0xff]  }
 0x184   :  { %v13883_v30 = vld [vmem:[%s14379_s25 + $0xc] ss:$16 sps:$4 sm:$0xff]   ;;  %v11327_v31 = vld [vmem:[#allocation3 + $0x8a4] ss:$48 sps:$4 sm:$0xff]   ;;  %v11325_v33 = vld [vmem:[#allocation3 + $0x8a0] ss:$48 sps:$4 sm:$0xff]  }
 0x185   :  { %v11330_v32 = vld [vmem:[#allocation3 + $0x8ac] ss:$48 sps:$4 sm:$0xff]   ;;  %vm9525_vm1 = vcmask 523264   ;;  %s14380_s15 = sld [smem:[#allocation46_spill]] }
 0x186   :  { %2689 = vmatpush1.bf16.msra.mxu0 %v11236_v34  ;;  %2775 = vmatpush1.bf16.msra.mxu1 %v11237_v35  ;;  %v11328_v34 = vld [vmem:[#allocation3 + $0x8a8] ss:$48 sps:$4 sm:$0xff]   ;;  %v11333_v35 = vld [vmem:[#allocation3 + $0x904] ss:$48 sps:$4 sm:$0xff]  }
 0x187   :  { %2690 = vmatprep.subr.bf16.mxu0 %v11238_v36  ;;  %2776 = vmatprep.subr.bf16.mxu1 %v11240_v37  ;;  %v11336_v36 = vld [vmem:[#allocation3 + $0x90c] ss:$48 sps:$4 sm:$0xff]   ;;  %v11331_v37 = vld [vmem:[#allocation3 + $0x900] ss:$48 sps:$4 sm:$0xff]  }
 0x18a   :  { %2691 = vmatpush1.bf16.msra.mxu0 %v11242_v38  ;;  %2777 = vmatpush1.bf16.msra.mxu1 %v11243_v39  ;;  %v11334_v38 = vld [vmem:[#allocation3 + $0x908] ss:$48 sps:$4 sm:$0xff]   ;;  %v11339_v39 = vld [vmem:[#allocation3 + $0x964] ss:$48 sps:$4 sm:$0xff]  }
 0x18b   :  { %2692 = vmatprep.subr.bf16.mxu0 %v11244_v40  ;;  %2778 = vmatprep.subr.bf16.mxu1 %v11246_v41  ;;  %v11342_v40 = vld [vmem:[#allocation3 + $0x96c] ss:$48 sps:$4 sm:$0xff]   ;;  %v11337_v41 = vld [vmem:[#allocation3 + $0x960] ss:$48 sps:$4 sm:$0xff]  }
 0x18e   :  { %2693 = vmatpush1.bf16.msra.mxu0 %v11248_v42  ;;  %2779 = vmatpush1.bf16.msra.mxu1 %v11249_v43  ;;  %v11340_v42 = vld [vmem:[#allocation3 + $0x968] ss:$48 sps:$4 sm:$0xff]   ;;  %v11345_v43 = vld [vmem:[#allocation3 + $0x9c4] ss:$48 sps:$4 sm:$0xff]  }
 0x18f   :  { %2694 = vmatprep.subr.bf16.mxu0 %v11250_v44  ;;  %2780 = vmatprep.subr.bf16.mxu1 %v11252_v45  ;;  %v11348_v44 = vld [vmem:[#allocation3 + $0x9cc] ss:$48 sps:$4 sm:$0xff]   ;;  %v11343_v45 = vld [vmem:[#allocation3 + $0x9c0] ss:$48 sps:$4 sm:$0xff]  }
 0x192   :  { %2695 = vmatpush1.bf16.msra.mxu0 %v11254_v46  ;;  %2781 = vmatpush1.bf16.msra.mxu1 %v11255_v48  ;;  %v11346_v46 = vld [vmem:[#allocation3 + $0x9c8] ss:$48 sps:$4 sm:$0xff]   ;;  %v11351_v48 = vld [vmem:[#allocation3 + $0xa24] ss:$48 sps:$4 sm:$0xff]  }
 0x193   :  { %2696 = vmatprep.subr.bf16.mxu0 %v11256_v49  ;;  %2782 = vmatprep.subr.bf16.mxu1 %v11258_v50  ;;  %v11354_v49 = vld [vmem:[#allocation3 + $0xa2c] ss:$48 sps:$4 sm:$0xff]   ;;  %v11349_v50 = vld [vmem:[#allocation3 + $0xa20] ss:$48 sps:$4 sm:$0xff]  }
 0x196   :  { %2697 = vmatpush1.bf16.msra.mxu0 %v11260_v51  ;;  %2783 = vmatpush1.bf16.msra.mxu1 %v11261_v52  ;;  %v11352_v51 = vld [vmem:[#allocation3 + $0xa28] ss:$48 sps:$4 sm:$0xff]   ;;  %v11357_v52 = vld [vmem:[#allocation3 + $0xa84] ss:$48 sps:$4 sm:$0xff]  }
 0x197   :  { %2698 = vmatprep.subr.bf16.mxu0 %v11262_v53  ;;  %2784 = vmatprep.subr.bf16.mxu1 %v11264_v54  ;;  %v11360_v53 = vld [vmem:[#allocation3 + $0xa8c] ss:$48 sps:$4 sm:$0xff]   ;;  %v11355_v54 = vld [vmem:[#allocation3 + $0xa80] ss:$48 sps:$4 sm:$0xff]  }
 0x19a   :  { %2699 = vmatpush1.bf16.msra.mxu0 %v11266_v55  ;;  %2785 = vmatpush1.bf16.msra.mxu1 %v11267_v56  ;;  %v11358_v55 = vld [vmem:[#allocation3 + $0xa88] ss:$48 sps:$4 sm:$0xff]   ;;  %v11363_v56 = vld [vmem:[#allocation3 + $0xae4] ss:$48 sps:$4 sm:$0xff]  }
 0x19b   :  { %2700 = vmatprep.subr.bf16.mxu0 %v11268_v57  ;;  %2786 = vmatprep.subr.bf16.mxu1 %v11270_v58  ;;  %v11366_v57 = vld [vmem:[#allocation3 + $0xaec] ss:$48 sps:$4 sm:$0xff]   ;;  %v11361_v58 = vld [vmem:[#allocation3 + $0xae0] ss:$48 sps:$4 sm:$0xff]  }
 0x19e   :  { %2701 = vmatpush1.bf16.msra.mxu0 %v11272_v59  ;;  %2787 = vmatpush1.bf16.msra.mxu1 %v11273_v60  ;;  %v11364_v59 = vld [vmem:[#allocation3 + $0xae8] ss:$48 sps:$4 sm:$0xff]   ;;  %v11369_v60 = vld [vmem:[#allocation3 + $0xb44] ss:$48 sps:$4 sm:$0xff]  }
 0x19f   :  { %2702 = vmatprep.subr.bf16.mxu0 %v11274_v61  ;;  %2788 = vmatprep.subr.bf16.mxu1 %v11276_v62  ;;  %v11372_v61 = vld [vmem:[#allocation3 + $0xb4c] ss:$48 sps:$4 sm:$0xff]   ;;  %v11367_v62 = vld [vmem:[#allocation3 + $0xb40] ss:$48 sps:$4 sm:$0xff]  }
 0x1a2   :  { %2703 = vmatpush1.bf16.msra.mxu0 %v11278_v63  ;;  %2789 = vmatpush1.bf16.msra.mxu1 %v11279_v0  ;;  %v11370_v63 = vld [vmem:[#allocation3 + $0xb48] ss:$48 sps:$4 sm:$0xff]   ;;  %v11375_v0 = vld [vmem:[#allocation3 + $0xba4] ss:$48 sps:$4 sm:$0xff]  }
 0x1a3   :  { %2715 = vmatprep.subr.bf16.mxu0 %v11284_v1  ;;  %2801 = vmatprep.subr.bf16.mxu1 %v11287_v2  ;;  %v11378_v1 = vld [vmem:[#allocation3 + $0xbac] ss:$48 sps:$4 sm:$0xff]   ;;  %v11373_v2 = vld [vmem:[#allocation3 + $0xba0] ss:$48 sps:$4 sm:$0xff]  }
 0x1a5   :  { %2705 = vmatmul.mubr.bf16.vlgmr.msra.gmra.mrb[0].mxu0 %v13876_v5  ;;  %2791 = vmatmul.mubr.bf16.vlgmr.msra.gmra.mrb[0].mxu1 %v13876_v5 }
 0x1a6   :  { %2716 = vmatpush1.bf16.msra.mxu0 %v11282_v3  ;;  %2802 = vmatpush1.bf16.msra.mxu1 %v11285_v4  ;;  %v11376_v3 = vld [vmem:[#allocation3 + $0xba8] ss:$48 sps:$4 sm:$0xff]   ;;  %v11384_v4 = vld [vmem:[#allocation3 + $0x14] ss:$48 sps:$4 sm:$0xff]  }
 0x1a7   :  { %2717 = vmatprep.subr.bf16.mxu0 %v11291_v6  ;;  %2803 = vmatprep.subr.bf16.mxu1 %v11294_v7  ;;  %v11387_v6 = vld [vmem:[#allocation3 + $0x1c] ss:$48 sps:$4 sm:$0xff]   ;;  %v13890_v7 = vld [vmem:[%s14379_s25 + $0x8] ss:$16 sps:$4 sm:$0xff]  }
 0x1a8   :  { %2747 = vmatprep.mubr.bf16.mxu0 %v13883_v30  ;;  %2833 = vmatprep.mubr.bf16.mxu1 %v13883_v30 }
 0x1aa   :  { %2718 = vmatpush1.bf16.msra.mxu0 %v11289_v8  ;;  %2804 = vmatpush1.bf16.msra.mxu1 %v11292_v9  ;;  %v11382_v8 = vld [vmem:[#allocation3 + $0x10] ss:$48 sps:$4 sm:$0xff]   ;;  %v11385_v9 = vld [vmem:[#allocation3 + $0x18] ss:$48 sps:$4 sm:$0xff]  }
 0x1ab   :  { %2719 = vmatprep.subr.bf16.mxu0 %v11297_v10  ;;  %2805 = vmatprep.subr.bf16.mxu1 %v11300_v11  ;;  %v11390_v10 = vld [vmem:[#allocation3 + $0x74] ss:$48 sps:$4 sm:$0xff]   ;;  %v11393_v11 = vld [vmem:[#allocation3 + $0x7c] ss:$48 sps:$4 sm:$0xff]  }
 0x1ae   :  { %2720 = vmatpush1.bf16.msra.mxu0 %v11295_v12  ;;  %2806 = vmatpush1.bf16.msra.mxu1 %v11298_v13  ;;  %v11388_v12 = vld [vmem:[#allocation3 + $0x70] ss:$48 sps:$4 sm:$0xff]   ;;  %v11391_v13 = vld [vmem:[#allocation3 + $0x78] ss:$48 sps:$4 sm:$0xff]  }
 0x1af   :  { %2721 = vmatprep.subr.bf16.mxu0 %v11303_v14  ;;  %2807 = vmatprep.subr.bf16.mxu1 %v11306_v15  ;;  %v11396_v14 = vld [vmem:[#allocation3 + $0xd4] ss:$48 sps:$4 sm:$0xff]   ;;  %v11399_v15 = vld [vmem:[#allocation3 + $0xdc] ss:$48 sps:$4 sm:$0xff]  }
 0x1b2   :  { %2722 = vmatpush1.bf16.msra.mxu0 %v11301_v16  ;;  %2808 = vmatpush1.bf16.msra.mxu1 %v11304_v17  ;;  %v11394_v16 = vld [vmem:[#allocation3 + $0xd0] ss:$48 sps:$4 sm:$0xff]   ;;  %v11397_v17 = vld [vmem:[#allocation3 + $0xd8] ss:$48 sps:$4 sm:$0xff]  }
 0x1b3   :  { %2723 = vmatprep.subr.bf16.mxu0 %v11309_v18  ;;  %2809 = vmatprep.subr.bf16.mxu1 %v11312_v19  ;;  %v11402_v18 = vld [vmem:[#allocation3 + $0x134] ss:$48 sps:$4 sm:$0xff]   ;;  %v11405_v19 = vld [vmem:[#allocation3 + $0x13c] ss:$48 sps:$4 sm:$0xff]  }
 0x1b6   :  { %2724 = vmatpush1.bf16.msra.mxu0 %v11307_v20  ;;  %2810 = vmatpush1.bf16.msra.mxu1 %v11310_v21  ;;  %v11400_v20 = vld [vmem:[#allocation3 + $0x130] ss:$48 sps:$4 sm:$0xff]   ;;  %v11403_v21 = vld [vmem:[#allocation3 + $0x138] ss:$48 sps:$4 sm:$0xff]  }
 0x1b7   :  { %2725 = vmatprep.subr.bf16.mxu0 %v11315_v22  ;;  %2811 = vmatprep.subr.bf16.mxu1 %v11318_v23  ;;  %v11408_v22 = vld [vmem:[#allocation3 + $0x194] ss:$48 sps:$4 sm:$0xff]   ;;  %v11411_v23 = vld [vmem:[#allocation3 + $0x19c] ss:$48 sps:$4 sm:$0xff]  }
 0x1ba   :  { %2726 = vmatpush1.bf16.msra.mxu0 %v11313_v24  ;;  %2812 = vmatpush1.bf16.msra.mxu1 %v11316_v25  ;;  %v11406_v24 = vld [vmem:[#allocation3 + $0x190] ss:$48 sps:$4 sm:$0xff]   ;;  %v11409_v25 = vld [vmem:[#allocation3 + $0x198] ss:$48 sps:$4 sm:$0xff]  }
 0x1bb   :  { %2727 = vmatprep.subr.bf16.mxu0 %v11321_v26  ;;  %2813 = vmatprep.subr.bf16.mxu1 %v11324_v27  ;;  %v11417_v26 = vld [vmem:[#allocation3 + $0x1fc] ss:$48 sps:$4 sm:$0xff]   ;;  %v11412_v27 = vld [vmem:[#allocation3 + $0x1f0] ss:$48 sps:$4 sm:$0xff]  }
 0x1be   :  { %2728 = vmatpush1.bf16.msra.mxu0 %v11319_v28  ;;  %2814 = vmatpush1.bf16.msra.mxu1 %v11322_v29  ;;  %v11415_v28 = vld [vmem:[#allocation3 + $0x1f8] ss:$48 sps:$4 sm:$0xff]   ;;  %v11420_v29 = vld [vmem:[#allocation3 + $0x254] ss:$48 sps:$4 sm:$0xff]  }
 0x1bf   :  { %2729 = vmatprep.subr.bf16.mxu0 %v11327_v31  ;;  %2815 = vmatprep.subr.bf16.mxu1 %v11330_v32  ;;  %v11423_v31 = vld [vmem:[#allocation3 + $0x25c] ss:$48 sps:$4 sm:$0xff]   ;;  %v11418_v32 = vld [vmem:[#allocation3 + $0x250] ss:$48 sps:$4 sm:$0xff]  }
 0x1c2   :  { %2730 = vmatpush1.bf16.msra.mxu0 %v11325_v33  ;;  %2816 = vmatpush1.bf16.msra.mxu1 %v11328_v34  ;;  %v11421_v33 = vld [vmem:[#allocation3 + $0x258] ss:$48 sps:$4 sm:$0xff]   ;;  %v11426_v34 = vld [vmem:[#allocation3 + $0x2b4] ss:$48 sps:$4 sm:$0xff]  }
 0x1c3   :  { %2731 = vmatprep.subr.bf16.mxu0 %v11333_v35  ;;  %2817 = vmatprep.subr.bf16.mxu1 %v11336_v36  ;;  %v11429_v35 = vld [vmem:[#allocation3 + $0x2bc] ss:$48 sps:$4 sm:$0xff]   ;;  %v11424_v36 = vld [vmem:[#allocation3 + $0x2b0] ss:$48 sps:$4 sm:$0xff]  }
 0x1c6   :  { %2732 = vmatpush1.bf16.msra.mxu0 %v11331_v37  ;;  %2818 = vmatpush1.bf16.msra.mxu1 %v11334_v38  ;;  %v11427_v37 = vld [vmem:[#allocation3 + $0x2b8] ss:$48 sps:$4 sm:$0xff]   ;;  %v11432_v38 = vld [vmem:[#allocation3 + $0x314] ss:$48 sps:$4 sm:$0xff]  }
 0x1c7   :  { %2733 = vmatprep.subr.bf16.mxu0 %v11339_v39  ;;  %2819 = vmatprep.subr.bf16.mxu1 %v11342_v40  ;;  %v11435_v39 = vld [vmem:[#allocation3 + $0x31c] ss:$48 sps:$4 sm:$0xff]   ;;  %v11430_v40 = vld [vmem:[#allocation3 + $0x310] ss:$48 sps:$4 sm:$0xff]  }
 0x1ca   :  { %2734 = vmatpush1.bf16.msra.mxu0 %v11337_v41  ;;  %2820 = vmatpush1.bf16.msra.mxu1 %v11340_v42  ;;  %v11433_v41 = vld [vmem:[#allocation3 + $0x318] ss:$48 sps:$4 sm:$0xff]   ;;  %v11438_v42 = vld [vmem:[#allocation3 + $0x374] ss:$48 sps:$4 sm:$0xff]  }
 0x1cb   :  { %2735 = vmatprep.subr.bf16.mxu0 %v11345_v43  ;;  %2821 = vmatprep.subr.bf16.mxu1 %v11348_v44  ;;  %v11441_v43 = vld [vmem:[#allocation3 + $0x37c] ss:$48 sps:$4 sm:$0xff]   ;;  %v11436_v44 = vld [vmem:[#allocation3 + $0x370] ss:$48 sps:$4 sm:$0xff]  }
 0x1ce   :  { %2736 = vmatpush1.bf16.msra.mxu0 %v11343_v45  ;;  %2822 = vmatpush1.bf16.msra.mxu1 %v11346_v46  ;;  %v11439_v45 = vld [vmem:[#allocation3 + $0x378] ss:$48 sps:$4 sm:$0xff]   ;;  %v11444_v46 = vld [vmem:[#allocation3 + $0x3d4] ss:$48 sps:$4 sm:$0xff]  }
 0x1cf   :  { %2737 = vmatprep.subr.bf16.mxu0 %v11351_v48  ;;  %2823 = vmatprep.subr.bf16.mxu1 %v11354_v49  ;;  %v11447_v48 = vld [vmem:[#allocation3 + $0x3dc] ss:$48 sps:$4 sm:$0xff]   ;;  %v11442_v49 = vld [vmem:[#allocation3 + $0x3d0] ss:$48 sps:$4 sm:$0xff]  }
 0x1d2   :  { %2738 = vmatpush1.bf16.msra.mxu0 %v11349_v50  ;;  %2824 = vmatpush1.bf16.msra.mxu1 %v11352_v51  ;;  %v11445_v50 = vld [vmem:[#allocation3 + $0x3d8] ss:$48 sps:$4 sm:$0xff]   ;;  %v11450_v51 = vld [vmem:[#allocation3 + $0x434] ss:$48 sps:$4 sm:$0xff]  }
 0x1d3   :  { %2739 = vmatprep.subr.bf16.mxu0 %v11357_v52  ;;  %2825 = vmatprep.subr.bf16.mxu1 %v11360_v53  ;;  %v11453_v52 = vld [vmem:[#allocation3 + $0x43c] ss:$48 sps:$4 sm:$0xff]   ;;  %v11448_v53 = vld [vmem:[#allocation3 + $0x430] ss:$48 sps:$4 sm:$0xff]  }
 0x1d6   :  { %2740 = vmatpush1.bf16.msra.mxu0 %v11355_v54  ;;  %2826 = vmatpush1.bf16.msra.mxu1 %v11358_v55  ;;  %v11451_v54 = vld [vmem:[#allocation3 + $0x438] ss:$48 sps:$4 sm:$0xff]   ;;  %v11456_v55 = vld [vmem:[#allocation3 + $0x494] ss:$48 sps:$4 sm:$0xff]  }
 0x1d7   :  { %2741 = vmatprep.subr.bf16.mxu0 %v11363_v56  ;;  %2827 = vmatprep.subr.bf16.mxu1 %v11366_v57  ;;  %v11459_v56 = vld [vmem:[#allocation3 + $0x49c] ss:$48 sps:$4 sm:$0xff]   ;;  %v11454_v57 = vld [vmem:[#allocation3 + $0x490] ss:$48 sps:$4 sm:$0xff]  }
 0x1da   :  { %2742 = vmatpush1.bf16.msra.mxu0 %v11361_v58  ;;  %2828 = vmatpush1.bf16.msra.mxu1 %v11364_v59  ;;  %v11457_v58 = vld [vmem:[#allocation3 + $0x498] ss:$48 sps:$4 sm:$0xff]   ;;  %v11462_v59 = vld [vmem:[#allocation3 + $0x4f4] ss:$48 sps:$4 sm:$0xff]  }
 0x1db   :  { %2743 = vmatprep.subr.bf16.mxu0 %v11369_v60  ;;  %2829 = vmatprep.subr.bf16.mxu1 %v11372_v61  ;;  %v11465_v60 = vld [vmem:[#allocation3 + $0x4fc] ss:$48 sps:$4 sm:$0xff]   ;;  %v11460_v61 = vld [vmem:[#allocation3 + $0x4f0] ss:$48 sps:$4 sm:$0xff]  }
 0x1de   :  { %2744 = vmatpush1.bf16.msra.mxu0 %v11367_v62  ;;  %2830 = vmatpush1.bf16.msra.mxu1 %v11370_v63  ;;  %v11463_v62 = vld [vmem:[#allocation3 + $0x4f8] ss:$48 sps:$4 sm:$0xff]   ;;  %v11468_v63 = vld [vmem:[#allocation3 + $0x554] ss:$48 sps:$4 sm:$0xff]  }
 0x1df   :  { %2745 = vmatprep.subr.bf16.mxu0 %v11375_v0  ;;  %2831 = vmatprep.subr.bf16.mxu1 %v11378_v1  ;;  %v11471_v0 = vld [vmem:[#allocation3 + $0x55c] ss:$48 sps:$4 sm:$0xff]   ;;  %v11466_v1 = vld [vmem:[#allocation3 + $0x550] ss:$48 sps:$4 sm:$0xff]  }
 0x1e2   :  { %2746 = vmatpush1.bf16.msra.mxu0 %v11373_v2  ;;  %2832 = vmatpush1.bf16.msra.mxu1 %v11376_v3  ;;  %v11469_v2 = vld [vmem:[#allocation3 + $0x558] ss:$48 sps:$4 sm:$0xff]   ;;  %v11474_v3 = vld [vmem:[#allocation3 + $0x5b4] ss:$48 sps:$4 sm:$0xff]  }
 0x1e3   :  { %2844 = vmatprep.subr.bf16.mxu0 %v11384_v4  ;;  %2930 = vmatprep.subr.bf16.mxu1 %v11387_v6  ;;  %v11477_v4 = vld [vmem:[#allocation3 + $0x5bc] ss:$48 sps:$4 sm:$0xff]   ;;  %v11472_v6 = vld [vmem:[#allocation3 + $0x5b0] ss:$48 sps:$4 sm:$0xff]  }
 0x1e5   :  { %2748 = vmatmul.mubr.bf16.vlgmr.msra.gmra.mrb[0].mxu0 %v13890_v7  ;;  %2834 = vmatmul.mubr.bf16.vlgmr.msra.gmra.mrb[0].mxu1 %v13890_v7 }
 0x1e6   :  { %2845 = vmatpush1.bf16.msra.mxu0 %v11382_v8  ;;  %2931 = vmatpush1.bf16.msra.mxu1 %v11385_v9  ;;  %v11475_v8 = vld [vmem:[#allocation3 + $0x5b8] ss:$48 sps:$4 sm:$0xff]   ;;  %v11480_v9 = vld [vmem:[#allocation3 + $0x614] ss:$48 sps:$4 sm:$0xff]  }
 0x1e7   :  { %2846 = vmatprep.subr.bf16.mxu0 %v11390_v10  ;;  %2932 = vmatprep.subr.bf16.mxu1 %v11393_v11  ;;  %v11483_v10 = vld [vmem:[#allocation3 + $0x61c] ss:$48 sps:$4 sm:$0xff]   ;;  %v11478_v11 = vld [vmem:[#allocation3 + $0x610] ss:$48 sps:$4 sm:$0xff]  }
 0x1e8   :  { %2876 = vmatprep.mubr.bf16.mxu0 %v13869_v47  ;;  %2962 = vmatprep.mubr.bf16.mxu1 %v13869_v47  ;;  %v11414_v47 = vld [vmem:[#allocation3 + $0x1f4] ss:$48 sps:$4 sm:$0xff]  }
 0x1ea   :  { %2847 = vmatpush1.bf16.msra.mxu0 %v11388_v12  ;;  %2933 = vmatpush1.bf16.msra.mxu1 %v11391_v13  ;;  %v11481_v12 = vld [vmem:[#allocation3 + $0x618] ss:$48 sps:$4 sm:$0xff]   ;;  %v11486_v13 = vld [vmem:[#allocation3 + $0x674] ss:$48 sps:$4 sm:$0xff]  }
 0x1eb   :  { %2848 = vmatprep.subr.bf16.mxu0 %v11396_v14  ;;  %2934 = vmatprep.subr.bf16.mxu1 %v11399_v15  ;;  %v11489_v14 = vld [vmem:[#allocation3 + $0x67c] ss:$48 sps:$4 sm:$0xff]   ;;  %v11484_v15 = vld [vmem:[#allocation3 + $0x670] ss:$48 sps:$4 sm:$0xff]  }
 0x1ee   :  { %2849 = vmatpush1.bf16.msra.mxu0 %v11394_v16  ;;  %2935 = vmatpush1.bf16.msra.mxu1 %v11397_v17  ;;  %v11487_v16 = vld [vmem:[#allocation3 + $0x678] ss:$48 sps:$4 sm:$0xff]   ;;  %v11492_v17 = vld [vmem:[#allocation3 + $0x6d4] ss:$48 sps:$4 sm:$0xff]  }
 0x1ef   :  { %2850 = vmatprep.subr.bf16.mxu0 %v11402_v18  ;;  %2936 = vmatprep.subr.bf16.mxu1 %v11405_v19  ;;  %v11495_v18 = vld [vmem:[#allocation3 + $0x6dc] ss:$48 sps:$4 sm:$0xff]   ;;  %v11490_v19 = vld [vmem:[#allocation3 + $0x6d0] ss:$48 sps:$4 sm:$0xff]  }
 0x1f2   :  { %2851 = vmatpush1.bf16.msra.mxu0 %v11400_v20  ;;  %2937 = vmatpush1.bf16.msra.mxu1 %v11403_v21  ;;  %v11493_v20 = vld [vmem:[#allocation3 + $0x6d8] ss:$48 sps:$4 sm:$0xff]   ;;  %v11498_v21 = vld [vmem:[#allocation3 + $0x734] ss:$48 sps:$4 sm:$0xff]  }
 0x1f3   :  { %2852 = vmatprep.subr.bf16.mxu0 %v11408_v22  ;;  %2938 = vmatprep.subr.bf16.mxu1 %v11411_v23  ;;  %v11496_v22 = vld [vmem:[#allocation3 + $0x730] ss:$48 sps:$4 sm:$0xff]   ;;  %v11499_v23 = vld [vmem:[#allocation3 + $0x738] ss:$48 sps:$4 sm:$0xff]  }
 0x1f6   :  { %2853 = vmatpush1.bf16.msra.mxu0 %v11406_v24  ;;  %2939 = vmatpush1.bf16.msra.mxu1 %v11409_v25  ;;  %v11504_v24 = vld [vmem:[#allocation3 + $0x794] ss:$48 sps:$4 sm:$0xff]   ;;  %v11507_v25 = vld [vmem:[#allocation3 + $0x79c] ss:$48 sps:$4 sm:$0xff]  }
 0x1f7   :  { %2854 = vmatprep.subr.bf16.mxu0 %v11414_v47  ;;  %2940 = vmatprep.subr.bf16.mxu1 %v11417_v26  ;;  %v11502_v47 = vld [vmem:[#allocation3 + $0x790] ss:$48 sps:$4 sm:$0xff]   ;;  %v11505_v26 = vld [vmem:[#allocation3 + $0x798] ss:$48 sps:$4 sm:$0xff]  }
 0x1fa   :  { %2855 = vmatpush1.bf16.msra.mxu0 %v11412_v27  ;;  %2941 = vmatpush1.bf16.msra.mxu1 %v11415_v28  ;;  %v11513_v27 = vld [vmem:[#allocation3 + $0x7fc] ss:$48 sps:$4 sm:$0xff]   ;;  %v11508_v28 = vld [vmem:[#allocation3 + $0x7f0] ss:$48 sps:$4 sm:$0xff]  }
 0x1fb   :  { %2856 = vmatprep.subr.bf16.mxu0 %v11420_v29  ;;  %2942 = vmatprep.subr.bf16.mxu1 %v11423_v31  ;;  %v11511_v29 = vld [vmem:[#allocation3 + $0x7f8] ss:$48 sps:$4 sm:$0xff]   ;;  %v11516_v31 = vld [vmem:[#allocation3 + $0x854] ss:$48 sps:$4 sm:$0xff]  }
 0x1fe   :  { %2857 = vmatpush1.bf16.msra.mxu0 %v11418_v32  ;;  %2943 = vmatpush1.bf16.msra.mxu1 %v11421_v33  ;;  %v11519_v32 = vld [vmem:[#allocation3 + $0x85c] ss:$48 sps:$4 sm:$0xff]   ;;  %v11514_v33 = vld [vmem:[#allocation3 + $0x850] ss:$48 sps:$4 sm:$0xff]  }
 0x1ff   :  { %2858 = vmatprep.subr.bf16.mxu0 %v11426_v34  ;;  %2944 = vmatprep.subr.bf16.mxu1 %v11429_v35  ;;  %v11517_v34 = vld [vmem:[#allocation3 + $0x858] ss:$48 sps:$4 sm:$0xff]   ;;  %v11522_v35 = vld [vmem:[#allocation3 + $0x8b4] ss:$48 sps:$4 sm:$0xff]  }
 0x202   :  { %2859 = vmatpush1.bf16.msra.mxu0 %v11424_v36  ;;  %2945 = vmatpush1.bf16.msra.mxu1 %v11427_v37  ;;  %v11525_v36 = vld [vmem:[#allocation3 + $0x8bc] ss:$48 sps:$4 sm:$0xff]   ;;  %v11520_v37 = vld [vmem:[#allocation3 + $0x8b0] ss:$48 sps:$4 sm:$0xff]  }
 0x203   :  { %2860 = vmatprep.subr.bf16.mxu0 %v11432_v38  ;;  %2946 = vmatprep.subr.bf16.mxu1 %v11435_v39  ;;  %v11523_v38 = vld [vmem:[#allocation3 + $0x8b8] ss:$48 sps:$4 sm:$0xff]   ;;  %v11528_v39 = vld [vmem:[#allocation3 + $0x914] ss:$48 sps:$4 sm:$0xff]  }
 0x206   :  { %2861 = vmatpush1.bf16.msra.mxu0 %v11430_v40  ;;  %2947 = vmatpush1.bf16.msra.mxu1 %v11433_v41  ;;  %v11531_v40 = vld [vmem:[#allocation3 + $0x91c] ss:$48 sps:$4 sm:$0xff]   ;;  %v11526_v41 = vld [vmem:[#allocation3 + $0x910] ss:$48 sps:$4 sm:$0xff]  }
 0x207   :  { %2862 = vmatprep.subr.bf16.mxu0 %v11438_v42  ;;  %2948 = vmatprep.subr.bf16.mxu1 %v11441_v43  ;;  %v11529_v42 = vld [vmem:[#allocation3 + $0x918] ss:$48 sps:$4 sm:$0xff]   ;;  %v11534_v43 = vld [vmem:[#allocation3 + $0x974] ss:$48 sps:$4 sm:$0xff]  }
 0x20a   :  { %2863 = vmatpush1.bf16.msra.mxu0 %v11436_v44  ;;  %2949 = vmatpush1.bf16.msra.mxu1 %v11439_v45  ;;  %v11537_v44 = vld [vmem:[#allocation3 + $0x97c] ss:$48 sps:$4 sm:$0xff]   ;;  %v11532_v45 = vld [vmem:[#allocation3 + $0x970] ss:$48 sps:$4 sm:$0xff]  }
 0x20b   :  { %2864 = vmatprep.subr.bf16.mxu0 %v11444_v46  ;;  %2950 = vmatprep.subr.bf16.mxu1 %v11447_v48  ;;  %v11535_v46 = vld [vmem:[#allocation3 + $0x978] ss:$48 sps:$4 sm:$0xff]   ;;  %v11540_v48 = vld [vmem:[#allocation3 + $0x9d4] ss:$48 sps:$4 sm:$0xff]  }
 0x20e   :  { %2865 = vmatpush1.bf16.msra.mxu0 %v11442_v49  ;;  %2951 = vmatpush1.bf16.msra.mxu1 %v11445_v50  ;;  %v11543_v49 = vld [vmem:[#allocation3 + $0x9dc] ss:$48 sps:$4 sm:$0xff]   ;;  %v11538_v50 = vld [vmem:[#allocation3 + $0x9d0] ss:$48 sps:$4 sm:$0xff]  }
 0x20f   :  { %2866 = vmatprep.subr.bf16.mxu0 %v11450_v51  ;;  %2952 = vmatprep.subr.bf16.mxu1 %v11453_v52  ;;  %v11541_v51 = vld [vmem:[#allocation3 + $0x9d8] ss:$48 sps:$4 sm:$0xff]   ;;  %v11546_v52 = vld [vmem:[#allocation3 + $0xa34] ss:$48 sps:$4 sm:$0xff]  }
 0x212   :  { %2867 = vmatpush1.bf16.msra.mxu0 %v11448_v53  ;;  %2953 = vmatpush1.bf16.msra.mxu1 %v11451_v54  ;;  %v11549_v53 = vld [vmem:[#allocation3 + $0xa3c] ss:$48 sps:$4 sm:$0xff]   ;;  %v11544_v54 = vld [vmem:[#allocation3 + $0xa30] ss:$48 sps:$4 sm:$0xff]  }
 0x213   :  { %2868 = vmatprep.subr.bf16.mxu0 %v11456_v55  ;;  %2954 = vmatprep.subr.bf16.mxu1 %v11459_v56  ;;  %v11547_v55 = vld [vmem:[#allocation3 + $0xa38] ss:$48 sps:$4 sm:$0xff]   ;;  %v11552_v56 = vld [vmem:[#allocation3 + $0xa94] ss:$48 sps:$4 sm:$0xff]  }
 0x216   :  { %2869 = vmatpush1.bf16.msra.mxu0 %v11454_v57  ;;  %2955 = vmatpush1.bf16.msra.mxu1 %v11457_v58  ;;  %v11555_v57 = vld [vmem:[#allocation3 + $0xa9c] ss:$48 sps:$4 sm:$0xff]   ;;  %v11550_v58 = vld [vmem:[#allocation3 + $0xa90] ss:$48 sps:$4 sm:$0xff]  }
 0x217   :  { %2870 = vmatprep.subr.bf16.mxu0 %v11462_v59  ;;  %2956 = vmatprep.subr.bf16.mxu1 %v11465_v60  ;;  %v11553_v59 = vld [vmem:[#allocation3 + $0xa98] ss:$48 sps:$4 sm:$0xff]   ;;  %v11558_v60 = vld [vmem:[#allocation3 + $0xaf4] ss:$48 sps:$4 sm:$0xff]  }
 0x21a   :  { %2871 = vmatpush1.bf16.msra.mxu0 %v11460_v61  ;;  %2957 = vmatpush1.bf16.msra.mxu1 %v11463_v62  ;;  %v11561_v61 = vld [vmem:[#allocation3 + $0xafc] ss:$48 sps:$4 sm:$0xff]   ;;  %v11556_v62 = vld [vmem:[#allocation3 + $0xaf0] ss:$48 sps:$4 sm:$0xff]  }
 0x21b   :  { %2872 = vmatprep.subr.bf16.mxu0 %v11468_v63  ;;  %2958 = vmatprep.subr.bf16.mxu1 %v11471_v0  ;;  %v11559_v63 = vld [vmem:[#allocation3 + $0xaf8] ss:$48 sps:$4 sm:$0xff]   ;;  %v11564_v0 = vld [vmem:[#allocation3 + $0xb54] ss:$48 sps:$4 sm:$0xff]  }
 0x21e   :  { %2873 = vmatpush1.bf16.msra.mxu0 %v11466_v1  ;;  %2959 = vmatpush1.bf16.msra.mxu1 %v11469_v2  ;;  %v11567_v1 = vld [vmem:[#allocation3 + $0xb5c] ss:$48 sps:$4 sm:$0xff]   ;;  %v11562_v2 = vld [vmem:[#allocation3 + $0xb50] ss:$48 sps:$4 sm:$0xff]  }
 0x21f   :  { %2874 = vmatprep.subr.bf16.mxu0 %v11474_v3  ;;  %2960 = vmatprep.subr.bf16.mxu1 %v11477_v4  ;;  %v11565_v3 = vld [vmem:[#allocation3 + $0xb58] ss:$48 sps:$4 sm:$0xff]   ;;  %v11570_v4 = vld [vmem:[#allocation3 + $0xbb4] ss:$48 sps:$4 sm:$0xff]  }
 0x222   :  { %2875 = vmatpush1.bf16.msra.mxu0 %v11472_v6  ;;  %2961 = vmatpush1.bf16.msra.mxu1 %v11475_v8  ;;  %v11573_v6 = vld [vmem:[#allocation3 + $0xbbc] ss:$48 sps:$4 sm:$0xff]   ;;  %v11568_v8 = vld [vmem:[#allocation3 + $0xbb0] ss:$48 sps:$4 sm:$0xff]  }
 0x223   :  { %2887 = vmatprep.subr.bf16.mxu0 %v11480_v9  ;;  %2973 = vmatprep.subr.bf16.mxu1 %v11483_v10  ;;  %v11571_v9 = vld [vmem:[#allocation3 + $0xbb8] ss:$48 sps:$4 sm:$0xff]   ;;  %v11576_v10 = vld [vmem:[#allocation3 + $0x24] ss:$48 sps:$4 sm:$0xff]  }
 0x225   :  { %2877 = vmatmul.mubr.bf16.vlgmr.msra.gmra.mrb[4].mxu0 %v13876_v5  ;;  %2963 = vmatmul.mubr.bf16.vlgmr.msra.gmra.mrb[4].mxu1 %v13876_v5  ;;  %v11501_v5 = vld [vmem:[#allocation3 + $0x73c] ss:$48 sps:$4 sm:$0xff]  }
 0x226   :  { %2888 = vmatpush1.bf16.msra.mxu0 %v11478_v11  ;;  %2974 = vmatpush1.bf16.msra.mxu1 %v11481_v12  ;;  %v11579_v11 = vld [vmem:[#allocation3 + $0x2c] ss:$48 sps:$4 sm:$0xff]   ;;  %v11574_v12 = vld [vmem:[#allocation3 + $0x20] ss:$48 sps:$4 sm:$0xff]  }
 0x227   :  { %2889 = vmatprep.subr.bf16.mxu0 %v11486_v13  ;;  %2975 = vmatprep.subr.bf16.mxu1 %v11489_v14  ;;  %v11577_v13 = vld [vmem:[#allocation3 + $0x28] ss:$48 sps:$4 sm:$0xff]   ;;  %v11582_v14 = vld [vmem:[#allocation3 + $0x84] ss:$48 sps:$4 sm:$0xff]  }
 0x228   :  { %2919 = vmatprep.mubr.bf16.mxu0 %v13883_v30  ;;  %3005 = vmatprep.mubr.bf16.mxu1 %v13883_v30  ;;  %v11510_v30 = vld [vmem:[#allocation3 + $0x7f4] ss:$48 sps:$4 sm:$0xff]  }
 0x22a   :  { %2890 = vmatpush1.bf16.msra.mxu0 %v11484_v15  ;;  %2976 = vmatpush1.bf16.msra.mxu1 %v11487_v16  ;;  %v11585_v15 = vld [vmem:[#allocation3 + $0x8c] ss:$48 sps:$4 sm:$0xff]   ;;  %v11580_v16 = vld [vmem:[#allocation3 + $0x80] ss:$48 sps:$4 sm:$0xff]  }
 0x22b   :  { %2891 = vmatprep.subr.bf16.mxu0 %v11492_v17  ;;  %2977 = vmatprep.subr.bf16.mxu1 %v11495_v18  ;;  %v11583_v17 = vld [vmem:[#allocation3 + $0x88] ss:$48 sps:$4 sm:$0xff]   ;;  %v11588_v18 = vld [vmem:[#allocation3 + $0xe4] ss:$48 sps:$4 sm:$0xff]  }
 0x22e   :  { %2892 = vmatpush1.bf16.msra.mxu0 %v11490_v19  ;;  %2978 = vmatpush1.bf16.msra.mxu1 %v11493_v20  ;;  %v11591_v19 = vld [vmem:[#allocation3 + $0xec] ss:$48 sps:$4 sm:$0xff]   ;;  %v11586_v20 = vld [vmem:[#allocation3 + $0xe0] ss:$48 sps:$4 sm:$0xff]  }
 0x22f   :  { %2893 = vmatprep.subr.bf16.mxu0 %v11498_v21  ;;  %2979 = vmatprep.subr.bf16.mxu1 %v11501_v5  ;;  %v11589_v21 = vld [vmem:[#allocation3 + $0xe8] ss:$48 sps:$4 sm:$0xff]   ;;  %v13058_v5 = vld [vmem:[%s14379_s25 + $0x4] ss:$16 sps:$4 sm:$0xff]  }
 0x232   :  { %2894 = vmatpush1.bf16.msra.mxu0 %v11496_v22  ;;  %2980 = vmatpush1.bf16.msra.mxu1 %v11499_v23  ;;  %v11594_v22 = vld [vmem:[#allocation3 + $0x144] ss:$48 sps:$4 sm:$0xff]   ;;  %v11597_v23 = vld [vmem:[#allocation3 + $0x14c] ss:$48 sps:$4 sm:$0xff]  }
 0x233   :  { %2895 = vmatprep.subr.bf16.mxu0 %v11504_v24  ;;  %2981 = vmatprep.subr.bf16.mxu1 %v11507_v25  ;;  %v11595_v24 = vld [vmem:[#allocation3 + $0x148] ss:$48 sps:$4 sm:$0xff]   ;;  %v11600_v25 = vld [vmem:[#allocation3 + $0x1a4] ss:$48 sps:$4 sm:$0xff]  }
 0x236   :  { %2896 = vmatpush1.bf16.msra.mxu0 %v11502_v47  ;;  %2982 = vmatpush1.bf16.msra.mxu1 %v11505_v26  ;;  %v11603_v47 = vld [vmem:[#allocation3 + $0x1ac] ss:$48 sps:$4 sm:$0xff]   ;;  %v11598_v26 = vld [vmem:[#allocation3 + $0x1a0] ss:$48 sps:$4 sm:$0xff]  }
 0x237   :  { %2897 = vmatprep.subr.bf16.mxu0 %v11510_v30  ;;  %2983 = vmatprep.subr.bf16.mxu1 %v11513_v27  ;;  %v11601_v30 = vld [vmem:[#allocation3 + $0x1a8] ss:$48 sps:$4 sm:$0xff]   ;;  %v11606_v27 = vld [vmem:[#allocation3 + $0x204] ss:$48 sps:$4 sm:$0xff]  }
 0x23a   :  { %2898 = vmatpush1.bf16.msra.mxu0 %v11508_v28  ;;  %2984 = vmatpush1.bf16.msra.mxu1 %v11511_v29  ;;  %v11609_v28 = vld [vmem:[#allocation3 + $0x20c] ss:$48 sps:$4 sm:$0xff]   ;;  %v11604_v29 = vld [vmem:[#allocation3 + $0x200] ss:$48 sps:$4 sm:$0xff]  }
 0x23b   :  { %2899 = vmatprep.subr.bf16.mxu0 %v11516_v31  ;;  %2985 = vmatprep.subr.bf16.mxu1 %v11519_v32  ;;  %v11607_v31 = vld [vmem:[#allocation3 + $0x208] ss:$48 sps:$4 sm:$0xff]   ;;  %v11612_v32 = vld [vmem:[#allocation3 + $0x264] ss:$48 sps:$4 sm:$0xff]  }
 0x23e   :  { %2900 = vmatpush1.bf16.msra.mxu0 %v11514_v33  ;;  %2986 = vmatpush1.bf16.msra.mxu1 %v11517_v34  ;;  %v11615_v33 = vld [vmem:[#allocation3 + $0x26c] ss:$48 sps:$4 sm:$0xff]   ;;  %v11610_v34 = vld [vmem:[#allocation3 + $0x260] ss:$48 sps:$4 sm:$0xff]  }
 0x23f   :  { %2901 = vmatprep.subr.bf16.mxu0 %v11522_v35  ;;  %2987 = vmatprep.subr.bf16.mxu1 %v11525_v36  ;;  %v11613_v35 = vld [vmem:[#allocation3 + $0x268] ss:$48 sps:$4 sm:$0xff]   ;;  %v11618_v36 = vld [vmem:[#allocation3 + $0x2c4] ss:$48 sps:$4 sm:$0xff]  }
 0x242   :  { %2902 = vmatpush1.bf16.msra.mxu0 %v11520_v37  ;;  %2988 = vmatpush1.bf16.msra.mxu1 %v11523_v38  ;;  %v11621_v37 = vld [vmem:[#allocation3 + $0x2cc] ss:$48 sps:$4 sm:$0xff]   ;;  %v11616_v38 = vld [vmem:[#allocation3 + $0x2c0] ss:$48 sps:$4 sm:$0xff]  }
 0x243   :  { %2903 = vmatprep.subr.bf16.mxu0 %v11528_v39  ;;  %2989 = vmatprep.subr.bf16.mxu1 %v11531_v40  ;;  %v11619_v39 = vld [vmem:[#allocation3 + $0x2c8] ss:$48 sps:$4 sm:$0xff]   ;;  %v11624_v40 = vld [vmem:[#allocation3 + $0x324] ss:$48 sps:$4 sm:$0xff]  }
 0x246   :  { %2904 = vmatpush1.bf16.msra.mxu0 %v11526_v41  ;;  %2990 = vmatpush1.bf16.msra.mxu1 %v11529_v42  ;;  %v11627_v41 = vld [vmem:[#allocation3 + $0x32c] ss:$48 sps:$4 sm:$0xff]   ;;  %v11622_v42 = vld [vmem:[#allocation3 + $0x320] ss:$48 sps:$4 sm:$0xff]  }
 0x247   :  { %2905 = vmatprep.subr.bf16.mxu0 %v11534_v43  ;;  %2991 = vmatprep.subr.bf16.mxu1 %v11537_v44  ;;  %v11625_v43 = vld [vmem:[#allocation3 + $0x328] ss:$48 sps:$4 sm:$0xff]   ;;  %v11630_v44 = vld [vmem:[#allocation3 + $0x384] ss:$48 sps:$4 sm:$0xff]  }
 0x24a   :  { %2906 = vmatpush1.bf16.msra.mxu0 %v11532_v45  ;;  %2992 = vmatpush1.bf16.msra.mxu1 %v11535_v46  ;;  %v11633_v45 = vld [vmem:[#allocation3 + $0x38c] ss:$48 sps:$4 sm:$0xff]   ;;  %v11628_v46 = vld [vmem:[#allocation3 + $0x380] ss:$48 sps:$4 sm:$0xff]  }
 0x24b   :  { %2907 = vmatprep.subr.bf16.mxu0 %v11540_v48  ;;  %2993 = vmatprep.subr.bf16.mxu1 %v11543_v49  ;;  %v11631_v48 = vld [vmem:[#allocation3 + $0x388] ss:$48 sps:$4 sm:$0xff]   ;;  %v11636_v49 = vld [vmem:[#allocation3 + $0x3e4] ss:$48 sps:$4 sm:$0xff]  }
 0x24e   :  { %2908 = vmatpush1.bf16.msra.mxu0 %v11538_v50  ;;  %2994 = vmatpush1.bf16.msra.mxu1 %v11541_v51  ;;  %v11639_v50 = vld [vmem:[#allocation3 + $0x3ec] ss:$48 sps:$4 sm:$0xff]   ;;  %v11634_v51 = vld [vmem:[#allocation3 + $0x3e0] ss:$48 sps:$4 sm:$0xff]  }
 0x24f   :  { %2909 = vmatprep.subr.bf16.mxu0 %v11546_v52  ;;  %2995 = vmatprep.subr.bf16.mxu1 %v11549_v53  ;;  %v11637_v52 = vld [vmem:[#allocation3 + $0x3e8] ss:$48 sps:$4 sm:$0xff]   ;;  %v11642_v53 = vld [vmem:[#allocation3 + $0x444] ss:$48 sps:$4 sm:$0xff]  }
 0x252   :  { %2910 = vmatpush1.bf16.msra.mxu0 %v11544_v54  ;;  %2996 = vmatpush1.bf16.msra.mxu1 %v11547_v55  ;;  %v11645_v54 = vld [vmem:[#allocation3 + $0x44c] ss:$48 sps:$4 sm:$0xff]   ;;  %v11640_v55 = vld [vmem:[#allocation3 + $0x440] ss:$48 sps:$4 sm:$0xff]  }
 0x253   :  { %2911 = vmatprep.subr.bf16.mxu0 %v11552_v56  ;;  %2997 = vmatprep.subr.bf16.mxu1 %v11555_v57  ;;  %v11643_v56 = vld [vmem:[#allocation3 + $0x448] ss:$48 sps:$4 sm:$0xff]   ;;  %v11648_v57 = vld [vmem:[#allocation3 + $0x4a4] ss:$48 sps:$4 sm:$0xff]  }
 0x256   :  { %2912 = vmatpush1.bf16.msra.mxu0 %v11550_v58  ;;  %2998 = vmatpush1.bf16.msra.mxu1 %v11553_v59  ;;  %v11651_v58 = vld [vmem:[#allocation3 + $0x4ac] ss:$48 sps:$4 sm:$0xff]   ;;  %v11646_v59 = vld [vmem:[#allocation3 + $0x4a0] ss:$48 sps:$4 sm:$0xff]  }
 0x257   :  { %2913 = vmatprep.subr.bf16.mxu0 %v11558_v60  ;;  %2999 = vmatprep.subr.bf16.mxu1 %v11561_v61  ;;  %v11649_v60 = vld [vmem:[#allocation3 + $0x4a8] ss:$48 sps:$4 sm:$0xff]   ;;  %v11654_v61 = vld [vmem:[#allocation3 + $0x504] ss:$48 sps:$4 sm:$0xff]  }
 0x25a   :  { %2914 = vmatpush1.bf16.msra.mxu0 %v11556_v62  ;;  %3000 = vmatpush1.bf16.msra.mxu1 %v11559_v63  ;;  %v11657_v62 = vld [vmem:[#allocation3 + $0x50c] ss:$48 sps:$4 sm:$0xff]   ;;  %v11652_v63 = vld [vmem:[#allocation3 + $0x500] ss:$48 sps:$4 sm:$0xff]  }
 0x25b   :  { %2915 = vmatprep.subr.bf16.mxu0 %v11564_v0  ;;  %3001 = vmatprep.subr.bf16.mxu1 %v11567_v1  ;;  %v11655_v0 = vld [vmem:[#allocation3 + $0x508] ss:$48 sps:$4 sm:$0xff]   ;;  %v11660_v1 = vld [vmem:[#allocation3 + $0x564] ss:$48 sps:$4 sm:$0xff]  }
 0x25e   :  { %2916 = vmatpush1.bf16.msra.mxu0 %v11562_v2  ;;  %3002 = vmatpush1.bf16.msra.mxu1 %v11565_v3  ;;  %v11663_v2 = vld [vmem:[#allocation3 + $0x56c] ss:$48 sps:$4 sm:$0xff]   ;;  %v11658_v3 = vld [vmem:[#allocation3 + $0x560] ss:$48 sps:$4 sm:$0xff]  }
 0x25f   :  { %2917 = vmatprep.subr.bf16.mxu0 %v11570_v4  ;;  %3003 = vmatprep.subr.bf16.mxu1 %v11573_v6  ;;  %v11661_v4 = vld [vmem:[#allocation3 + $0x568] ss:$48 sps:$4 sm:$0xff]   ;;  %v11666_v6 = vld [vmem:[#allocation3 + $0x5c4] ss:$48 sps:$4 sm:$0xff]  }
 0x262   :  { %2918 = vmatpush1.bf16.msra.mxu0 %v11568_v8  ;;  %3004 = vmatpush1.bf16.msra.mxu1 %v11571_v9  ;;  %v11669_v8 = vld [vmem:[#allocation3 + $0x5cc] ss:$48 sps:$4 sm:$0xff]   ;;  %v11664_v9 = vld [vmem:[#allocation3 + $0x5c0] ss:$48 sps:$4 sm:$0xff]  }
 0x263   :  { %3016 = vmatprep.subr.bf16.mxu0 %v11576_v10  ;;  %3102 = vmatprep.subr.bf16.mxu1 %v11579_v11  ;;  %v11667_v10 = vld [vmem:[#allocation3 + $0x5c8] ss:$48 sps:$4 sm:$0xff]   ;;  %v11672_v11 = vld [vmem:[#allocation3 + $0x624] ss:$48 sps:$4 sm:$0xff]  }
 0x265   :  { %2920 = vmatmul.mubr.bf16.vlgmr.msra.gmra.mrb[4].mxu0 %v13890_v7  ;;  %3006 = vmatmul.mubr.bf16.vlgmr.msra.gmra.mrb[4].mxu1 %v13890_v7  ;;  %v11592_v7 = vld [vmem:[#allocation3 + $0x140] ss:$48 sps:$4 sm:$0xff]  }
 0x266   :  { %3017 = vmatpush1.bf16.msra.mxu0 %v11574_v12  ;;  %3103 = vmatpush1.bf16.msra.mxu1 %v11577_v13  ;;  %v11675_v12 = vld [vmem:[#allocation3 + $0x62c] ss:$48 sps:$4 sm:$0xff]   ;;  %v11670_v13 = vld [vmem:[#allocation3 + $0x620] ss:$48 sps:$4 sm:$0xff]  }
 0x267   :  { %3018 = vmatprep.subr.bf16.mxu0 %v11582_v14  ;;  %3104 = vmatprep.subr.bf16.mxu1 %v11585_v15  ;;  %v11673_v14 = vld [vmem:[#allocation3 + $0x628] ss:$48 sps:$4 sm:$0xff]   ;;  %v11678_v15 = vld [vmem:[#allocation3 + $0x684] ss:$48 sps:$4 sm:$0xff]  }
 0x268   :  { %3048 = vmatprep.mubr.bf16.mxu0 %v13058_v5  ;;  %3134 = vmatprep.mubr.bf16.mxu1 %v13058_v5  ;;  %v11682_v5 = vld [vmem:[#allocation3 + $0x6e0] ss:$48 sps:$4 sm:$0xff]  }
 0x26a   :  { %3019 = vmatpush1.bf16.msra.mxu0 %v11580_v16  ;;  %3105 = vmatpush1.bf16.msra.mxu1 %v11583_v17  ;;  %v11681_v16 = vld [vmem:[#allocation3 + $0x68c] ss:$48 sps:$4 sm:$0xff]   ;;  %v11676_v17 = vld [vmem:[#allocation3 + $0x680] ss:$48 sps:$4 sm:$0xff]  }
 0x26b   :  { %3020 = vmatprep.subr.bf16.mxu0 %v11588_v18  ;;  %3106 = vmatprep.subr.bf16.mxu1 %v11591_v19  ;;  %v11679_v18 = vld [vmem:[#allocation3 + $0x688] ss:$48 sps:$4 sm:$0xff]   ;;  %v13059_v19 = vld [vmem:[%s14379_s25] ss:$16 sps:$4 sm:$0xff]  }
 0x26e   :  { %3021 = vmatpush1.bf16.msra.mxu0 %v11586_v20  ;;  %3107 = vmatpush1.bf16.msra.mxu1 %v11589_v21  ;;  %v11684_v20 = vld [vmem:[#allocation3 + $0x6e4] ss:$48 sps:$4 sm:$0xff]   ;;  %v11687_v21 = vld [vmem:[#allocation3 + $0x6ec] ss:$48 sps:$4 sm:$0xff]  }
 0x26f   :  { %3022 = vmatprep.subr.bf16.mxu0 %v11594_v22  ;;  %3108 = vmatprep.subr.bf16.mxu1 %v11597_v23  ;;  %v11685_v22 = vld [vmem:[#allocation3 + $0x6e8] ss:$48 sps:$4 sm:$0xff]   ;;  %v13060_v23 = vld [vmem:[%s14379_s25 + $0xc] ss:$16 sps:$4 sm:$0xff]  }
 0x272   :  { %3023 = vmatpush1.bf16.msra.mxu0 %v11592_v7  ;;  %3109 = vmatpush1.bf16.msra.mxu1 %v11595_v24  ;;  %v11690_v7 = vld [vmem:[#allocation3 + $0x744] ss:$48 sps:$4 sm:$0xff]   ;;  %v11693_v24 = vld [vmem:[#allocation3 + $0x74c] ss:$48 sps:$4 sm:$0xff]  }
 0x273   :  { %3024 = vmatprep.subr.bf16.mxu0 %v11600_v25  ;;  %3110 = vmatprep.subr.bf16.mxu1 %v11603_v47  ;;  %v3652_v25 = vlaneseq  ;;  %v11688_v47 = vld [vmem:[#allocation3 + $0x740] ss:$48 sps:$4 sm:$0xff]  }
 0x276   :  { %3025 = vmatpush1.bf16.msra.mxu0 %v11598_v26  ;;  %3111 = vmatpush1.bf16.msra.mxu1 %v11601_v30  ;;  %v11691_v26 = vld [vmem:[#allocation3 + $0x748] ss:$48 sps:$4 sm:$0xff]   ;;  %v11696_v30 = vld [vmem:[#allocation3 + $0x7a4] ss:$48 sps:$4 sm:$0xff]  }
 0x277   :  { %3026 = vmatprep.subr.bf16.mxu0 %v11606_v27  ;;  %3112 = vmatprep.subr.bf16.mxu1 %v11609_v28  ;;  %v11699_v27 = vld [vmem:[#allocation3 + $0x7ac] ss:$48 sps:$4 sm:$0xff]   ;;  %v13911_v28 = vshrl.u32 %v3652_v25, 7  ;;  %v11751_v25 = vld [vmem:[#allocation3 + $0xb08] ss:$48 sps:$4 sm:$0xff]  }
 0x27a   :  { %3027 = vmatpush1.bf16.msra.mxu0 %v11604_v29  ;;  %3113 = vmatpush1.bf16.msra.mxu1 %v11607_v31  ;;  %v11694_v29 = vld [vmem:[#allocation3 + $0x7a0] ss:$48 sps:$4 sm:$0xff]   ;;  %v11697_v31 = vld [vmem:[#allocation3 + $0x7a8] ss:$48 sps:$4 sm:$0xff]  }
 0x27b   :  { %3028 = vmatprep.subr.bf16.mxu0 %v11612_v32  ;;  %3114 = vmatprep.subr.bf16.mxu1 %v11615_v33  ;;  %v11702_v32 = vld [vmem:[#allocation3 + $0x804] ss:$48 sps:$4 sm:$0xff]   ;;  %v11705_v33 = vld [vmem:[#allocation3 + $0x80c] ss:$48 sps:$4 sm:$0xff]  }
 0x27e   :  { %3029 = vmatpush1.bf16.msra.mxu0 %v11610_v34  ;;  %3115 = vmatpush1.bf16.msra.mxu1 %v11613_v35  ;;  %v3647_v34 = vld [vmem:[#allocation7] sm:$0xff]  ;;  %v13914_v35 = vsub.s32 2, %v13911_v28 }
 0x27f   :  { %3030 = vmatprep.subr.bf16.mxu0 %v11618_v36  ;;  %3116 = vmatprep.subr.bf16.mxu1 %v11621_v37  ;;  %v11700_v36 = vld [vmem:[#allocation3 + $0x800] ss:$48 sps:$4 sm:$0xff]   ;;  %v11703_v37 = vld [vmem:[#allocation3 + $0x808] ss:$48 sps:$4 sm:$0xff]  }
 0x282   :  { %3031 = vmatpush1.bf16.msra.mxu0 %v11616_v38  ;;  %3117 = vmatpush1.bf16.msra.mxu1 %v11619_v39  ;;  %v13917_v38 = vsub.s32 0, %v13911_v28  ;;  %v11708_v39 = vld [vmem:[#allocation3 + $0x864] ss:$48 sps:$4 sm:$0xff]  }
 0x283   :  { %3032 = vmatprep.subr.bf16.mxu0 %v11624_v40  ;;  %3118 = vmatprep.subr.bf16.mxu1 %v11627_v41  ;;  %v11711_v40 = vld [vmem:[#allocation3 + $0x86c] ss:$48 sps:$4 sm:$0xff]   ;;  %v13920_v41 = vsub.s32 1, %v13911_v28 }
 0x286   :  { %3033 = vmatpush1.bf16.msra.mxu0 %v11622_v42  ;;  %3119 = vmatpush1.bf16.msra.mxu1 %v11625_v43  ;;  %v13923_v42 = vsub.s32 3, %v13911_v28  ;;  %v13926_v43 = vrot.slane %v3647_v34, %v13914_v35 }
 0x287   :  { %3034 = vmatprep.subr.bf16.mxu0 %v11630_v44  ;;  %3120 = vmatprep.subr.bf16.mxu1 %v11633_v45 }
 0x28a   :  { %3035 = vmatpush1.bf16.msra.mxu0 %v11628_v46  ;;  %3121 = vmatpush1.bf16.msra.mxu1 %v11631_v48  ;;  %v11706_v46 = vld [vmem:[#allocation3 + $0x860] ss:$48 sps:$4 sm:$0xff]   ;;  %v11709_v48 = vld [vmem:[#allocation3 + $0x868] ss:$48 sps:$4 sm:$0xff]  }
 0x28b   :  { %3036 = vmatprep.subr.bf16.mxu0 %v11636_v49  ;;  %3122 = vmatprep.subr.bf16.mxu1 %v11639_v50  ;;  %v13933_v49 = vrot.slane %v3647_v34, %v13917_v38 }
 0x28e   :  { %3037 = vmatpush1.bf16.msra.mxu0 %v11634_v51  ;;  %3123 = vmatpush1.bf16.msra.mxu1 %v11637_v52  ;;  %v13940_v52 = vrot.slane %v3647_v34, %v13920_v41 }
 0x28f   :  { %3038 = vmatprep.subr.bf16.mxu0 %v11642_v53  ;;  %3124 = vmatprep.subr.bf16.mxu1 %v11645_v54  ;;  %v13943_v53 = vrot.slane %v3647_v34, %v13923_v42  ;;  %v11768_v34 = vld [vmem:[#allocation5 + $0x4] ss:$48 sps:$4 sm:$0xff]  }
 0x292   :  { %3039 = vmatpush1.bf16.msra.mxu0 %v11640_v55  ;;  %3125 = vmatpush1.bf16.msra.mxu1 %v11643_v56 }
 0x293   :  { %3040 = vmatprep.subr.bf16.mxu0 %v11648_v57  ;;  %3126 = vmatprep.subr.bf16.mxu1 %v11651_v58 }
 0x296   :  { %3041 = vmatpush1.bf16.msra.mxu0 %v11646_v59  ;;  %3127 = vmatpush1.bf16.msra.mxu1 %v11649_v60  ;;  %v11714_v60 = vld [vmem:[#allocation3 + $0x8c4] ss:$48 sps:$4 sm:$0xff]  }
 0x297   :  { %3042 = vmatprep.subr.bf16.mxu0 %v11654_v61  ;;  %3128 = vmatprep.subr.bf16.mxu1 %v11657_v62  ;;  %v11717_v61 = vld [vmem:[#allocation3 + $0x8cc] ss:$48 sps:$4 sm:$0xff]  }
 0x29a   :  { %3043 = vmatpush1.bf16.msra.mxu0 %v11652_v63  ;;  %3129 = vmatpush1.bf16.msra.mxu1 %v11655_v0  ;;  %v11712_v0 = vld [vmem:[#allocation3 + $0x8c0] ss:$48 sps:$4 sm:$0xff]  }
 0x29b   :  { %3044 = vmatprep.subr.bf16.mxu0 %v11660_v1  ;;  %3130 = vmatprep.subr.bf16.mxu1 %v11663_v2  ;;  %v11715_v1 = vld [vmem:[#allocation3 + $0x8c8] ss:$48 sps:$4 sm:$0xff]   ;;  %v11720_v2 = vld [vmem:[#allocation3 + $0x924] ss:$48 sps:$4 sm:$0xff]  }
 0x29e   :  { %3045 = vmatpush1.bf16.msra.mxu0 %v11658_v3  ;;  %3131 = vmatpush1.bf16.msra.mxu1 %v11661_v4  ;;  %v11723_v3 = vld [vmem:[#allocation3 + $0x92c] ss:$48 sps:$4 sm:$0xff]   ;;  %v11718_v4 = vld [vmem:[#allocation3 + $0x920] ss:$48 sps:$4 sm:$0xff]  }
 0x29f   :  { %3046 = vmatprep.subr.bf16.mxu0 %v11666_v6  ;;  %3132 = vmatprep.subr.bf16.mxu1 %v11669_v8  ;;  %v11721_v6 = vld [vmem:[#allocation3 + $0x928] ss:$48 sps:$4 sm:$0xff]   ;;  %v11726_v8 = vld [vmem:[#allocation3 + $0x984] ss:$48 sps:$4 sm:$0xff]  }
 0x2a2   :  { %3047 = vmatpush1.bf16.msra.mxu0 %v11664_v9  ;;  %3133 = vmatpush1.bf16.msra.mxu1 %v11667_v10  ;;  %v11729_v9 = vld [vmem:[#allocation3 + $0x98c] ss:$48 sps:$4 sm:$0xff]   ;;  %v11724_v10 = vld [vmem:[#allocation3 + $0x980] ss:$48 sps:$4 sm:$0xff]  }
 0x2a3   :  { %3059 = vmatprep.subr.bf16.mxu0 %v11672_v11  ;;  %3145 = vmatprep.subr.bf16.mxu1 %v11675_v12  ;;  %v11727_v11 = vld [vmem:[#allocation3 + $0x988] ss:$48 sps:$4 sm:$0xff]   ;;  %v11732_v12 = vld [vmem:[#allocation3 + $0x9e4] ss:$48 sps:$4 sm:$0xff]  }
 0x2a5   :  { %3049 = vmatmul.mubr.bf16.vlgmr.msra.gmra.mrb[8].mxu0 %v13059_v19  ;;  %3135 = vmatmul.mubr.bf16.vlgmr.msra.gmra.mrb[8].mxu1 %v13059_v19  ;;  %v11739_v19 = vld [vmem:[#allocation3 + $0xa48] ss:$48 sps:$4 sm:$0xff]  }
 0x2a6   :  { %3060 = vmatpush1.bf16.msra.mxu0 %v11670_v13  ;;  %3146 = vmatpush1.bf16.msra.mxu1 %v11673_v14  ;;  %v11735_v13 = vld [vmem:[#allocation3 + $0x9ec] ss:$48 sps:$4 sm:$0xff]   ;;  %v11730_v14 = vld [vmem:[#allocation3 + $0x9e0] ss:$48 sps:$4 sm:$0xff]  }
 0x2a7   :  { %3061 = vmatprep.subr.bf16.mxu0 %v11678_v15  ;;  %3147 = vmatprep.subr.bf16.mxu1 %v11681_v16  ;;  %v11733_v15 = vld [vmem:[#allocation3 + $0x9e8] ss:$48 sps:$4 sm:$0xff]   ;;  %v11738_v16 = vld [vmem:[#allocation3 + $0xa44] ss:$48 sps:$4 sm:$0xff]  }
 0x2a8   :  { %3091 = vmatprep.mubr.bf16.mxu0 %v13060_v23  ;;  %3177 = vmatprep.mubr.bf16.mxu1 %v13060_v23  ;;  %v11750_v23 = vld [vmem:[#allocation3 + $0xb04] ss:$48 sps:$4 sm:$0xff]  }
 0x2aa   :  { %3062 = vmatpush1.bf16.msra.mxu0 %v11676_v17  ;;  %3148 = vmatpush1.bf16.msra.mxu1 %v11679_v18  ;;  %v11741_v17 = vld [vmem:[#allocation3 + $0xa4c] ss:$48 sps:$4 sm:$0xff]   ;;  %v11736_v18 = vld [vmem:[#allocation3 + $0xa40] ss:$48 sps:$4 sm:$0xff]  }
 0x2ab   :  { %3063 = vmatprep.subr.bf16.mxu0 %v11684_v20  ;;  %3149 = vmatprep.subr.bf16.mxu1 %v11687_v21  ;;  %v11744_v20 = vld [vmem:[#allocation3 + $0xaa4] ss:$48 sps:$4 sm:$0xff]   ;;  %v11747_v21 = vld [vmem:[#allocation3 + $0xaac] ss:$48 sps:$4 sm:$0xff]  }
 0x2ae   :  { %3064 = vmatpush1.bf16.msra.mxu0 %v11682_v5  ;;  %3150 = vmatpush1.bf16.msra.mxu1 %v11685_v22  ;;  %v11742_v5 = vld [vmem:[#allocation3 + $0xaa0] ss:$48 sps:$4 sm:$0xff]   ;;  %v11745_v22 = vld [vmem:[#allocation3 + $0xaa8] ss:$48 sps:$4 sm:$0xff]  }
 0x2af   :  { %3065 = vmatprep.subr.bf16.mxu0 %v11690_v7  ;;  %3151 = vmatprep.subr.bf16.mxu1 %v11693_v24  ;;  %v11753_v7 = vld [vmem:[#allocation3 + $0xb0c] ss:$48 sps:$4 sm:$0xff]   ;;  %v11748_v24 = vld [vmem:[#allocation3 + $0xb00] ss:$48 sps:$4 sm:$0xff]  }
 0x2b2   :  { %3066 = vmatpush1.bf16.msra.mxu0 %v11688_v47  ;;  %3152 = vmatpush1.bf16.msra.mxu1 %v11691_v26  ;;  %v11756_v47 = vld [vmem:[#allocation3 + $0xb64] ss:$48 sps:$4 sm:$0xff]   ;;  %v11759_v26 = vld [vmem:[#allocation3 + $0xb6c] ss:$48 sps:$4 sm:$0xff]  }
 0x2b3   :  { %3067 = vmatprep.subr.bf16.mxu0 %v11696_v30  ;;  %3153 = vmatprep.subr.bf16.mxu1 %v11699_v27  ;;  %v11754_v30 = vld [vmem:[#allocation3 + $0xb60] ss:$48 sps:$4 sm:$0xff]   ;;  %v11757_v27 = vld [vmem:[#allocation3 + $0xb68] ss:$48 sps:$4 sm:$0xff]  }
 0x2b6   :  { %3068 = vmatpush1.bf16.msra.mxu0 %v11694_v29  ;;  %3154 = vmatpush1.bf16.msra.mxu1 %v11697_v31  ;;  %v11762_v29 = vld [vmem:[#allocation3 + $0xbc4] ss:$48 sps:$4 sm:$0xff]   ;;  %v11765_v31 = vld [vmem:[#allocation3 + $0xbcc] ss:$48 sps:$4 sm:$0xff]  }
 0x2b7   :  { %3069 = vmatprep.subr.bf16.mxu0 %v11702_v32  ;;  %3155 = vmatprep.subr.bf16.mxu1 %v11705_v33  ;;  %v11760_v32 = vld [vmem:[#allocation3 + $0xbc0] ss:$48 sps:$4 sm:$0xff]   ;;  %v11763_v33 = vld [vmem:[#allocation3 + $0xbc8] ss:$48 sps:$4 sm:$0xff]  }
 0x2b8   :  { %v13928_v44 = vpop.f32.mrb[0].mxu0  ;;  %v13930_v45 = vpop.f32.mrb[0].mxu1 }
 0x2b9   :  { %v13935_v50 = vpop.f32.mrb[1].mxu0  ;;  %v13937_v51 = vpop.f32.mrb[1].mxu1 }
 0x2ba   :  { %v2753_v54 = vpop.f32.mrb[2].mxu0  ;;  %v2839_v55 = vpop.f32.mrb[2].mxu1  ;;  %3070 = vmatpush1.bf16.msra.mxu0 %v11700_v36  ;;  %3156 = vmatpush1.bf16.msra.mxu1 %v11703_v37  ;;  %v11771_v36 = vld [vmem:[#allocation5 + $0xc] ss:$48 sps:$4 sm:$0xff]   ;;  %v11766_v37 = vld [vmem:[#allocation5] ss:$48 sps:$4 sm:$0xff]  }
 0x2bb   :  { %v13946_v56 = vadd.f32 %v13933_v49, %v2753_v54  ;;  %v13949_v57 = vadd.f32 %v13926_v43, %v2839_v55  ;;  %v2755_v58 = vpop.f32.mrb[3].mxu0  ;;  %v2841_v59 = vpop.f32.mrb[3].mxu1  ;;  %3071 = vmatprep.subr.bf16.mxu0 %v11708_v39  ;;  %3157 = vmatprep.subr.bf16.mxu1 %v11711_v40  ;;  %v11769_v39 = vld [vmem:[#allocation5 + $0x8] ss:$48 sps:$4 sm:$0xff]   ;;  %v11774_v40 = vld [vmem:[#allocation5 + $0x64] ss:$48 sps:$4 sm:$0xff]  }
 0x2bc   :  { %v13952_v62 = vadd.f32 %v13940_v52, %v2755_v58  ;;  %v13955_v63 = vadd.f32 %v13943_v53, %v2841_v59  ;;  %v11772_v54 = vld [vmem:[#allocation5 + $0x60] ss:$48 sps:$4 sm:$0xff]   ;;  %v11775_v55 = vld [vmem:[#allocation5 + $0x68] ss:$48 sps:$4 sm:$0xff]   ;;  %v11780_v58 = vld [vmem:[#allocation5 + $0xc4] ss:$48 sps:$4 sm:$0xff]  }
 0x2bd   :  { %v11783_v59 = vld [vmem:[#allocation5 + $0xcc] ss:$48 sps:$4 sm:$0xff]  }
 0x2be   :  { %3072 = vmatpush1.bf16.msra.mxu0 %v11706_v46  ;;  %3158 = vmatpush1.bf16.msra.mxu1 %v11709_v48  ;;  %v11777_v46 = vld [vmem:[#allocation5 + $0x6c] ss:$48 sps:$4 sm:$0xff]   ;;  %v13061_v48 = vld [vmem:[%s14379_s25 + $0x8] ss:$16 sps:$4 sm:$0xff]  }
 0x2bf   :  { %3073 = vmatprep.subr.bf16.mxu0 %v11714_v60  ;;  %3159 = vmatprep.subr.bf16.mxu1 %v11717_v61  ;;  %v11778_v60 = vld [vmem:[#allocation5 + $0xc0] ss:$48 sps:$4 sm:$0xff]   ;;  %v11781_v61 = vld [vmem:[#allocation5 + $0xc8] ss:$48 sps:$4 sm:$0xff]  }
 0x2c2   :  { %3074 = vmatpush1.bf16.msra.mxu0 %v11712_v0  ;;  %3160 = vmatpush1.bf16.msra.mxu1 %v11715_v1  ;;  %v11786_v0 = vld [vmem:[#allocation5 + $0x124] ss:$48 sps:$4 sm:$0xff]   ;;  %v11789_v1 = vld [vmem:[#allocation5 + $0x12c] ss:$48 sps:$4 sm:$0xff]  }
 0x2c3   :  { %3075 = vmatprep.subr.bf16.mxu0 %v11720_v2  ;;  %3161 = vmatprep.subr.bf16.mxu1 %v11723_v3  ;;  %v11784_v2 = vld [vmem:[#allocation5 + $0x120] ss:$48 sps:$4 sm:$0xff]   ;;  %v11787_v3 = vld [vmem:[#allocation5 + $0x128] ss:$48 sps:$4 sm:$0xff]  }
 0x2c6   :  { %3076 = vmatpush1.bf16.msra.mxu0 %v11718_v4  ;;  %3162 = vmatpush1.bf16.msra.mxu1 %v11721_v6  ;;  %v11792_v4 = vld [vmem:[#allocation5 + $0x184] ss:$48 sps:$4 sm:$0xff]   ;;  %v11795_v6 = vld [vmem:[#allocation5 + $0x18c] ss:$48 sps:$4 sm:$0xff]  }
 0x2c7   :  { %3077 = vmatprep.subr.bf16.mxu0 %v11726_v8  ;;  %3163 = vmatprep.subr.bf16.mxu1 %v11729_v9  ;;  %v11790_v8 = vld [vmem:[#allocation5 + $0x180] ss:$48 sps:$4 sm:$0xff]   ;;  %v11793_v9 = vld [vmem:[#allocation5 + $0x188] ss:$48 sps:$4 sm:$0xff]  }
 0x2ca   :  { %3078 = vmatpush1.bf16.msra.mxu0 %v11724_v10  ;;  %3164 = vmatpush1.bf16.msra.mxu1 %v11727_v11  ;;  %v11798_v10 = vld [vmem:[#allocation5 + $0x1e4] ss:$48 sps:$4 sm:$0xff]   ;;  %v11801_v11 = vld [vmem:[#allocation5 + $0x1ec] ss:$48 sps:$4 sm:$0xff]  }
 0x2cb   :  { %3079 = vmatprep.subr.bf16.mxu0 %v11732_v12  ;;  %3165 = vmatprep.subr.bf16.mxu1 %v11735_v13  ;;  %v11796_v12 = vld [vmem:[#allocation5 + $0x1e0] ss:$48 sps:$4 sm:$0xff]   ;;  %v11799_v13 = vld [vmem:[#allocation5 + $0x1e8] ss:$48 sps:$4 sm:$0xff]  }
 0x2ce   :  { %3080 = vmatpush1.bf16.msra.mxu0 %v11730_v14  ;;  %3166 = vmatpush1.bf16.msra.mxu1 %v11733_v15  ;;  %v11804_v14 = vld [vmem:[#allocation5 + $0x244] ss:$48 sps:$4 sm:$0xff]   ;;  %v11807_v15 = vld [vmem:[#allocation5 + $0x24c] ss:$48 sps:$4 sm:$0xff]  }
 0x2cf   :  { %3081 = vmatprep.subr.bf16.mxu0 %v11738_v16  ;;  %3167 = vmatprep.subr.bf16.mxu1 %v11741_v17  ;;  %v11802_v16 = vld [vmem:[#allocation5 + $0x240] ss:$48 sps:$4 sm:$0xff]   ;;  %v11805_v17 = vld [vmem:[#allocation5 + $0x248] ss:$48 sps:$4 sm:$0xff]  }
 0x2d2   :  { %3082 = vmatpush1.bf16.msra.mxu0 %v11736_v18  ;;  %3168 = vmatpush1.bf16.msra.mxu1 %v11739_v19  ;;  %v11810_v18 = vld [vmem:[#allocation5 + $0x2a4] ss:$48 sps:$4 sm:$0xff]   ;;  %v11813_v19 = vld [vmem:[#allocation5 + $0x2ac] ss:$48 sps:$4 sm:$0xff]  }
 0x2d3   :  { %3083 = vmatprep.subr.bf16.mxu0 %v11744_v20  ;;  %3169 = vmatprep.subr.bf16.mxu1 %v11747_v21  ;;  %v11808_v20 = vld [vmem:[#allocation5 + $0x2a0] ss:$48 sps:$4 sm:$0xff]   ;;  %v11811_v21 = vld [vmem:[#allocation5 + $0x2a8] ss:$48 sps:$4 sm:$0xff]  }
 0x2d6   :  { %3084 = vmatpush1.bf16.msra.mxu0 %v11742_v5  ;;  %3170 = vmatpush1.bf16.msra.mxu1 %v11745_v22  ;;  %v11816_v5 = vld [vmem:[#allocation5 + $0x304] ss:$48 sps:$4 sm:$0xff]   ;;  %v11819_v22 = vld [vmem:[#allocation5 + $0x30c] ss:$48 sps:$4 sm:$0xff]  }
 0x2d7   :  { %3085 = vmatprep.subr.bf16.mxu0 %v11750_v23  ;;  %3171 = vmatprep.subr.bf16.mxu1 %v11753_v7  ;;  %v11814_v23 = vld [vmem:[#allocation5 + $0x300] ss:$48 sps:$4 sm:$0xff]   ;;  %v11817_v7 = vld [vmem:[#allocation5 + $0x308] ss:$48 sps:$4 sm:$0xff]  }
 0x2da   :  { %3086 = vmatpush1.bf16.msra.mxu0 %v11748_v24  ;;  %3172 = vmatpush1.bf16.msra.mxu1 %v11751_v25  ;;  %v11822_v24 = vld [vmem:[#allocation5 + $0x364] ss:$48 sps:$4 sm:$0xff]   ;;  %v11825_v25 = vld [vmem:[#allocation5 + $0x36c] ss:$48 sps:$4 sm:$0xff]  }
 0x2db   :  { %3087 = vmatprep.subr.bf16.mxu0 %v11756_v47  ;;  %3173 = vmatprep.subr.bf16.mxu1 %v11759_v26  ;;  %v11820_v47 = vld [vmem:[#allocation5 + $0x360] ss:$48 sps:$4 sm:$0xff]   ;;  %v11823_v26 = vld [vmem:[#allocation5 + $0x368] ss:$48 sps:$4 sm:$0xff]  }
 0x2de   :  { %3088 = vmatpush1.bf16.msra.mxu0 %v11754_v30  ;;  %3174 = vmatpush1.bf16.msra.mxu1 %v11757_v27  ;;  %v11828_v30 = vld [vmem:[#allocation5 + $0x3c4] ss:$48 sps:$4 sm:$0xff]   ;;  %v11831_v27 = vld [vmem:[#allocation5 + $0x3cc] ss:$48 sps:$4 sm:$0xff]  }
 0x2df   :  { %3089 = vmatprep.subr.bf16.mxu0 %v11762_v29  ;;  %3175 = vmatprep.subr.bf16.mxu1 %v11765_v31  ;;  %v11826_v29 = vld [vmem:[#allocation5 + $0x3c0] ss:$48 sps:$4 sm:$0xff]   ;;  %v11829_v31 = vld [vmem:[#allocation5 + $0x3c8] ss:$48 sps:$4 sm:$0xff]  }
 0x2e2   :  { %3090 = vmatpush1.bf16.msra.mxu0 %v11760_v32  ;;  %3176 = vmatpush1.bf16.msra.mxu1 %v11763_v33  ;;  %v3678_v32 = vsub.s32 6, %v13911_v28  ;;  %v3670_v33 = vsub.s32 4, %v13911_v28 }
 0x2e3   :  { %5749 = vmatprep.subr.bf16.mxu0 %v11768_v34  ;;  %5831 = vmatprep.subr.bf16.mxu1 %v11771_v36  ;;  %v3674_v34 = vsub.s32 5, %v13911_v28  ;;  %v3682_v36 = vsub.s32 7, %v13911_v28 }
 0x2e5   :  { %3092 = vmatmul.mubr.bf16.vlgmr.msra.gmra.mrb[8].mxu0 %v13061_v48  ;;  %3178 = vmatmul.mubr.bf16.vlgmr.msra.gmra.mrb[8].mxu1 %v13061_v48 }
 0x2e6   :  { %5750 = vmatpush1.bf16.msra.mxu0 %v11766_v37  ;;  %5832 = vmatpush1.bf16.msra.mxu1 %v11769_v39  ;;  %v13062_v37 = vld [vmem:[#allocation7] sm:$0xff] }
 0x2e7   :  { %5751 = vmatprep.subr.bf16.mxu0 %v11774_v40  ;;  %5833 = vmatprep.subr.bf16.mxu1 %v11777_v46  ;;  %v13964_v39 = vrot.slane %v13062_v37, %v3678_v32  ;;  %v13972_v48 = vrot.slane %v13062_v37, %v3670_v33 }
 0x2ea   :  { %5752 = vmatpush1.bf16.msra.mxu0 %v11772_v54  ;;  %5834 = vmatpush1.bf16.msra.mxu1 %v11775_v55 }
 0x2eb   :  { %5753 = vmatprep.subr.bf16.mxu0 %v11780_v58  ;;  %5835 = vmatprep.subr.bf16.mxu1 %v11783_v59  ;;  %v11834_v58 = vld [vmem:[#allocation5 + $0x424] ss:$48 sps:$4 sm:$0xff]   ;;  %v11837_v59 = vld [vmem:[#allocation5 + $0x42c] ss:$48 sps:$4 sm:$0xff]  }
 0x2ee   :  { %5754 = vmatpush1.bf16.msra.mxu0 %v11778_v60  ;;  %5836 = vmatpush1.bf16.msra.mxu1 %v11781_v61  ;;  %v13980_v60 = vrot.slane %v13062_v37, %v3674_v34  ;;  %v13982_v61 = vrot.slane %v13062_v37, %v3682_v36 }
 0x2ef   :  { %5755 = vmatprep.subr.bf16.mxu0 %v11786_v0  ;;  %5837 = vmatprep.subr.bf16.mxu1 %v11789_v1 }
 0x2f2   :  { %5756 = vmatpush1.bf16.msra.mxu0 %v11784_v2  ;;  %5838 = vmatpush1.bf16.msra.mxu1 %v11787_v3  ;;  %v11832_v2 = vld [vmem:[#allocation5 + $0x420] ss:$48 sps:$4 sm:$0xff]   ;;  %v11835_v3 = vld [vmem:[#allocation5 + $0x428] ss:$48 sps:$4 sm:$0xff]  }
 0x2f3   :  { %5757 = vmatprep.subr.bf16.mxu0 %v11792_v4  ;;  %5839 = vmatprep.subr.bf16.mxu1 %v11795_v6 }
 0x2f6   :  { %5758 = vmatpush1.bf16.msra.mxu0 %v11790_v8  ;;  %5840 = vmatpush1.bf16.msra.mxu1 %v11793_v9 }
 0x2f7   :  { %5759 = vmatprep.subr.bf16.mxu0 %v11798_v10  ;;  %5841 = vmatprep.subr.bf16.mxu1 %v11801_v11 }
 0x2fa   :  { %5760 = vmatpush1.bf16.msra.mxu0 %v11796_v12  ;;  %5842 = vmatpush1.bf16.msra.mxu1 %v11799_v13  ;;  %v11840_v12 = vld [vmem:[#allocation5 + $0x484] ss:$48 sps:$4 sm:$0xff]   ;;  %v11843_v13 = vld [vmem:[#allocation5 + $0x48c] ss:$48 sps:$4 sm:$0xff]  }
 0x2fb   :  { %5761 = vmatprep.subr.bf16.mxu0 %v11804_v14  ;;  %5843 = vmatprep.subr.bf16.mxu1 %v11807_v15  ;;  %v11838_v14 = vld [vmem:[#allocation5 + $0x480] ss:$48 sps:$4 sm:$0xff]   ;;  %v11841_v15 = vld [vmem:[#allocation5 + $0x488] ss:$48 sps:$4 sm:$0xff]  }
 0x2fe   :  { %5762 = vmatpush1.bf16.msra.mxu0 %v11802_v16  ;;  %5844 = vmatpush1.bf16.msra.mxu1 %v11805_v17  ;;  %v11846_v16 = vld [vmem:[#allocation5 + $0x4e4] ss:$48 sps:$4 sm:$0xff]   ;;  %v11849_v17 = vld [vmem:[#allocation5 + $0x4ec] ss:$48 sps:$4 sm:$0xff]  }
 0x2ff   :  { %5763 = vmatprep.subr.bf16.mxu0 %v11810_v18  ;;  %5845 = vmatprep.subr.bf16.mxu1 %v11813_v19  ;;  %v11844_v18 = vld [vmem:[#allocation5 + $0x4e0] ss:$48 sps:$4 sm:$0xff]   ;;  %v11847_v19 = vld [vmem:[#allocation5 + $0x4e8] ss:$48 sps:$4 sm:$0xff]  }
 0x302   :  { %5764 = vmatpush1.bf16.msra.mxu0 %v11808_v20  ;;  %5846 = vmatpush1.bf16.msra.mxu1 %v11811_v21  ;;  %v11852_v20 = vld [vmem:[#allocation5 + $0x544] ss:$48 sps:$4 sm:$0xff]   ;;  %v11855_v21 = vld [vmem:[#allocation5 + $0x54c] ss:$48 sps:$4 sm:$0xff]  }
 0x303   :  { %5765 = vmatprep.subr.bf16.mxu0 %v11816_v5  ;;  %5847 = vmatprep.subr.bf16.mxu1 %v11819_v22  ;;  %v11850_v5 = vld [vmem:[#allocation5 + $0x540] ss:$48 sps:$4 sm:$0xff]   ;;  %v11853_v22 = vld [vmem:[#allocation5 + $0x548] ss:$48 sps:$4 sm:$0xff]  }
 0x306   :  { %5766 = vmatpush1.bf16.msra.mxu0 %v11814_v23  ;;  %5848 = vmatpush1.bf16.msra.mxu1 %v11817_v7  ;;  %v11858_v23 = vld [vmem:[#allocation5 + $0x5a4] ss:$48 sps:$4 sm:$0xff]   ;;  %v11861_v7 = vld [vmem:[#allocation5 + $0x5ac] ss:$48 sps:$4 sm:$0xff]  }
 0x307   :  { %5767 = vmatprep.subr.bf16.mxu0 %v11822_v24  ;;  %5849 = vmatprep.subr.bf16.mxu1 %v11825_v25  ;;  %v11856_v24 = vld [vmem:[#allocation5 + $0x5a0] ss:$48 sps:$4 sm:$0xff]   ;;  %v11859_v25 = vld [vmem:[#allocation5 + $0x5a8] ss:$48 sps:$4 sm:$0xff]  }
 0x30a   :  { %5768 = vmatpush1.bf16.msra.mxu0 %v11820_v47  ;;  %5850 = vmatpush1.bf16.msra.mxu1 %v11823_v26  ;;  %v11864_v47 = vld [vmem:[#allocation5 + $0x604] ss:$48 sps:$4 sm:$0xff]   ;;  %v11867_v26 = vld [vmem:[#allocation5 + $0x60c] ss:$48 sps:$4 sm:$0xff]  }
 0x30b   :  { %5769 = vmatprep.subr.bf16.mxu0 %v11828_v30  ;;  %5851 = vmatprep.subr.bf16.mxu1 %v11831_v27  ;;  %v3712_v30 = vadd.f32 %v13933_v49, %v13928_v44  ;;  %v3714_v27 = vadd.f32 %v13926_v43, %v13930_v45 }
 0x30d   :  { %v10166_v32 = vmul.f32 -1.442695, %v3712_v30  ;;  %v10168_v36 = vmul.f32 -1.442695, %v3714_v27 }
 0x30e   :  { %5770 = vmatpush1.bf16.msra.mxu0 %v11826_v29  ;;  %5852 = vmatpush1.bf16.msra.mxu1 %v11829_v31  ;;  %v3713_v29 = vadd.f32 %v13940_v52, %v13935_v50  ;;  %v3715_v31 = vadd.f32 %v13943_v53, %v13937_v51 }
 0x30f   :  { %5771 = vmatprep.subr.bf16.mxu0 %v11834_v58  ;;  %5853 = vmatprep.subr.bf16.mxu1 %v11837_v59  ;;  %12906 = vpow2.f32 %v10166_v32 }
 0x310   :  { %v10167_v37 = vmul.f32 -1.442695, %v3713_v29  ;;  %v10169_v58 = vmul.f32 -1.442695, %v3715_v31  ;;  %12908 = vpow2.f32 %v10168_v36 }
 0x312   :  { %5772 = vmatpush1.bf16.msra.mxu0 %v11832_v2  ;;  %5854 = vmatpush1.bf16.msra.mxu1 %v11835_v3  ;;  %12910 = vpow2.f32 %v10167_v37 }
 0x313   :  { %5773 = vmatprep.subr.bf16.mxu0 %v11840_v12  ;;  %5855 = vmatprep.subr.bf16.mxu1 %v11843_v13  ;;  %12912 = vpow2.f32 %v10169_v58 }
 0x316   :  { %5774 = vmatpush1.bf16.msra.mxu0 %v11838_v14  ;;  %5856 = vmatpush1.bf16.msra.mxu1 %v11841_v15 }
 0x317   :  { %5775 = vmatprep.subr.bf16.mxu0 %v11846_v16  ;;  %5857 = vmatprep.subr.bf16.mxu1 %v11849_v17 }
 0x319   :  { %v12907_v51 = vpop.eup %12906 }
 0x31a   :  { %5776 = vmatpush1.bf16.msra.mxu0 %v11844_v18  ;;  %5858 = vmatpush1.bf16.msra.mxu1 %v11847_v19  ;;  %v12909_v53 = vpop.eup %12908  ;;  %v3736_v3 = vadd.f32 1.0, %v12907_v51 }
 0x31b   :  { %5777 = vmatprep.subr.bf16.mxu0 %v11852_v20  ;;  %5859 = vmatprep.subr.bf16.mxu1 %v11855_v21 }
 0x31e   :  { %5778 = vmatpush1.bf16.msra.mxu0 %v11850_v5  ;;  %5860 = vmatpush1.bf16.msra.mxu1 %v11853_v22 }
 0x31f   :  { %5779 = vmatprep.subr.bf16.mxu0 %v11858_v23  ;;  %5861 = vmatprep.subr.bf16.mxu1 %v11861_v7 }
 0x322   :  { %5780 = vmatpush1.bf16.msra.mxu0 %v11856_v24  ;;  %5862 = vmatpush1.bf16.msra.mxu1 %v11859_v25 }
 0x323   :  { %5790 = vmatprep.subr.bf16.mxu0 %v11864_v47  ;;  %5872 = vmatprep.subr.bf16.mxu1 %v11867_v26 }
 0x338   :  { %v13966_v40 = vpop.f32.mrb[4].mxu0  ;;  %v13968_v46 = vpop.f32.mrb[4].mxu1 }
 0x339   :  { %v13974_v54 = vpop.f32.mrb[5].mxu0  ;;  %v13976_v55 = vpop.f32.mrb[5].mxu1  ;;  %v3716_v44 = vadd.f32 %v13972_v48, %v13966_v40  ;;  %v3718_v43 = vadd.f32 %v13964_v39, %v13968_v46  ;;  %v3738_v40 = vadd.f32 1.0, %v12909_v53 }
 0x33a   :  { %v2925_v0 = vpop.f32.mrb[6].mxu0  ;;  %v3011_v1 = vpop.f32.mrb[6].mxu1  ;;  %v3717_v45 = vadd.f32 %v13980_v60, %v13974_v54  ;;  %v3719_v49 = vadd.f32 %v13982_v61, %v13976_v55  ;;  %v3649_v55 = vld [vmem:[#allocation8] sm:$0xf] }
 0x33b   :  { %v13985_v4 = vadd.f32 %v13972_v48, %v2925_v0  ;;  %v13988_v6 = vadd.f32 %v13964_v39, %v3011_v1  ;;  %v2927_v8 = vpop.f32.mrb[7].mxu0  ;;  %v3013_v9 = vpop.f32.mrb[7].mxu1  ;;  %v10170_v50 = vmul.f32 -1.442695, %v3716_v44  ;;  %v10172_v52 = vmul.f32 -1.442695, %v3718_v43 }
 0x33c   :  { %v13991_v10 = vadd.f32 %v13980_v60, %v2927_v8  ;;  %v13994_v11 = vadd.f32 %v13982_v61, %v3013_v9  ;;  %v10171_v59 = vmul.f32 -1.442695, %v3717_v45  ;;  %v12911_v0 = vpop.eup %12910  ;;  %v10173_v1 = vmul.f32 -1.442695, %v3719_v49  ;;  %v3648_v61 = vld [vmem:[#allocation7 + $0x8] sm:$0xf] }
 0x33d   :  { %v12913_v2 = vpop.eup %12912  ;;  %12914 = vpow2.f32 %v10170_v50  ;;  %v3737_v48 = vadd.f32 1.0, %v12911_v0  ;;  %v14013_v14 = vrot.slane %v3649_v55, %v13917_v38  ;;  %v14016_v15 = vrot.slane %v3649_v55, %v13914_v35 }
 0x33e   :  { %12916 = vpow2.f32 %v10172_v52  ;;  %v3739_v39 = vadd.f32 1.0, %v12913_v2  ;;  %v3687_v18 = vrot.slane %v3648_v61, %v13917_v38  ;;  %v3695_v19 = vrot.slane %v3648_v61, %v13914_v35 }
 0x33f   :  { %12918 = vpow2.f32 %v10171_v59  ;;  %v14021_v20 = vrot.slane %v3649_v55, %v13920_v41  ;;  %v3691_v22 = vrot.slane %v3648_v61, %v13920_v41  ;;  %v3699_v23 = vrot.slane %v3648_v61, %v13923_v42 }
 0x340   :  { %12920 = vpow2.f32 %v10173_v1  ;;  %v14026_v7 = vrot.slane %v3649_v55, %v13923_v42 }
 0x341   :  { %12922 = vrcp.f32 %v3736_v3 }
 0x342   :  { %12924 = vrcp.f32 %v3738_v40 }
 0x343   :  { %12926 = vrcp.f32 %v3737_v48 }
 0x344   :  { %12928 = vrcp.f32 %v3739_v39 }
 0x347   :  { %v12915_v46 = vpop.eup %12914 }
 0x348   :  { %v12917_v54 = vpop.eup %12916  ;;  %v3760_v9 = vadd.f32 1.0, %v12915_v46 }
 0x349   :  { %v12919_v60 = vpop.eup %12918  ;;  %v3762_v13 = vadd.f32 1.0, %v12917_v54 }
 0x34a   :  { %v12921_v8 = vpop.eup %12920  ;;  %v3761_v17 = vadd.f32 1.0, %v12919_v60  ;;  %12930 = vrcp.f32 %v3760_v9 }
 0x34b   :  { %v12923_v12 = vpop.eup %12922  ;;  %v3763_v5 = vadd.f32 1.0, %v12921_v8  ;;  %12932 = vrcp.f32 %v3762_v13 }
 0x34c   :  { %v12925_v16 = vpop.eup %12924  ;;  %v3793_v47 = vmul.f32 %v12923_v12, %v14013_v14  ;;  %12934 = vrcp.f32 %v3761_v17 }
 0x34d   :  { %v12927_v21 = vpop.eup %12926  ;;  %v3795_v30 = vmul.f32 %v12925_v16, %v14016_v15  ;;  %12936 = vrcp.f32 %v3763_v5  ;;  %v11862_v5 = vld [vmem:[#allocation5 + $0x600] ss:$48 sps:$4 sm:$0xff]  }
 0x34e   :  { %v12929_v24 = vpop.eup %12928  ;;  %v3794_v32 = vmul.f32 %v12927_v21, %v14021_v20 }
 0x34f   :  { %v3796_v44 = vmul.f32 %v12929_v24, %v14026_v7  ;;  %v11870_v24 = vld [vmem:[#allocation5 + $0x664] ss:$48 sps:$4 sm:$0xff]  }
 0x354   :  { %v12931_v40 = vpop.eup %12930 }
 0x355   :  { %v12933_v48 = vpop.eup %12932  ;;  %v3805_v54 = vsub.f32 1.0, %v12931_v40  ;;  %v11900_v40 = vld [vmem:[#allocation5 + $0x844] ss:$48 sps:$4 sm:$0xff]  }
 0x356   :  { %v12935_v39 = vpop.eup %12934  ;;  %v3807_v60 = vsub.f32 1.0, %v12933_v48  ;;  %v11903_v48 = vld [vmem:[#allocation5 + $0x84c] ss:$48 sps:$4 sm:$0xff]  }
 0x357   :  { %v12937_v46 = vpop.eup %12936  ;;  %v3806_v8 = vsub.f32 1.0, %v12935_v39  ;;  %v11898_v39 = vld [vmem:[#allocation5 + $0x840] ss:$48 sps:$4 sm:$0xff]  }
 0x358   :  { %v3808_v13 = vsub.f32 1.0, %v12937_v46  ;;  %v11901_v46 = vld [vmem:[#allocation5 + $0x848] ss:$48 sps:$4 sm:$0xff]  }
 0x3b8   :  { %v3093_v25 = vpop.f32.mrb[8].mxu0  ;;  %v3179_v26 = vpop.f32.mrb[8].mxu1 }
 0x3b9   :  { %v3720_v27 = vadd.f32 %v3687_v18, %v3093_v25  ;;  %v3722_v29 = vadd.f32 %v3695_v19, %v3179_v26  ;;  %v3095_v31 = vpop.f32.mrb[9].mxu0  ;;  %v3181_v36 = vpop.f32.mrb[9].mxu1  ;;  %v11873_v25 = vld [vmem:[#allocation5 + $0x66c] ss:$48 sps:$4 sm:$0xff]   ;;  %v11868_v26 = vld [vmem:[#allocation5 + $0x660] ss:$48 sps:$4 sm:$0xff]  }
 0x3ba   :  { %v3721_v37 = vadd.f32 %v3691_v22, %v3095_v31  ;;  %v3723_v58 = vadd.f32 %v3699_v23, %v3181_v36  ;;  %v3097_v43 = vpop.f32.mrb[10].mxu0  ;;  %v3183_v45 = vpop.f32.mrb[10].mxu1  ;;  %v11874_v31 = vld [vmem:[#allocation5 + $0x6c0] ss:$48 sps:$4 sm:$0xff]   ;;  %v11882_v36 = vld [vmem:[#allocation5 + $0x724] ss:$48 sps:$4 sm:$0xff]  }
 0x3bb   :  { %v3797_v49 = vadd.f32 %v3793_v47, %v3720_v27  ;;  %v3799_v50 = vadd.f32 %v3795_v30, %v3722_v29  ;;  %v14032_v51 = vadd.f32 %v3687_v18, %v3097_v43  ;;  %v14034_v52 = vadd.f32 %v3695_v19, %v3183_v45  ;;  %v3099_v53 = vpop.f32.mrb[11].mxu0  ;;  %v3185_v59 = vpop.f32.mrb[11].mxu1  ;;  %v11871_v30 = vld [vmem:[#allocation5 + $0x668] ss:$48 sps:$4 sm:$0xff]   ;;  %v11876_v27 = vld [vmem:[#allocation5 + $0x6c4] ss:$48 sps:$4 sm:$0xff]  }
 0x3bc   :  { %v3798_v0 = vadd.f32 %v3794_v32, %v3721_v37  ;;  %v3800_v1 = vadd.f32 %v3796_v44, %v3723_v58  ;;  %v14036_v2 = vadd.f32 %v3691_v22, %v3099_v53  ;;  %v14038_v3 = vadd.f32 %v3699_v23, %v3185_v59  ;;  %v11865_v22 = vld [vmem:[#allocation5 + $0x608] ss:$48 sps:$4 sm:$0xff]   ;;  %v11879_v29 = vld [vmem:[#allocation5 + $0x6cc] ss:$48 sps:$4 sm:$0xff]   ;;  %v11880_v58 = vld [vmem:[#allocation5 + $0x720] ss:$48 sps:$4 sm:$0xff]  }
 0x3bd   :  { %12938 = vtanh.f32 %v3797_v49  ;;  %v11877_v32 = vld [vmem:[#allocation5 + $0x6c8] ss:$48 sps:$4 sm:$0xff]   ;;  %v11885_v37 = vld [vmem:[#allocation5 + $0x72c] ss:$48 sps:$4 sm:$0xff]   ;;  %v11888_v43 = vld [vmem:[#allocation5 + $0x784] ss:$48 sps:$4 sm:$0xff]  }
 0x3be   :  { %12940 = vtanh.f32 %v3799_v50  ;;  %v11883_v44 = vld [vmem:[#allocation5 + $0x728] ss:$48 sps:$4 sm:$0xff]   ;;  %v11891_v45 = vld [vmem:[#allocation5 + $0x78c] ss:$48 sps:$4 sm:$0xff]   ;;  %v11886_v49 = vld [vmem:[#allocation5 + $0x780] ss:$48 sps:$4 sm:$0xff]  }
 0x3bf   :  { %12942 = vtanh.f32 %v3798_v0  ;;  %v11889_v50 = vld [vmem:[#allocation5 + $0x788] ss:$48 sps:$4 sm:$0xff]   ;;  %v11894_v53 = vld [vmem:[#allocation5 + $0x7e4] ss:$48 sps:$4 sm:$0xff]   ;;  %v11897_v59 = vld [vmem:[#allocation5 + $0x7ec] ss:$48 sps:$4 sm:$0xff]  }
 0x3c0   :  { %12944 = vtanh.f32 %v3800_v1  ;;  %v11892_v0 = vld [vmem:[#allocation5 + $0x7e0] ss:$48 sps:$4 sm:$0xff]   ;;  %v11895_v1 = vld [vmem:[#allocation5 + $0x7e8] ss:$48 sps:$4 sm:$0xff]  }
 0x3c7   :  { %v12939_v55 = vpop.eup %12938 }
 0x3c8   :  { %v12941_v61 = vpop.eup %12940  ;;  %v14040_v9 = vmul.f32 %v12939_v55, %v3805_v54  ;;  %v11906_v54 = vld [vmem:[#allocation5 + $0x8a4] ss:$48 sps:$4 sm:$0xff]   ;;  %v11909_v55 = vld [vmem:[#allocation5 + $0x8ac] ss:$48 sps:$4 sm:$0xff]  }
 0x3c9   :  { %v12943_v12 = vpop.eup %12942  ;;  %v14042_v16 = vmul.f32 %v12941_v61, %v3807_v60  ;;  %v11904_v60 = vld [vmem:[#allocation5 + $0x8a0] ss:$48 sps:$4 sm:$0xff]   ;;  %v11907_v61 = vld [vmem:[#allocation5 + $0x8a8] ss:$48 sps:$4 sm:$0xff]  }
 0x3ca   :  { %v12945_v17 = vpop.eup %12944  ;;  %v14044_v18 = vmul.f32 %v12943_v12, %v3806_v8  ;;  %v14054_v23 = vpack.c.bf16 %v14040_v9, %v14040_v9  ;;  %v11912_v8 = vld [vmem:[#allocation5 + $0x904] ss:$48 sps:$4 sm:$0xff]   ;;  %v11915_v12 = vld [vmem:[#allocation5 + $0x90c] ss:$48 sps:$4 sm:$0xff]  }
 0x3cb   :  { %v14046_v19 = vmul.f32 %v12945_v17, %v3808_v13  ;;  %v11910_v13 = vld [vmem:[#allocation5 + $0x900] ss:$48 sps:$4 sm:$0xff]   ;;  %v11913_v17 = vld [vmem:[#allocation5 + $0x908] ss:$48 sps:$4 sm:$0xff]  }
 0x3cc   :  { %v14050_v21 = vpack.c.bf16 %v14044_v18, %v14044_v18 }
 0x3cd   :  { %v14062_v47 = vpack.c.bf16 %v14046_v19, %v14046_v19 }
 0x3ce   :  { %5781 = vmatprep.mubr.bf16.mxu0 %v14050_v21  ;;  %5863 = vmatprep.mubr.bf16.mxu1 %v14050_v21 }
 0x3cf   :  { %5782 = vmatmul.mubr.bf16.vlgmr.msra.gmra.mrb[12].mxu0 %v14054_v23  ;;  %5864 = vmatmul.mubr.bf16.vlgmr.msra.gmra.mrb[12].mxu1 %v14054_v23 }
 0x3d0   :  { %5791 = vmatpush1.bf16.msra.mxu0 %v11862_v5  ;;  %5873 = vmatpush1.bf16.msra.mxu1 %v11865_v22  ;;  %v11918_v5 = vld [vmem:[#allocation5 + $0x964] ss:$48 sps:$4 sm:$0xff]   ;;  %v11921_v22 = vld [vmem:[#allocation5 + $0x96c] ss:$48 sps:$4 sm:$0xff]  }
 0x3d1   :  { %5822 = vmatprep.mubr.bf16.mxu0 %v14062_v47  ;;  %5904 = vmatprep.mubr.bf16.mxu1 %v14062_v47 }
 0x3d2   :  { %5792 = vmatprep.subr.bf16.mxu0 %v11870_v24  ;;  %5874 = vmatprep.subr.bf16.mxu1 %v11873_v25  ;;  %v11916_v24 = vld [vmem:[#allocation5 + $0x960] ss:$48 sps:$4 sm:$0xff]   ;;  %v11919_v25 = vld [vmem:[#allocation5 + $0x968] ss:$48 sps:$4 sm:$0xff]  }
 0x3d4   :  { %5793 = vmatpush1.bf16.msra.mxu0 %v11868_v26  ;;  %5875 = vmatpush1.bf16.msra.mxu1 %v11871_v30  ;;  %v11924_v26 = vld [vmem:[#allocation5 + $0x9c4] ss:$48 sps:$4 sm:$0xff]   ;;  %v11927_v30 = vld [vmem:[#allocation5 + $0x9cc] ss:$48 sps:$4 sm:$0xff]  }
 0x3d5   :  { %5794 = vmatprep.subr.bf16.mxu0 %v11876_v27  ;;  %5876 = vmatprep.subr.bf16.mxu1 %v11879_v29  ;;  %v11922_v27 = vld [vmem:[#allocation5 + $0x9c0] ss:$48 sps:$4 sm:$0xff]   ;;  %v11925_v29 = vld [vmem:[#allocation5 + $0x9c8] ss:$48 sps:$4 sm:$0xff]  }
 0x3d8   :  { %5795 = vmatpush1.bf16.msra.mxu0 %v11874_v31  ;;  %5877 = vmatpush1.bf16.msra.mxu1 %v11877_v32  ;;  %v11930_v31 = vld [vmem:[#allocation5 + $0xa24] ss:$48 sps:$4 sm:$0xff]   ;;  %v11933_v32 = vld [vmem:[#allocation5 + $0xa2c] ss:$48 sps:$4 sm:$0xff]  }
 0x3d9   :  { %5796 = vmatprep.subr.bf16.mxu0 %v11882_v36  ;;  %5878 = vmatprep.subr.bf16.mxu1 %v11885_v37  ;;  %v11928_v36 = vld [vmem:[#allocation5 + $0xa20] ss:$48 sps:$4 sm:$0xff]   ;;  %v11931_v37 = vld [vmem:[#allocation5 + $0xa28] ss:$48 sps:$4 sm:$0xff]  }
 0x3dc   :  { %5797 = vmatpush1.bf16.msra.mxu0 %v11880_v58  ;;  %5879 = vmatpush1.bf16.msra.mxu1 %v11883_v44  ;;  %v11936_v58 = vld [vmem:[#allocation5 + $0xa84] ss:$48 sps:$4 sm:$0xff]   ;;  %v11939_v44 = vld [vmem:[#allocation5 + $0xa8c] ss:$48 sps:$4 sm:$0xff]  }
 0x3dd   :  { %5798 = vmatprep.subr.bf16.mxu0 %v11888_v43  ;;  %5880 = vmatprep.subr.bf16.mxu1 %v11891_v45  ;;  %v11934_v43 = vld [vmem:[#allocation5 + $0xa80] ss:$48 sps:$4 sm:$0xff]   ;;  %v11937_v45 = vld [vmem:[#allocation5 + $0xa88] ss:$48 sps:$4 sm:$0xff]  }
 0x3e0   :  { %5799 = vmatpush1.bf16.msra.mxu0 %v11886_v49  ;;  %5881 = vmatpush1.bf16.msra.mxu1 %v11889_v50  ;;  %v11942_v49 = vld [vmem:[#allocation5 + $0xae4] ss:$48 sps:$4 sm:$0xff]   ;;  %v11945_v50 = vld [vmem:[#allocation5 + $0xaec] ss:$48 sps:$4 sm:$0xff]  }
 0x3e1   :  { %5800 = vmatprep.subr.bf16.mxu0 %v11894_v53  ;;  %5882 = vmatprep.subr.bf16.mxu1 %v11897_v59  ;;  %v11940_v53 = vld [vmem:[#allocation5 + $0xae0] ss:$48 sps:$4 sm:$0xff]   ;;  %v11943_v59 = vld [vmem:[#allocation5 + $0xae8] ss:$48 sps:$4 sm:$0xff]  }
 0x3e4   :  { %5801 = vmatpush1.bf16.msra.mxu0 %v11892_v0  ;;  %5883 = vmatpush1.bf16.msra.mxu1 %v11895_v1  ;;  %v11948_v0 = vld [vmem:[#allocation5 + $0xb44] ss:$48 sps:$4 sm:$0xff]   ;;  %v11951_v1 = vld [vmem:[#allocation5 + $0xb4c] ss:$48 sps:$4 sm:$0xff]  }
 0x3e5   :  { %5802 = vmatprep.subr.bf16.mxu0 %v11900_v40  ;;  %5884 = vmatprep.subr.bf16.mxu1 %v11903_v48  ;;  %v11946_v40 = vld [vmem:[#allocation5 + $0xb40] ss:$48 sps:$4 sm:$0xff]   ;;  %v11949_v48 = vld [vmem:[#allocation5 + $0xb48] ss:$48 sps:$4 sm:$0xff]  }
 0x3e8   :  { %5803 = vmatpush1.bf16.msra.mxu0 %v11898_v39  ;;  %5885 = vmatpush1.bf16.msra.mxu1 %v11901_v46  ;;  %v11954_v39 = vld [vmem:[#allocation5 + $0xba4] ss:$48 sps:$4 sm:$0xff]   ;;  %v11957_v46 = vld [vmem:[#allocation5 + $0xbac] ss:$48 sps:$4 sm:$0xff]  }
 0x3e9   :  { %5804 = vmatprep.subr.bf16.mxu0 %v11906_v54  ;;  %5886 = vmatprep.subr.bf16.mxu1 %v11909_v55  ;;  %v11952_v54 = vld [vmem:[#allocation5 + $0xba0] ss:$48 sps:$4 sm:$0xff]   ;;  %v11955_v55 = vld [vmem:[#allocation5 + $0xba8] ss:$48 sps:$4 sm:$0xff]  }
 0x3ec   :  { %5805 = vmatpush1.bf16.msra.mxu0 %v11904_v60  ;;  %5887 = vmatpush1.bf16.msra.mxu1 %v11907_v61  ;;  %v11960_v60 = vld [vmem:[#allocation5 + $0x14] ss:$48 sps:$4 sm:$0xff]   ;;  %v11963_v61 = vld [vmem:[#allocation5 + $0x1c] ss:$48 sps:$4 sm:$0xff]  }
 0x3ed   :  { %5806 = vmatprep.subr.bf16.mxu0 %v11912_v8  ;;  %5888 = vmatprep.subr.bf16.mxu1 %v11915_v12  ;;  %v11958_v8 = vld [vmem:[#allocation5 + $0x10] ss:$48 sps:$4 sm:$0xff]   ;;  %v14068_v12 = vpack.c.bf16 %v14042_v16, %v14042_v16 }
 0x3f0   :  { %5807 = vmatpush1.bf16.msra.mxu0 %v11910_v13  ;;  %5889 = vmatpush1.bf16.msra.mxu1 %v11913_v17  ;;  %v11961_v13 = vld [vmem:[#allocation5 + $0x18] ss:$48 sps:$4 sm:$0xff]   ;;  %v11966_v17 = vld [vmem:[#allocation5 + $0x74] ss:$48 sps:$4 sm:$0xff]  }
 0x3f1   :  { %5808 = vmatprep.subr.bf16.mxu0 %v11918_v5  ;;  %5890 = vmatprep.subr.bf16.mxu1 %v11921_v22  ;;  %v11969_v5 = vld [vmem:[#allocation5 + $0x7c] ss:$48 sps:$4 sm:$0xff]   ;;  %v11964_v22 = vld [vmem:[#allocation5 + $0x70] ss:$48 sps:$4 sm:$0xff]  }
 0x3f4   :  { %5809 = vmatpush1.bf16.msra.mxu0 %v11916_v24  ;;  %5891 = vmatpush1.bf16.msra.mxu1 %v11919_v25  ;;  %v11967_v24 = vld [vmem:[#allocation5 + $0x78] ss:$48 sps:$4 sm:$0xff]   ;;  %v11972_v25 = vld [vmem:[#allocation5 + $0xd4] ss:$48 sps:$4 sm:$0xff]  }
 0x3f5   :  { %5810 = vmatprep.subr.bf16.mxu0 %v11924_v26  ;;  %5892 = vmatprep.subr.bf16.mxu1 %v11927_v30  ;;  %v11975_v26 = vld [vmem:[#allocation5 + $0xdc] ss:$48 sps:$4 sm:$0xff]   ;;  %v11970_v30 = vld [vmem:[#allocation5 + $0xd0] ss:$48 sps:$4 sm:$0xff]  }
 0x3f8   :  { %5811 = vmatpush1.bf16.msra.mxu0 %v11922_v27  ;;  %5893 = vmatpush1.bf16.msra.mxu1 %v11925_v29  ;;  %v11973_v27 = vld [vmem:[#allocation5 + $0xd8] ss:$48 sps:$4 sm:$0xff]   ;;  %v11978_v29 = vld [vmem:[#allocation5 + $0x134] ss:$48 sps:$4 sm:$0xff]  }
 0x3f9   :  { %5812 = vmatprep.subr.bf16.mxu0 %v11930_v31  ;;  %5894 = vmatprep.subr.bf16.mxu1 %v11933_v32  ;;  %v11981_v31 = vld [vmem:[#allocation5 + $0x13c] ss:$48 sps:$4 sm:$0xff]   ;;  %v11976_v32 = vld [vmem:[#allocation5 + $0x130] ss:$48 sps:$4 sm:$0xff]  }
 0x3fc   :  { %5813 = vmatpush1.bf16.msra.mxu0 %v11928_v36  ;;  %5895 = vmatpush1.bf16.msra.mxu1 %v11931_v37  ;;  %v11979_v36 = vld [vmem:[#allocation5 + $0x138] ss:$48 sps:$4 sm:$0xff]   ;;  %v11984_v37 = vld [vmem:[#allocation5 + $0x194] ss:$48 sps:$4 sm:$0xff]  }
 0x3fd   :  { %5814 = vmatprep.subr.bf16.mxu0 %v11936_v58  ;;  %5896 = vmatprep.subr.bf16.mxu1 %v11939_v44  ;;  %v11987_v58 = vld [vmem:[#allocation5 + $0x19c] ss:$48 sps:$4 sm:$0xff]   ;;  %v11982_v44 = vld [vmem:[#allocation5 + $0x190] ss:$48 sps:$4 sm:$0xff]  }
 0x400   :  { %5815 = vmatpush1.bf16.msra.mxu0 %v11934_v43  ;;  %5897 = vmatpush1.bf16.msra.mxu1 %v11937_v45  ;;  %v11985_v43 = vld [vmem:[#allocation5 + $0x198] ss:$48 sps:$4 sm:$0xff]   ;;  %v11990_v45 = vld [vmem:[#allocation5 + $0x1f4] ss:$48 sps:$4 sm:$0xff]  }
 0x401   :  { %5816 = vmatprep.subr.bf16.mxu0 %v11942_v49  ;;  %5898 = vmatprep.subr.bf16.mxu1 %v11945_v50  ;;  %v11993_v49 = vld [vmem:[#allocation5 + $0x1fc] ss:$48 sps:$4 sm:$0xff]   ;;  %v11988_v50 = vld [vmem:[#allocation5 + $0x1f0] ss:$48 sps:$4 sm:$0xff]  }
 0x404   :  { %5817 = vmatpush1.bf16.msra.mxu0 %v11940_v53  ;;  %5899 = vmatpush1.bf16.msra.mxu1 %v11943_v59  ;;  %v11991_v53 = vld [vmem:[#allocation5 + $0x1f8] ss:$48 sps:$4 sm:$0xff]   ;;  %v11996_v59 = vld [vmem:[#allocation5 + $0x254] ss:$48 sps:$4 sm:$0xff]  }
 0x405   :  { %5818 = vmatprep.subr.bf16.mxu0 %v11948_v0  ;;  %5900 = vmatprep.subr.bf16.mxu1 %v11951_v1  ;;  %v11999_v0 = vld [vmem:[#allocation5 + $0x25c] ss:$48 sps:$4 sm:$0xff]   ;;  %v11994_v1 = vld [vmem:[#allocation5 + $0x250] ss:$48 sps:$4 sm:$0xff]  }
 0x408   :  { %5819 = vmatpush1.bf16.msra.mxu0 %v11946_v40  ;;  %5901 = vmatpush1.bf16.msra.mxu1 %v11949_v48  ;;  %v11997_v40 = vld [vmem:[#allocation5 + $0x258] ss:$48 sps:$4 sm:$0xff]   ;;  %v12002_v48 = vld [vmem:[#allocation5 + $0x2b4] ss:$48 sps:$4 sm:$0xff]  }
 0x409   :  { %5820 = vmatprep.subr.bf16.mxu0 %v11954_v39  ;;  %5902 = vmatprep.subr.bf16.mxu1 %v11957_v46  ;;  %v12005_v39 = vld [vmem:[#allocation5 + $0x2bc] ss:$48 sps:$4 sm:$0xff]   ;;  %v12000_v46 = vld [vmem:[#allocation5 + $0x2b0] ss:$48 sps:$4 sm:$0xff]  }
 0x40c   :  { %5821 = vmatpush1.bf16.msra.mxu0 %v11952_v54  ;;  %5903 = vmatpush1.bf16.msra.mxu1 %v11955_v55  ;;  %v12003_v54 = vld [vmem:[#allocation5 + $0x2b8] ss:$48 sps:$4 sm:$0xff]   ;;  %v12008_v55 = vld [vmem:[#allocation5 + $0x314] ss:$48 sps:$4 sm:$0xff]  }
 0x40d   :  { %5913 = vmatprep.subr.bf16.mxu0 %v11960_v60  ;;  %5995 = vmatprep.subr.bf16.mxu1 %v11963_v61  ;;  %v12011_v60 = vld [vmem:[#allocation5 + $0x31c] ss:$48 sps:$4 sm:$0xff]   ;;  %v12006_v61 = vld [vmem:[#allocation5 + $0x310] ss:$48 sps:$4 sm:$0xff]  }
 0x40f   :  { %5823 = vmatmul.mubr.bf16.vlgmr.msra.gmra.mrb[12].mxu0 %v14068_v12  ;;  %5905 = vmatmul.mubr.bf16.vlgmr.msra.gmra.mrb[12].mxu1 %v14068_v12 }
 0x410   :  { %5914 = vmatpush1.bf16.msra.mxu0 %v11958_v8  ;;  %5945 = vmatprep.mubr.bf16.mxu0 %v14050_v21  ;;  %v12009_v8 = vld [vmem:[#allocation5 + $0x318] ss:$48 sps:$4 sm:$0xff]  }
 0x411   :  { %5996 = vmatpush1.bf16.msra.mxu1 %v11961_v13  ;;  %6027 = vmatprep.mubr.bf16.mxu1 %v14050_v21  ;;  %v12014_v13 = vld [vmem:[#allocation5 + $0x374] ss:$48 sps:$4 sm:$0xff]  }
 0x412   :  { %5915 = vmatprep.subr.bf16.mxu0 %v11966_v17  ;;  %5997 = vmatprep.subr.bf16.mxu1 %v11969_v5  ;;  %v12017_v17 = vld [vmem:[#allocation5 + $0x37c] ss:$48 sps:$4 sm:$0xff]   ;;  %v12012_v5 = vld [vmem:[#allocation5 + $0x370] ss:$48 sps:$4 sm:$0xff]  }
 0x414   :  { %5916 = vmatpush1.bf16.msra.mxu0 %v11964_v22  ;;  %v12015_v22 = vld [vmem:[#allocation5 + $0x378] ss:$48 sps:$4 sm:$0xff]  }
 0x415   :  { %5998 = vmatpush1.bf16.msra.mxu1 %v11967_v24  ;;  %5917 = vmatprep.subr.bf16.mxu0 %v11972_v25  ;;  %v12020_v24 = vld [vmem:[#allocation5 + $0x3d4] ss:$48 sps:$4 sm:$0xff]   ;;  %v12023_v25 = vld [vmem:[#allocation5 + $0x3dc] ss:$48 sps:$4 sm:$0xff]  }
 0x416   :  { %5999 = vmatprep.subr.bf16.mxu1 %v11975_v26  ;;  %v12018_v26 = vld [vmem:[#allocation5 + $0x3d0] ss:$48 sps:$4 sm:$0xff]  }
 0x418   :  { %5918 = vmatpush1.bf16.msra.mxu0 %v11970_v30  ;;  %v12021_v30 = vld [vmem:[#allocation5 + $0x3d8] ss:$48 sps:$4 sm:$0xff]  }
 0x419   :  { %6000 = vmatpush1.bf16.msra.mxu1 %v11973_v27  ;;  %5919 = vmatprep.subr.bf16.mxu0 %v11978_v29  ;;  %v12026_v27 = vld [vmem:[#allocation5 + $0x434] ss:$48 sps:$4 sm:$0xff]   ;;  %v12029_v29 = vld [vmem:[#allocation5 + $0x43c] ss:$48 sps:$4 sm:$0xff]  }
 0x41a   :  { %6001 = vmatprep.subr.bf16.mxu1 %v11981_v31  ;;  %v12024_v31 = vld [vmem:[#allocation5 + $0x430] ss:$48 sps:$4 sm:$0xff]  }
 0x41c   :  { %5920 = vmatpush1.bf16.msra.mxu0 %v11976_v32  ;;  %v12027_v32 = vld [vmem:[#allocation5 + $0x438] ss:$48 sps:$4 sm:$0xff]  }
 0x41d   :  { %6002 = vmatpush1.bf16.msra.mxu1 %v11979_v36  ;;  %5921 = vmatprep.subr.bf16.mxu0 %v11984_v37  ;;  %v12032_v36 = vld [vmem:[#allocation5 + $0x494] ss:$48 sps:$4 sm:$0xff]   ;;  %v12035_v37 = vld [vmem:[#allocation5 + $0x49c] ss:$48 sps:$4 sm:$0xff]  }
 0x41e   :  { %6003 = vmatprep.subr.bf16.mxu1 %v11987_v58  ;;  %v12030_v58 = vld [vmem:[#allocation5 + $0x490] ss:$48 sps:$4 sm:$0xff]  }
 0x420   :  { %5922 = vmatpush1.bf16.msra.mxu0 %v11982_v44  ;;  %v12033_v44 = vld [vmem:[#allocation5 + $0x498] ss:$48 sps:$4 sm:$0xff]  }
 0x421   :  { %6004 = vmatpush1.bf16.msra.mxu1 %v11985_v43  ;;  %5923 = vmatprep.subr.bf16.mxu0 %v11990_v45  ;;  %v12038_v43 = vld [vmem:[#allocation5 + $0x4f4] ss:$48 sps:$4 sm:$0xff]   ;;  %v12041_v45 = vld [vmem:[#allocation5 + $0x4fc] ss:$48 sps:$4 sm:$0xff]  }
 0x422   :  { %6005 = vmatprep.subr.bf16.mxu1 %v11993_v49  ;;  %v12036_v49 = vld [vmem:[#allocation5 + $0x4f0] ss:$48 sps:$4 sm:$0xff]  }
 0x424   :  { %5924 = vmatpush1.bf16.msra.mxu0 %v11988_v50  ;;  %v12039_v50 = vld [vmem:[#allocation5 + $0x4f8] ss:$48 sps:$4 sm:$0xff]  }
 0x425   :  { %6006 = vmatpush1.bf16.msra.mxu1 %v11991_v53  ;;  %5925 = vmatprep.subr.bf16.mxu0 %v11996_v59  ;;  %v12044_v53 = vld [vmem:[#allocation5 + $0x554] ss:$48 sps:$4 sm:$0xff]   ;;  %v12047_v59 = vld [vmem:[#allocation5 + $0x55c] ss:$48 sps:$4 sm:$0xff]  }
 0x426   :  { %6007 = vmatprep.subr.bf16.mxu1 %v11999_v0  ;;  %v12042_v0 = vld [vmem:[#allocation5 + $0x550] ss:$48 sps:$4 sm:$0xff]  }
 0x428   :  { %5926 = vmatpush1.bf16.msra.mxu0 %v11994_v1  ;;  %v12045_v1 = vld [vmem:[#allocation5 + $0x558] ss:$48 sps:$4 sm:$0xff]  }
 0x429   :  { %6008 = vmatpush1.bf16.msra.mxu1 %v11997_v40  ;;  %5927 = vmatprep.subr.bf16.mxu0 %v12002_v48  ;;  %v12050_v40 = vld [vmem:[#allocation5 + $0x5b4] ss:$48 sps:$4 sm:$0xff]   ;;  %v12053_v48 = vld [vmem:[#allocation5 + $0x5bc] ss:$48 sps:$4 sm:$0xff]  }
 0x42a   :  { %6009 = vmatprep.subr.bf16.mxu1 %v12005_v39  ;;  %v12048_v39 = vld [vmem:[#allocation5 + $0x5b0] ss:$48 sps:$4 sm:$0xff]  }
 0x42c   :  { %5928 = vmatpush1.bf16.msra.mxu0 %v12000_v46  ;;  %v12051_v46 = vld [vmem:[#allocation5 + $0x5b8] ss:$48 sps:$4 sm:$0xff]  }
 0x42d   :  { %6010 = vmatpush1.bf16.msra.mxu1 %v12003_v54  ;;  %5929 = vmatprep.subr.bf16.mxu0 %v12008_v55  ;;  %v12056_v54 = vld [vmem:[#allocation5 + $0x614] ss:$48 sps:$4 sm:$0xff]   ;;  %v12059_v55 = vld [vmem:[#allocation5 + $0x61c] ss:$48 sps:$4 sm:$0xff]  }
 0x42e   :  { %6011 = vmatprep.subr.bf16.mxu1 %v12011_v60  ;;  %v12054_v60 = vld [vmem:[#allocation5 + $0x610] ss:$48 sps:$4 sm:$0xff]  }
 0x430   :  { %5930 = vmatpush1.bf16.msra.mxu0 %v12006_v61  ;;  %v12057_v61 = vld [vmem:[#allocation5 + $0x618] ss:$48 sps:$4 sm:$0xff]  }
 0x431   :  { %6012 = vmatpush1.bf16.msra.mxu1 %v12009_v8  ;;  %5931 = vmatprep.subr.bf16.mxu0 %v12014_v13  ;;  %v12062_v8 = vld [vmem:[#allocation5 + $0x674] ss:$48 sps:$4 sm:$0xff]   ;;  %v12065_v13 = vld [vmem:[#allocation5 + $0x67c] ss:$48 sps:$4 sm:$0xff]  }
 0x432   :  { %6013 = vmatprep.subr.bf16.mxu1 %v12017_v17  ;;  %v12060_v17 = vld [vmem:[#allocation5 + $0x670] ss:$48 sps:$4 sm:$0xff]  }
 0x434   :  { %5932 = vmatpush1.bf16.msra.mxu0 %v12012_v5  ;;  %v12063_v5 = vld [vmem:[#allocation5 + $0x678] ss:$48 sps:$4 sm:$0xff]  }
 0x435   :  { %6014 = vmatpush1.bf16.msra.mxu1 %v12015_v22  ;;  %5933 = vmatprep.subr.bf16.mxu0 %v12020_v24  ;;  %v12068_v22 = vld [vmem:[#allocation5 + $0x6d4] ss:$48 sps:$4 sm:$0xff]   ;;  %v12071_v24 = vld [vmem:[#allocation5 + $0x6dc] ss:$48 sps:$4 sm:$0xff]  }
 0x436   :  { %6015 = vmatprep.subr.bf16.mxu1 %v12023_v25  ;;  %v12066_v25 = vld [vmem:[#allocation5 + $0x6d0] ss:$48 sps:$4 sm:$0xff]  }
 0x438   :  { %5934 = vmatpush1.bf16.msra.mxu0 %v12018_v26  ;;  %v12069_v26 = vld [vmem:[#allocation5 + $0x6d8] ss:$48 sps:$4 sm:$0xff]  }
 0x439   :  { %6016 = vmatpush1.bf16.msra.mxu1 %v12021_v30  ;;  %5935 = vmatprep.subr.bf16.mxu0 %v12026_v27  ;;  %v12074_v30 = vld [vmem:[#allocation5 + $0x734] ss:$48 sps:$4 sm:$0xff]   ;;  %v12077_v27 = vld [vmem:[#allocation5 + $0x73c] ss:$48 sps:$4 sm:$0xff]  }
 0x43a   :  { %6017 = vmatprep.subr.bf16.mxu1 %v12029_v29  ;;  %v12072_v29 = vld [vmem:[#allocation5 + $0x730] ss:$48 sps:$4 sm:$0xff]  }
 0x43c   :  { %5936 = vmatpush1.bf16.msra.mxu0 %v12024_v31  ;;  %v12075_v31 = vld [vmem:[#allocation5 + $0x738] ss:$48 sps:$4 sm:$0xff]  }
 0x43d   :  { %6018 = vmatpush1.bf16.msra.mxu1 %v12027_v32  ;;  %5937 = vmatprep.subr.bf16.mxu0 %v12032_v36  ;;  %v12080_v32 = vld [vmem:[#allocation5 + $0x794] ss:$48 sps:$4 sm:$0xff]   ;;  %v12083_v36 = vld [vmem:[#allocation5 + $0x79c] ss:$48 sps:$4 sm:$0xff]  }
 0x43e   :  { %6019 = vmatprep.subr.bf16.mxu1 %v12035_v37  ;;  %v12078_v37 = vld [vmem:[#allocation5 + $0x790] ss:$48 sps:$4 sm:$0xff]  }
 0x440   :  { %5938 = vmatpush1.bf16.msra.mxu0 %v12030_v58  ;;  %v12081_v58 = vld [vmem:[#allocation5 + $0x798] ss:$48 sps:$4 sm:$0xff]  }
 0x441   :  { %6020 = vmatpush1.bf16.msra.mxu1 %v12033_v44  ;;  %5939 = vmatprep.subr.bf16.mxu0 %v12038_v43  ;;  %v12086_v44 = vld [vmem:[#allocation5 + $0x7f4] ss:$48 sps:$4 sm:$0xff]   ;;  %v12089_v43 = vld [vmem:[#allocation5 + $0x7fc] ss:$48 sps:$4 sm:$0xff]  }
 0x442   :  { %6021 = vmatprep.subr.bf16.mxu1 %v12041_v45  ;;  %v12084_v45 = vld [vmem:[#allocation5 + $0x7f0] ss:$48 sps:$4 sm:$0xff]  }
 0x444   :  { %5940 = vmatpush1.bf16.msra.mxu0 %v12036_v49  ;;  %v12087_v49 = vld [vmem:[#allocation5 + $0x7f8] ss:$48 sps:$4 sm:$0xff]  }
 0x445   :  { %6022 = vmatpush1.bf16.msra.mxu1 %v12039_v50  ;;  %5941 = vmatprep.subr.bf16.mxu0 %v12044_v53  ;;  %v12092_v50 = vld [vmem:[#allocation5 + $0x854] ss:$48 sps:$4 sm:$0xff]   ;;  %v12095_v53 = vld [vmem:[#allocation5 + $0x85c] ss:$48 sps:$4 sm:$0xff]  }
 0x446   :  { %6023 = vmatprep.subr.bf16.mxu1 %v12047_v59  ;;  %v12090_v59 = vld [vmem:[#allocation5 + $0x850] ss:$48 sps:$4 sm:$0xff]  }
 0x448   :  { %5942 = vmatpush1.bf16.msra.mxu0 %v12042_v0  ;;  %v12093_v0 = vld [vmem:[#allocation5 + $0x858] ss:$48 sps:$4 sm:$0xff]  }
 0x449   :  { %6024 = vmatpush1.bf16.msra.mxu1 %v12045_v1  ;;  %5943 = vmatprep.subr.bf16.mxu0 %v12050_v40  ;;  %v12098_v1 = vld [vmem:[#allocation5 + $0x8b4] ss:$48 sps:$4 sm:$0xff]   ;;  %v12101_v40 = vld [vmem:[#allocation5 + $0x8bc] ss:$48 sps:$4 sm:$0xff]  }
 0x44a   :  { %6025 = vmatprep.subr.bf16.mxu1 %v12053_v48  ;;  %v12096_v48 = vld [vmem:[#allocation5 + $0x8b0] ss:$48 sps:$4 sm:$0xff]  }
 0x44c   :  { %5944 = vmatpush1.bf16.msra.mxu0 %v12048_v39  ;;  %v12099_v39 = vld [vmem:[#allocation5 + $0x8b8] ss:$48 sps:$4 sm:$0xff]  }
 0x44d   :  { %6026 = vmatpush1.bf16.msra.mxu1 %v12051_v46  ;;  %5954 = vmatprep.subr.bf16.mxu0 %v12056_v54  ;;  %v12104_v46 = vld [vmem:[#allocation5 + $0x914] ss:$48 sps:$4 sm:$0xff]   ;;  %v12107_v54 = vld [vmem:[#allocation5 + $0x91c] ss:$48 sps:$4 sm:$0xff]  }
 0x44e   :  { %6036 = vmatprep.subr.bf16.mxu1 %v12059_v55  ;;  %v12102_v55 = vld [vmem:[#allocation5 + $0x910] ss:$48 sps:$4 sm:$0xff]  }
 0x44f   :  { %5946 = vmatmul.mubr.bf16.vlgmr.msra.gmra.mrb[16].mxu0 %v14054_v23 }
 0x450   :  { %6028 = vmatmul.mubr.bf16.vlgmr.msra.gmra.mrb[16].mxu1 %v14054_v23  ;;  %5955 = vmatpush1.bf16.msra.mxu0 %v12054_v60  ;;  %v12105_v60 = vld [vmem:[#allocation5 + $0x918] ss:$48 sps:$4 sm:$0xff]  }
 0x451   :  { %5986 = vmatprep.mubr.bf16.mxu0 %v14062_v47  ;;  %6037 = vmatpush1.bf16.msra.mxu1 %v12057_v61  ;;  %v12110_v61 = vld [vmem:[#allocation5 + $0x974] ss:$48 sps:$4 sm:$0xff]  }
 0x452   :  { %6068 = vmatprep.mubr.bf16.mxu1 %v14062_v47  ;;  %5956 = vmatprep.subr.bf16.mxu0 %v12062_v8  ;;  %v12113_v8 = vld [vmem:[#allocation5 + $0x97c] ss:$48 sps:$4 sm:$0xff]  }
 0x453   :  { %6038 = vmatprep.subr.bf16.mxu1 %v12065_v13  ;;  %v12108_v13 = vld [vmem:[#allocation5 + $0x970] ss:$48 sps:$4 sm:$0xff]  }
 0x454   :  { %5957 = vmatpush1.bf16.msra.mxu0 %v12060_v17  ;;  %v12111_v17 = vld [vmem:[#allocation5 + $0x978] ss:$48 sps:$4 sm:$0xff]  }
 0x455   :  { %6039 = vmatpush1.bf16.msra.mxu1 %v12063_v5  ;;  %5958 = vmatprep.subr.bf16.mxu0 %v12068_v22  ;;  %v12116_v5 = vld [vmem:[#allocation5 + $0x9d4] ss:$48 sps:$4 sm:$0xff]   ;;  %v12119_v22 = vld [vmem:[#allocation5 + $0x9dc] ss:$48 sps:$4 sm:$0xff]  }
 0x456   :  { %6040 = vmatprep.subr.bf16.mxu1 %v12071_v24  ;;  %v12114_v24 = vld [vmem:[#allocation5 + $0x9d0] ss:$48 sps:$4 sm:$0xff]  }
 0x458   :  { %5959 = vmatpush1.bf16.msra.mxu0 %v12066_v25  ;;  %v12117_v25 = vld [vmem:[#allocation5 + $0x9d8] ss:$48 sps:$4 sm:$0xff]  }
 0x459   :  { %6041 = vmatpush1.bf16.msra.mxu1 %v12069_v26  ;;  %5960 = vmatprep.subr.bf16.mxu0 %v12074_v30  ;;  %v12122_v26 = vld [vmem:[#allocation5 + $0xa34] ss:$48 sps:$4 sm:$0xff]   ;;  %v12125_v30 = vld [vmem:[#allocation5 + $0xa3c] ss:$48 sps:$4 sm:$0xff]  }
 0x45a   :  { %6042 = vmatprep.subr.bf16.mxu1 %v12077_v27  ;;  %v12120_v27 = vld [vmem:[#allocation5 + $0xa30] ss:$48 sps:$4 sm:$0xff]  }
 0x45c   :  { %5961 = vmatpush1.bf16.msra.mxu0 %v12072_v29  ;;  %v12123_v29 = vld [vmem:[#allocation5 + $0xa38] ss:$48 sps:$4 sm:$0xff]  }
 0x45d   :  { %6043 = vmatpush1.bf16.msra.mxu1 %v12075_v31  ;;  %5962 = vmatprep.subr.bf16.mxu0 %v12080_v32  ;;  %v12128_v31 = vld [vmem:[#allocation5 + $0xa94] ss:$48 sps:$4 sm:$0xff]   ;;  %v12131_v32 = vld [vmem:[#allocation5 + $0xa9c] ss:$48 sps:$4 sm:$0xff]  }
 0x45e   :  { %6044 = vmatprep.subr.bf16.mxu1 %v12083_v36  ;;  %v12126_v36 = vld [vmem:[#allocation5 + $0xa90] ss:$48 sps:$4 sm:$0xff]  }
 0x460   :  { %5963 = vmatpush1.bf16.msra.mxu0 %v12078_v37  ;;  %v12129_v37 = vld [vmem:[#allocation5 + $0xa98] ss:$48 sps:$4 sm:$0xff]  }
 0x461   :  { %6045 = vmatpush1.bf16.msra.mxu1 %v12081_v58  ;;  %5964 = vmatprep.subr.bf16.mxu0 %v12086_v44  ;;  %v12134_v58 = vld [vmem:[#allocation5 + $0xaf4] ss:$48 sps:$4 sm:$0xff]   ;;  %v12137_v44 = vld [vmem:[#allocation5 + $0xafc] ss:$48 sps:$4 sm:$0xff]  }
 0x462   :  { %6046 = vmatprep.subr.bf16.mxu1 %v12089_v43  ;;  %v12132_v43 = vld [vmem:[#allocation5 + $0xaf0] ss:$48 sps:$4 sm:$0xff]  }
 0x464   :  { %5965 = vmatpush1.bf16.msra.mxu0 %v12084_v45  ;;  %v12135_v45 = vld [vmem:[#allocation5 + $0xaf8] ss:$48 sps:$4 sm:$0xff]  }
 0x465   :  { %6047 = vmatpush1.bf16.msra.mxu1 %v12087_v49  ;;  %5966 = vmatprep.subr.bf16.mxu0 %v12092_v50  ;;  %v12140_v49 = vld [vmem:[#allocation5 + $0xb54] ss:$48 sps:$4 sm:$0xff]   ;;  %v12143_v50 = vld [vmem:[#allocation5 + $0xb5c] ss:$48 sps:$4 sm:$0xff]  }
 0x466   :  { %6048 = vmatprep.subr.bf16.mxu1 %v12095_v53  ;;  %v12138_v53 = vld [vmem:[#allocation5 + $0xb50] ss:$48 sps:$4 sm:$0xff]  }
 0x468   :  { %5967 = vmatpush1.bf16.msra.mxu0 %v12090_v59  ;;  %v12141_v59 = vld [vmem:[#allocation5 + $0xb58] ss:$48 sps:$4 sm:$0xff]  }
 0x469   :  { %6049 = vmatpush1.bf16.msra.mxu1 %v12093_v0  ;;  %5968 = vmatprep.subr.bf16.mxu0 %v12098_v1  ;;  %v12146_v0 = vld [vmem:[#allocation5 + $0xbb4] ss:$48 sps:$4 sm:$0xff]   ;;  %v12149_v1 = vld [vmem:[#allocation5 + $0xbbc] ss:$48 sps:$4 sm:$0xff]  }
 0x46a   :  { %6050 = vmatprep.subr.bf16.mxu1 %v12101_v40  ;;  %v12144_v40 = vld [vmem:[#allocation5 + $0xbb0] ss:$48 sps:$4 sm:$0xff]  }
 0x46c   :  { %5969 = vmatpush1.bf16.msra.mxu0 %v12096_v48  ;;  %v12147_v48 = vld [vmem:[#allocation5 + $0xbb8] ss:$48 sps:$4 sm:$0xff]  }
 0x46d   :  { %6051 = vmatpush1.bf16.msra.mxu1 %v12099_v39  ;;  %5970 = vmatprep.subr.bf16.mxu0 %v12104_v46  ;;  %v12152_v39 = vld [vmem:[#allocation5 + $0x24] ss:$48 sps:$4 sm:$0xff]  }
 0x46e   :  { %6052 = vmatprep.subr.bf16.mxu1 %v12107_v54  ;;  %v12155_v46 = vld [vmem:[#allocation5 + $0x624] ss:$48 sps:$4 sm:$0xff]   ;;  %v12150_v54 = vld [vmem:[#allocation5 + $0x20] ss:$48 sps:$4 sm:$0xff]  }
 0x470   :  { %5971 = vmatpush1.bf16.msra.mxu0 %v12102_v55  ;;  %v12153_v55 = vld [vmem:[#allocation5 + $0x620] ss:$48 sps:$4 sm:$0xff]  }
 0x471   :  { %6053 = vmatpush1.bf16.msra.mxu1 %v12105_v60  ;;  %5972 = vmatprep.subr.bf16.mxu0 %v12110_v61  ;;  %v12158_v60 = vld [vmem:[#allocation5 + $0x84] ss:$48 sps:$4 sm:$0xff]  }
 0x472   :  { %6054 = vmatprep.subr.bf16.mxu1 %v12113_v8  ;;  %v12161_v61 = vld [vmem:[#allocation5 + $0x684] ss:$48 sps:$4 sm:$0xff]   ;;  %v12156_v8 = vld [vmem:[#allocation5 + $0x80] ss:$48 sps:$4 sm:$0xff]  }
 0x474   :  { %5973 = vmatpush1.bf16.msra.mxu0 %v12108_v13  ;;  %v12159_v13 = vld [vmem:[#allocation5 + $0x680] ss:$48 sps:$4 sm:$0xff]  }
 0x475   :  { %6055 = vmatpush1.bf16.msra.mxu1 %v12111_v17  ;;  %5974 = vmatprep.subr.bf16.mxu0 %v12116_v5  ;;  %v12164_v17 = vld [vmem:[#allocation5 + $0xe4] ss:$48 sps:$4 sm:$0xff]  }
 0x476   :  { %6056 = vmatprep.subr.bf16.mxu1 %v12119_v22  ;;  %v12167_v5 = vld [vmem:[#allocation5 + $0x6e4] ss:$48 sps:$4 sm:$0xff]   ;;  %v12162_v22 = vld [vmem:[#allocation5 + $0xe0] ss:$48 sps:$4 sm:$0xff]  }
 0x478   :  { %5975 = vmatpush1.bf16.msra.mxu0 %v12114_v24  ;;  %v12165_v24 = vld [vmem:[#allocation5 + $0x6e0] ss:$48 sps:$4 sm:$0xff]  }
 0x479   :  { %6057 = vmatpush1.bf16.msra.mxu1 %v12117_v25  ;;  %5976 = vmatprep.subr.bf16.mxu0 %v12122_v26  ;;  %v12170_v25 = vld [vmem:[#allocation5 + $0x144] ss:$48 sps:$4 sm:$0xff]  }
 0x47a   :  { %6058 = vmatprep.subr.bf16.mxu1 %v12125_v30  ;;  %v12173_v26 = vld [vmem:[#allocation5 + $0x744] ss:$48 sps:$4 sm:$0xff]   ;;  %v12168_v30 = vld [vmem:[#allocation5 + $0x140] ss:$48 sps:$4 sm:$0xff]  }
 0x47c   :  { %5977 = vmatpush1.bf16.msra.mxu0 %v12120_v27  ;;  %v12171_v27 = vld [vmem:[#allocation5 + $0x740] ss:$48 sps:$4 sm:$0xff]  }
 0x47d   :  { %6059 = vmatpush1.bf16.msra.mxu1 %v12123_v29  ;;  %5978 = vmatprep.subr.bf16.mxu0 %v12128_v31  ;;  %v12176_v29 = vld [vmem:[#allocation5 + $0x1a4] ss:$48 sps:$4 sm:$0xff]  }
 0x47e   :  { %6060 = vmatprep.subr.bf16.mxu1 %v12131_v32  ;;  %v12179_v31 = vld [vmem:[#allocation5 + $0x7a4] ss:$48 sps:$4 sm:$0xff]   ;;  %v12174_v32 = vld [vmem:[#allocation5 + $0x1a0] ss:$48 sps:$4 sm:$0xff]  }
 0x480   :  { %5979 = vmatpush1.bf16.msra.mxu0 %v12126_v36  ;;  %v12177_v36 = vld [vmem:[#allocation5 + $0x7a0] ss:$48 sps:$4 sm:$0xff]  }
 0x481   :  { %6061 = vmatpush1.bf16.msra.mxu1 %v12129_v37  ;;  %5980 = vmatprep.subr.bf16.mxu0 %v12134_v58  ;;  %v12182_v37 = vld [vmem:[#allocation5 + $0x204] ss:$48 sps:$4 sm:$0xff]  }
 0x482   :  { %6062 = vmatprep.subr.bf16.mxu1 %v12137_v44  ;;  %v12185_v58 = vld [vmem:[#allocation5 + $0x804] ss:$48 sps:$4 sm:$0xff]   ;;  %v12180_v44 = vld [vmem:[#allocation5 + $0x200] ss:$48 sps:$4 sm:$0xff]  }
 0x484   :  { %5981 = vmatpush1.bf16.msra.mxu0 %v12132_v43  ;;  %v12183_v43 = vld [vmem:[#allocation5 + $0x800] ss:$48 sps:$4 sm:$0xff]  }
 0x485   :  { %6063 = vmatpush1.bf16.msra.mxu1 %v12135_v45  ;;  %5982 = vmatprep.subr.bf16.mxu0 %v12140_v49  ;;  %v12188_v45 = vld [vmem:[#allocation5 + $0x264] ss:$48 sps:$4 sm:$0xff]  }
 0x486   :  { %6064 = vmatprep.subr.bf16.mxu1 %v12143_v50  ;;  %v12191_v49 = vld [vmem:[#allocation5 + $0x864] ss:$48 sps:$4 sm:$0xff]   ;;  %v12186_v50 = vld [vmem:[#allocation5 + $0x260] ss:$48 sps:$4 sm:$0xff]  }
 0x488   :  { %5983 = vmatpush1.bf16.msra.mxu0 %v12138_v53  ;;  %v12189_v53 = vld [vmem:[#allocation5 + $0x860] ss:$48 sps:$4 sm:$0xff]  }
 0x489   :  { %6065 = vmatpush1.bf16.msra.mxu1 %v12141_v59  ;;  %5984 = vmatprep.subr.bf16.mxu0 %v12146_v0  ;;  %v12194_v59 = vld [vmem:[#allocation5 + $0x2c4] ss:$48 sps:$4 sm:$0xff]  }
 0x48a   :  { %6066 = vmatprep.subr.bf16.mxu1 %v12149_v1  ;;  %v12197_v0 = vld [vmem:[#allocation5 + $0x8c4] ss:$48 sps:$4 sm:$0xff]   ;;  %v12192_v1 = vld [vmem:[#allocation5 + $0x2c0] ss:$48 sps:$4 sm:$0xff]  }
 0x48c   :  { %5985 = vmatpush1.bf16.msra.mxu0 %v12144_v40  ;;  %v12195_v40 = vld [vmem:[#allocation5 + $0x8c0] ss:$48 sps:$4 sm:$0xff]  }
 0x48d   :  { %6067 = vmatpush1.bf16.msra.mxu1 %v12147_v48  ;;  %6077 = vmatprep.subr.bf16.mxu0 %v12152_v39  ;;  %v12200_v48 = vld [vmem:[#allocation5 + $0x324] ss:$48 sps:$4 sm:$0xff]  }
 0x48e   :  { %6118 = vmatprep.subr.bf16.mxu1 %v12155_v46  ;;  %v12203_v39 = vld [vmem:[#allocation5 + $0x924] ss:$48 sps:$4 sm:$0xff]   ;;  %v12198_v46 = vld [vmem:[#allocation5 + $0x320] ss:$48 sps:$4 sm:$0xff]  }
 0x48f   :  { %5987 = vmatmul.mubr.bf16.vlgmr.msra.gmra.mrb[16].mxu0 %v14068_v12 }
 0x490   :  { %6069 = vmatmul.mubr.bf16.vlgmr.msra.gmra.mrb[16].mxu1 %v14068_v12  ;;  %6078 = vmatpush1.bf16.msra.mxu0 %v12150_v54  ;;  %v12201_v54 = vld [vmem:[#allocation5 + $0x920] ss:$48 sps:$4 sm:$0xff]  }
 0x491   :  { %6109 = vmatprep.mubr.bf16.mxu0 %v14050_v21  ;;  %6119 = vmatpush1.bf16.msra.mxu1 %v12153_v55  ;;  %v12206_v55 = vld [vmem:[#allocation5 + $0x384] ss:$48 sps:$4 sm:$0xff]  }
 0x492   :  { %6150 = vmatprep.mubr.bf16.mxu1 %v14062_v47  ;;  %6079 = vmatprep.subr.bf16.mxu0 %v12158_v60  ;;  %v12209_v60 = vld [vmem:[#allocation5 + $0x984] ss:$48 sps:$4 sm:$0xff]  }
 0x493   :  { %6120 = vmatprep.subr.bf16.mxu1 %v12161_v61  ;;  %v12204_v61 = vld [vmem:[#allocation5 + $0x380] ss:$48 sps:$4 sm:$0xff]  }
 0x494   :  { %6080 = vmatpush1.bf16.msra.mxu0 %v12156_v8  ;;  %v12207_v8 = vld [vmem:[#allocation5 + $0x980] ss:$48 sps:$4 sm:$0xff]  }
 0x495   :  { %6121 = vmatpush1.bf16.msra.mxu1 %v12159_v13  ;;  %6081 = vmatprep.subr.bf16.mxu0 %v12164_v17  ;;  %v12212_v13 = vld [vmem:[#allocation5 + $0x3e4] ss:$48 sps:$4 sm:$0xff]  }
 0x496   :  { %6122 = vmatprep.subr.bf16.mxu1 %v12167_v5  ;;  %v12215_v17 = vld [vmem:[#allocation5 + $0x9e4] ss:$48 sps:$4 sm:$0xff]   ;;  %v12210_v5 = vld [vmem:[#allocation5 + $0x3e0] ss:$48 sps:$4 sm:$0xff]  }
 0x498   :  { %6082 = vmatpush1.bf16.msra.mxu0 %v12162_v22  ;;  %v12213_v22 = vld [vmem:[#allocation5 + $0x9e0] ss:$48 sps:$4 sm:$0xff]  }
 0x499   :  { %6123 = vmatpush1.bf16.msra.mxu1 %v12165_v24  ;;  %6083 = vmatprep.subr.bf16.mxu0 %v12170_v25  ;;  %v12218_v24 = vld [vmem:[#allocation5 + $0x444] ss:$48 sps:$4 sm:$0xff]  }
 0x49a   :  { %6124 = vmatprep.subr.bf16.mxu1 %v12173_v26  ;;  %v12221_v25 = vld [vmem:[#allocation5 + $0xa44] ss:$48 sps:$4 sm:$0xff]   ;;  %v12216_v26 = vld [vmem:[#allocation5 + $0x440] ss:$48 sps:$4 sm:$0xff]  }
 0x49c   :  { %6084 = vmatpush1.bf16.msra.mxu0 %v12168_v30  ;;  %v12219_v30 = vld [vmem:[#allocation5 + $0xa40] ss:$48 sps:$4 sm:$0xff]  }
 0x49d   :  { %6125 = vmatpush1.bf16.msra.mxu1 %v12171_v27  ;;  %6085 = vmatprep.subr.bf16.mxu0 %v12176_v29  ;;  %v12224_v27 = vld [vmem:[#allocation5 + $0x4a4] ss:$48 sps:$4 sm:$0xff]  }
 0x49e   :  { %6126 = vmatprep.subr.bf16.mxu1 %v12179_v31  ;;  %v12227_v29 = vld [vmem:[#allocation5 + $0xaa4] ss:$48 sps:$4 sm:$0xff]   ;;  %v12222_v31 = vld [vmem:[#allocation5 + $0x4a0] ss:$48 sps:$4 sm:$0xff]  }
 0x4a0   :  { %6086 = vmatpush1.bf16.msra.mxu0 %v12174_v32  ;;  %v12225_v32 = vld [vmem:[#allocation5 + $0xaa0] ss:$48 sps:$4 sm:$0xff]  }
 0x4a1   :  { %6127 = vmatpush1.bf16.msra.mxu1 %v12177_v36  ;;  %6087 = vmatprep.subr.bf16.mxu0 %v12182_v37  ;;  %v12230_v36 = vld [vmem:[#allocation5 + $0x504] ss:$48 sps:$4 sm:$0xff]  }
 0x4a2   :  { %6128 = vmatprep.subr.bf16.mxu1 %v12185_v58  ;;  %v12233_v37 = vld [vmem:[#allocation5 + $0xb04] ss:$48 sps:$4 sm:$0xff]   ;;  %v12228_v58 = vld [vmem:[#allocation5 + $0x500] ss:$48 sps:$4 sm:$0xff]  }
 0x4a4   :  { %6088 = vmatpush1.bf16.msra.mxu0 %v12180_v44  ;;  %v12231_v44 = vld [vmem:[#allocation5 + $0xb00] ss:$48 sps:$4 sm:$0xff]  }
 0x4a5   :  { %6129 = vmatpush1.bf16.msra.mxu1 %v12183_v43  ;;  %6089 = vmatprep.subr.bf16.mxu0 %v12188_v45  ;;  %v12236_v43 = vld [vmem:[#allocation5 + $0x564] ss:$48 sps:$4 sm:$0xff]  }
 0x4a6   :  { %6130 = vmatprep.subr.bf16.mxu1 %v12191_v49  ;;  %v12239_v45 = vld [vmem:[#allocation5 + $0xb64] ss:$48 sps:$4 sm:$0xff]   ;;  %v12234_v49 = vld [vmem:[#allocation5 + $0x560] ss:$48 sps:$4 sm:$0xff]  }
 0x4a8   :  { %6090 = vmatpush1.bf16.msra.mxu0 %v12186_v50  ;;  %v12237_v50 = vld [vmem:[#allocation5 + $0xb60] ss:$48 sps:$4 sm:$0xff]  }
 0x4a9   :  { %6131 = vmatpush1.bf16.msra.mxu1 %v12189_v53  ;;  %6091 = vmatprep.subr.bf16.mxu0 %v12194_v59  ;;  %v12242_v53 = vld [vmem:[#allocation5 + $0x5c4] ss:$48 sps:$4 sm:$0xff]  }
 0x4aa   :  { %6132 = vmatprep.subr.bf16.mxu1 %v12197_v0  ;;  %v12245_v59 = vld [vmem:[#allocation5 + $0xbc4] ss:$48 sps:$4 sm:$0xff]   ;;  %v12240_v0 = vld [vmem:[#allocation5 + $0x5c0] ss:$48 sps:$4 sm:$0xff]  }
 0x4ac   :  { %6092 = vmatpush1.bf16.msra.mxu0 %v12192_v1  ;;  %v12243_v1 = vld [vmem:[#allocation5 + $0xbc0] ss:$48 sps:$4 sm:$0xff]  }
 0x4ad   :  { %6133 = vmatpush1.bf16.msra.mxu1 %v12195_v40  ;;  %6093 = vmatprep.subr.bf16.mxu0 %v12200_v48  ;;  %v12248_v40 = vld [vmem:[#allocation5 + $0x2c] ss:$48 sps:$4 sm:$0xff]  }
 0x4ae   :  { %6134 = vmatprep.subr.bf16.mxu1 %v12203_v39  ;;  %v12251_v48 = vld [vmem:[#allocation5 + $0x62c] ss:$48 sps:$4 sm:$0xff]   ;;  %v12246_v39 = vld [vmem:[#allocation5 + $0x28] ss:$48 sps:$4 sm:$0xff]  }
 0x4b0   :  { %6094 = vmatpush1.bf16.msra.mxu0 %v12198_v46  ;;  %v12249_v46 = vld [vmem:[#allocation5 + $0x628] ss:$48 sps:$4 sm:$0xff]  }
 0x4b1   :  { %6135 = vmatpush1.bf16.msra.mxu1 %v12201_v54  ;;  %6095 = vmatprep.subr.bf16.mxu0 %v12206_v55  ;;  %v12254_v54 = vld [vmem:[#allocation5 + $0x8c] ss:$48 sps:$4 sm:$0xff]  }
 0x4b2   :  { %6136 = vmatprep.subr.bf16.mxu1 %v12209_v60  ;;  %v12257_v55 = vld [vmem:[#allocation5 + $0x68c] ss:$48 sps:$4 sm:$0xff]   ;;  %v12252_v60 = vld [vmem:[#allocation5 + $0x88] ss:$48 sps:$4 sm:$0xff]  }
 0x4b4   :  { %6096 = vmatpush1.bf16.msra.mxu0 %v12204_v61  ;;  %v12255_v61 = vld [vmem:[#allocation5 + $0x688] ss:$48 sps:$4 sm:$0xff]  }
 0x4b5   :  { %6137 = vmatpush1.bf16.msra.mxu1 %v12207_v8  ;;  %6097 = vmatprep.subr.bf16.mxu0 %v12212_v13  ;;  %v12260_v8 = vld [vmem:[#allocation5 + $0xec] ss:$48 sps:$4 sm:$0xff]  }
 0x4b6   :  { %6138 = vmatprep.subr.bf16.mxu1 %v12215_v17  ;;  %v12263_v13 = vld [vmem:[#allocation5 + $0x6ec] ss:$48 sps:$4 sm:$0xff]   ;;  %v12258_v17 = vld [vmem:[#allocation5 + $0xe8] ss:$48 sps:$4 sm:$0xff]  }
 0x4b8   :  { %6098 = vmatpush1.bf16.msra.mxu0 %v12210_v5  ;;  %v12261_v5 = vld [vmem:[#allocation5 + $0x6e8] ss:$48 sps:$4 sm:$0xff]  }
 0x4b9   :  { %6139 = vmatpush1.bf16.msra.mxu1 %v12213_v22  ;;  %6099 = vmatprep.subr.bf16.mxu0 %v12218_v24  ;;  %v12266_v22 = vld [vmem:[#allocation5 + $0x14c] ss:$48 sps:$4 sm:$0xff]  }
 0x4ba   :  { %6140 = vmatprep.subr.bf16.mxu1 %v12221_v25  ;;  %v12269_v24 = vld [vmem:[#allocation5 + $0x74c] ss:$48 sps:$4 sm:$0xff]   ;;  %v12264_v25 = vld [vmem:[#allocation5 + $0x148] ss:$48 sps:$4 sm:$0xff]  }
 0x4bc   :  { %6100 = vmatpush1.bf16.msra.mxu0 %v12216_v26  ;;  %v12272_v26 = vld [vmem:[#allocation5 + $0x1ac] ss:$48 sps:$4 sm:$0xff]  }
 0x4bd   :  { %6141 = vmatpush1.bf16.msra.mxu1 %v12219_v30  ;;  %6101 = vmatprep.subr.bf16.mxu0 %v12224_v27  ;;  %v12275_v30 = vld [vmem:[#allocation5 + $0x7ac] ss:$48 sps:$4 sm:$0xff]   ;;  %v12273_v27 = vld [vmem:[#allocation5 + $0x7a8] ss:$48 sps:$4 sm:$0xff]  }
 0x4be   :  { %6142 = vmatprep.subr.bf16.mxu1 %v12227_v29  ;;  %v12278_v29 = vld [vmem:[#allocation5 + $0x20c] ss:$48 sps:$4 sm:$0xff]  }
 0x4c0   :  { %6102 = vmatpush1.bf16.msra.mxu0 %v12222_v31  ;;  %v12281_v31 = vld [vmem:[#allocation5 + $0x80c] ss:$48 sps:$4 sm:$0xff]  }
 0x4c1   :  { %6143 = vmatpush1.bf16.msra.mxu1 %v12225_v32  ;;  %6103 = vmatprep.subr.bf16.mxu0 %v12230_v36  ;;  %v12276_v32 = vld [vmem:[#allocation5 + $0x208] ss:$48 sps:$4 sm:$0xff]  }
 0x4c2   :  { %6144 = vmatprep.subr.bf16.mxu1 %v12233_v37  ;;  %v12279_v36 = vld [vmem:[#allocation5 + $0x808] ss:$48 sps:$4 sm:$0xff]   ;;  %v12284_v37 = vld [vmem:[#allocation5 + $0x26c] ss:$48 sps:$4 sm:$0xff]  }
 0x4c4   :  { %6104 = vmatpush1.bf16.msra.mxu0 %v12228_v58 }
 0x4c5   :  { %6145 = vmatpush1.bf16.msra.mxu1 %v12231_v44  ;;  %6105 = vmatprep.subr.bf16.mxu0 %v12236_v43  ;;  %v12287_v43 = vld [vmem:[#allocation5 + $0x86c] ss:$48 sps:$4 sm:$0xff]  }
 0x4c6   :  { %6146 = vmatprep.subr.bf16.mxu1 %v12239_v45 }
 0x4c8   :  { %6106 = vmatpush1.bf16.msra.mxu0 %v12234_v49 }
 0x4c9   :  { %6147 = vmatpush1.bf16.msra.mxu1 %v12237_v50  ;;  %6107 = vmatprep.subr.bf16.mxu0 %v12242_v53 }
 0x4ca   :  { %6148 = vmatprep.subr.bf16.mxu1 %v12245_v59 }
 0x4cc   :  { %6108 = vmatpush1.bf16.msra.mxu0 %v12240_v0 }
 0x4cd   :  { %6149 = vmatpush1.bf16.msra.mxu1 %v12243_v1  ;;  %6159 = vmatprep.subr.bf16.mxu0 %v12248_v40 }
 0x4ce   :  { %6200 = vmatprep.subr.bf16.mxu1 %v12251_v48  ;;  %v12282_v48 = vld [vmem:[#allocation5 + $0x268] ss:$48 sps:$4 sm:$0xff]  }
 0x4cf   :  { %6110 = vmatmul.mubr.bf16.vlgmr.msra.gmra.mrb[20].mxu0 %v14054_v23 }
 0x4d0   :  { %6151 = vmatmul.mubr.bf16.vlgmr.msra.gmra.mrb[20].mxu1 %v14068_v12  ;;  %6160 = vmatpush1.bf16.msra.mxu0 %v12246_v39 }
 0x4d1   :  { %6191 = vmatprep.mubr.bf16.mxu0 %v14050_v21  ;;  %6201 = vmatpush1.bf16.msra.mxu1 %v12249_v46  ;;  %v12267_v21 = vld [vmem:[#allocation5 + $0x748] ss:$48 sps:$4 sm:$0xff]  }
 0x4d2   :  { %6232 = vmatprep.mubr.bf16.mxu1 %v14062_v47  ;;  %6161 = vmatprep.subr.bf16.mxu0 %v12254_v54  ;;  %v12270_v47 = vld [vmem:[#allocation5 + $0x1a8] ss:$48 sps:$4 sm:$0xff]   ;;  %v12290_v54 = vld [vmem:[#allocation5 + $0x2cc] ss:$48 sps:$4 sm:$0xff]  }
 0x4d3   :  { %6202 = vmatprep.subr.bf16.mxu1 %v12257_v55  ;;  %v12288_v55 = vld [vmem:[#allocation5 + $0x2c8] ss:$48 sps:$4 sm:$0xff]  }
 0x4d4   :  { %6162 = vmatpush1.bf16.msra.mxu0 %v12252_v60  ;;  %v12296_v60 = vld [vmem:[#allocation5 + $0x32c] ss:$48 sps:$4 sm:$0xff]  }
 0x4d5   :  { %6203 = vmatpush1.bf16.msra.mxu1 %v12255_v61  ;;  %6163 = vmatprep.subr.bf16.mxu0 %v12260_v8  ;;  %v12294_v61 = vld [vmem:[#allocation5 + $0x328] ss:$48 sps:$4 sm:$0xff]  }
 0x4d6   :  { %6204 = vmatprep.subr.bf16.mxu1 %v12263_v13  ;;  %v12297_v8 = vld [vmem:[#allocation5 + $0x928] ss:$48 sps:$4 sm:$0xff]   ;;  %v12302_v13 = vld [vmem:[#allocation5 + $0x38c] ss:$48 sps:$4 sm:$0xff]  }
 0x4d8   :  { %6164 = vmatpush1.bf16.msra.mxu0 %v12258_v17  ;;  %v12305_v17 = vld [vmem:[#allocation5 + $0x98c] ss:$48 sps:$4 sm:$0xff]  }
 0x4d9   :  { %6205 = vmatpush1.bf16.msra.mxu1 %v12261_v5  ;;  %6165 = vmatprep.subr.bf16.mxu0 %v12266_v22  ;;  %v12300_v5 = vld [vmem:[#allocation5 + $0x388] ss:$48 sps:$4 sm:$0xff]  }
 0x4da   :  { %6206 = vmatprep.subr.bf16.mxu1 %v12269_v24  ;;  %v12303_v22 = vld [vmem:[#allocation5 + $0x988] ss:$48 sps:$4 sm:$0xff]   ;;  %v12308_v24 = vld [vmem:[#allocation5 + $0x3ec] ss:$48 sps:$4 sm:$0xff]  }
 0x4dc   :  { %6166 = vmatpush1.bf16.msra.mxu0 %v12264_v25  ;;  %v12311_v25 = vld [vmem:[#allocation5 + $0x9ec] ss:$48 sps:$4 sm:$0xff]  }
 0x4dd   :  { %6207 = vmatpush1.bf16.msra.mxu1 %v12267_v21  ;;  %6167 = vmatprep.subr.bf16.mxu0 %v12272_v26  ;;  %v12306_v21 = vld [vmem:[#allocation5 + $0x3e8] ss:$48 sps:$4 sm:$0xff]  }
 0x4de   :  { %6208 = vmatprep.subr.bf16.mxu1 %v12275_v30  ;;  %v12309_v26 = vld [vmem:[#allocation5 + $0x9e8] ss:$48 sps:$4 sm:$0xff]   ;;  %v12314_v30 = vld [vmem:[#allocation5 + $0x44c] ss:$48 sps:$4 sm:$0xff]  }
 0x4e0   :  { %6168 = vmatpush1.bf16.msra.mxu0 %v12270_v47  ;;  %v12317_v47 = vld [vmem:[#allocation5 + $0xa4c] ss:$48 sps:$4 sm:$0xff]  }
 0x4e1   :  { %6209 = vmatpush1.bf16.msra.mxu1 %v12273_v27  ;;  %6169 = vmatprep.subr.bf16.mxu0 %v12278_v29  ;;  %v12312_v27 = vld [vmem:[#allocation5 + $0x448] ss:$48 sps:$4 sm:$0xff]  }
 0x4e2   :  { %v5824_v58 = vpop.f32.mrb[12].mxu0  ;;  %v5906_v44 = vpop.f32.mrb[12].mxu1  ;;  %6210 = vmatprep.subr.bf16.mxu1 %v12281_v31  ;;  %v12315_v29 = vld [vmem:[#allocation5 + $0xa48] ss:$48 sps:$4 sm:$0xff]   ;;  %v12320_v31 = vld [vmem:[#allocation5 + $0x4ac] ss:$48 sps:$4 sm:$0xff]  }
 0x4e3   :  { %v14087_v45 = vadd.f32 %v5824_v58, %v13946_v56  ;;  %v14090_v49 = vadd.f32 %v5906_v44, %v13949_v57  ;;  %v5826_v50 = vpop.f32.mrb[13].mxu0  ;;  %v5908_v53 = vpop.f32.mrb[13].mxu1  ;;  %v12285_v56 = vld [vmem:[#allocation5 + $0x868] ss:$48 sps:$4 sm:$0xff]   ;;  %v12293_v57 = vld [vmem:[#allocation5 + $0x8cc] ss:$48 sps:$4 sm:$0xff]  }
 0x4e4   :  { %v14093_v59 = vadd.f32 %v5826_v50, %v13952_v62  ;;  %v14096_v0 = vadd.f32 %v5908_v53, %v13955_v63  ;;  %v5828_v1 = vpop.f32.mrb[14].mxu0  ;;  %v5910_v40 = vpop.f32.mrb[14].mxu1  ;;  %6170 = vmatpush1.bf16.msra.mxu0 %v12276_v32  ;;  %v12291_v62 = vld [vmem:[#allocation5 + $0x8c8] ss:$48 sps:$4 sm:$0xff]   ;;  %v12299_v63 = vld [vmem:[#allocation5 + $0x92c] ss:$48 sps:$4 sm:$0xff]  }
 0x4e5   :  { %6211 = vmatpush1.bf16.msra.mxu1 %v12279_v36  ;;  %v5829_v39 = vpop.f32.mrb[15].mxu0  ;;  %v5911_v46 = vpop.f32.mrb[15].mxu1  ;;  %6171 = vmatprep.subr.bf16.mxu0 %v12284_v37  ;;  %v12323_v32 = vld [vmem:[#allocation5 + $0xaac] ss:$48 sps:$4 sm:$0xff]   ;;  %v12318_v36 = vld [vmem:[#allocation5 + $0x4a8] ss:$48 sps:$4 sm:$0xff]  }
 0x4e6   :  { %6212 = vmatprep.subr.bf16.mxu1 %v12287_v43  ;;  %v12321_v37 = vld [vmem:[#allocation5 + $0xaa8] ss:$48 sps:$4 sm:$0xff]   ;;  %v12326_v58 = vld [vmem:[#allocation5 + $0x50c] ss:$48 sps:$4 sm:$0xff]  }
 0x4e7   :  { %v12329_v44 = vld [vmem:[#allocation5 + $0xb0c] ss:$48 sps:$4 sm:$0xff]   ;;  %v12324_v43 = vld [vmem:[#allocation5 + $0x508] ss:$48 sps:$4 sm:$0xff]  }
 0x4e8   :  { %6172 = vmatpush1.bf16.msra.mxu0 %v12282_v48  ;;  %v12327_v50 = vld [vmem:[#allocation5 + $0xb08] ss:$48 sps:$4 sm:$0xff]   ;;  %v12332_v53 = vld [vmem:[#allocation5 + $0x56c] ss:$48 sps:$4 sm:$0xff]  }
 0x4e9   :  { %6213 = vmatpush1.bf16.msra.mxu1 %v12285_v56  ;;  %6173 = vmatprep.subr.bf16.mxu0 %v12290_v54  ;;  %v12335_v1 = vld [vmem:[#allocation5 + $0xb6c] ss:$48 sps:$4 sm:$0xff]   ;;  %v12330_v40 = vld [vmem:[#allocation5 + $0x568] ss:$48 sps:$4 sm:$0xff]  }
 0x4ea   :  { %6214 = vmatprep.subr.bf16.mxu1 %v12293_v57  ;;  %v12333_v48 = vld [vmem:[#allocation5 + $0xb68] ss:$48 sps:$4 sm:$0xff]   ;;  %v12338_v39 = vld [vmem:[#allocation5 + $0x5cc] ss:$48 sps:$4 sm:$0xff]  }
 0x4eb   :  { %v12341_v46 = vld [vmem:[#allocation5 + $0xbcc] ss:$48 sps:$4 sm:$0xff]   ;;  %v12336_v56 = vld [vmem:[#allocation5 + $0x5c8] ss:$48 sps:$4 sm:$0xff]  }
 0x4ec   :  { %6174 = vmatpush1.bf16.msra.mxu0 %v12288_v55  ;;  %v12339_v54 = vld [vmem:[#allocation5 + $0xbc8] ss:$48 sps:$4 sm:$0xff]   ;;  %v12344_v57 = vld [vmem:[#allocation10 + $0x4] ss:$24 sps:$4 sm:$0xff]  }
 0x4ed   :  { %6215 = vmatpush1.bf16.msra.mxu1 %v12291_v62  ;;  %6175 = vmatprep.subr.bf16.mxu0 %v12296_v60  ;;  %v12347_v55 = vld [vmem:[#allocation10 + $0xc] ss:$24 sps:$4 sm:$0xff]   ;;  %v12342_v62 = vld [vmem:[#allocation10] ss:$24 sps:$4 sm:$0xff]  }
 0x4ee   :  { %6216 = vmatprep.subr.bf16.mxu1 %v12299_v63  ;;  %v12345_v60 = vld [vmem:[#allocation10 + $0x8] ss:$24 sps:$4 sm:$0xff]   ;;  %v12350_v63 = vld [vmem:[#allocation10 + $0x34] ss:$24 sps:$4 sm:$0xff]  }
 0x4f0   :  { %6176 = vmatpush1.bf16.msra.mxu0 %v12294_v61  ;;  %v12353_v61 = vld [vmem:[#allocation10 + $0x3c] ss:$24 sps:$4 sm:$0xff]  }
 0x4f1   :  { %6217 = vmatpush1.bf16.msra.mxu1 %v12297_v8  ;;  %6177 = vmatprep.subr.bf16.mxu0 %v12302_v13  ;;  %v12348_v8 = vld [vmem:[#allocation10 + $0x30] ss:$24 sps:$4 sm:$0xff]  }
 0x4f2   :  { %6218 = vmatprep.subr.bf16.mxu1 %v12305_v17  ;;  %v12351_v13 = vld [vmem:[#allocation10 + $0x38] ss:$24 sps:$4 sm:$0xff]   ;;  %v12356_v17 = vld [vmem:[#allocation10 + $0x64] ss:$24 sps:$4 sm:$0xff]  }
 0x4f4   :  { %6178 = vmatpush1.bf16.msra.mxu0 %v12300_v5  ;;  %v12359_v5 = vld [vmem:[#allocation10 + $0x6c] ss:$24 sps:$4 sm:$0xff]  }
 0x4f5   :  { %6219 = vmatpush1.bf16.msra.mxu1 %v12303_v22  ;;  %6179 = vmatprep.subr.bf16.mxu0 %v12308_v24  ;;  %v12354_v22 = vld [vmem:[#allocation10 + $0x60] ss:$24 sps:$4 sm:$0xff]  }
 0x4f6   :  { %6220 = vmatprep.subr.bf16.mxu1 %v12311_v25  ;;  %v12357_v24 = vld [vmem:[#allocation10 + $0x68] ss:$24 sps:$4 sm:$0xff]   ;;  %v12362_v25 = vld [vmem:[#allocation10 + $0x94] ss:$24 sps:$4 sm:$0xff]  }
 0x4f8   :  { %6180 = vmatpush1.bf16.msra.mxu0 %v12306_v21  ;;  %v12365_v21 = vld [vmem:[#allocation10 + $0x9c] ss:$24 sps:$4 sm:$0xff]  }
 0x4f9   :  { %6221 = vmatpush1.bf16.msra.mxu1 %v12309_v26  ;;  %6181 = vmatprep.subr.bf16.mxu0 %v12314_v30  ;;  %v12368_v26 = vld [vmem:[#allocation10 + $0xc4] ss:$24 sps:$4 sm:$0xff]  }
 0x4fa   :  { %6222 = vmatprep.subr.bf16.mxu1 %v12317_v47  ;;  %v12371_v30 = vld [vmem:[#allocation10 + $0xcc] ss:$24 sps:$4 sm:$0xff]   ;;  %v12366_v47 = vld [vmem:[#allocation10 + $0xc0] ss:$24 sps:$4 sm:$0xff]  }
 0x4fc   :  { %6182 = vmatpush1.bf16.msra.mxu0 %v12312_v27  ;;  %v12369_v27 = vld [vmem:[#allocation10 + $0xc8] ss:$24 sps:$4 sm:$0xff]  }
 0x4fd   :  { %6223 = vmatpush1.bf16.msra.mxu1 %v12315_v29  ;;  %6183 = vmatprep.subr.bf16.mxu0 %v12320_v31  ;;  %v12374_v29 = vld [vmem:[#allocation10 + $0xf4] ss:$24 sps:$4 sm:$0xff]  }
 0x4fe   :  { %6224 = vmatprep.subr.bf16.mxu1 %v12323_v32  ;;  %v12377_v31 = vld [vmem:[#allocation10 + $0xfc] ss:$24 sps:$4 sm:$0xff]   ;;  %v12372_v32 = vld [vmem:[#allocation10 + $0xf0] ss:$24 sps:$4 sm:$0xff]  }
 0x500   :  { %6184 = vmatpush1.bf16.msra.mxu0 %v12318_v36  ;;  %v12375_v36 = vld [vmem:[#allocation10 + $0xf8] ss:$24 sps:$4 sm:$0xff]  }
 0x501   :  { %6225 = vmatpush1.bf16.msra.mxu1 %v12321_v37  ;;  %6185 = vmatprep.subr.bf16.mxu0 %v12326_v58  ;;  %v12380_v37 = vld [vmem:[#allocation10 + $0x124] ss:$24 sps:$4 sm:$0xff]  }
 0x502   :  { %6226 = vmatprep.subr.bf16.mxu1 %v12329_v44  ;;  %v12383_v58 = vld [vmem:[#allocation10 + $0x12c] ss:$24 sps:$4 sm:$0xff]   ;;  %v12378_v44 = vld [vmem:[#allocation10 + $0x120] ss:$24 sps:$4 sm:$0xff]  }
 0x504   :  { %6186 = vmatpush1.bf16.msra.mxu0 %v12324_v43  ;;  %v12381_v43 = vld [vmem:[#allocation10 + $0x128] ss:$24 sps:$4 sm:$0xff]  }
 0x505   :  { %6227 = vmatpush1.bf16.msra.mxu1 %v12327_v50  ;;  %6187 = vmatprep.subr.bf16.mxu0 %v12332_v53  ;;  %v12386_v50 = vld [vmem:[#allocation10 + $0x154] ss:$24 sps:$4 sm:$0xff]  }
 0x506   :  { %6228 = vmatprep.subr.bf16.mxu1 %v12335_v1  ;;  %v12389_v53 = vld [vmem:[#allocation10 + $0x15c] ss:$24 sps:$4 sm:$0xff]   ;;  %v12384_v1 = vld [vmem:[#allocation10 + $0x150] ss:$24 sps:$4 sm:$0xff]  }
 0x508   :  { %6188 = vmatpush1.bf16.msra.mxu0 %v12330_v40  ;;  %v12387_v40 = vld [vmem:[#allocation10 + $0x158] ss:$24 sps:$4 sm:$0xff]  }
 0x509   :  { %6229 = vmatpush1.bf16.msra.mxu1 %v12333_v48  ;;  %6189 = vmatprep.subr.bf16.mxu0 %v12338_v39  ;;  %v12392_v48 = vld [vmem:[#allocation10 + $0x184] ss:$24 sps:$4 sm:$0xff]  }
 0x50a   :  { %6230 = vmatprep.subr.bf16.mxu1 %v12341_v46  ;;  %v12395_v39 = vld [vmem:[#allocation10 + $0x18c] ss:$24 sps:$4 sm:$0xff]   ;;  %v12390_v46 = vld [vmem:[#allocation10 + $0x180] ss:$24 sps:$4 sm:$0xff]  }
 0x50c   :  { %6190 = vmatpush1.bf16.msra.mxu0 %v12336_v56  ;;  %v12393_v56 = vld [vmem:[#allocation10 + $0x188] ss:$24 sps:$4 sm:$0xff]  }
 0x50d   :  { %6231 = vmatpush1.bf16.msra.mxu1 %v12339_v54  ;;  %7485 = vmatprep.subr.bf16.mxu0 %v12344_v57  ;;  %v12398_v54 = vld [vmem:[#allocation10 + $0x1b4] ss:$24 sps:$4 sm:$0xff]  }
 0x50e   :  { %7571 = vmatprep.subr.bf16.mxu1 %v12347_v55  ;;  %v12401_v57 = vld [vmem:[#allocation10 + $0x1bc] ss:$24 sps:$4 sm:$0xff]   ;;  %v12396_v55 = vld [vmem:[#allocation10 + $0x1b0] ss:$24 sps:$4 sm:$0xff]  }
 0x50f   :  { %6192 = vmatmul.mubr.bf16.vlgmr.msra.gmra.mrb[24].mxu0 %v14054_v23  ;;  %v12360_v23 = vld [vmem:[#allocation10 + $0x90] ss:$24 sps:$4 sm:$0xff]  }
 0x510   :  { %6233 = vmatmul.mubr.bf16.vlgmr.msra.gmra.mrb[24].mxu1 %v14068_v12  ;;  %7486 = vmatpush1.bf16.msra.mxu0 %v12342_v62  ;;  %v12363_v12 = vld [vmem:[#allocation10 + $0x98] ss:$24 sps:$4 sm:$0xff]  }
 0x511   :  { %7572 = vmatpush1.bf16.msra.mxu1 %v12345_v60  ;;  %7487 = vmatprep.subr.bf16.mxu0 %v12350_v63  ;;  %v12399_v62 = vld [vmem:[#allocation10 + $0x1b8] ss:$24 sps:$4 sm:$0xff]   ;;  %v12404_v60 = vld [vmem:[#allocation10 + $0x1e4] ss:$24 sps:$4 sm:$0xff]  }
 0x512   :  { %7573 = vmatprep.subr.bf16.mxu1 %v12353_v61  ;;  %v12407_v63 = vld [vmem:[#allocation10 + $0x1ec] ss:$24 sps:$4 sm:$0xff]   ;;  %v12402_v61 = vld [vmem:[#allocation10 + $0x1e0] ss:$24 sps:$4 sm:$0xff]  }
 0x514   :  { %7488 = vmatpush1.bf16.msra.mxu0 %v12348_v8  ;;  %v12405_v8 = vld [vmem:[#allocation10 + $0x1e8] ss:$24 sps:$4 sm:$0xff]  }
 0x515   :  { %7574 = vmatpush1.bf16.msra.mxu1 %v12351_v13  ;;  %7489 = vmatprep.subr.bf16.mxu0 %v12356_v17  ;;  %v12410_v13 = vld [vmem:[#allocation10 + $0x214] ss:$24 sps:$4 sm:$0xff]  }
 0x516   :  { %7575 = vmatprep.subr.bf16.mxu1 %v12359_v5  ;;  %v12413_v17 = vld [vmem:[#allocation10 + $0x21c] ss:$24 sps:$4 sm:$0xff]   ;;  %v12408_v5 = vld [vmem:[#allocation10 + $0x210] ss:$24 sps:$4 sm:$0xff]  }
 0x518   :  { %7490 = vmatpush1.bf16.msra.mxu0 %v12354_v22  ;;  %v12411_v22 = vld [vmem:[#allocation10 + $0x218] ss:$24 sps:$4 sm:$0xff]  }
 0x519   :  { %7576 = vmatpush1.bf16.msra.mxu1 %v12357_v24  ;;  %7491 = vmatprep.subr.bf16.mxu0 %v12362_v25  ;;  %v12416_v24 = vld [vmem:[#allocation10 + $0x244] ss:$24 sps:$4 sm:$0xff]  }
 0x51a   :  { %7577 = vmatprep.subr.bf16.mxu1 %v12365_v21  ;;  %v12419_v25 = vld [vmem:[#allocation10 + $0x24c] ss:$24 sps:$4 sm:$0xff]   ;;  %v12414_v21 = vld [vmem:[#allocation10 + $0x240] ss:$24 sps:$4 sm:$0xff]  }
 0x51c   :  { %7492 = vmatpush1.bf16.msra.mxu0 %v12360_v23  ;;  %v12417_v23 = vld [vmem:[#allocation10 + $0x248] ss:$24 sps:$4 sm:$0xff]  }
 0x51d   :  { %7578 = vmatpush1.bf16.msra.mxu1 %v12363_v12  ;;  %7493 = vmatprep.subr.bf16.mxu0 %v12368_v26  ;;  %v12422_v12 = vld [vmem:[#allocation10 + $0x274] ss:$24 sps:$4 sm:$0xff]  }
 0x51e   :  { %7579 = vmatprep.subr.bf16.mxu1 %v12371_v30  ;;  %v12425_v26 = vld [vmem:[#allocation10 + $0x27c] ss:$24 sps:$4 sm:$0xff]   ;;  %v12420_v30 = vld [vmem:[#allocation10 + $0x270] ss:$24 sps:$4 sm:$0xff]  }
 0x520   :  { %7494 = vmatpush1.bf16.msra.mxu0 %v12366_v47  ;;  %v12423_v47 = vld [vmem:[#allocation10 + $0x278] ss:$24 sps:$4 sm:$0xff]  }
 0x521   :  { %7580 = vmatpush1.bf16.msra.mxu1 %v12369_v27  ;;  %7495 = vmatprep.subr.bf16.mxu0 %v12374_v29  ;;  %v12428_v27 = vld [vmem:[#allocation10 + $0x2a4] ss:$24 sps:$4 sm:$0xff]  }
 0x522   :  { %7581 = vmatprep.subr.bf16.mxu1 %v12377_v31  ;;  %v12431_v29 = vld [vmem:[#allocation10 + $0x2ac] ss:$24 sps:$4 sm:$0xff]   ;;  %v12426_v31 = vld [vmem:[#allocation10 + $0x2a0] ss:$24 sps:$4 sm:$0xff]  }
 0x524   :  { %7496 = vmatpush1.bf16.msra.mxu0 %v12372_v32  ;;  %v12429_v32 = vld [vmem:[#allocation10 + $0x2a8] ss:$24 sps:$4 sm:$0xff]  }
 0x525   :  { %7582 = vmatpush1.bf16.msra.mxu1 %v12375_v36  ;;  %7497 = vmatprep.subr.bf16.mxu0 %v12380_v37  ;;  %v12434_v36 = vld [vmem:[#allocation10 + $0x2d4] ss:$24 sps:$4 sm:$0xff]  }
 0x526   :  { %7583 = vmatprep.subr.bf16.mxu1 %v12383_v58  ;;  %v12437_v37 = vld [vmem:[#allocation10 + $0x2dc] ss:$24 sps:$4 sm:$0xff]   ;;  %v12432_v58 = vld [vmem:[#allocation10 + $0x2d0] ss:$24 sps:$4 sm:$0xff]  }
 0x528   :  { %7498 = vmatpush1.bf16.msra.mxu0 %v12378_v44  ;;  %v12435_v44 = vld [vmem:[#allocation10 + $0x2d8] ss:$24 sps:$4 sm:$0xff]  }
 0x529   :  { %7584 = vmatpush1.bf16.msra.mxu1 %v12381_v43  ;;  %7499 = vmatprep.subr.bf16.mxu0 %v12386_v50  ;;  %v12440_v43 = vld [vmem:[#allocation10 + $0x304] ss:$24 sps:$4 sm:$0xff]  }
 0x52a   :  { %7585 = vmatprep.subr.bf16.mxu1 %v12389_v53  ;;  %v12443_v50 = vld [vmem:[#allocation10 + $0x30c] ss:$24 sps:$4 sm:$0xff]  }
 0x52c   :  { %7500 = vmatpush1.bf16.msra.mxu0 %v12384_v1 }
 0x52d   :  { %7586 = vmatpush1.bf16.msra.mxu1 %v12387_v40  ;;  %7501 = vmatprep.subr.bf16.mxu0 %v12392_v48 }
 0x52e   :  { %7587 = vmatprep.subr.bf16.mxu1 %v12395_v39 }
 0x530   :  { %7502 = vmatpush1.bf16.msra.mxu0 %v12390_v46 }
 0x531   :  { %7588 = vmatpush1.bf16.msra.mxu1 %v12393_v56  ;;  %7503 = vmatprep.subr.bf16.mxu0 %v12398_v54 }
 0x532   :  { %7589 = vmatprep.subr.bf16.mxu1 %v12401_v57 }
 0x534   :  { %7504 = vmatpush1.bf16.msra.mxu0 %v12396_v55 }
 0x535   :  { %7590 = vmatpush1.bf16.msra.mxu1 %v12399_v62  ;;  %7505 = vmatprep.subr.bf16.mxu0 %v12404_v60 }
 0x536   :  { %7591 = vmatprep.subr.bf16.mxu1 %v12407_v63  ;;  %v10558_v63 = vmul.f32 -1.442695, %v14087_v45 }
 0x538   :  { %7506 = vmatpush1.bf16.msra.mxu0 %v12402_v61  ;;  %v10559_v61 = vmul.f32 -1.442695, %v14093_v59  ;;  %12946 = vpow2.f32 %v10558_v63 }
 0x539   :  { %7592 = vmatpush1.bf16.msra.mxu1 %v12405_v8  ;;  %7507 = vmatprep.subr.bf16.mxu0 %v12410_v13 }
 0x53a   :  { %7593 = vmatprep.subr.bf16.mxu1 %v12413_v17  ;;  %12948 = vpow2.f32 %v10559_v61  ;;  %v12446_v61 = vld [vmem:[#allocation10 + $0x334] ss:$24 sps:$4 sm:$0xff]  }
 0x53c   :  { %7508 = vmatpush1.bf16.msra.mxu0 %v12408_v5 }
 0x53d   :  { %7594 = vmatpush1.bf16.msra.mxu1 %v12411_v22  ;;  %7509 = vmatprep.subr.bf16.mxu0 %v12416_v24 }
 0x53e   :  { %7595 = vmatprep.subr.bf16.mxu1 %v12419_v25 }
 0x540   :  { %7510 = vmatpush1.bf16.msra.mxu0 %v12414_v21 }
 0x541   :  { %7596 = vmatpush1.bf16.msra.mxu1 %v12417_v23  ;;  %7511 = vmatprep.subr.bf16.mxu0 %v12422_v12 }
 0x542   :  { %7597 = vmatprep.subr.bf16.mxu1 %v12425_v26 }
 0x544   :  { %7512 = vmatpush1.bf16.msra.mxu0 %v12420_v30 }
 0x545   :  { %7598 = vmatpush1.bf16.msra.mxu1 %v12423_v47  ;;  %7513 = vmatprep.subr.bf16.mxu0 %v12428_v27 }
 0x546   :  { %7599 = vmatprep.subr.bf16.mxu1 %v12431_v29 }
 0x548   :  { %7514 = vmatpush1.bf16.msra.mxu0 %v12426_v31 }
 0x549   :  { %7600 = vmatpush1.bf16.msra.mxu1 %v12429_v32  ;;  %7515 = vmatprep.subr.bf16.mxu0 %v12434_v36 }
 0x54a   :  { %7601 = vmatprep.subr.bf16.mxu1 %v12437_v37 }
 0x54c   :  { %7516 = vmatpush1.bf16.msra.mxu0 %v12432_v58 }
 0x54d   :  { %7602 = vmatpush1.bf16.msra.mxu1 %v12435_v44  ;;  %7528 = vmatprep.subr.bf16.mxu0 %v12440_v43 }
 0x54e   :  { %7614 = vmatprep.subr.bf16.mxu1 %v12443_v50 }
 0x562   :  { %v5988_v53 = vpop.f32.mrb[16].mxu0 }
 0x563   :  { %v6269_v1 = vadd.f32 %v5988_v53, %v13985_v4  ;;  %v6070_v40 = vpop.f32.mrb[16].mxu1  ;;  %v5990_v48 = vpop.f32.mrb[17].mxu0 }
 0x564   :  { %v14102_v39 = vadd.f32 %v6070_v40, %v13988_v6  ;;  %v6270_v46 = vadd.f32 %v5990_v48, %v13991_v10  ;;  %v6072_v56 = vpop.f32.mrb[17].mxu1  ;;  %v5992_v54 = vpop.f32.mrb[18].mxu0 }
 0x565   :  { %v14106_v57 = vadd.f32 %v6072_v56, %v13994_v11  ;;  %v6074_v55 = vpop.f32.mrb[18].mxu1  ;;  %v5993_v62 = vpop.f32.mrb[19].mxu0  ;;  %v10562_v4 = vmul.f32 -1.442695, %v6269_v1 }
 0x566   :  { %v6075_v60 = vpop.f32.mrb[19].mxu1  ;;  %v10563_v8 = vmul.f32 -1.442695, %v6270_v46  ;;  %v12947_v6 = vpop.eup %12946 }
 0x567   :  { %v12949_v13 = vpop.eup %12948  ;;  %12950 = vpow2.f32 %v10562_v4  ;;  %v6257_v10 = vadd.f32 1.0, %v12947_v6  ;;  %v12441_v60 = vld [vmem:[#allocation10 + $0x308] ss:$24 sps:$4 sm:$0xff]   ;;  %v12449_v4 = vld [vmem:[#allocation10 + $0x33c] ss:$24 sps:$4 sm:$0xff]  }
 0x568   :  { %12952 = vpow2.f32 %v10563_v8  ;;  %v6258_v17 = vadd.f32 1.0, %v12949_v13  ;;  %v12444_v8 = vld [vmem:[#allocation10 + $0x330] ss:$24 sps:$4 sm:$0xff]   ;;  %v12452_v6 = vld [vmem:[#allocation10 + $0x364] ss:$24 sps:$4 sm:$0xff]  }
 0x569   :  { %12954 = vrcp.f32 %v6257_v10  ;;  %v12455_v13 = vld [vmem:[#allocation10 + $0x36c] ss:$24 sps:$4 sm:$0xff]   ;;  %v12453_v10 = vld [vmem:[#allocation10 + $0x368] ss:$24 sps:$4 sm:$0xff]  }
 0x56a   :  { %12956 = vrcp.f32 %v6258_v17  ;;  %v12458_v17 = vld [vmem:[#allocation10 + $0x394] ss:$24 sps:$4 sm:$0xff]  }
 0x571   :  { %v12951_v11 = vpop.eup %12950 }
 0x572   :  { %v12953_v5 = vpop.eup %12952  ;;  %v6285_v45 = vadd.f32 1.0, %v12951_v11  ;;  %v12461_v11 = vld [vmem:[#allocation10 + $0x39c] ss:$24 sps:$4 sm:$0xff]  }
 0x573   :  { %v6286_v12 = vadd.f32 1.0, %v12953_v5  ;;  %v12955_v31 = vpop.eup %12954  ;;  %v10560_v5 = vmul.f32 -1.442695, %v14090_v49  ;;  %v12473_v49 = vld [vmem:[#allocation10 + $0x3fc] ss:$24 sps:$4 sm:$0xff]  }
 0x574   :  { %v12957_v36 = vpop.eup %12956  ;;  %12958 = vrcp.f32 %v6285_v45  ;;  %v12464_v45 = vld [vmem:[#allocation10 + $0x3c4] ss:$24 sps:$4 sm:$0xff]  }
 0x575   :  { %12960 = vrcp.f32 %v6286_v12  ;;  %v12470_v12 = vld [vmem:[#allocation10 + $0x3f4] ss:$24 sps:$4 sm:$0xff]  }
 0x57e   :  { %v12959_v50 = vpop.eup %12958 }
 0x57f   :  { %v12961_v53 = vpop.eup %12960  ;;  %v6313_v1 = vsub.f32 1.0, %v12959_v50 }
 0x580   :  { %v6322_v54 = vmul.f32 %v12961_v53, %v14044_v18 }
 0x5a2   :  { %v6111_v22 = vpop.f32.mrb[20].mxu0 }
 0x5a3   :  { %v6152_v24 = vpop.f32.mrb[20].mxu1  ;;  %v6113_v25 = vpop.f32.mrb[21].mxu0 }
 0x5a4   :  { %v6153_v21 = vadd.f32 %v6152_v24, %v6111_v22  ;;  %v6154_v59 = vpop.f32.mrb[21].mxu1  ;;  %v6115_v23 = vpop.f32.mrb[22].mxu0  ;;  %v12456_v22 = vld [vmem:[#allocation10 + $0x390] ss:$24 sps:$4 sm:$0xff]  }
 0x5a5   :  { %v6155_v26 = vadd.f32 %v6154_v59, %v6113_v25  ;;  %v6156_v30 = vpop.f32.mrb[22].mxu1  ;;  %v6116_v47 = vpop.f32.mrb[23].mxu0  ;;  %v12459_v24 = vld [vmem:[#allocation10 + $0x398] ss:$24 sps:$4 sm:$0xff]   ;;  %v10561_v25 = vmul.f32 -1.442695, %v14096_v0 }
 0x5a6   :  { %v6297_v27 = vadd.f32 %v6153_v21, %v14013_v14  ;;  %v6157_v29 = vpop.f32.mrb[23].mxu1  ;;  %v6314_v14 = vsub.f32 1.0, %v12961_v53  ;;  %v12467_v21 = vld [vmem:[#allocation10 + $0x3cc] ss:$24 sps:$4 sm:$0xff]   ;;  %v12462_v59 = vld [vmem:[#allocation10 + $0x3c0] ss:$24 sps:$4 sm:$0xff]  }
 0x5a7   :  { %v6298_v32 = vadd.f32 %v6155_v26, %v14021_v20  ;;  %v6321_v20 = vmul.f32 %v12959_v50, %v14040_v9  ;;  %v12465_v23 = vld [vmem:[#allocation10 + $0x3c8] ss:$24 sps:$4 sm:$0xff]   ;;  %v12471_v30 = vld [vmem:[#allocation10 + $0x3f8] ss:$24 sps:$4 sm:$0xff]   ;;  %v12476_v0 = vld [vmem:[#allocation10 + $0x424] ss:$24 sps:$4 sm:$0xff]  }
 0x5a8   :  { %v6301_v37 = vmul.f32 %v12955_v31, %v6297_v27  ;;  %v12468_v26 = vld [vmem:[#allocation10 + $0x3f0] ss:$24 sps:$4 sm:$0xff]   ;;  %v12479_v47 = vld [vmem:[#allocation10 + $0x42c] ss:$24 sps:$4 sm:$0xff]   ;;  %v10564_v27 = vmul.f32 -1.442695, %v14102_v39 }
 0x5a9   :  { %v6302_v58 = vmul.f32 %v12957_v36, %v6298_v32  ;;  %v10565_v29 = vmul.f32 -1.442695, %v14106_v57  ;;  %v12474_v31 = vld [vmem:[#allocation10 + $0x420] ss:$24 sps:$4 sm:$0xff]   ;;  %v12482_v36 = vld [vmem:[#allocation10 + $0x454] ss:$24 sps:$4 sm:$0xff]  }
 0x5aa   :  { %v6305_v44 = vadd.f32 %v6301_v37, %v14032_v51  ;;  %v12477_v32 = vld [vmem:[#allocation10 + $0x428] ss:$24 sps:$4 sm:$0xff]   ;;  %v12485_v37 = vld [vmem:[#allocation10 + $0x45c] ss:$24 sps:$4 sm:$0xff]   ;;  %v12483_v50 = vld [vmem:[#allocation10 + $0x458] ss:$24 sps:$4 sm:$0xff]  }
 0x5ab   :  { %v6306_v43 = vadd.f32 %v6302_v58, %v14036_v2  ;;  %v12438_v2 = vld [vmem:[#allocation10 + $0x300] ss:$24 sps:$4 sm:$0xff]   ;;  %v12488_v39 = vld [vmem:[#allocation10 + $0x484] ss:$24 sps:$4 sm:$0xff]  }
 0x5ac   :  { %12962 = vtanh.f32 %v6305_v44  ;;  %v12491_v57 = vld [vmem:[#allocation10 + $0x48c] ss:$24 sps:$4 sm:$0xff]  }
 0x5ad   :  { %12964 = vtanh.f32 %v6306_v43  ;;  %v12480_v43 = vld [vmem:[#allocation10 + $0x450] ss:$24 sps:$4 sm:$0xff]  }
 0x5ae   :  { %12966 = vpow2.f32 %v10560_v5 }
 0x5af   :  { %12968 = vpow2.f32 %v10561_v25  ;;  %v12509_v25 = vld [vmem:[#allocation10 + $0x51c] ss:$24 sps:$4 sm:$0xff]  }
 0x5b0   :  { %12970 = vpow2.f32 %v10564_v27  ;;  %v12515_v27 = vld [vmem:[#allocation10 + $0x54c] ss:$24 sps:$4 sm:$0xff]  }
 0x5b1   :  { %12972 = vpow2.f32 %v10565_v29 }
 0x5b6   :  { %v12963_v40 = vpop.eup %12962 }
 0x5b7   :  { %v12965_v48 = vpop.eup %12964  ;;  %v6317_v46 = vmul.f32 %v12963_v40, %v6313_v1  ;;  %v12486_v40 = vld [vmem:[#allocation10 + $0x480] ss:$24 sps:$4 sm:$0xff]  }
 0x5b8   :  { %v6318_v56 = vmul.f32 %v12965_v48, %v6314_v14  ;;  %v12967_v58 = vpop.eup %12966  ;;  %v12489_v14 = vld [vmem:[#allocation10 + $0x488] ss:$24 sps:$4 sm:$0xff]   ;;  %v12494_v48 = vld [vmem:[#allocation10 + $0x4b4] ss:$24 sps:$4 sm:$0xff]  }
 0x5b9   :  { %v6325_v55 = vadd.f32 %v6321_v20, %v6317_v46  ;;  %v12969_v44 = vpop.eup %12968  ;;  %v6259_v53 = vadd.f32 1.0, %v12967_v58  ;;  %v12497_v46 = vld [vmem:[#allocation10 + $0x4bc] ss:$24 sps:$4 sm:$0xff]   ;;  %v12492_v20 = vld [vmem:[#allocation10 + $0x4b0] ss:$24 sps:$4 sm:$0xff]  }
 0x5ba   :  { %v6326_v62 = vadd.f32 %v6322_v54, %v6318_v56  ;;  %v6260_v1 = vadd.f32 1.0, %v12969_v44  ;;  %v12495_v56 = vld [vmem:[#allocation10 + $0x4b8] ss:$24 sps:$4 sm:$0xff]   ;;  %v12971_v54 = vpop.eup %12970  ;;  %v12524_v44 = vld [vmem:[#allocation10 + $0x5a4] ss:$24 sps:$4 sm:$0xff]  }
 0x5bb   :  { %v14120_v63 = vpack.c.bf16 %v6325_v55, %v14040_v9  ;;  %v12450_v9 = vld [vmem:[#allocation10 + $0x360] ss:$24 sps:$4 sm:$0xff]   ;;  %12974 = vrcp.f32 %v6259_v53  ;;  %v12500_v55 = vld [vmem:[#allocation10 + $0x4e4] ss:$24 sps:$4 sm:$0xff]  }
 0x5bc   :  { %v14117_v51 = vpack.c.bf16 %v6326_v62, %v14044_v18  ;;  %v12447_v18 = vld [vmem:[#allocation10 + $0x338] ss:$24 sps:$4 sm:$0xff]   ;;  %12976 = vrcp.f32 %v6260_v1  ;;  %v12503_v62 = vld [vmem:[#allocation10 + $0x4ec] ss:$24 sps:$4 sm:$0xff]   ;;  %v12525_v53 = vld [vmem:[#allocation10 + $0x5a8] ss:$24 sps:$4 sm:$0xff]  }
 0x5bd   :  { %v12519_v58 = vld [vmem:[#allocation10 + $0x578] ss:$24 sps:$4 sm:$0xff]  }
 0x5be   :  { %7517 = vmatprep.mubr.bf16.mxu0 %v14117_v51  ;;  %7603 = vmatprep.mubr.bf16.mxu1 %v14117_v51 }
 0x5bf   :  { %7518 = vmatmul.mubr.bf16.vlgmr.msra.gmra.mrb[28].mxu0 %v14120_v63  ;;  %7604 = vmatmul.mubr.bf16.vlgmr.msra.gmra.mrb[28].mxu1 %v14120_v63 }
 0x5c0   :  { %7529 = vmatpush1.bf16.msra.mxu0 %v12438_v2  ;;  %7615 = vmatpush1.bf16.msra.mxu1 %v12441_v60  ;;  %v12973_v2 = vpop.eup %12972 }
 0x5c1   :  { %7530 = vmatprep.subr.bf16.mxu0 %v12446_v61  ;;  %7616 = vmatprep.subr.bf16.mxu1 %v12449_v4 }
 0x5c4   :  { %7531 = vmatpush1.bf16.msra.mxu0 %v12444_v8  ;;  %7617 = vmatpush1.bf16.msra.mxu1 %v12447_v18  ;;  %v12498_v8 = vld [vmem:[#allocation10 + $0x4e0] ss:$24 sps:$4 sm:$0xff]  }
 0x5c5   :  { %7532 = vmatprep.subr.bf16.mxu0 %v12452_v6  ;;  %7618 = vmatprep.subr.bf16.mxu1 %v12455_v13  ;;  %v12501_v18 = vld [vmem:[#allocation10 + $0x4e8] ss:$24 sps:$4 sm:$0xff]   ;;  %v6287_v6 = vadd.f32 1.0, %v12971_v54  ;;  %v12531_v54 = vld [vmem:[#allocation10 + $0x5d8] ss:$24 sps:$4 sm:$0xff]  }
 0x5c7   :  { %12978 = vrcp.f32 %v6287_v6  ;;  %v12539_v6 = vld [vmem:[#allocation10 + $0x44] ss:$24 sps:$4 sm:$0xff]  }
 0x5c8   :  { %7533 = vmatpush1.bf16.msra.mxu0 %v12450_v9  ;;  %7619 = vmatpush1.bf16.msra.mxu1 %v12453_v10 }
 0x5c9   :  { %7534 = vmatprep.subr.bf16.mxu0 %v12458_v17  ;;  %7620 = vmatprep.subr.bf16.mxu1 %v12461_v11  ;;  %v12506_v17 = vld [vmem:[#allocation10 + $0x514] ss:$24 sps:$4 sm:$0xff]   ;;  %v6288_v11 = vadd.f32 1.0, %v12973_v2 }
 0x5ca   :  { %v12536_v2 = vld [vmem:[#allocation10 + $0x14] ss:$24 sps:$4 sm:$0xff]  }
 0x5cb   :  { %12980 = vrcp.f32 %v6288_v11  ;;  %v12546_v11 = vld [vmem:[#allocation10 + $0xd0] ss:$24 sps:$4 sm:$0xff]  }
 0x5cc   :  { %7535 = vmatpush1.bf16.msra.mxu0 %v12456_v22  ;;  %7621 = vmatpush1.bf16.msra.mxu1 %v12459_v24 }
 0x5cd   :  { %7536 = vmatprep.subr.bf16.mxu0 %v12464_v45  ;;  %7622 = vmatprep.subr.bf16.mxu1 %v12467_v21 }
 0x5d0   :  { %7537 = vmatpush1.bf16.msra.mxu0 %v12462_v59  ;;  %7623 = vmatpush1.bf16.msra.mxu1 %v12465_v23  ;;  %v12975_v59 = vpop.eup %12974 }
 0x5d1   :  { %7538 = vmatprep.subr.bf16.mxu0 %v12470_v12  ;;  %7624 = vmatprep.subr.bf16.mxu1 %v12473_v49  ;;  %v12977_v12 = vpop.eup %12976 }
 0x5d4   :  { %7539 = vmatpush1.bf16.msra.mxu0 %v12468_v26  ;;  %7625 = vmatpush1.bf16.msra.mxu1 %v12471_v30  ;;  %v12504_v26 = vld [vmem:[#allocation10 + $0x510] ss:$24 sps:$4 sm:$0xff]  }
 0x5d5   :  { %7540 = vmatprep.subr.bf16.mxu0 %v12476_v0  ;;  %7626 = vmatprep.subr.bf16.mxu1 %v12479_v47  ;;  %v12507_v30 = vld [vmem:[#allocation10 + $0x518] ss:$24 sps:$4 sm:$0xff]   ;;  %v12512_v47 = vld [vmem:[#allocation10 + $0x544] ss:$24 sps:$4 sm:$0xff]  }
 0x5d8   :  { %7541 = vmatpush1.bf16.msra.mxu0 %v12474_v31  ;;  %7627 = vmatpush1.bf16.msra.mxu1 %v12477_v32  ;;  %v12513_v31 = vld [vmem:[#allocation10 + $0x548] ss:$24 sps:$4 sm:$0xff]   ;;  %v12518_v32 = vld [vmem:[#allocation10 + $0x574] ss:$24 sps:$4 sm:$0xff]  }
 0x5d9   :  { %7542 = vmatprep.subr.bf16.mxu0 %v12482_v36  ;;  %7628 = vmatprep.subr.bf16.mxu1 %v12485_v37  ;;  %v12521_v36 = vld [vmem:[#allocation10 + $0x57c] ss:$24 sps:$4 sm:$0xff]   ;;  %v12516_v37 = vld [vmem:[#allocation10 + $0x570] ss:$24 sps:$4 sm:$0xff]  }
 0x5dc   :  { %7543 = vmatpush1.bf16.msra.mxu0 %v12480_v43  ;;  %7629 = vmatpush1.bf16.msra.mxu1 %v12483_v50  ;;  %v12979_v43 = vpop.eup %12978  ;;  %v12522_v50 = vld [vmem:[#allocation10 + $0x5a0] ss:$24 sps:$4 sm:$0xff]  }
 0x5dd   :  { %7544 = vmatprep.subr.bf16.mxu0 %v12488_v39  ;;  %7630 = vmatprep.subr.bf16.mxu1 %v12491_v57  ;;  %v12530_v39 = vld [vmem:[#allocation10 + $0x5d4] ss:$24 sps:$4 sm:$0xff]   ;;  %v6315_v1 = vsub.f32 1.0, %v12979_v43 }
 0x5de   :  { %v12533_v57 = vld [vmem:[#allocation10 + $0x5dc] ss:$24 sps:$4 sm:$0xff]  }
 0x5e0   :  { %7545 = vmatpush1.bf16.msra.mxu0 %v12486_v40  ;;  %7631 = vmatpush1.bf16.msra.mxu1 %v12489_v14 }
 0x5e1   :  { %7546 = vmatprep.subr.bf16.mxu0 %v12494_v48  ;;  %7632 = vmatprep.subr.bf16.mxu1 %v12497_v46 }
 0x5e2   :  { %v6193_v60 = vpop.f32.mrb[24].mxu0 }
 0x5e3   :  { %v6234_v61 = vpop.f32.mrb[24].mxu1  ;;  %v6195_v4 = vpop.f32.mrb[25].mxu0 }
 0x5e4   :  { %v6235_v13 = vadd.f32 %v6234_v61, %v6193_v60  ;;  %7547 = vmatpush1.bf16.msra.mxu0 %v12492_v20  ;;  %v6236_v9 = vpop.f32.mrb[25].mxu1  ;;  %7633 = vmatpush1.bf16.msra.mxu1 %v12495_v56  ;;  %v6197_v10 = vpop.f32.mrb[26].mxu0  ;;  %v6323_v20 = vmul.f32 %v12979_v43, %v14042_v16  ;;  %v12528_v56 = vld [vmem:[#allocation10 + $0x5d0] ss:$24 sps:$4 sm:$0xff]   ;;  %v12590_v43 = vld [vmem:[#allocation10 + $0x374] ss:$24 sps:$4 sm:$0xff]  }
 0x5e5   :  { %v6237_v5 = vadd.f32 %v6236_v9, %v6195_v4  ;;  %v6238_v22 = vpop.f32.mrb[26].mxu1  ;;  %v6198_v24 = vpop.f32.mrb[27].mxu0  ;;  %7548 = vmatprep.subr.bf16.mxu0 %v12500_v55  ;;  %7634 = vmatprep.subr.bf16.mxu1 %v12503_v62  ;;  %v12540_v9 = vld [vmem:[#allocation10 + $0x70] ss:$24 sps:$4 sm:$0xff]   ;;  %v12543_v10 = vld [vmem:[#allocation10 + $0xa0] ss:$24 sps:$4 sm:$0xff]  }
 0x5e6   :  { %v6299_v45 = vadd.f32 %v6235_v13, %v14016_v15  ;;  %v6239_v21 = vpop.f32.mrb[27].mxu1  ;;  %v12537_v13 = vld [vmem:[#allocation10 + $0x40] ss:$24 sps:$4 sm:$0xff]   ;;  %v12554_v24 = vld [vmem:[#allocation10 + $0x134] ss:$24 sps:$4 sm:$0xff]  }
 0x5e7   :  { %v6300_v23 = vadd.f32 %v6237_v5, %v14026_v7  ;;  %v12510_v7 = vld [vmem:[#allocation10 + $0x540] ss:$24 sps:$4 sm:$0xff]   ;;  %v12551_v5 = vld [vmem:[#allocation10 + $0x104] ss:$24 sps:$4 sm:$0xff]   ;;  %v12560_v21 = vld [vmem:[#allocation10 + $0x194] ss:$24 sps:$4 sm:$0xff]  }
 0x5e8   :  { %v6303_v49 = vmul.f32 %v12975_v59, %v6299_v45  ;;  %7549 = vmatpush1.bf16.msra.mxu0 %v12498_v8  ;;  %7635 = vmatpush1.bf16.msra.mxu1 %v12501_v18  ;;  %v12534_v8 = vld [vmem:[#allocation10 + $0x10] ss:$24 sps:$4 sm:$0xff]   ;;  %v12549_v22 = vld [vmem:[#allocation10 + $0x100] ss:$24 sps:$4 sm:$0xff]  }
 0x5e9   :  { %v6304_v0 = vmul.f32 %v12977_v12, %v6300_v23  ;;  %7550 = vmatprep.subr.bf16.mxu0 %v12506_v17  ;;  %7636 = vmatprep.subr.bf16.mxu1 %v12509_v25  ;;  %v12548_v17 = vld [vmem:[#allocation10 + $0xd4] ss:$24 sps:$4 sm:$0xff]   ;;  %v12557_v25 = vld [vmem:[#allocation10 + $0x164] ss:$24 sps:$4 sm:$0xff]   ;;  %v12555_v45 = vld [vmem:[#allocation10 + $0x160] ss:$24 sps:$4 sm:$0xff]  }
 0x5ea   :  { %v6307_v29 = vadd.f32 %v6303_v49, %v14034_v52  ;;  %v12527_v52 = vld [vmem:[#allocation10 + $0x5ac] ss:$24 sps:$4 sm:$0xff]   ;;  %v12558_v59 = vld [vmem:[#allocation10 + $0x190] ss:$24 sps:$4 sm:$0xff]   ;;  %v12561_v12 = vld [vmem:[#allocation10 + $0x1c0] ss:$24 sps:$4 sm:$0xff]  }
 0x5eb   :  { %v6308_v15 = vadd.f32 %v6304_v0, %v14038_v3  ;;  %v12981_v3 = vpop.eup %12980  ;;  %v12563_v23 = vld [vmem:[#allocation10 + $0x1c4] ss:$24 sps:$4 sm:$0xff]   ;;  %v12566_v49 = vld [vmem:[#allocation10 + $0x1f4] ss:$24 sps:$4 sm:$0xff]   ;;  %v12567_v0 = vld [vmem:[#allocation10 + $0x220] ss:$24 sps:$4 sm:$0xff]  }
 0x5ec   :  { %12982 = vtanh.f32 %v6307_v29  ;;  %7551 = vmatpush1.bf16.msra.mxu0 %v12504_v26  ;;  %7637 = vmatpush1.bf16.msra.mxu1 %v12507_v30  ;;  %v6316_v14 = vsub.f32 1.0, %v12981_v3  ;;  %v6324_v62 = vmul.f32 %v12981_v3, %v14046_v19  ;;  %v12564_v26 = vld [vmem:[#allocation10 + $0x1f0] ss:$24 sps:$4 sm:$0xff]   ;;  %v12569_v30 = vld [vmem:[#allocation10 + $0x224] ss:$24 sps:$4 sm:$0xff]  }
 0x5ed   :  { %12984 = vtanh.f32 %v6308_v15  ;;  %7552 = vmatprep.subr.bf16.mxu0 %v12512_v47  ;;  %7638 = vmatprep.subr.bf16.mxu1 %v12515_v27  ;;  %v12572_v47 = vld [vmem:[#allocation10 + $0x254] ss:$24 sps:$4 sm:$0xff]   ;;  %v12570_v27 = vld [vmem:[#allocation10 + $0x250] ss:$24 sps:$4 sm:$0xff]   ;;  %v12575_v29 = vld [vmem:[#allocation10 + $0x284] ss:$24 sps:$4 sm:$0xff]  }
 0x5ee   :  { %v12573_v15 = vld [vmem:[#allocation10 + $0x280] ss:$24 sps:$4 sm:$0xff]   ;;  %v12588_v3 = vld [vmem:[#allocation10 + $0x370] ss:$24 sps:$4 sm:$0xff]  }
 0x5f0   :  { %7553 = vmatpush1.bf16.msra.mxu0 %v12510_v7  ;;  %7639 = vmatpush1.bf16.msra.mxu1 %v12513_v31  ;;  %v12578_v7 = vld [vmem:[#allocation10 + $0x2b4] ss:$24 sps:$4 sm:$0xff]   ;;  %v12576_v31 = vld [vmem:[#allocation10 + $0x2b0] ss:$24 sps:$4 sm:$0xff]  }
 0x5f1   :  { %7554 = vmatprep.subr.bf16.mxu0 %v12518_v32  ;;  %7640 = vmatprep.subr.bf16.mxu1 %v12521_v36  ;;  %v12581_v32 = vld [vmem:[#allocation10 + $0x2e4] ss:$24 sps:$4 sm:$0xff]   ;;  %v12579_v36 = vld [vmem:[#allocation10 + $0x2e0] ss:$24 sps:$4 sm:$0xff]  }
 0x5f4   :  { %7555 = vmatpush1.bf16.msra.mxu0 %v12516_v37  ;;  %7641 = vmatpush1.bf16.msra.mxu1 %v12519_v58  ;;  %v12584_v37 = vld [vmem:[#allocation10 + $0x314] ss:$24 sps:$4 sm:$0xff]   ;;  %v12582_v58 = vld [vmem:[#allocation10 + $0x310] ss:$24 sps:$4 sm:$0xff]  }
 0x5f5   :  { %7556 = vmatprep.subr.bf16.mxu0 %v12524_v44  ;;  %7642 = vmatprep.subr.bf16.mxu1 %v12527_v52  ;;  %v12587_v44 = vld [vmem:[#allocation10 + $0x344] ss:$24 sps:$4 sm:$0xff]   ;;  %v12585_v52 = vld [vmem:[#allocation10 + $0x340] ss:$24 sps:$4 sm:$0xff]  }
 0x5f6   :  { %v12983_v40 = vpop.eup %12982 }
 0x5f7   :  { %v12985_v48 = vpop.eup %12984  ;;  %v6319_v46 = vmul.f32 %v12983_v40, %v6315_v1  ;;  %v12599_v1 = vld [vmem:[#allocation10 + $0x404] ss:$24 sps:$4 sm:$0xff]   ;;  %v12602_v40 = vld [vmem:[#allocation10 + $0x434] ss:$24 sps:$4 sm:$0xff]  }
 0x5f8   :  { %7557 = vmatpush1.bf16.msra.mxu0 %v12522_v50  ;;  %7643 = vmatpush1.bf16.msra.mxu1 %v12525_v53  ;;  %v6320_v55 = vmul.f32 %v12985_v48, %v6316_v14  ;;  %v12593_v50 = vld [vmem:[#allocation10 + $0x3a4] ss:$24 sps:$4 sm:$0xff]   ;;  %v12591_v53 = vld [vmem:[#allocation10 + $0x3a0] ss:$24 sps:$4 sm:$0xff]   ;;  %v12600_v14 = vld [vmem:[#allocation10 + $0x430] ss:$24 sps:$4 sm:$0xff]  }
 0x5f9   :  { %7558 = vmatprep.subr.bf16.mxu0 %v12530_v39  ;;  %7644 = vmatprep.subr.bf16.mxu1 %v12533_v57  ;;  %v6327_v60 = vadd.f32 %v6323_v20, %v6319_v46  ;;  %v12596_v39 = vld [vmem:[#allocation10 + $0x3d4] ss:$24 sps:$4 sm:$0xff]   ;;  %v12594_v57 = vld [vmem:[#allocation10 + $0x3d0] ss:$24 sps:$4 sm:$0xff]   ;;  %v12605_v48 = vld [vmem:[#allocation10 + $0x464] ss:$24 sps:$4 sm:$0xff]  }
 0x5fa   :  { %v6328_v61 = vadd.f32 %v6324_v62, %v6320_v55  ;;  %v12603_v46 = vld [vmem:[#allocation10 + $0x460] ss:$24 sps:$4 sm:$0xff]   ;;  %v12608_v20 = vld [vmem:[#allocation10 + $0x494] ss:$24 sps:$4 sm:$0xff]  }
 0x5fb   :  { %v14140_v18 = vpack.c.bf16 %v6327_v60, %v14042_v16  ;;  %v12545_v16 = vld [vmem:[#allocation10 + $0xa4] ss:$24 sps:$4 sm:$0xff]   ;;  %v12609_v55 = vld [vmem:[#allocation10 + $0x4c0] ss:$24 sps:$4 sm:$0xff]   ;;  %v12614_v62 = vld [vmem:[#allocation10 + $0x4f4] ss:$24 sps:$4 sm:$0xff]  }
 0x5fc   :  { %7559 = vmatpush1.bf16.msra.mxu0 %v12528_v56  ;;  %7645 = vmatpush1.bf16.msra.mxu1 %v12531_v54  ;;  %v14137_v4 = vpack.c.bf16 %v6328_v61, %v14046_v19  ;;  %v12542_v19 = vld [vmem:[#allocation10 + $0x74] ss:$24 sps:$4 sm:$0xff]   ;;  %v12606_v56 = vld [vmem:[#allocation10 + $0x490] ss:$24 sps:$4 sm:$0xff]   ;;  %v12611_v54 = vld [vmem:[#allocation10 + $0x4c4] ss:$24 sps:$4 sm:$0xff]  }
 0x5fd   :  { %7657 = vmatprep.subr.bf16.mxu0 %v12536_v2  ;;  %v12612_v2 = vld [vmem:[#allocation10 + $0x4f0] ss:$24 sps:$4 sm:$0xff]   ;;  %v12617_v60 = vld [vmem:[#allocation10 + $0x524] ss:$24 sps:$4 sm:$0xff]   ;;  %v12615_v61 = vld [vmem:[#allocation10 + $0x520] ss:$24 sps:$4 sm:$0xff]  }
 0x5fe   :  { %7560 = vmatprep.mubr.bf16.mxu0 %v14137_v4  ;;  %7646 = vmatprep.mubr.bf16.mxu1 %v14137_v4 }
 0x5ff   :  { %7561 = vmatmul.mubr.bf16.vlgmr.msra.gmra.mrb[28].mxu0 %v14140_v18  ;;  %7647 = vmatmul.mubr.bf16.vlgmr.msra.gmra.mrb[28].mxu1 %v14140_v18 }
 0x600   :  { %7658 = vmatpush1.bf16.msra.mxu0 %v12534_v8  ;;  %7689 = vmatprep.mubr.bf16.mxu0 %v14117_v51  ;;  %v12552_v51 = vld [vmem:[#allocation10 + $0x130] ss:$24 sps:$4 sm:$0xff]  }
 0x601   :  { %7659 = vmatprep.subr.bf16.mxu0 %v12539_v6  ;;  %v12618_v8 = vld [vmem:[#allocation10 + $0x550] ss:$24 sps:$4 sm:$0xff]   ;;  %v12623_v6 = vld [vmem:[#allocation10 + $0x584] ss:$24 sps:$4 sm:$0xff]  }
 0x604   :  { %7660 = vmatpush1.bf16.msra.mxu0 %v12537_v13  ;;  %v12621_v13 = vld [vmem:[#allocation10 + $0x580] ss:$24 sps:$4 sm:$0xff]  }
 0x605   :  { %7661 = vmatprep.subr.bf16.mxu0 %v12542_v19  ;;  %v12626_v19 = vld [vmem:[#allocation10 + $0x5b4] ss:$24 sps:$4 sm:$0xff]  }
 0x608   :  { %7662 = vmatpush1.bf16.msra.mxu0 %v12540_v9  ;;  %v12630_v9 = vld [vmem:[#allocation11] ss:$24 sps:$4 sm:$0xff]  }
 0x609   :  { %7663 = vmatprep.subr.bf16.mxu0 %v12545_v16  ;;  %v12632_v16 = vld [vmem:[#allocation11 + $0x4] ss:$24 sps:$4 sm:$0xff]  }
 0x60a   :  { %8411 = vmatprep.subr.bf16.mxu1 %v12632_v16 }
 0x60b   :  { %8412 = vmatpush1.bf16.msra.mxu1 %v12630_v9 }
 0x60c   :  { %7664 = vmatpush1.bf16.msra.mxu0 %v12543_v10  ;;  %v12638_v10 = vld [vmem:[#allocation11 + $0x34] ss:$24 sps:$4 sm:$0xff]  }
 0x60d   :  { %7665 = vmatprep.subr.bf16.mxu0 %v12548_v17  ;;  %v12624_v17 = vld [vmem:[#allocation10 + $0x5b0] ss:$24 sps:$4 sm:$0xff]   ;;  %8413 = vmatprep.subr.bf16.mxu1 %v12638_v10 }
 0x610   :  { %7666 = vmatpush1.bf16.msra.mxu0 %v12546_v11  ;;  %v12629_v11 = vld [vmem:[#allocation10 + $0x5e4] ss:$24 sps:$4 sm:$0xff]  }
 0x611   :  { %7667 = vmatprep.subr.bf16.mxu0 %v12551_v5  ;;  %v12636_v5 = vld [vmem:[#allocation11 + $0x30] ss:$24 sps:$4 sm:$0xff]  }
 0x612   :  { %8414 = vmatpush1.bf16.msra.mxu1 %v12636_v5 }
 0x614   :  { %7668 = vmatpush1.bf16.msra.mxu0 %v12549_v22  ;;  %v12644_v22 = vld [vmem:[#allocation11 + $0x64] ss:$24 sps:$4 sm:$0xff]  }
 0x615   :  { %7669 = vmatprep.subr.bf16.mxu0 %v12554_v24  ;;  %v12627_v24 = vld [vmem:[#allocation10 + $0x5e0] ss:$24 sps:$4 sm:$0xff]   ;;  %8415 = vmatprep.subr.bf16.mxu1 %v12644_v22 }
 0x618   :  { %7670 = vmatpush1.bf16.msra.mxu0 %v12552_v51  ;;  %v12635_v51 = vld [vmem:[#allocation11 + $0x14] ss:$24 sps:$4 sm:$0xff]  }
 0x619   :  { %7671 = vmatprep.subr.bf16.mxu0 %v12557_v25  ;;  %v12642_v25 = vld [vmem:[#allocation11 + $0x60] ss:$24 sps:$4 sm:$0xff]  }
 0x61a   :  { %8416 = vmatpush1.bf16.msra.mxu1 %v12642_v25 }
 0x61c   :  { %7672 = vmatpush1.bf16.msra.mxu0 %v12555_v45  ;;  %v12650_v45 = vld [vmem:[#allocation11 + $0x94] ss:$24 sps:$4 sm:$0xff]  }
 0x61d   :  { %7673 = vmatprep.subr.bf16.mxu0 %v12560_v21  ;;  %v12633_v21 = vld [vmem:[#allocation11 + $0x10] ss:$24 sps:$4 sm:$0xff]   ;;  %8417 = vmatprep.subr.bf16.mxu1 %v12650_v45 }
 0x620   :  { %7674 = vmatpush1.bf16.msra.mxu0 %v12558_v59  ;;  %v12641_v59 = vld [vmem:[#allocation11 + $0x44] ss:$24 sps:$4 sm:$0xff]  }
 0x621   :  { %7675 = vmatprep.subr.bf16.mxu0 %v12563_v23  ;;  %v12648_v23 = vld [vmem:[#allocation11 + $0x90] ss:$24 sps:$4 sm:$0xff]  }
 0x622   :  { %8418 = vmatpush1.bf16.msra.mxu1 %v12648_v23  ;;  %v12705_v23 = vld [vmem:[#allocation11 + $0x250] ss:$24 sps:$4 sm:$0xff]  }
 0x624   :  { %7676 = vmatpush1.bf16.msra.mxu0 %v12561_v12  ;;  %v12656_v12 = vld [vmem:[#allocation11 + $0xc4] ss:$24 sps:$4 sm:$0xff]  }
 0x625   :  { %7677 = vmatprep.subr.bf16.mxu0 %v12566_v49  ;;  %v12639_v49 = vld [vmem:[#allocation11 + $0x40] ss:$24 sps:$4 sm:$0xff]   ;;  %8419 = vmatprep.subr.bf16.mxu1 %v12656_v12  ;;  %v12710_v12 = vld [vmem:[#allocation11 + $0x274] ss:$24 sps:$4 sm:$0xff]  }
 0x628   :  { %7678 = vmatpush1.bf16.msra.mxu0 %v12564_v26  ;;  %v12647_v26 = vld [vmem:[#allocation11 + $0x74] ss:$24 sps:$4 sm:$0xff]  }
 0x629   :  { %7679 = vmatprep.subr.bf16.mxu0 %v12569_v30  ;;  %v12654_v30 = vld [vmem:[#allocation11 + $0xc0] ss:$24 sps:$4 sm:$0xff]  }
 0x62a   :  { %8420 = vmatpush1.bf16.msra.mxu1 %v12654_v30  ;;  %v12711_v30 = vld [vmem:[#allocation11 + $0x280] ss:$24 sps:$4 sm:$0xff]  }
 0x62c   :  { %7680 = vmatpush1.bf16.msra.mxu0 %v12567_v0  ;;  %v12662_v0 = vld [vmem:[#allocation11 + $0xf4] ss:$24 sps:$4 sm:$0xff]  }
 0x62d   :  { %7681 = vmatprep.subr.bf16.mxu0 %v12572_v47  ;;  %v12645_v47 = vld [vmem:[#allocation11 + $0x70] ss:$24 sps:$4 sm:$0xff]   ;;  %8421 = vmatprep.subr.bf16.mxu1 %v12662_v0  ;;  %v12716_v0 = vld [vmem:[#allocation11 + $0x2a4] ss:$24 sps:$4 sm:$0xff]  }
 0x630   :  { %7682 = vmatpush1.bf16.msra.mxu0 %v12570_v27  ;;  %v12653_v27 = vld [vmem:[#allocation11 + $0xa4] ss:$24 sps:$4 sm:$0xff]  }
 0x631   :  { %7683 = vmatprep.subr.bf16.mxu0 %v12575_v29  ;;  %v12660_v29 = vld [vmem:[#allocation11 + $0xf0] ss:$24 sps:$4 sm:$0xff]  }
 0x632   :  { %8422 = vmatpush1.bf16.msra.mxu1 %v12660_v29  ;;  %v12717_v29 = vld [vmem:[#allocation11 + $0x2b0] ss:$24 sps:$4 sm:$0xff]  }
 0x634   :  { %7684 = vmatpush1.bf16.msra.mxu0 %v12573_v15  ;;  %v12668_v15 = vld [vmem:[#allocation11 + $0x124] ss:$24 sps:$4 sm:$0xff]  }
 0x635   :  { %7685 = vmatprep.subr.bf16.mxu0 %v12578_v7  ;;  %v12651_v7 = vld [vmem:[#allocation11 + $0xa0] ss:$24 sps:$4 sm:$0xff]   ;;  %8423 = vmatprep.subr.bf16.mxu1 %v12668_v15  ;;  %v12722_v15 = vld [vmem:[#allocation11 + $0x2d4] ss:$24 sps:$4 sm:$0xff]  }
 0x638   :  { %7686 = vmatpush1.bf16.msra.mxu0 %v12576_v31  ;;  %v12666_v31 = vld [vmem:[#allocation11 + $0x120] ss:$24 sps:$4 sm:$0xff]  }
 0x639   :  { %7687 = vmatprep.subr.bf16.mxu0 %v12581_v32  ;;  %v12674_v32 = vld [vmem:[#allocation11 + $0x154] ss:$24 sps:$4 sm:$0xff]   ;;  %8424 = vmatpush1.bf16.msra.mxu1 %v12666_v31  ;;  %v12723_v31 = vld [vmem:[#allocation11 + $0x2e0] ss:$24 sps:$4 sm:$0xff]  }
 0x63a   :  { %8425 = vmatprep.subr.bf16.mxu1 %v12674_v32  ;;  %v12728_v32 = vld [vmem:[#allocation11 + $0xc] ss:$24 sps:$4 sm:$0xff]  }
 0x63c   :  { %7688 = vmatpush1.bf16.msra.mxu0 %v12579_v36  ;;  %v12657_v36 = vld [vmem:[#allocation11 + $0xd0] ss:$24 sps:$4 sm:$0xff]  }
 0x63d   :  { %7700 = vmatprep.subr.bf16.mxu0 %v12584_v37  ;;  %v12665_v37 = vld [vmem:[#allocation11 + $0x104] ss:$24 sps:$4 sm:$0xff]  }
 0x63f   :  { %7690 = vmatmul.mubr.bf16.vlgmr.msra.gmra.mrb[32].mxu0 %v14120_v63  ;;  %v12597_v63 = vld [vmem:[#allocation10 + $0x400] ss:$24 sps:$4 sm:$0xff]  }
 0x640   :  { %7701 = vmatpush1.bf16.msra.mxu0 %v12582_v58  ;;  %7732 = vmatprep.mubr.bf16.mxu0 %v14137_v4  ;;  %v12620_v4 = vld [vmem:[#allocation10 + $0x554] ss:$24 sps:$4 sm:$0xff]   ;;  %v12672_v58 = vld [vmem:[#allocation11 + $0x150] ss:$24 sps:$4 sm:$0xff]  }
 0x641   :  { %7702 = vmatprep.subr.bf16.mxu0 %v12587_v44  ;;  %v12680_v44 = vld [vmem:[#allocation11 + $0x184] ss:$24 sps:$4 sm:$0xff]   ;;  %8426 = vmatpush1.bf16.msra.mxu1 %v12672_v58 }
 0x642   :  { %8427 = vmatprep.subr.bf16.mxu1 %v12680_v44 }
 0x644   :  { %7703 = vmatpush1.bf16.msra.mxu0 %v12585_v52  ;;  %v12663_v52 = vld [vmem:[#allocation11 + $0x100] ss:$24 sps:$4 sm:$0xff]  }
 0x645   :  { %7704 = vmatprep.subr.bf16.mxu0 %v12590_v43  ;;  %v12671_v43 = vld [vmem:[#allocation11 + $0x134] ss:$24 sps:$4 sm:$0xff]  }
 0x648   :  { %7705 = vmatpush1.bf16.msra.mxu0 %v12588_v3  ;;  %v12678_v3 = vld [vmem:[#allocation11 + $0x180] ss:$24 sps:$4 sm:$0xff]  }
 0x649   :  { %7706 = vmatprep.subr.bf16.mxu0 %v12593_v50  ;;  %v12686_v50 = vld [vmem:[#allocation11 + $0x1b4] ss:$24 sps:$4 sm:$0xff]   ;;  %8428 = vmatpush1.bf16.msra.mxu1 %v12678_v3 }
 0x64a   :  { %8429 = vmatprep.subr.bf16.mxu1 %v12686_v50 }
 0x64c   :  { %7707 = vmatpush1.bf16.msra.mxu0 %v12591_v53  ;;  %v12669_v53 = vld [vmem:[#allocation11 + $0x130] ss:$24 sps:$4 sm:$0xff]  }
 0x64d   :  { %7708 = vmatprep.subr.bf16.mxu0 %v12596_v39  ;;  %v12677_v39 = vld [vmem:[#allocation11 + $0x164] ss:$24 sps:$4 sm:$0xff]  }
 0x650   :  { %7709 = vmatpush1.bf16.msra.mxu0 %v12594_v57  ;;  %v12684_v57 = vld [vmem:[#allocation11 + $0x1b0] ss:$24 sps:$4 sm:$0xff]  }
 0x651   :  { %7710 = vmatprep.subr.bf16.mxu0 %v12599_v1  ;;  %v12692_v1 = vld [vmem:[#allocation11 + $0x1e4] ss:$24 sps:$4 sm:$0xff]   ;;  %8430 = vmatpush1.bf16.msra.mxu1 %v12684_v57 }
 0x652   :  { %8431 = vmatprep.subr.bf16.mxu1 %v12692_v1 }
 0x654   :  { %7711 = vmatpush1.bf16.msra.mxu0 %v12597_v63  ;;  %v12675_v63 = vld [vmem:[#allocation11 + $0x160] ss:$24 sps:$4 sm:$0xff]  }
 0x655   :  { %7712 = vmatprep.subr.bf16.mxu0 %v12602_v40  ;;  %v12683_v40 = vld [vmem:[#allocation11 + $0x194] ss:$24 sps:$4 sm:$0xff]  }
 0x658   :  { %7713 = vmatpush1.bf16.msra.mxu0 %v12600_v14  ;;  %v12690_v14 = vld [vmem:[#allocation11 + $0x1e0] ss:$24 sps:$4 sm:$0xff]  }
 0x659   :  { %7714 = vmatprep.subr.bf16.mxu0 %v12605_v48  ;;  %v12681_v48 = vld [vmem:[#allocation11 + $0x190] ss:$24 sps:$4 sm:$0xff]   ;;  %8432 = vmatpush1.bf16.msra.mxu1 %v12690_v14 }
 0x65c   :  { %7715 = vmatpush1.bf16.msra.mxu0 %v12603_v46  ;;  %v12689_v46 = vld [vmem:[#allocation11 + $0x1c4] ss:$24 sps:$4 sm:$0xff]  }
 0x65d   :  { %7716 = vmatprep.subr.bf16.mxu0 %v12608_v20  ;;  %v12687_v20 = vld [vmem:[#allocation11 + $0x1c0] ss:$24 sps:$4 sm:$0xff]  }
 0x660   :  { %7717 = vmatpush1.bf16.msra.mxu0 %v12606_v56  ;;  %v12695_v56 = vld [vmem:[#allocation11 + $0x1f4] ss:$24 sps:$4 sm:$0xff]  }
 0x661   :  { %7718 = vmatprep.subr.bf16.mxu0 %v12611_v54  ;;  %v12693_v54 = vld [vmem:[#allocation11 + $0x1f0] ss:$24 sps:$4 sm:$0xff]  }
 0x664   :  { %7719 = vmatpush1.bf16.msra.mxu0 %v12609_v55  ;;  %v14150_v55 = vld [vmem:[#allocation13] sm:$0x3f] }
 0x665   :  { %7720 = vmatprep.subr.bf16.mxu0 %v12614_v62  ;;  %v7849_v9 = vrot.slane %v14150_v55, %v13920_v41  ;;  %v7857_v16 = vrot.slane %v14150_v55, %v13923_v42  ;;  %v12707_v42 = vld [vmem:[#allocation11 + $0x254] ss:$24 sps:$4 sm:$0xff]  }
 0x668   :  { %7721 = vmatpush1.bf16.msra.mxu0 %v12612_v2 }
 0x669   :  { %7722 = vmatprep.subr.bf16.mxu0 %v12617_v60  ;;  %v12698_v60 = vld [vmem:[#allocation11 + $0x214] ss:$24 sps:$4 sm:$0xff]  }
 0x66a   :  { %8433 = vmatprep.subr.bf16.mxu1 %v12698_v60 }
 0x66c   :  { %7723 = vmatpush1.bf16.msra.mxu0 %v12615_v61  ;;  %v7845_v61 = vrot.slane %v14150_v55, %v13917_v38 }
 0x66d   :  { %7724 = vmatprep.subr.bf16.mxu0 %v12620_v4  ;;  %v7853_v4 = vrot.slane %v14150_v55, %v13914_v35 }
 0x670   :  { %7725 = vmatpush1.bf16.msra.mxu0 %v12618_v8 }
 0x671   :  { %7726 = vmatprep.subr.bf16.mxu0 %v12623_v6 }
 0x674   :  { %7727 = vmatpush1.bf16.msra.mxu0 %v12621_v13  ;;  %v12696_v13 = vld [vmem:[#allocation11 + $0x210] ss:$24 sps:$4 sm:$0xff]  }
 0x675   :  { %7728 = vmatprep.subr.bf16.mxu0 %v12626_v19  ;;  %v12701_v19 = vld [vmem:[#allocation11 + $0x224] ss:$24 sps:$4 sm:$0xff]   ;;  %8434 = vmatpush1.bf16.msra.mxu1 %v12696_v13 }
 0x678   :  { %7729 = vmatpush1.bf16.msra.mxu0 %v12624_v17 }
 0x679   :  { %7730 = vmatprep.subr.bf16.mxu0 %v12629_v11  ;;  %v12699_v11 = vld [vmem:[#allocation11 + $0x220] ss:$24 sps:$4 sm:$0xff]  }
 0x67c   :  { %7731 = vmatpush1.bf16.msra.mxu0 %v12627_v24 }
 0x67d   :  { %8493 = vmatprep.subr.bf16.mxu0 %v12635_v51 }
 0x67f   :  { %7733 = vmatmul.mubr.bf16.vlgmr.msra.gmra.mrb[32].mxu0 %v14140_v18  ;;  %v12659_v18 = vld [vmem:[#allocation11 + $0xd4] ss:$24 sps:$4 sm:$0xff]  }
 0x680   :  { %8494 = vmatpush1.bf16.msra.mxu0 %v12633_v21  ;;  %v12704_v21 = vld [vmem:[#allocation11 + $0x244] ss:$24 sps:$4 sm:$0xff]  }
 0x681   :  { %8495 = vmatprep.subr.bf16.mxu0 %v12641_v59  ;;  %v12702_v59 = vld [vmem:[#allocation11 + $0x240] ss:$24 sps:$4 sm:$0xff]   ;;  %8435 = vmatprep.subr.bf16.mxu1 %v12704_v21 }
 0x682   :  { %8436 = vmatpush1.bf16.msra.mxu1 %v12702_v59 }
 0x683   :  { %8437 = vmatprep.subr.bf16.mxu1 %v12710_v12  ;;  %v12726_v12 = vld [vmem:[#allocation11 + $0x8] ss:$24 sps:$4 sm:$0xff]  }
 0x684   :  { %8496 = vmatpush1.bf16.msra.mxu0 %v12639_v49  ;;  %v12708_v49 = vld [vmem:[#allocation11 + $0x270] ss:$24 sps:$4 sm:$0xff]  }
 0x685   :  { %8497 = vmatprep.subr.bf16.mxu0 %v12647_v26  ;;  %v12713_v26 = vld [vmem:[#allocation11 + $0x284] ss:$24 sps:$4 sm:$0xff]  }
 0x686   :  { %8438 = vmatpush1.bf16.msra.mxu1 %v12708_v49 }
 0x687   :  { %8439 = vmatprep.subr.bf16.mxu1 %v12716_v0  ;;  %v12734_v0 = vld [vmem:[#allocation11 + $0x6c] ss:$24 sps:$4 sm:$0xff]  }
 0x688   :  { %8498 = vmatpush1.bf16.msra.mxu0 %v12645_v47  ;;  %v12719_v47 = vld [vmem:[#allocation11 + $0x2b4] ss:$24 sps:$4 sm:$0xff]  }
 0x689   :  { %8499 = vmatprep.subr.bf16.mxu0 %v12653_v27  ;;  %v12714_v27 = vld [vmem:[#allocation11 + $0x2a0] ss:$24 sps:$4 sm:$0xff]  }
 0x68a   :  { %8440 = vmatpush1.bf16.msra.mxu1 %v12714_v27  ;;  %v12737_v27 = vld [vmem:[#allocation11 + $0x9c] ss:$24 sps:$4 sm:$0xff]  }
 0x68b   :  { %8441 = vmatprep.subr.bf16.mxu1 %v12722_v15  ;;  %v12740_v15 = vld [vmem:[#allocation11 + $0xcc] ss:$24 sps:$4 sm:$0xff]  }
 0x68c   :  { %8500 = vmatpush1.bf16.msra.mxu0 %v12651_v7  ;;  %v12725_v7 = vld [vmem:[#allocation11 + $0x2e4] ss:$24 sps:$4 sm:$0xff]  }
 0x68d   :  { %8501 = vmatprep.subr.bf16.mxu0 %v12659_v18  ;;  %v12720_v18 = vld [vmem:[#allocation11 + $0x2d0] ss:$24 sps:$4 sm:$0xff]  }
 0x68e   :  { %8442 = vmatpush1.bf16.msra.mxu1 %v12720_v18  ;;  %v12743_v18 = vld [vmem:[#allocation11 + $0xfc] ss:$24 sps:$4 sm:$0xff]  }
 0x68f   :  { %8452 = vmatprep.subr.bf16.mxu1 %v12728_v32  ;;  %v12746_v32 = vld [vmem:[#allocation11 + $0x12c] ss:$24 sps:$4 sm:$0xff]  }
 0x690   :  { %8502 = vmatpush1.bf16.msra.mxu0 %v12657_v36 }
 0x691   :  { %8503 = vmatprep.subr.bf16.mxu0 %v12665_v37 }
 0x694   :  { %8504 = vmatpush1.bf16.msra.mxu0 %v12663_v52 }
 0x695   :  { %8505 = vmatprep.subr.bf16.mxu0 %v12671_v43 }
 0x698   :  { %8506 = vmatpush1.bf16.msra.mxu0 %v12669_v53 }
 0x699   :  { %8507 = vmatprep.subr.bf16.mxu0 %v12677_v39 }
 0x69c   :  { %8508 = vmatpush1.bf16.msra.mxu0 %v12675_v63 }
 0x69d   :  { %8509 = vmatprep.subr.bf16.mxu0 %v12683_v40  ;;  %v7840_v40 = vld [vmem:[#allocation14] sm:$0x3] }
 0x6a0   :  { %8510 = vmatpush1.bf16.msra.mxu0 %v12681_v48 }
 0x6a1   :  { %8511 = vmatprep.subr.bf16.mxu0 %v12689_v46  ;;  %v7861_v46 = vrot.slane %v14150_v55, %v3670_v33 }
 0x6a4   :  { %8512 = vmatpush1.bf16.msra.mxu0 %v12687_v20  ;;  %v14175_v20 = vrot.slane %v7840_v40, %v13917_v38 }
 0x6a5   :  { %8513 = vmatprep.subr.bf16.mxu0 %v12695_v56 }
 0x6a8   :  { %8514 = vmatpush1.bf16.msra.mxu0 %v12693_v54 }
 0x6a9   :  { %8515 = vmatprep.subr.bf16.mxu0 %v12701_v19 }
 0x6ac   :  { %8516 = vmatpush1.bf16.msra.mxu0 %v12699_v11 }
 0x6ad   :  { %8517 = vmatprep.subr.bf16.mxu0 %v12707_v42 }
 0x6b0   :  { %8518 = vmatpush1.bf16.msra.mxu0 %v12705_v23 }
 0x6b1   :  { %8519 = vmatprep.subr.bf16.mxu0 %v12713_v26  ;;  %v12731_v26 = vld [vmem:[#allocation11 + $0x3c] ss:$24 sps:$4 sm:$0xff]  }
 0x6b4   :  { %8520 = vmatpush1.bf16.msra.mxu0 %v12711_v30  ;;  %v12729_v30 = vld [vmem:[#allocation11 + $0x38] ss:$24 sps:$4 sm:$0xff]  }
 0x6b5   :  { %8521 = vmatprep.subr.bf16.mxu0 %v12719_v47  ;;  %v12732_v47 = vld [vmem:[#allocation11 + $0x68] ss:$24 sps:$4 sm:$0xff]  }
 0x6b8   :  { %8522 = vmatpush1.bf16.msra.mxu0 %v12717_v29  ;;  %v12735_v29 = vld [vmem:[#allocation11 + $0x98] ss:$24 sps:$4 sm:$0xff]  }
 0x6b9   :  { %8523 = vmatprep.subr.bf16.mxu0 %v12725_v7  ;;  %v12738_v7 = vld [vmem:[#allocation11 + $0xc8] ss:$24 sps:$4 sm:$0xff]  }
 0x6bc   :  { %8524 = vmatpush1.bf16.msra.mxu0 %v12723_v31  ;;  %v12741_v31 = vld [vmem:[#allocation11 + $0xf8] ss:$24 sps:$4 sm:$0xff]  }
 0x6d2   :  { %v7562_v62 = vpop.f32.mrb[28].mxu0  ;;  %v14152_v2 = vpop.f32.mrb[28].mxu1 }
 0x6d3   :  { %v7564_v8 = vpop.f32.mrb[29].mxu0  ;;  %v7650_v6 = vpop.f32.mrb[29].mxu1  ;;  %v7872_v36 = vadd.f32 %v7845_v61, %v7562_v62  ;;  %v7874_v52 = vadd.f32 %v7853_v4, %v14152_v2  ;;  %v7865_v62 = vrot.slane %v14150_v55, %v3674_v34  ;;  %v14181_v2 = vrot.slane %v7840_v40, %v13920_v41  ;;  %v12767_v40 = vld [vmem:[#allocation11 + $0x27c] ss:$24 sps:$4 sm:$0xff]  }
 0x6d4   :  { %v7566_v10 = vpop.f32.mrb[30].mxu0  ;;  %v7652_v17 = vpop.f32.mrb[30].mxu1  ;;  %v7873_v37 = vadd.f32 %v7849_v9, %v7564_v8  ;;  %v7875_v43 = vadd.f32 %v7857_v16, %v7650_v6 }
 0x6d5   :  { %v14162_v5 = vadd.f32 %v7845_v61, %v7566_v10  ;;  %v14164_v22 = vadd.f32 %v7853_v4, %v7652_v17  ;;  %v7568_v24 = vpop.f32.mrb[31].mxu0  ;;  %v7654_v51 = vpop.f32.mrb[31].mxu1  ;;  %v10758_v58 = vmul.f32 -1.442695, %v7872_v36  ;;  %v10760_v3 = vmul.f32 -1.442695, %v7874_v52 }
 0x6d6   :  { %v14166_v25 = vadd.f32 %v7849_v9, %v7568_v24  ;;  %v14168_v45 = vadd.f32 %v7857_v16, %v7654_v51  ;;  %v10759_v44 = vmul.f32 -1.442695, %v7873_v37  ;;  %v10761_v53 = vmul.f32 -1.442695, %v7875_v43  ;;  %v12744_v36 = vld [vmem:[#allocation11 + $0x128] ss:$24 sps:$4 sm:$0xff]  }
 0x6d7   :  { %12986 = vpow2.f32 %v10758_v58  ;;  %v12749_v37 = vld [vmem:[#allocation11 + $0x15c] ss:$24 sps:$4 sm:$0xff]   ;;  %v12747_v58 = vld [vmem:[#allocation11 + $0x158] ss:$24 sps:$4 sm:$0xff]   ;;  %v12750_v52 = vld [vmem:[#allocation11 + $0x188] ss:$24 sps:$4 sm:$0xff]  }
 0x6d8   :  { %12988 = vpow2.f32 %v10759_v44  ;;  %v12752_v44 = vld [vmem:[#allocation11 + $0x18c] ss:$24 sps:$4 sm:$0xff]   ;;  %v12755_v43 = vld [vmem:[#allocation11 + $0x1bc] ss:$24 sps:$4 sm:$0xff]  }
 0x6d9   :  { %12990 = vpow2.f32 %v10760_v3  ;;  %v12753_v3 = vld [vmem:[#allocation11 + $0x1b8] ss:$24 sps:$4 sm:$0xff]  }
 0x6da   :  { %12992 = vpow2.f32 %v10761_v53  ;;  %v12756_v53 = vld [vmem:[#allocation11 + $0x1e8] ss:$24 sps:$4 sm:$0xff]  }
 0x6e1   :  { %v12987_v50 = vpop.eup %12986 }
 0x6e2   :  { %v12989_v39 = vpop.eup %12988  ;;  %v7884_v57 = vadd.f32 1.0, %v12987_v50  ;;  %v12758_v50 = vld [vmem:[#allocation11 + $0x1ec] ss:$24 sps:$4 sm:$0xff]  }
 0x6e3   :  { %v7885_v1 = vadd.f32 1.0, %v12989_v39  ;;  %v12991_v63 = vpop.eup %12990  ;;  %v12761_v39 = vld [vmem:[#allocation11 + $0x21c] ss:$24 sps:$4 sm:$0xff]  }
 0x6e4   :  { %12994 = vrcp.f32 %v7884_v57  ;;  %v12993_v14 = vpop.eup %12992  ;;  %v7896_v48 = vadd.f32 1.0, %v12991_v63  ;;  %v12759_v57 = vld [vmem:[#allocation11 + $0x218] ss:$24 sps:$4 sm:$0xff]   ;;  %v12762_v63 = vld [vmem:[#allocation11 + $0x248] ss:$24 sps:$4 sm:$0xff]  }
 0x6e5   :  { %12996 = vrcp.f32 %v7885_v1  ;;  %v7897_v54 = vadd.f32 1.0, %v12993_v14  ;;  %v12764_v1 = vld [vmem:[#allocation11 + $0x24c] ss:$24 sps:$4 sm:$0xff]   ;;  %v12765_v14 = vld [vmem:[#allocation11 + $0x278] ss:$24 sps:$4 sm:$0xff]  }
 0x6e6   :  { %12998 = vrcp.f32 %v7896_v48  ;;  %v12770_v48 = vld [vmem:[#allocation11 + $0x2ac] ss:$24 sps:$4 sm:$0xff]  }
 0x6e7   :  { %13000 = vrcp.f32 %v7897_v54  ;;  %v12771_v54 = vld [vmem:[#allocation11 + $0x2d8] ss:$24 sps:$4 sm:$0xff]  }
 0x6ee   :  { %v12995_v56 = vpop.eup %12994 }
 0x6ef   :  { %v12997_v60 = vpop.eup %12996  ;;  %v7913_v8 = vmul.f32 %v12995_v56, %v14175_v20  ;;  %v12773_v56 = vld [vmem:[#allocation11 + $0x2dc] ss:$24 sps:$4 sm:$0xff]  }
 0x6f0   :  { %v7914_v13 = vmul.f32 %v12997_v60, %v14181_v2  ;;  %v12999_v10 = vpop.eup %12998  ;;  %v12776_v60 = vld [vmem:[#allocation16 + $0x4] ss:$12 sps:$4 sm:$0xff]  }
 0x6f1   :  { %v13001_v17 = vpop.eup %13000  ;;  %v7919_v11 = vsub.f32 1.0, %v12999_v10  ;;  %v12794_v10 = vld [vmem:[#allocation16 + $0x94] ss:$12 sps:$4 sm:$0xff]  }
 0x6f2   :  { %v7920_v51 = vsub.f32 1.0, %v13001_v17  ;;  %v12792_v17 = vld [vmem:[#allocation16 + $0x90] ss:$12 sps:$4 sm:$0xff]  }
 0x752   :  { %v7734_v61 = vpop.f32.mrb[32].mxu0 }
 0x753   :  { %v7876_v4 = vadd.f32 %v7861_v46, %v7734_v61  ;;  %v7736_v6 = vpop.f32.mrb[33].mxu0  ;;  %v12779_v61 = vld [vmem:[#allocation16 + $0x1c] ss:$12 sps:$4 sm:$0xff]  }
 0x754   :  { %v7877_v33 = vadd.f32 %v7865_v62, %v7736_v6  ;;  %v7738_v19 = vpop.f32.mrb[34].mxu0  ;;  %v12780_v6 = vld [vmem:[#allocation16 + $0x30] ss:$12 sps:$4 sm:$0xff]  }
 0x755   :  { %v7915_v9 = vadd.f32 %v7913_v8, %v7876_v4  ;;  %v14185_v16 = vadd.f32 %v7861_v46, %v7738_v19  ;;  %v7740_v28 = vpop.f32.mrb[35].mxu0  ;;  %v12768_v46 = vld [vmem:[#allocation11 + $0x2a8] ss:$24 sps:$4 sm:$0xff]   ;;  %v12788_v19 = vld [vmem:[#allocation16 + $0x64] ss:$12 sps:$4 sm:$0xff]  }
 0x756   :  { %v7916_v34 = vadd.f32 %v7914_v13, %v7877_v33  ;;  %v14187_v55 = vadd.f32 %v7865_v62, %v7740_v28  ;;  %v12774_v62 = vld [vmem:[#allocation16] ss:$12 sps:$4 sm:$0xff]   ;;  %v12777_v4 = vld [vmem:[#allocation16 + $0x18] ss:$12 sps:$4 sm:$0xff]   ;;  %v12783_v13 = vld [vmem:[#allocation16 + $0x48] ss:$12 sps:$4 sm:$0xff]  }
 0x757   :  { %13002 = vtanh.f32 %v7915_v9  ;;  %v12782_v8 = vld [vmem:[#allocation16 + $0x34] ss:$12 sps:$4 sm:$0xff]   ;;  %v12785_v33 = vld [vmem:[#allocation16 + $0x4c] ss:$12 sps:$4 sm:$0xff]   ;;  %v12791_v28 = vld [vmem:[#allocation16 + $0x7c] ss:$12 sps:$4 sm:$0xff]  }
 0x758   :  { %13004 = vtanh.f32 %v7916_v34  ;;  %v12786_v9 = vld [vmem:[#allocation16 + $0x60] ss:$12 sps:$4 sm:$0xff]   ;;  %v12789_v34 = vld [vmem:[#allocation16 + $0x78] ss:$12 sps:$4 sm:$0xff]  }
 0x761   :  { %v13003_v24 = vpop.eup %13002 }
 0x762   :  { %v13005_v21 = vpop.eup %13004  ;;  %v14189_v59 = vmul.f32 %v13003_v24, %v7919_v11  ;;  %v12797_v11 = vld [vmem:[#allocation16 + $0xac] ss:$12 sps:$4 sm:$0xff]   ;;  %v12795_v24 = vld [vmem:[#allocation16 + $0xa8] ss:$12 sps:$4 sm:$0xff]  }
 0x763   :  { %v14191_v42 = vmul.f32 %v13005_v21, %v7920_v51  ;;  %v12800_v51 = vld [vmem:[#allocation16 + $0xc4] ss:$12 sps:$4 sm:$0xff]   ;;  %v12801_v21 = vld [vmem:[#allocation16 + $0xc8] ss:$12 sps:$4 sm:$0xff]  }
 0x764   :  { %v14197_v49 = vpack.c.bf16 %v14189_v59, %v14189_v59  ;;  %10970 = vmatprep.subr.bf16.mxu0 %v12801_v21 }
 0x765   :  { %v7930_v23 = vpack.c.bf16 %v14191_v42, %v14191_v42 }
 0x767   :  { %8443 = vmatprep.mubr.bf16.mxu1 %v7930_v23  ;;  %8525 = vmatprep.mubr.bf16.mxu0 %v7930_v23 }
 0x768   :  { %8444 = vmatmul.mubr.bf16.vlgmr.msra.gmra.mrb[32].mxu1 %v14197_v49  ;;  %8526 = vmatmul.mubr.bf16.vlgmr.msra.gmra.mrb[36].mxu0 %v14197_v49 }
 0x769   :  { %8453 = vmatpush1.bf16.msra.mxu1 %v12726_v12  ;;  %8484 = vmatprep.mubr.bf16.mxu1 %v7930_v23  ;;  %v12798_v23 = vld [vmem:[#allocation16 + $0xc0] ss:$12 sps:$4 sm:$0xff]   ;;  %v12802_v12 = vld [vmem:[#allocation16 + $0x8] ss:$12 sps:$4 sm:$0xff]  }
 0x76a   :  { %8454 = vmatprep.subr.bf16.mxu1 %v12731_v26  ;;  %10971 = vmatpush3.bf16.msra.mxu0 %v12802_v12  ;;  %v12806_v26 = vld [vmem:[#allocation16 + $0xe0] ss:$12 sps:$4 sm:$0xff]  }
 0x76b   :  { %10972 = vmatprep.subr.bf16.mxu0 %v12806_v26 }
 0x76d   :  { %8455 = vmatpush1.bf16.msra.mxu1 %v12729_v30  ;;  %v12803_v30 = vld [vmem:[#allocation16 + $0xd8] ss:$12 sps:$4 sm:$0xff]  }
 0x76e   :  { %8456 = vmatprep.subr.bf16.mxu1 %v12734_v0  ;;  %v12807_v0 = vld [vmem:[#allocation16 + $0x20] ss:$12 sps:$4 sm:$0xff]  }
 0x76f   :  { %10973 = vmatpush3.bf16.msra.mxu0 %v12807_v0 }
 0x771   :  { %8457 = vmatpush1.bf16.msra.mxu1 %v12732_v47  ;;  %v12810_v47 = vld [vmem:[#allocation16 + $0xf4] ss:$12 sps:$4 sm:$0xff]  }
 0x772   :  { %8458 = vmatprep.subr.bf16.mxu1 %v12737_v27  ;;  %v12811_v27 = vld [vmem:[#allocation16 + $0xf8] ss:$12 sps:$4 sm:$0xff]  }
 0x773   :  { %10974 = vmatprep.subr.bf16.mxu0 %v12811_v27 }
 0x775   :  { %8459 = vmatpush1.bf16.msra.mxu1 %v12735_v29  ;;  %v12808_v29 = vld [vmem:[#allocation16 + $0xf0] ss:$12 sps:$4 sm:$0xff]  }
 0x776   :  { %8460 = vmatprep.subr.bf16.mxu1 %v12740_v15  ;;  %v12812_v15 = vld [vmem:[#allocation16 + $0x38] ss:$12 sps:$4 sm:$0xff]  }
 0x777   :  { %10975 = vmatpush3.bf16.msra.mxu0 %v12812_v15 }
 0x779   :  { %8461 = vmatpush1.bf16.msra.mxu1 %v12738_v7  ;;  %v12815_v7 = vld [vmem:[#allocation16 + $0x10c] ss:$12 sps:$4 sm:$0xff]  }
 0x77a   :  { %8462 = vmatprep.subr.bf16.mxu1 %v12743_v18  ;;  %v12816_v18 = vld [vmem:[#allocation16 + $0x110] ss:$12 sps:$4 sm:$0xff]  }
 0x77b   :  { %10976 = vmatprep.subr.bf16.mxu0 %v12816_v18 }
 0x77d   :  { %8463 = vmatpush1.bf16.msra.mxu1 %v12741_v31  ;;  %v12813_v31 = vld [vmem:[#allocation16 + $0x108] ss:$12 sps:$4 sm:$0xff]  }
 0x77e   :  { %8464 = vmatprep.subr.bf16.mxu1 %v12746_v32  ;;  %v12817_v32 = vld [vmem:[#allocation16 + $0x50] ss:$12 sps:$4 sm:$0xff]  }
 0x77f   :  { %10977 = vmatpush3.bf16.msra.mxu0 %v12817_v32 }
 0x781   :  { %8465 = vmatpush1.bf16.msra.mxu1 %v12744_v36  ;;  %v12820_v36 = vld [vmem:[#allocation16 + $0x124] ss:$12 sps:$4 sm:$0xff]  }
 0x782   :  { %8466 = vmatprep.subr.bf16.mxu1 %v12749_v37  ;;  %v12821_v37 = vld [vmem:[#allocation16 + $0x128] ss:$12 sps:$4 sm:$0xff]  }
 0x783   :  { %10978 = vmatprep.subr.bf16.mxu0 %v12821_v37 }
 0x785   :  { %8467 = vmatpush1.bf16.msra.mxu1 %v12747_v58  ;;  %v12818_v58 = vld [vmem:[#allocation16 + $0x120] ss:$12 sps:$4 sm:$0xff]  }
 0x786   :  { %8468 = vmatprep.subr.bf16.mxu1 %v12752_v44  ;;  %v12822_v44 = vld [vmem:[#allocation16 + $0x68] ss:$12 sps:$4 sm:$0xff]  }
 0x787   :  { %10979 = vmatpush3.bf16.msra.mxu0 %v12822_v44 }
 0x789   :  { %8469 = vmatpush1.bf16.msra.mxu1 %v12750_v52  ;;  %v12825_v52 = vld [vmem:[#allocation16 + $0x13c] ss:$12 sps:$4 sm:$0xff]  }
 0x78a   :  { %8470 = vmatprep.subr.bf16.mxu1 %v12755_v43  ;;  %v12826_v43 = vld [vmem:[#allocation16 + $0x140] ss:$12 sps:$4 sm:$0xff]  }
 0x78b   :  { %10980 = vmatprep.subr.bf16.mxu0 %v12826_v43 }
 0x78d   :  { %8471 = vmatpush1.bf16.msra.mxu1 %v12753_v3  ;;  %v12823_v3 = vld [vmem:[#allocation16 + $0x138] ss:$12 sps:$4 sm:$0xff]  }
 0x78e   :  { %8472 = vmatprep.subr.bf16.mxu1 %v12758_v50  ;;  %v12827_v50 = vld [vmem:[#allocation16 + $0x80] ss:$12 sps:$4 sm:$0xff]  }
 0x78f   :  { %10981 = vmatpush3.bf16.msra.mxu0 %v12827_v50  ;;  %v12840_v50 = vld [vmem:[#allocation17 + $0x4] ss:$12 sps:$4 sm:$0xff]  }
 0x791   :  { %8473 = vmatpush1.bf16.msra.mxu1 %v12756_v53  ;;  %v12830_v53 = vld [vmem:[#allocation16 + $0x154] ss:$12 sps:$4 sm:$0xff]  }
 0x792   :  { %8474 = vmatprep.subr.bf16.mxu1 %v12761_v39  ;;  %v12831_v39 = vld [vmem:[#allocation16 + $0x158] ss:$12 sps:$4 sm:$0xff]  }
 0x793   :  { %10982 = vmatprep.subr.bf16.mxu0 %v12831_v39  ;;  %v12841_v39 = vld [vmem:[#allocation17 + $0x8] ss:$12 sps:$4 sm:$0xff]  }
 0x795   :  { %8475 = vmatpush1.bf16.msra.mxu1 %v12759_v57  ;;  %v12828_v57 = vld [vmem:[#allocation16 + $0x150] ss:$12 sps:$4 sm:$0xff]  }
 0x796   :  { %8476 = vmatprep.subr.bf16.mxu1 %v12764_v1  ;;  %v12832_v1 = vld [vmem:[#allocation16 + $0x98] ss:$12 sps:$4 sm:$0xff]  }
 0x797   :  { %10983 = vmatpush3.bf16.msra.mxu0 %v12832_v1  ;;  %v12844_v1 = vld [vmem:[#allocation17 + $0x1c] ss:$12 sps:$4 sm:$0xff]  }
 0x799   :  { %8477 = vmatpush1.bf16.msra.mxu1 %v12762_v63  ;;  %v12835_v63 = vld [vmem:[#allocation16 + $0x16c] ss:$12 sps:$4 sm:$0xff]  }
 0x79a   :  { %8478 = vmatprep.subr.bf16.mxu1 %v12767_v40  ;;  %v12836_v40 = vld [vmem:[#allocation16 + $0x170] ss:$12 sps:$4 sm:$0xff]  }
 0x79b   :  { %10984 = vmatprep.subr.bf16.mxu0 %v12836_v40  ;;  %v12846_v40 = vld [vmem:[#allocation17 + $0x30] ss:$12 sps:$4 sm:$0xff]  }
 0x79d   :  { %8479 = vmatpush1.bf16.msra.mxu1 %v12765_v14  ;;  %v12833_v14 = vld [vmem:[#allocation16 + $0x168] ss:$12 sps:$4 sm:$0xff]  }
 0x79e   :  { %8480 = vmatprep.subr.bf16.mxu1 %v12770_v48  ;;  %v12837_v48 = vld [vmem:[#allocation16 + $0xb0] ss:$12 sps:$4 sm:$0xff]  }
 0x79f   :  { %10985 = vmatpush3.bf16.msra.mxu0 %v12837_v48  ;;  %v12852_v48 = vld [vmem:[#allocation17 + $0x4c] ss:$12 sps:$4 sm:$0xff]  }
 0x7a1   :  { %8481 = vmatpush1.bf16.msra.mxu1 %v12768_v46 }
 0x7a2   :  { %8482 = vmatprep.subr.bf16.mxu1 %v12773_v56 }
 0x7a5   :  { %8483 = vmatpush1.bf16.msra.mxu1 %v12771_v54 }
 0x7a6   :  { %8900 = vmatprep.subr.bf16.mxu1 %v12776_v60 }
 0x7a8   :  { %8485 = vmatmul.mubr.bf16.vlgmr.msra.gmra.mrb[36].mxu1 %v14197_v49  ;;  %v12805_v49 = vld [vmem:[#allocation16 + $0xdc] ss:$12 sps:$4 sm:$0xff]  }
 0x7a9   :  { %8901 = vmatpush1.bf16.msra.mxu1 %v12774_v62 }
 0x7aa   :  { %8902 = vmatprep.subr.bf16.mxu1 %v12779_v61 }
 0x7ad   :  { %8903 = vmatpush1.bf16.msra.mxu1 %v12777_v4 }
 0x7ae   :  { %8904 = vmatprep.subr.bf16.mxu1 %v12782_v8 }
 0x7b1   :  { %8905 = vmatpush1.bf16.msra.mxu1 %v12780_v6 }
 0x7b2   :  { %8906 = vmatprep.subr.bf16.mxu1 %v12785_v33 }
 0x7b5   :  { %8907 = vmatpush1.bf16.msra.mxu1 %v12783_v13 }
 0x7b6   :  { %8908 = vmatprep.subr.bf16.mxu1 %v12788_v19 }
 0x7b9   :  { %8909 = vmatpush1.bf16.msra.mxu1 %v12786_v9 }
 0x7ba   :  { %8910 = vmatprep.subr.bf16.mxu1 %v12791_v28 }
 0x7bd   :  { %8911 = vmatpush1.bf16.msra.mxu1 %v12789_v34 }
 0x7be   :  { %8912 = vmatprep.subr.bf16.mxu1 %v12794_v10 }
 0x7c1   :  { %8913 = vmatpush1.bf16.msra.mxu1 %v12792_v17 }
 0x7c2   :  { %8914 = vmatprep.subr.bf16.mxu1 %v12797_v11 }
 0x7c5   :  { %8915 = vmatpush1.bf16.msra.mxu1 %v12795_v24 }
 0x7c6   :  { %8916 = vmatprep.subr.bf16.mxu1 %v12800_v51 }
 0x7c9   :  { %8917 = vmatpush1.bf16.msra.mxu1 %v12798_v23 }
 0x7ca   :  { %8918 = vmatprep.subr.bf16.mxu1 %v12805_v49 }
 0x7cd   :  { %8919 = vmatpush1.bf16.msra.mxu1 %v12803_v30 }
 0x7ce   :  { %8920 = vmatprep.subr.bf16.mxu1 %v12810_v47 }
 0x7d1   :  { %8921 = vmatpush1.bf16.msra.mxu1 %v12808_v29 }
 0x7d2   :  { %8922 = vmatprep.subr.bf16.mxu1 %v12815_v7 }
 0x7d5   :  { %8923 = vmatpush1.bf16.msra.mxu1 %v12813_v31 }
 0x7d6   :  { %8924 = vmatprep.subr.bf16.mxu1 %v12820_v36 }
 0x7d9   :  { %8925 = vmatpush1.bf16.msra.mxu1 %v12818_v58 }
 0x7da   :  { %8926 = vmatprep.subr.bf16.mxu1 %v12825_v52 }
 0x7dd   :  { %8927 = vmatpush1.bf16.msra.mxu1 %v12823_v3 }
 0x7de   :  { %8928 = vmatprep.subr.bf16.mxu1 %v12830_v53  ;;  %v12838_v53 = vld [vmem:[#allocation17] ss:$12 sps:$4 sm:$0xff]  }
 0x7e1   :  { %8929 = vmatpush1.bf16.msra.mxu1 %v12828_v57  ;;  %v13505_v57 = vmov 0.0  }
 0x7e2   :  { %8930 = vmatprep.subr.bf16.mxu1 %v12835_v63  ;;  %11019 = vmatprep.subr.bf16.mxu0 %v13505_v57  ;;  %v12842_v63 = vld [vmem:[#allocation17 + $0x18] ss:$12 sps:$4 sm:$0xff]  }
 0x7e5   :  { %8931 = vmatpush1.bf16.msra.mxu1 %v12833_v14  ;;  %v12849_v14 = vld [vmem:[#allocation17 + $0x38] ss:$12 sps:$4 sm:$0xff]  }
 0x7e6   :  { %9192 = vmatprep.subr.bf16.mxu1 %v12840_v50  ;;  %v12870_v50 = vld [vmem:[%s14348_s13] ss:$8 sps:$4 sm:$0xff]  }
 0x83b   :  { %v8445_v46 = vpop.f32.mrb[32].mxu1  ;;  %v8527_v56 = vpop.f32.mrb[36].mxu0 }
 0x83c   :  { %v8534_v54 = vadd.f32 %v8445_v46, %v14162_v5  ;;  %v8447_v62 = vpop.f32.mrb[33].mxu1  ;;  %v8529_v60 = vpop.f32.mrb[37].mxu0  ;;  %v8562_v5 = vadd.f32 %v8527_v56, %v14175_v20  ;;  %v12850_v46 = vld [vmem:[#allocation17 + $0x48] ss:$12 sps:$4 sm:$0xff]   ;;  %v12853_v56 = vld [vmem:[#allocation17 + $0x50] ss:$12 sps:$4 sm:$0xff]  }
 0x83d   :  { %v8535_v61 = vadd.f32 %v8447_v62, %v14166_v25  ;;  %v8449_v4 = vpop.f32.mrb[34].mxu1  ;;  %v8531_v8 = vpop.f32.mrb[38].mxu0  ;;  %v8563_v11 = vadd.f32 %v8529_v60, %v14181_v2  ;;  %v12854_v62 = vld [vmem:[#allocation17 + $0x60] ss:$12 sps:$4 sm:$0xff]   ;;  %v12857_v60 = vld [vmem:[#allocation17 + $0x68] ss:$12 sps:$4 sm:$0xff]  }
 0x83e   :  { %v10858_v6 = vmul.f32 -1.442695, %v8534_v54  ;;  %v8450_v33 = vpop.f32.mrb[35].mxu1  ;;  %v8532_v13 = vpop.f32.mrb[39].mxu0  ;;  %v12856_v54 = vld [vmem:[#allocation17 + $0x64] ss:$12 sps:$4 sm:$0xff]  }
 0x83f   :  { %v10859_v19 = vmul.f32 -1.442695, %v8535_v61  ;;  %v12858_v61 = vld [vmem:[#allocation17 + $0x78] ss:$12 sps:$4 sm:$0xff]   ;;  %v12860_v4 = vld [vmem:[#allocation17 + $0x7c] ss:$12 sps:$4 sm:$0xff]  }
 0x840   :  { %13006 = vpow2.f32 %v10858_v6  ;;  %v12861_v8 = vld [vmem:[#allocation17 + $0x80] ss:$12 sps:$4 sm:$0xff]   ;;  %v12862_v33 = vld [vmem:[#allocation17 + $0x90] ss:$12 sps:$4 sm:$0xff]   ;;  %v12865_v13 = vld [vmem:[#allocation17 + $0x98] ss:$12 sps:$4 sm:$0xff]  }
 0x841   :  { %13008 = vpow2.f32 %v10859_v19  ;;  %v12864_v6 = vld [vmem:[#allocation17 + $0x94] ss:$12 sps:$4 sm:$0xff]   ;;  %v12868_v19 = vld [vmem:[#allocation17 + $0xac] ss:$12 sps:$4 sm:$0xff]  }
 0x84a   :  { %v13007_v9 = vpop.eup %13006 }
 0x84b   :  { %v13009_v28 = vpop.eup %13008  ;;  %v8542_v34 = vadd.f32 1.0, %v13007_v9  ;;  %v13506_v9 = vmov 0  }
 0x84c   :  { %v8543_v10 = vadd.f32 1.0, %v13009_v28  ;;  %v12866_v28 = vld [vmem:[#allocation17 + $0xa8] ss:$12 sps:$4 sm:$0xff]  }
 0x84d   :  { %13010 = vrcp.f32 %v8542_v34  ;;  %v12869_v34 = vld [vmem:[#allocation17 + $0xb0] ss:$12 sps:$4 sm:$0xff]  }
 0x84e   :  { %13012 = vrcp.f32 %v8543_v10  ;;  %v9016_v10 = vld [vmem:[#allocation19] sm:$0x7] }
 0x857   :  { %v13011_v17 = vpop.eup %13010 }
 0x858   :  { %v13013_v25 = vpop.eup %13012  ;;  %v8564_v24 = vmul.f32 %v13011_v17, %v8562_v5  ;;  %v9022_v5 = vrot.slane %v9016_v10, %v13917_v38 }
 0x859   :  { %v8565_v51 = vmul.f32 %v13013_v25, %v8563_v11  ;;  %v9026_v25 = vrot.slane %v9016_v10, %v13920_v41 }
 0x85a   :  { %v8566_v21 = vadd.f32 %v8564_v24, %v14185_v16 }
 0x85b   :  { %v8567_v23 = vadd.f32 %v8565_v51, %v14187_v55 }
 0x87b   :  { %v8486_v12 = vpop.f32.mrb[36].mxu1 }
 0x87c   :  { %v8548_v49 = vadd.f32 %v8486_v12, %v14164_v22  ;;  %v8488_v26 = vpop.f32.mrb[37].mxu1 }
 0x87d   :  { %v8549_v30 = vadd.f32 %v8488_v26, %v14168_v45  ;;  %v8490_v0 = vpop.f32.mrb[38].mxu1 }
 0x87e   :  { %v10860_v47 = vmul.f32 -1.442695, %v8548_v49  ;;  %v8491_v27 = vpop.f32.mrb[39].mxu1 }
 0x87f   :  { %v10861_v20 = vmul.f32 -1.442695, %v8549_v30 }
 0x880   :  { %13014 = vpow2.f32 %v10860_v47 }
 0x881   :  { %13016 = vpow2.f32 %v10861_v20  ;;  %v9030_v20 = vrot.slane %v9016_v10, %v13914_v35 }
 0x88a   :  { %v13015_v2 = vpop.eup %13014 }
 0x88b   :  { %v13017_v29 = vpop.eup %13016  ;;  %v8556_v15 = vadd.f32 1.0, %v13015_v2 }
 0x88c   :  { %v8557_v7 = vadd.f32 1.0, %v13017_v29 }
 0x88d   :  { %13018 = vrcp.f32 %v8556_v15 }
 0x88e   :  { %13020 = vrcp.f32 %v8557_v7 }
 0x88f   :  { %13022 = vtanh.f32 %v8566_v21 }
 0x890   :  { %13024 = vtanh.f32 %v8567_v23 }
 0x897   :  { %v13019_v16 = vpop.eup %13018 }
 0x898   :  { %v13021_v55 = vpop.eup %13020  ;;  %v8570_v22 = vsub.f32 1.0, %v13019_v16  ;;  %v8574_v36 = vmul.f32 %v13019_v16, %v14189_v59 }
 0x899   :  { %v13023_v18 = vpop.eup %13022  ;;  %v8571_v31 = vsub.f32 1.0, %v13021_v55  ;;  %v8575_v58 = vmul.f32 %v13021_v55, %v14191_v42 }
 0x89a   :  { %v13025_v45 = vpop.eup %13024  ;;  %v8572_v32 = vmul.f32 %v13023_v18, %v8570_v22 }
 0x89b   :  { %v8573_v37 = vmul.f32 %v13025_v45, %v8571_v31  ;;  %v14233_v31 = vld [vmem:[#allocation20] ss:$0 sm:$0xff] }
 0x89c   :  { %v8576_v44 = vadd.f32 %v8574_v36, %v8572_v32 }
 0x89d   :  { %v8577_v52 = vadd.f32 %v8575_v58, %v8573_v37 }
 0x89e   :  { %v8578_v3 = vpack.c.bf16 %v8576_v44, %v14189_v59  ;;  %v12848_v59 = vld [vmem:[#allocation17 + $0x34] ss:$12 sps:$4 sm:$0xff]  }
 0x89f   :  { %v8579_v43 = vpack.c.bf16 %v8577_v52, %v14191_v42  ;;  %v12845_v42 = vld [vmem:[#allocation17 + $0x20] ss:$12 sps:$4 sm:$0xff]  }
 0x8a1   :  { %8932 = vmatprep.mubr.bf16.mxu1 %v8579_v43  ;;  %8975 = vmatprep.mubr.bf16.mxu0 %v8579_v43 }
 0x8a2   :  { %8933 = vmatmul.mubr.bf16.vlgmr.msra.gmra.mrb[40].mxu1 %v8578_v3  ;;  %8976 = vmatmul.mubr.bf16.vlgmr.msra.gmra.mrb[40].mxu0 %v8578_v3  ;;  %v12872_v3 = vld [vmem:[%s14348_s13 + $0x4] ss:$8 sps:$4 sm:$0xff]  }
 0x8a3   :  { %9193 = vmatpush1.bf16.msra.mxu1 %v12838_v53  ;;  %11020 = vmatpush3.bf16.msra.mxu0 %v12841_v39  ;;  %v12875_v53 = vld [vmem:[%s14348_s13 + $0x14] ss:$8 sps:$4 sm:$0xff]   ;;  %v12873_v39 = vld [vmem:[%s14348_s13 + $0x10] ss:$8 sps:$4 sm:$0xff]  }
 0x8a4   :  { %11021 = vmatprep.subr.bf16.mxu0 %v13505_v57  ;;  %9194 = vmatprep.subr.bf16.mxu1 %v12844_v1  ;;  %v12878_v1 = vld [vmem:[%s14348_s13 + $0x24] ss:$8 sps:$4 sm:$0xff]  }
 0x8a5   :  { %9224 = vmatprep.mubr.bf16.mxu1 %v13506_v9  ;;  %11035 = vmatprep.mubr.msk.bf16.mxu0 %vm13507_vm0, %v13505_v57 }
 0x8a7   :  { %9195 = vmatpush1.bf16.msra.mxu1 %v12842_v63  ;;  %11022 = vmatpush3.bf16.msra.mxu0 %v12845_v42  ;;  %v12876_v63 = vld [vmem:[%s14348_s13 + $0x20] ss:$8 sps:$4 sm:$0xff]   ;;  %v12881_v42 = vld [vmem:[%s14348_s13 + $0x34] ss:$8 sps:$4 sm:$0xff]  }
 0x8a8   :  { %11023 = vmatprep.subr.bf16.mxu0 %v13505_v57  ;;  %9196 = vmatprep.subr.bf16.mxu1 %v12848_v59  ;;  %v12879_v59 = vld [vmem:[%s14348_s13 + $0x30] ss:$8 sps:$4 sm:$0xff]  }
 0x8ab   :  { %9197 = vmatpush1.bf16.msra.mxu1 %v12846_v40  ;;  %11024 = vmatpush3.bf16.msra.mxu0 %v12849_v14  ;;  %v12884_v40 = vld [vmem:[%s14348_s13 + $0x44] ss:$8 sps:$4 sm:$0xff]   ;;  %v12882_v14 = vld [vmem:[%s14348_s13 + $0x40] ss:$8 sps:$4 sm:$0xff]  }
 0x8ac   :  { %11025 = vmatprep.subr.bf16.mxu0 %v13505_v57  ;;  %9198 = vmatprep.subr.bf16.mxu1 %v12852_v48  ;;  %v12887_v48 = vld [vmem:[%s14348_s13 + $0x54] ss:$8 sps:$4 sm:$0xff]  }
 0x8af   :  { %9199 = vmatpush1.bf16.msra.mxu1 %v12850_v46  ;;  %11026 = vmatpush3.bf16.msra.mxu0 %v12853_v56  ;;  %v12885_v46 = vld [vmem:[%s14348_s13 + $0x50] ss:$8 sps:$4 sm:$0xff]   ;;  %v12890_v56 = vld [vmem:[%s14348_s13 + $0x64] ss:$8 sps:$4 sm:$0xff]  }
 0x8b0   :  { %11027 = vmatprep.subr.bf16.mxu0 %v13505_v57  ;;  %9200 = vmatprep.subr.bf16.mxu1 %v12856_v54  ;;  %v12888_v54 = vld [vmem:[%s14348_s13 + $0x60] ss:$8 sps:$4 sm:$0xff]  }
 0x8b3   :  { %9201 = vmatpush1.bf16.msra.mxu1 %v12854_v62  ;;  %11028 = vmatpush3.bf16.msra.mxu0 %v12857_v60  ;;  %v12893_v62 = vld [vmem:[%s14348_s13 + $0x74] ss:$8 sps:$4 sm:$0xff]   ;;  %v12891_v60 = vld [vmem:[%s14348_s13 + $0x70] ss:$8 sps:$4 sm:$0xff]   ;;  %s13509_s13 = smov 64  }
 0x8b4   :  { %11029 = vmatprep.subr.bf16.mxu0 %v13505_v57  ;;  %9202 = vmatprep.subr.bf16.mxu1 %v12860_v4 }
 0x8b7   :  { %9203 = vmatpush1.bf16.msra.mxu1 %v12858_v61  ;;  %11030 = vmatpush3.bf16.msra.mxu0 %v12861_v8 }
 0x8b8   :  { %9204 = vmatprep.subr.bf16.mxu1 %v12864_v6  ;;  %11031 = vmatprep.subr.bf16.mxu0 %v13505_v57 }
 0x8bb   :  { %9205 = vmatpush1.bf16.msra.mxu1 %v12862_v33  ;;  %11032 = vmatpush3.bf16.msra.mxu0 %v12865_v13 }
 0x8bc   :  { %9206 = vmatprep.subr.bf16.mxu1 %v12868_v19  ;;  %11033 = vmatprep.subr.bf16.mxu0 %v13505_v57 }
 0x8bf   :  { %9207 = vmatpush1.bf16.msra.mxu1 %v12866_v28  ;;  %11034 = vmatpush3.bf16.msra.mxu0 %v12869_v34 }
 0x8c0   :  { %9392 = vmatprep.subr.bf16.mxu1 %v12872_v3  ;;  %v12899_v3 = vld [vmem:[#allocation22 + $0x14] ss:$8 sps:$4 sm:$0xff]  }
 0x975   :  { %v8934_v17 = vpop.f32.mrb[40].mxu1  ;;  %v10986_v11 = vpop.f32.mrb[40].mxu0 }
 0x976   :  { %v9034_v24 = vadd.f32 %v9022_v5, %v8934_v17  ;;  %v8936_v51 = vpop.f32.mrb[41].mxu1  ;;  %v10987_v21 = vpop.f32.mrb[41].mxu0 }
 0x977   :  { %v10988_v23 = vadd.f32 %v10987_v21, %v10986_v11  ;;  %v8938_v12 = vpop.f32.mrb[42].mxu1  ;;  %v10989_v49 = vpop.f32.mrb[42].mxu0  ;;  %v9035_v27 = vadd.f32 %v9026_v25, %v8936_v51 }
 0x978   :  { %v10910_v26 = vmul.f32 -1.442695, %v9034_v24  ;;  %v14226_v30 = vadd.f32 %v9022_v5, %v8938_v12  ;;  %v8940_v0 = vpop.f32.mrb[43].mxu1  ;;  %v10990_v47 = vpop.f32.mrb[43].mxu0 }
 0x979   :  { %v14229_v2 = vadd.f32 %v9026_v25, %v8940_v0  ;;  %v10991_v29 = vadd.f32 %v10990_v47, %v10989_v49  ;;  %v10911_v7 = vmul.f32 -1.442695, %v9035_v27  ;;  %v9036_v32 = vadd.f32 %v10988_v23, %v9030_v20 }
 0x97a   :  { %13026 = vpow2.f32 %v10910_v26 }
 0x97b   :  { %v14231_v15 = vadd.f32 %v10991_v29, %v9030_v20  ;;  %13028 = vpow2.f32 %v10911_v7 }
 0x984   :  { %v13027_v16 = vpop.eup %13026 }
 0x985   :  { %v9040_v55 = vadd.f32 1.0, %v13027_v16  ;;  %v13029_v22 = vpop.eup %13028 }
 0x986   :  { %v9046_v18 = vadd.f32 1.0, %v13029_v22 }
 0x987   :  { %13030 = vrcp.f32 %v9040_v55 }
 0x988   :  { %13032 = vrcp.f32 %v9046_v18 }
 0x991   :  { %v13031_v45 = vpop.eup %13030 }
 0x992   :  { %v9055_v35 = vmul.f32 %v13031_v45, %v14233_v31  ;;  %v13033_v37 = vpop.eup %13032 }
 0x993   :  { %v9058_v58 = vsub.f32 1.0, %v13033_v37  ;;  %v14302_v37 = vld [vmem:[#allocation25] ss:$0 sm:$0xff] }
 0x994   :  { %v9056_v36 = vadd.f32 %v9055_v35, %v9036_v32 }
 0x996   :  { %13034 = vtanh.f32 %v9056_v36 }
 0x9a0   :  { %v13035_v44 = vpop.eup %13034 }
 0x9a1   :  { %v14236_v52 = vmul.f32 %v13035_v44, %v9058_v58 }
 0x9a3   :  { %v9063_v43 = vpack.c.bf16 %v14236_v52, %v14236_v52 }
 0x9a5   :  { %9225 = vmatmul.mubr.bf16.vlgmr.msra.gmra.mrb[44].mxu1 %v9063_v43  ;;  %11036 = vmatmul.mubr.bf16.vlgmr.msra.gmra.mrb[44].mxu0 %v9063_v43  ;;  %v12896_v43 = vld [vmem:[#allocation22 + $0x4] ss:$8 sps:$4 sm:$0xff]  }
 0x9a6   :  { %9424 = vmatprep.mubr.bf16.mxu1 %v13506_v9  ;;  %9561 = vmatprep.mubr.bf16.mxu0 %v13506_v9 }
 0x9a7   :  { %9393 = vmatpush1.bf16.msra.mxu1 %v12870_v50  ;;  %9529 = vmatprep.subr.bf16.mxu0 %v12896_v43  ;;  %v12897_v50 = vld [vmem:[#allocation22 + $0x10] ss:$8 sps:$4 sm:$0xff]  }
 0x9a8   :  { %9394 = vmatprep.subr.bf16.mxu1 %v12875_v53  ;;  %v13508_v53 = vmov 0.0|0.0  }
 0x9ab   :  { %9395 = vmatpush1.bf16.msra.mxu1 %v12873_v39 }
 0x9ac   :  { %9396 = vmatprep.subr.bf16.mxu1 %v12878_v1  ;;  %v12902_v1 = vld [vmem:[#allocation22 + $0x24] ss:$8 sps:$4 sm:$0xff]  }
 0x9af   :  { %9397 = vmatpush1.bf16.msra.mxu1 %v12876_v63  ;;  %v12900_v63 = vld [vmem:[#allocation22 + $0x20] ss:$8 sps:$4 sm:$0xff]  }
 0x9b0   :  { %9398 = vmatprep.subr.bf16.mxu1 %v12881_v42  ;;  %v12905_v42 = vld [vmem:[#allocation22 + $0x34] ss:$8 sps:$4 sm:$0xff]  }
 0x9b3   :  { %9399 = vmatpush1.bf16.msra.mxu1 %v12879_v59  ;;  %v12903_v59 = vld [vmem:[#allocation22 + $0x30] ss:$8 sps:$4 sm:$0xff]  }
 0x9b4   :  { %9400 = vmatprep.subr.bf16.mxu1 %v12884_v40 }
 0x9b7   :  { %9401 = vmatpush1.bf16.msra.mxu1 %v12882_v14 }
 0x9b8   :  { %9402 = vmatprep.subr.bf16.mxu1 %v12887_v48 }
 0x9bb   :  { %9403 = vmatpush1.bf16.msra.mxu1 %v12885_v46 }
 0x9bc   :  { %9404 = vmatprep.subr.bf16.mxu1 %v12890_v56  ;;  %v9589_v56 = vld [vmem:[#allocation26] sm:$0xff] }
 0x9bf   :  { %9405 = vmatpush1.bf16.msra.mxu1 %v12888_v54  ;;  %v9590_v54 = vld [vmem:[#allocation26 + $0x8] sm:$0xff] }
 0x9c0   :  { %9406 = vmatprep.subr.bf16.mxu1 %v12893_v62  ;;  %v11090_v62 = vpack.c.bf16 %v9590_v54, %v9589_v56 }
 0x9c3   :  { %9407 = vmatpush1.bf16.msra.mxu1 %v12891_v60  ;;  %v9591_v60 = vld [vmem:[#allocation26 + $0x10] sm:$0xff] }
 0x9c4   :  { %11077 = vmatprep.subr.bf16.mxu1 %v13508_v53 }
 0xa78   :  { %v9226_v61 = vpop.f32.mrb[44].mxu1  ;;  %v9267_v4 = vpop.f32.mrb[44].mxu0 }
 0xa79   :  { %v9273_v8 = vadd.f32 %v9226_v61, %v14226_v30  ;;  %v9228_v6 = vpop.f32.mrb[45].mxu1  ;;  %v11037_v33 = vpop.f32.mrb[45].mxu0  ;;  %v9287_v51 = vadd.f32 %v14233_v31, %v9267_v4  ;;  %v9592_v61 = vld [vmem:[#allocation26 + $0x18] sm:$0xff] }
 0xa7a   :  { %v9280_v13 = vadd.f32 %v9228_v6, %v14229_v2  ;;  %v9230_v19 = vpop.f32.mrb[46].mxu1  ;;  %v9270_v9 = vpop.f32.mrb[46].mxu0  ;;  %v9443_v2 = vld [vmem:[#allocation23] sm:$0x3]  ;;  %v9593_v6 = vld [vmem:[#allocation26 + $0x20] sm:$0xff]  ;;  %v9594_v33 = vld [vmem:[#allocation26 + $0x28] sm:$0xff] }
 0xa7b   :  { %v10937_v28 = vmul.f32 -1.442695, %v9273_v8  ;;  %v9231_v34 = vpop.f32.mrb[47].mxu1  ;;  %v11038_v10 = vpop.f32.mrb[47].mxu0  ;;  %v9449_v29 = vrot.slane %v9443_v2, %v13917_v38  ;;  %v9453_v55 = vrot.slane %v9443_v2, %v13920_v41  ;;  %v12894_v41 = vld [vmem:[#allocation22] ss:$8 sps:$4 sm:$0xff]   ;;  %v11093_v8 = vpack.c.bf16 %v9592_v61, %v9591_v60 }
 0xa7c   :  { %v10938_v5 = vmul.f32 -1.442695, %v9280_v13  ;;  %9530 = vmatpush1.bf16.msra.mxu0 %v12894_v41  ;;  %v11096_v13 = vpack.c.bf16 %v9594_v33, %v9593_v6  ;;  %v9595_v19 = vld [vmem:[#allocation26 + $0x30] sm:$0xff]  ;;  %v9596_v9 = vld [vmem:[#allocation26 + $0x38] sm:$0xff] }
 0xa7d   :  { %13036 = vpow2.f32 %v10937_v28  ;;  %9531 = vmatprep.subr.bf16.mxu0 %v12899_v3  ;;  %v11099_v28 = vpack.c.bf16 %v9596_v9, %v9595_v19  ;;  %v9600_v2 = vld [vmem:[#allocation28 + $0x18] sm:$0xff] }
 0xa7e   :  { %13038 = vpow2.f32 %v10938_v5 }
 0xa80   :  { %9532 = vmatpush1.bf16.msra.mxu0 %v12897_v50 }
 0xa81   :  { %9533 = vmatprep.subr.bf16.mxu0 %v12902_v1 }
 0xa84   :  { %9534 = vmatpush1.bf16.msra.mxu0 %v12900_v63 }
 0xa85   :  { %9535 = vmatprep.subr.bf16.mxu0 %v12905_v42 }
 0xa87   :  { %v13037_v17 = vpop.eup %13036 }
 0xa88   :  { %v9277_v11 = vadd.f32 1.0, %v13037_v17  ;;  %v13039_v25 = vpop.eup %13038  ;;  %9536 = vmatpush1.bf16.msra.mxu0 %v12903_v59 }
 0xa89   :  { %v9284_v24 = vadd.f32 1.0, %v13039_v25  ;;  %11089 = vmatprep.subr.bf16.mxu0 %v13508_v53 }
 0xa8a   :  { %13040 = vrcp.f32 %v9277_v11 }
 0xa8b   :  { %13042 = vrcp.f32 %v9284_v24 }
 0xa94   :  { %v13041_v21 = vpop.eup %13040 }
 0xa95   :  { %v9288_v23 = vmul.f32 %v13041_v21, %v9287_v51  ;;  %v13043_v49 = vpop.eup %13042 }
 0xa96   :  { %v9291_v26 = vsub.f32 1.0, %v13043_v49  ;;  %v9293_v47 = vmul.f32 %v13043_v49, %v14236_v52 }
 0xa97   :  { %v9289_v12 = vadd.f32 %v9288_v23, %v14231_v15 }
 0xa99   :  { %13044 = vtanh.f32 %v9289_v12 }
 0xaa3   :  { %v13045_v30 = vpop.eup %13044 }
 0xaa4   :  { %v9292_v0 = vmul.f32 %v13045_v30, %v9291_v26 }
 0xaa6   :  { %v9294_v27 = vadd.f32 %v9293_v47, %v9292_v0  ;;  %v9597_v0 = vld [vmem:[#allocation28] sm:$0xff]  ;;  %v9598_v47 = vld [vmem:[#allocation28 + $0x8] sm:$0xff] }
 0xaa8   :  { %v9295_v20 = vpack.c.bf16 %v9294_v27, %v14236_v52  ;;  %v9599_v27 = vld [vmem:[#allocation28 + $0x10] sm:$0xff] }
 0xaaa   :  { %9425 = vmatmul.mubr.bf16.vlgmr.msra.gmra.mrb[48].mxu1 %v9295_v20  ;;  %v11078_v20 = vpack.c.bf16 %v9598_v47, %v9597_v0 }
 0xaab   :  { %11055 = vmatprep.mubr.msk.f32.mxu1 %vm13507_vm0, %v13505_v57 }
 0xaac   :  { %11079 = vmatpush3.bf16.msra.mxu1 %v11078_v20 }
 0xaad   :  { %11080 = vmatprep.subr.bf16.mxu1 %v13508_v53 }
 0xb7d   :  { %v9426_v7 = vpop.f32.mrb[48].mxu1 }
 0xb7e   :  { %v9456_v16 = vadd.f32 %v9449_v29, %v9426_v7  ;;  %v9428_v15 = vpop.f32.mrb[49].mxu1  ;;  %v9601_v7 = vld [vmem:[#allocation28 + $0x20] sm:$0xff] }
 0xb7f   :  { %v9430_v22 = vpop.f32.mrb[50].mxu1  ;;  %v9457_v38 = vadd.f32 %v9453_v55, %v9428_v15 }
 0xb80   :  { %v10955_v18 = vmul.f32 -1.442695, %v9456_v16  ;;  %v14298_v31 = vadd.f32 %v9449_v29, %v9430_v22  ;;  %v9432_v45 = vpop.f32.mrb[51].mxu1  ;;  %v11081_v29 = vpack.c.bf16 %v9600_v2, %v9599_v27  ;;  %v9602_v16 = vld [vmem:[#allocation28 + $0x28] sm:$0xff]  ;;  %v9603_v22 = vld [vmem:[#allocation28 + $0x30] sm:$0xff] }
 0xb81   :  { %v14300_v32 = vadd.f32 %v9453_v55, %v9432_v45  ;;  %v11084_v15 = vpack.c.bf16 %v9602_v16, %v9601_v7 }
 0xb82   :  { %13046 = vpow2.f32 %v10955_v18  ;;  %11082 = vmatpush3.bf16.msra.mxu1 %v11081_v29  ;;  %v9604_v18 = vld [vmem:[#allocation28 + $0x38] sm:$0xff] }
 0xb83   :  { %11083 = vmatprep.subr.bf16.mxu1 %v13508_v53 }
 0xb86   :  { %11085 = vmatpush3.bf16.msra.mxu1 %v11084_v15 }
 0xb87   :  { %11086 = vmatprep.subr.bf16.mxu1 %v13508_v53 }
 0xb8c   :  { %v13047_v35 = vpop.eup %13046 }
 0xb8d   :  { %v9461_v36 = vadd.f32 1.0, %v13047_v35 }
 0xb8f   :  { %13048 = vrcp.f32 %v9461_v36 }
 0xb99   :  { %v13049_v58 = vpop.eup %13048 }
 0xb9a   :  { %v9470_v44 = vmul.f32 %v13049_v58, %v14302_v37  ;;  %v9473_v40 = vsub.f32 1.0, %v13049_v58 }
 0xb9c   :  { %v9471_v52 = vadd.f32 %v9470_v44, %v9457_v38  ;;  %v10969_v44 = vld [vmem:[#allocation29] ss:$0 sm:$0xff] }
 0xb9e   :  { %13050 = vtanh.f32 %v9471_v52 }
 0xba8   :  { %v13051_v39 = vpop.eup %13050 }
 0xba9   :  { %9475 = vrot.lane.b32.xlu0 %v13051_v39, %s13509_s13 }
 0xc1b   :  { %v9476_v14 = vpop.permute.xlu0 %9475 }
 0xc1c   :  { %v14308_v48 = vmul.f32 %v9476_v14, %v9473_v40 }
 0xc1e   :  { %v9481_v46 = vpack.c.bf16 %v14308_v48, %v14308_v48 }
 0xc20   :  { %9483 = vrot.lane.b32.xlu0 %v9481_v46, %s13509_s13 }
 0xc24   :  { %9681 = vrot.lane.b32.xlu0 %v14308_v48, %s13509_s13 }
 0xc92   :  { %v9484_v4 = vpop.permute.xlu0 %9483 }
 0xc93   :  { %10965 = vmatmul.mubr.msk.bf16.vlgmr.msra.gmra.mrb[48].mxu0 %vm9525_vm1, %v9484_v4 }
 0xc94   :  { %11091 = vmatpush3.bf16.msra.mxu0 %v11090_v62  ;;  %11074 = vmatprep.mubr.msk.f32.mxu0 %vm13507_vm0, %v13505_v57 }
 0xc95   :  { %11092 = vmatprep.subr.bf16.mxu0 %v13508_v53 }
 0xc96   :  { %v9682_v34 = vpop.permute.xlu0 %9681 }
 0xc98   :  { %11094 = vmatpush3.bf16.msra.mxu0 %v11093_v8 }
 0xc99   :  { %11095 = vmatprep.subr.bf16.mxu0 %v13508_v53 }
 0xc9c   :  { %11097 = vmatpush3.bf16.msra.mxu0 %v11096_v13 }
 0xc9d   :  { %11098 = vmatprep.subr.bf16.mxu0 %v13508_v53 }
 0xca0   :  { %11100 = vmatpush3.bf16.msra.mxu0 %v11099_v28 }
 0xca3   :  { %11075 = vmatmul.mubr.msk.f32.vlgmr.msra.gmra.mrb[52].mxu0 %vm9525_vm1, %v9682_v34 }
 0xd66   :  { %v9563_v10 = vpop.f32.mrb[48].mxu0 }
 0xd67   :  { %v9570_v57 = vadd.f32 %v9563_v10, %v14298_v31  ;;  %v9565_v5 = vpop.f32.mrb[49].mxu0  ;;  %v11087_v31 = vpack.c.bf16 %v9604_v18, %v9603_v22 }
 0xd68   :  { %v9567_v17 = vpop.f32.mrb[50].mxu0  ;;  %v9577_v12 = vadd.f32 %v14302_v37, %v9565_v5 }
 0xd69   :  { %v10966_v11 = vmul.f32 -1.442695, %v9570_v57  ;;  %v9568_v25 = vpop.f32.mrb[51].mxu0  ;;  %11088 = vmatpush3.bf16.msra.mxu1 %v11087_v31 }
 0xd6b   :  { %13052 = vpow2.f32 %v10966_v11 }
 0xd75   :  { %v13053_v24 = vpop.eup %13052 }
 0xd76   :  { %v9574_v51 = vadd.f32 1.0, %v13053_v24  ;;  %v9751_v21 = vpop.f32.mrb[52].mxu0 }
 0xd77   :  { %v11076_v23 = vpop.f32.mrb[53].mxu0 }
 0xd78   :  { %13054 = vrcp.f32 %v9574_v51 }
 0xd82   :  { %v13055_v49 = vpop.eup %13054 }
 0xd83   :  { %v9578_v26 = vmul.f32 %v13055_v49, %v9577_v12  ;;  %v9581_v45 = vsub.f32 1.0, %v13055_v49  ;;  %v9587_v35 = vmul.f32 %v13055_v49, %v14308_v48 }
 0xd85   :  { %v9579_v30 = vadd.f32 %v9578_v26, %v14300_v32 }
 0xd87   :  { %13056 = vtanh.f32 %v9579_v30 }
 0xd91   :  { %v13057_v55 = vpop.eup %13056 }
 0xd92   :  { %9583 = vrot.lane.b32.xlu1 %v13057_v55, %s13509_s13 }
 0xe04   :  { %v9584_v32 = vpop.permute.xlu1 %9583 }
 0xe05   :  { %v9586_v36 = vmul.f32 %v9584_v32, %v9581_v45 }
 0xe07   :  { %v9588_v37 = vadd.f32 %v9587_v35, %v9586_v36 }
 0xe09   :  { %9606 = vrot.lane.b32.xlu1 %v9588_v37, %s13509_s13 }
 0xe7b   :  { %v9607_v58 = vpop.permute.xlu1 %9606 }
 0xe7c   :  { %11056 = vmatmul.mubr.msk.f32.vlgmr.msra.gmra.mrb[52].mxu1 %vm9525_vm1, %v9607_v58 }
 0xf4f   :  { %v9676_v38 = vpop.f32.mrb[52].mxu1 }
 0xf50   :  { %v9752_v52 = vadd.f32 %v9751_v21, %v9676_v38  ;;  %v11057_v41 = vpop.f32.mrb[53].mxu1 }
 0xf52   :  { %v9762_v43 = vadd.f32 %v10969_v44, %v9752_v52 }
 0xf54   :  { %9763 = vst [vmem:[%s14380_s15] sm:$0xff] %v9762_v43 }
 0xf55   :  { %9768 = vsyncpa [#allocation4], 1 }
 0xf56   :  { %9769 = vsyncpa [#allocation6], 1 }
 0xf57   :  { %9770 = vsyncpa [#allocation9], 1 }
 0xf58   :  { %9771 = vsyncpa [#allocation12], 1 }
 0xf59   :  { %9772 = vsyncpa [#allocation15], 1 }
 0xf5a   :  { %9773 = vsyncpa [#allocation18], 1 }
 0xf5b   :  { %9774 = vsyncpa [#allocation21], 1 }
 0xf5c   :  { %9775 = vsyncpa [#allocation24], 1 }
 0xf5d   :  { %9776 = vsyncpa [#allocation27], 1 }
 0xf5e   :  { %9777 = vsyncpa [#allocation30], 1 }

</bundles_post_ra>
